<compile_context>
chip_gen: v5e
topology: v5e:2x2
jax: 0.10.0
libtpu: 0.0.40
codegen_flags: <defaults>
</compile_context>

<pallas_src>
import functools
import math

import jax
import jax.numpy as jnp
from jax.experimental import pallas as pl
from jax.experimental.pallas import tpu as pltpu

EPS = 1e-5
# MXU operand dtype; accumulation and all epilogue math stay in float32.
GEMM_DTYPE = jnp.bfloat16


def _full_spec(shape):
    return pl.BlockSpec(shape, lambda *_: (0,) * len(shape))


def _fold_bn(bn):
    s = bn["gamma"] / jnp.sqrt(bn["var"] + EPS)
    return s, bn["beta"] - bn["mean"] * s


# ----------------------------- fused GEMM kernel ----------------------------

def _gemm_kernel(*refs, relu6, has_res, has_post):
    x_ref, w_ref, b_ref = refs[0], refs[1], refs[2]
    k = 3
    r_ref = None
    ps_ref = pt_ref = None
    if has_res:
        r_ref = refs[k]
        k += 1
    if has_post:
        ps_ref, pt_ref = refs[k], refs[k + 1]
        k += 2
    o_ref = refs[k]

    acc = jnp.dot(x_ref[...], w_ref[...], preferred_element_type=jnp.float32)
    acc = acc + b_ref[...]
    if relu6:
        acc = jnp.clip(acc, 0.0, 6.0)
    if has_res:
        acc = acc + r_ref[...]
    if has_post:
        acc = acc * ps_ref[...] + pt_ref[...]
    o_ref[...] = acc


def _pick_block_m(m):
    # Tile M when it is large & cleanly divisible; multiples of 16 keep bf16
    # sublane tiling legal.  Otherwise use the full extent (toy shapes).
    for bm in (512, 256, 128):
        if m > bm and m % bm == 0:
            return bm
    return m


def gemm_fused(x, w, bias, *, relu6=False, residual=None, post=None):
    """y = post( act(x @ w + bias) + residual ); x:(M,K), w:(K,N)."""
    M, K = x.shape
    N = w.shape[1]
    bm = _pick_block_m(M)
    grid = (M // bm,)

    x = x.astype(GEMM_DTYPE)
    w = w.astype(GEMM_DTYPE)

    in_specs = [pl.BlockSpec((bm, K), lambda i: (i, 0)),
                pl.BlockSpec((K, N), lambda i: (0, 0)),
                pl.BlockSpec((1, N), lambda i: (0, 0))]
    args = [x, w, bias.reshape(1, N).astype(jnp.float32)]

    if residual is not None:
        in_specs.append(pl.BlockSpec((bm, N), lambda i: (i, 0)))
        args.append(residual.reshape(M, N).astype(jnp.float32))
    if post is not None:
        ps, pt = post
        in_specs.append(pl.BlockSpec((1, N), lambda i: (0, 0)))
        in_specs.append(pl.BlockSpec((1, N), lambda i: (0, 0)))
        args.append(ps.reshape(1, N).astype(jnp.float32))
        args.append(pt.reshape(1, N).astype(jnp.float32))

    kernel = functools.partial(_gemm_kernel, relu6=relu6,
                               has_res=residual is not None,
                               has_post=post is not None)
    return pl.pallas_call(
        kernel,
        grid=grid,
        in_specs=in_specs,
        out_specs=pl.BlockSpec((bm, N), lambda i: (i, 0)),
        out_shape=jax.ShapeDtypeStruct((M, N), jnp.float32),
        compiler_params=pltpu.CompilerParams(
            dimension_semantics=("parallel",)),
    )(*args)


# ---------------------------- conv glue (im2col) ----------------------------

def _extract_patches(x, kh, kw, stride, padding):
    B, H, W, C = x.shape
    if padding:
        x = jnp.pad(x, ((0, 0), (padding, padding), (padding, padding), (0, 0)))
    Hp, Wp = H + 2 * padding, W + 2 * padding
    Ho = (Hp - kh) // stride + 1
    Wo = (Wp - kw) // stride + 1
    cols = []
    for i in range(kh):
        for j in range(kw):
            cols.append(x[:, i:i + stride * (Ho - 1) + 1:stride,
                           j:j + stride * (Wo - 1) + 1:stride, :])
    p = jnp.concatenate(cols, axis=-1)  # (B, Ho, Wo, kh*kw*C)
    return p.reshape(B * Ho * Wo, kh * kw * C), (B, Ho, Wo)


def conv2d(x, w, b, *, bn=None, relu6=False, stride=1, padding=0,
           residual=None, post=None):
    """x: (B,H,W,Cin); w: torch layout (Cout,Cin,kh,kw).

    Fused epilogue: + bias, (folded) BN, ReLU6, + residual, post-affine.
    """
    Cout, Cin, kh, kw = w.shape
    wm = jnp.transpose(w, (2, 3, 1, 0)).reshape(kh * kw * Cin, Cout)
    if bn is not None:
        s, t = _fold_bn(bn)
        wm = wm * s[None, :]          # fold BN scale into weight columns
        bias = b * s + t
    else:
        bias = b
    patches, (B, Ho, Wo) = _extract_patches(x, kh, kw, stride, padding)
    res2d = None
    if residual is not None:
        res2d = residual.reshape(B * Ho * Wo, Cout)
    y = gemm_fused(patches, wm, bias, relu6=relu6, residual=res2d, post=post)
    return y.reshape(B, Ho, Wo, Cout)


def conv_transpose2d(x, w, b, *, stride=2, padding=1, output_padding=1,
                     residual=None):
    """x: (B,H,W,Cin); w: torch ConvTranspose2d layout (Cin,Cout,kh,kw)."""
    Cin, Cout, kh, kw = w.shape
    B, H, W, _ = x.shape
    Hd = (H - 1) * stride + 1
    Wd = (W - 1) * stride + 1
    xd = jnp.zeros((B, Hd, Wd, Cin), x.dtype).at[:, ::stride, ::stride, :].set(x)
    lo = kh - 1 - padding
    hi = kh - 1 - padding + output_padding
    xd = jnp.pad(xd, ((0, 0), (lo, hi), (lo, hi), (0, 0)))
    wf = jnp.flip(w, axis=(2, 3))
    wm = jnp.transpose(wf, (2, 3, 0, 1)).reshape(kh * kw * Cin, Cout)
    patches, (B2, Ho, Wo) = _extract_patches(xd, kh, kw, 1, 0)
    res2d = None
    if residual is not None:
        res2d = residual.reshape(B2 * Ho * Wo, Cout)
    y = gemm_fused(patches, wm, b, residual=res2d)
    return y.reshape(B2, Ho, Wo, Cout)


# ------------------------------- attention ----------------------------------

def _attention_kernel(q_ref, k_ref, v_ref, o_ref, *, scale):
    q = q_ref[...]                      # (hb, N, dk)
    k = k_ref[...]
    v = v_ref[...]
    s = jnp.einsum('bqd,bkd->bqk', q, k,
                   preferred_element_type=jnp.float32) * scale
    m = jnp.max(s, axis=-1, keepdims=True)
    p = jnp.exp(s - m)
    denom = jnp.sum(p, axis=-1, keepdims=True)
    p = p * pl.reciprocal(denom, approx=True)
    o_ref[...] = jnp.einsum('bqk,bkd->bqd', p.astype(v.dtype), v,
                            preferred_element_type=jnp.float32)


def multi_head_attention(x, mha):
    B, H, W, C = x.shape
    N = H * W
    nh, dk, dv = mha["heads"], mha["dk"], mha["dv"]
    xf = x.reshape(B * N, C)

    # fused Q/K/V projection: one launch, lane-dense N = nh*(dk+dk+dv)
    wqkv = jnp.concatenate([mha["wq"][0], mha["wk"][0], mha["wv"][0]], axis=1)
    bqkv = jnp.concatenate([mha["wq"][1], mha["wk"][1], mha["wv"][1]], axis=0)
    qkv = gemm_fused(xf, wqkv, bqkv)
    q = qkv[:, :nh * dk]
    k = qkv[:, nh * dk:2 * nh * dk]
    v = qkv[:, 2 * nh * dk:]

    def split(t, d):
        return t.reshape(B, N, nh, d).transpose(0, 2, 1, 3).reshape(B * nh, N, d)

    qh = split(q, dk).astype(GEMM_DTYPE)
    kh_ = split(k, dk).astype(GEMM_DTYPE)
    vh = split(v, dv).astype(GEMM_DTYPE)

    BH = B * nh
    nblk = 2 if BH % 2 == 0 else 1      # 2 blocks -> megacore-parallel on v7x
    hb = BH // nblk
    attn = pl.pallas_call(
        functools.partial(_attention_kernel, scale=1.0 / math.sqrt(dk)),
        grid=(nblk,),
        in_specs=[pl.BlockSpec((hb, N, dk), lambda i: (i, 0, 0)),
                  pl.BlockSpec((hb, N, dk), lambda i: (i, 0, 0)),
                  pl.BlockSpec((hb, N, dv), lambda i: (i, 0, 0))],
        out_specs=pl.BlockSpec((hb, N, dv), lambda i: (i, 0, 0)),
        out_shape=jax.ShapeDtypeStruct((BH, N, dv), jnp.float32),
        compiler_params=pltpu.CompilerParams(
            dimension_semantics=("parallel",)),
    )(qh, kh_, vh)

    attn = attn.reshape(B, nh, N, dv).transpose(0, 2, 1, 3).reshape(B * N, nh * dv)
    out = gemm_fused(attn.astype(GEMM_DTYPE), mha["wo"][0], mha["wo"][1])
    return out.reshape(B, H, W, C)


# -------------------- fused final 1x1 conv + log-softmax --------------------

def _head_logsoftmax_kernel(xt_ref, w_ref, b_ref, o_ref):
    # y = W x^T + b  -> (2, M), lane-dense along M
    y = jnp.dot(w_ref[...], xt_ref[...], preferred_element_type=jnp.float32)
    y = y + b_ref[...]
    m = jnp.max(y, axis=0, keepdims=True)
    lse = m + jnp.log(jnp.sum(jnp.exp(y - m), axis=0, keepdims=True))
    o_ref[...] = y - lse


def head_logsoftmax(x, w, b):
    """x: (B,H,W,C); w: torch (2, C, 1, 1); b: (2,).  Returns (B, 2, H*W)."""
    B, H, W, C = x.shape
    M = B * H * W
    xt = x.reshape(M, C).T              # (C, M) — M on the lane dim
    wt = w.reshape(2, C)
    out = pl.pallas_call(
        _head_logsoftmax_kernel,
        grid=(1,),
        in_specs=[_full_spec((C, M)), _full_spec((2, C)), _full_spec((2, 1))],
        out_specs=_full_spec((2, M)),
        out_shape=jax.ShapeDtypeStruct((2, M), jnp.float32),
    )(xt, wt, b.reshape(2, 1))
    return out.reshape(2, B, H * W).transpose(1, 0, 2)


# -------------------------------- parameters --------------------------------

def init_params(key, chn):
    it = iter(jax.random.split(key, 96))

    def conv(cin, cout, k):
        fan = cin * k * k
        w = jax.random.normal(next(it), (cout, cin, k, k), jnp.float32) / math.sqrt(fan)
        b = 0.02 * jax.random.normal(next(it), (cout,), jnp.float32)
        return (w, b)

    def convT(cin, cout, k):
        fan = cout * k * k
        w = jax.random.normal(next(it), (cin, cout, k, k), jnp.float32) / math.sqrt(fan)
        b = 0.02 * jax.random.normal(next(it), (cout,), jnp.float32)
        return (w, b)

    def bn(c):
        return dict(
            gamma=1.0 + 0.1 * jax.random.normal(next(it), (c,), jnp.float32),
            beta=0.1 * jax.random.normal(next(it), (c,), jnp.float32),
            mean=0.1 * jax.random.normal(next(it), (c,), jnp.float32),
            var=1.0 + 0.1 * jnp.abs(jax.random.normal(next(it), (c,), jnp.float32)),
        )

    def linear(din, dout):
        w = jax.random.normal(next(it), (din, dout), jnp.float32) / math.sqrt(din)
        b = 0.02 * jax.random.normal(next(it), (dout,), jnp.float32)
        return (w, b)

    C = chn
    p = {}
    p["input_conv1"] = conv(1, C, 3)
    p["b1r1_c1"] = conv(C, C, 3); p["b1r1_bn"] = bn(C); p["b1r1_c2"] = conv(C, C, 3)
    p["block1_c"] = conv(C, C, 3); p["block1_bn"] = bn(C)
    p["b2r2_c1"] = conv(C, 2 * C, 1); p["b2r2_bn"] = bn(2 * C); p["b2r2_c2"] = conv(2 * C, 2 * C, 3)
    p["block2_c"] = conv(C, 2 * C, 3); p["block2_bn"] = bn(2 * C)
    p["b3r3_c1"] = conv(2 * C, 4 * C, 1); p["b3r3_bn"] = bn(4 * C); p["b3r3_c2"] = conv(4 * C, 4 * C, 3)
    p["block3_c"] = conv(2 * C, 4 * C, 3); p["block3_bn"] = bn(4 * C)
    # NOTE: self.bn(res3) is dead in the reference forward (overwritten) -> omitted.
    heads, dk, dv = 8, 32, 32
    p["mha"] = dict(heads=heads, dk=dk, dv=dv,
                    wq=linear(4 * C, heads * dk), wk=linear(4 * C, heads * dk),
                    wv=linear(4 * C, heads * dv), wo=linear(heads * dv, 4 * C))
    p["up2"] = convT(4 * C, 2 * C, 3)
    p["up2_1_c"] = conv(2 * C, 2 * C, 3); p["up2_1_bn"] = bn(2 * C)
    p["up1"] = convT(2 * C, C, 3)
    p["up1_1_c"] = conv(C, C, 3); p["up1_1_bn"] = bn(C)
    p["out_bn"] = bn(C)
    p["out_c"] = conv(C, C, 3); p["out_bn2"] = bn(C)
    p["out_"] = conv(C, 2, 1)
    return p


# ---------------------------------- forward ---------------------------------

def att_net_forward(params, x_nchw):
    p = params
    x = jnp.transpose(x_nchw, (0, 2, 3, 1)).astype(jnp.float32)  # -> NHWC

    x = conv2d(x, *p["input_conv1"], stride=1, padding=1)

    # block1_res1 / block1 — residual add fused into the block1 conv epilogue
    t = conv2d(x, *p["b1r1_c1"], bn=p["b1r1_bn"], relu6=True, stride=1, padding=1)
    x_top = conv2d(t, *p["b1r1_c2"], stride=1, padding=1)
    res1 = conv2d(x_top, *p["block1_c"], bn=p["block1_bn"], relu6=True,
                  stride=1, padding=1, residual=x_top)

    # block2_res2 / block2 — residual fused into the trailing plain conv
    xb = conv2d(res1, *p["block2_c"], bn=p["block2_bn"], relu6=True, stride=2, padding=1)
    t = conv2d(res1, *p["b2r2_c1"], bn=p["b2r2_bn"], relu6=True, stride=2, padding=0)
    res2 = conv2d(t, *p["b2r2_c2"], stride=1, padding=1, residual=xb)

    # block3_res3 / block3
    xb = conv2d(res2, *p["block3_c"], bn=p["block3_bn"], relu6=True, stride=2, padding=1)
    t = conv2d(res2, *p["b3r3_c1"], bn=p["b3r3_bn"], relu6=True, stride=2, padding=0)
    res3 = conv2d(t, *p["b3r3_c2"], stride=1, padding=1, residual=xb)

    # `x = self.bn(res3)` in the reference is immediately overwritten -> skipped.
    x = multi_head_attention(res3, p["mha"])

    # up2 (+ res2 fused) ; up2_1 (+ skip fused)
    x = conv_transpose2d(x, *p["up2"], residual=res2)
    x = conv2d(x, *p["up2_1_c"], bn=p["up2_1_bn"], relu6=True,
               stride=1, padding=1, residual=x)

    # up1 (+ res1 fused) ; up1_1 (+ skip fused, out_bn folded as post-affine)
    x = conv_transpose2d(x, *p["up1"], residual=res1)
    s_bn, t_bn = _fold_bn(p["out_bn"])
    x = conv2d(x, *p["up1_1_c"], bn=p["up1_1_bn"], relu6=True,
               stride=1, padding=1, residual=x, post=(s_bn, t_bn))

    # Dropout2d(0.5): identity in inference mode.
    x = conv2d(x, *p["out_c"], bn=p["out_bn2"], relu6=True, stride=1, padding=1)

    # final 1x1 conv (C -> 2) fused with the 2-way log-softmax (lane-dense)
    w2, b2 = p["out_"]
    return head_logsoftmax(x, w2, b2)           # (B, 2, H*W)


if __name__ == "__main__":
    key = jax.random.PRNGKey(0)
    k_param, k_x = jax.random.split(key)
    chn = 8                                      # input_size
    params = init_params(k_param, chn)
    x = jax.random.normal(k_x, (2, 1, 16, 16), jnp.float32)  # NCHW like PyTorch
    fwd = jax.jit(functools.partial(att_net_forward, params))
    out = fwd(x)
    jax.block_until_ready(out)
    assert out.shape == (2, 2, 16 * 16)
    print("KERNEL_OK")
</pallas_src>

<mosaic_0001>
module attributes {stable_mosaic.version = 11 : i64} {
  func.func @_gemm_kernel(%arg0: i32, %arg1: memref<256x9xbf16, #tpu.memory_space<vmem>>, %arg2: memref<9x8xbf16, #tpu.memory_space<vmem>>, %arg3: memref<1x8xf32, #tpu.memory_space<vmem>>, %arg4: memref<256x8xf32, #tpu.memory_space<vmem>>) attributes {dimension_semantics = [#tpu.dimension_semantics<parallel>], iteration_bounds = array<i64: 2>, scalar_prefetch = 0 : i64, scratch_operands = 0 : i64, tpu.core_type = #tpu.core_type<tc>, window_params = [{transform_indices = @transform_0, window_bounds = array<i64: 256, 9>}, {pipeline_mode = #tpu.pipeline_mode<synchronous>, transform_indices = @transform_1, window_bounds = array<i64: 9, 8>}, {pipeline_mode = #tpu.pipeline_mode<synchronous>, transform_indices = @transform_2, window_bounds = array<i64: 1, 8>}, {transform_indices = @transform_3, window_bounds = array<i64: 256, 8>}]} {
    %c0 = arith.constant 0 : index
    %c0_0 = arith.constant 0 : index
    %0 = vector.load %arg1[%c0, %c0_0] : memref<256x9xbf16, #tpu.memory_space<vmem>>, vector<256x9xbf16>
    %c0_1 = arith.constant 0 : index
    %c0_2 = arith.constant 0 : index
    %1 = vector.load %arg2[%c0_1, %c0_2] : memref<9x8xbf16, #tpu.memory_space<vmem>>, vector<9x8xbf16>
    %cst = arith.constant dense<0.000000e+00> : vector<256x8xf32>
    %2 = tpu.matmul %0, %1, %cst {dimension_numbers = #tpu.dot_dimension_numbers<[1], [0], [0], [1], [0, 0, 1, 1], [], []>} : vector<256x9xbf16>, vector<9x8xbf16>, vector<256x8xf32> -> vector<256x8xf32>
    %c0_3 = arith.constant 0 : index
    %c0_4 = arith.constant 0 : index
    %3 = vector.load %arg3[%c0_3, %c0_4] : memref<1x8xf32, #tpu.memory_space<vmem>>, vector<1x8xf32>
    %4 = vector.broadcast %3 : vector<1x8xf32> to vector<256x8xf32>
    %5 = arith.addf %2, %4 : vector<256x8xf32>
    %c0_5 = arith.constant 0 : index
    %c0_6 = arith.constant 0 : index
    %6 = vector.load %arg4[%c0_5, %c0_6] : memref<256x8xf32, #tpu.memory_space<vmem>>, vector<256x8xf32>
    tpu.vector_store %arg4[%c0_5, %c0_6], %5 {strides = array<i32>} : memref<256x8xf32, #tpu.memory_space<vmem>>, vector<256x8xf32>,
    return
  }
  func.func @transform_0(%arg0: i32) -> (i32, i32) {
    %c0_i32 = arith.constant 0 : i32
    %c0_i32_0 = arith.constant 0 : i32
    return %arg0, %c0_i32 : i32, i32
  }
  func.func @transform_1(%arg0: i32) -> (i32, i32) {
    %c0_i32 = arith.constant 0 : i32
    %c0_i32_0 = arith.constant 0 : i32
    %c0_i32_1 = arith.constant 0 : i32
    return %c0_i32, %c0_i32_0 : i32, i32
  }
  func.func @transform_2(%arg0: i32) -> (i32, i32) {
    %c0_i32 = arith.constant 0 : i32
    %c0_i32_0 = arith.constant 0 : i32
    %c0_i32_1 = arith.constant 0 : i32
    return %c0_i32, %c0_i32_0 : i32, i32
  }
  func.func @transform_3(%arg0: i32) -> (i32, i32) {
    %c0_i32 = arith.constant 0 : i32
    %c0_i32_0 = arith.constant 0 : i32
    return %arg0, %c0_i32 : i32, i32
  }
}

module attributes {stable_mosaic.version = 11 : i64} {
  func.func @_gemm_kernel(%arg0: i32, %arg1: memref<256x72xbf16, #tpu.memory_space<vmem>>, %arg2: memref<72x8xbf16, #tpu.memory_space<vmem>>, %arg3: memref<1x8xf32, #tpu.memory_space<vmem>>, %arg4: memref<256x8xf32, #tpu.memory_space<vmem>>) attributes {dimension_semantics = [#tpu.dimension_semantics<parallel>], iteration_bounds = array<i64: 2>, scalar_prefetch = 0 : i64, scratch_operands = 0 : i64, tpu.core_type = #tpu.core_type<tc>, window_params = [{transform_indices = @transform_0, window_bounds = array<i64: 256, 72>}, {pipeline_mode = #tpu.pipeline_mode<synchronous>, transform_indices = @transform_1, window_bounds = array<i64: 72, 8>}, {pipeline_mode = #tpu.pipeline_mode<synchronous>, transform_indices = @transform_2, window_bounds = array<i64: 1, 8>}, {transform_indices = @transform_3, window_bounds = array<i64: 256, 8>}]} {
    %c0 = arith.constant 0 : index
    %c0_0 = arith.constant 0 : index
    %0 = vector.load %arg1[%c0, %c0_0] : memref<256x72xbf16, #tpu.memory_space<vmem>>, vector<256x72xbf16>
    %c0_1 = arith.constant 0 : index
    %c0_2 = arith.constant 0 : index
    %1 = vector.load %arg2[%c0_1, %c0_2] : memref<72x8xbf16, #tpu.memory_space<vmem>>, vector<72x8xbf16>
    %cst = arith.constant dense<0.000000e+00> : vector<256x8xf32>
    %2 = tpu.matmul %0, %1, %cst {dimension_numbers = #tpu.dot_dimension_numbers<[1], [0], [0], [1], [0, 0, 1, 1], [], []>} : vector<256x72xbf16>, vector<72x8xbf16>, vector<256x8xf32> -> vector<256x8xf32>
    %c0_3 = arith.constant 0 : index
    %c0_4 = arith.constant 0 : index
    %3 = vector.load %arg3[%c0_3, %c0_4] : memref<1x8xf32, #tpu.memory_space<vmem>>, vector<1x8xf32>
    %4 = vector.broadcast %3 : vector<1x8xf32> to vector<256x8xf32>
    %5 = arith.addf %2, %4 : vector<256x8xf32>
    %cst_5 = arith.constant 0.000000e+00 : f32
    %cst_6 = arith.constant 6.000000e+00 : f32
    %6 = vector.broadcast %cst_5 : f32 to vector<256x8xf32>
    %7 = arith.maximumf %6, %5 : vector<256x8xf32>
    %8 = vector.broadcast %cst_6 : f32 to vector<256x8xf32>
    %9 = arith.minimumf %8, %7 : vector<256x8xf32>
    %c0_7 = arith.constant 0 : index
    %c0_8 = arith.constant 0 : index
    %10 = vector.load %arg4[%c0_7, %c0_8] : memref<256x8xf32, #tpu.memory_space<vmem>>, vector<256x8xf32>
    tpu.vector_store %arg4[%c0_7, %c0_8], %9 {strides = array<i32>} : memref<256x8xf32, #tpu.memory_space<vmem>>, vector<256x8xf32>,
    return
  }
  func.func @transform_0(%arg0: i32) -> (i32, i32) {
    %c0_i32 = arith.constant 0 : i32
    %c0_i32_0 = arith.constant 0 : i32
    return %arg0, %c0_i32 : i32, i32
  }
  func.func @transform_1(%arg0: i32) -> (i32, i32) {
    %c0_i32 = arith.constant 0 : i32
    %c0_i32_0 = arith.constant 0 : i32
    %c0_i32_1 = arith.constant 0 : i32
    return %c0_i32, %c0_i32_0 : i32, i32
  }
  func.func @transform_2(%arg0: i32) -> (i32, i32) {
    %c0_i32 = arith.constant 0 : i32
    %c0_i32_0 = arith.constant 0 : i32
    %c0_i32_1 = arith.constant 0 : i32
    return %c0_i32, %c0_i32_0 : i32, i32
  }
  func.func @transform_3(%arg0: i32) -> (i32, i32) {
    %c0_i32 = arith.constant 0 : i32
    %c0_i32_0 = arith.constant 0 : i32
    return %arg0, %c0_i32 : i32, i32
  }
}

module attributes {stable_mosaic.version = 11 : i64} {
  func.func @_gemm_kernel(%arg0: i32, %arg1: memref<256x72xbf16, #tpu.memory_space<vmem>>, %arg2: memref<72x8xbf16, #tpu.memory_space<vmem>>, %arg3: memref<1x8xf32, #tpu.memory_space<vmem>>, %arg4: memref<256x8xf32, #tpu.memory_space<vmem>>) attributes {dimension_semantics = [#tpu.dimension_semantics<parallel>], iteration_bounds = array<i64: 2>, scalar_prefetch = 0 : i64, scratch_operands = 0 : i64, tpu.core_type = #tpu.core_type<tc>, window_params = [{transform_indices = @transform_0, window_bounds = array<i64: 256, 72>}, {pipeline_mode = #tpu.pipeline_mode<synchronous>, transform_indices = @transform_1, window_bounds = array<i64: 72, 8>}, {pipeline_mode = #tpu.pipeline_mode<synchronous>, transform_indices = @transform_2, window_bounds = array<i64: 1, 8>}, {transform_indices = @transform_3, window_bounds = array<i64: 256, 8>}]} {
    %c0 = arith.constant 0 : index
    %c0_0 = arith.constant 0 : index
    %0 = vector.load %arg1[%c0, %c0_0] : memref<256x72xbf16, #tpu.memory_space<vmem>>, vector<256x72xbf16>
    %c0_1 = arith.constant 0 : index
    %c0_2 = arith.constant 0 : index
    %1 = vector.load %arg2[%c0_1, %c0_2] : memref<72x8xbf16, #tpu.memory_space<vmem>>, vector<72x8xbf16>
    %cst = arith.constant dense<0.000000e+00> : vector<256x8xf32>
    %2 = tpu.matmul %0, %1, %cst {dimension_numbers = #tpu.dot_dimension_numbers<[1], [0], [0], [1], [0, 0, 1, 1], [], []>} : vector<256x72xbf16>, vector<72x8xbf16>, vector<256x8xf32> -> vector<256x8xf32>
    %c0_3 = arith.constant 0 : index
    %c0_4 = arith.constant 0 : index
    %3 = vector.load %arg3[%c0_3, %c0_4] : memref<1x8xf32, #tpu.memory_space<vmem>>, vector<1x8xf32>
    %4 = vector.broadcast %3 : vector<1x8xf32> to vector<256x8xf32>
    %5 = arith.addf %2, %4 : vector<256x8xf32>
    %c0_5 = arith.constant 0 : index
    %c0_6 = arith.constant 0 : index
    %6 = vector.load %arg4[%c0_5, %c0_6] : memref<256x8xf32, #tpu.memory_space<vmem>>, vector<256x8xf32>
    tpu.vector_store %arg4[%c0_5, %c0_6], %5 {strides = array<i32>} : memref<256x8xf32, #tpu.memory_space<vmem>>, vector<256x8xf32>,
    return
  }
  func.func @transform_0(%arg0: i32) -> (i32, i32) {
    %c0_i32 = arith.constant 0 : i32
    %c0_i32_0 = arith.constant 0 : i32
    return %arg0, %c0_i32 : i32, i32
  }
  func.func @transform_1(%arg0: i32) -> (i32, i32) {
    %c0_i32 = arith.constant 0 : i32
    %c0_i32_0 = arith.constant 0 : i32
    %c0_i32_1 = arith.constant 0 : i32
    return %c0_i32, %c0_i32_0 : i32, i32
  }
  func.func @transform_2(%arg0: i32) -> (i32, i32) {
    %c0_i32 = arith.constant 0 : i32
    %c0_i32_0 = arith.constant 0 : i32
    %c0_i32_1 = arith.constant 0 : i32
    return %c0_i32, %c0_i32_0 : i32, i32
  }
  func.func @transform_3(%arg0: i32) -> (i32, i32) {
    %c0_i32 = arith.constant 0 : i32
    %c0_i32_0 = arith.constant 0 : i32
    return %arg0, %c0_i32 : i32, i32
  }
}

module attributes {stable_mosaic.version = 11 : i64} {
  func.func @_gemm_kernel(%arg0: i32, %arg1: memref<256x72xbf16, #tpu.memory_space<vmem>>, %arg2: memref<72x8xbf16, #tpu.memory_space<vmem>>, %arg3: memref<1x8xf32, #tpu.memory_space<vmem>>, %arg4: memref<256x8xf32, #tpu.memory_space<vmem>>, %arg5: memref<256x8xf32, #tpu.memory_space<vmem>>) attributes {dimension_semantics = [#tpu.dimension_semantics<parallel>], iteration_bounds = array<i64: 2>, scalar_prefetch = 0 : i64, scratch_operands = 0 : i64, tpu.core_type = #tpu.core_type<tc>, window_params = [{transform_indices = @transform_0, window_bounds = array<i64: 256, 72>}, {pipeline_mode = #tpu.pipeline_mode<synchronous>, transform_indices = @transform_1, window_bounds = array<i64: 72, 8>}, {pipeline_mode = #tpu.pipeline_mode<synchronous>, transform_indices = @transform_2, window_bounds = array<i64: 1, 8>}, {transform_indices = @transform_3, window_bounds = array<i64: 256, 8>}, {transform_indices = @transform_4, window_bounds = array<i64: 256, 8>}]} {
    %c0 = arith.constant 0 : index
    %c0_0 = arith.constant 0 : index
    %0 = vector.load %arg1[%c0, %c0_0] : memref<256x72xbf16, #tpu.memory_space<vmem>>, vector<256x72xbf16>
    %c0_1 = arith.constant 0 : index
    %c0_2 = arith.constant 0 : index
    %1 = vector.load %arg2[%c0_1, %c0_2] : memref<72x8xbf16, #tpu.memory_space<vmem>>, vector<72x8xbf16>
    %cst = arith.constant dense<0.000000e+00> : vector<256x8xf32>
    %2 = tpu.matmul %0, %1, %cst {dimension_numbers = #tpu.dot_dimension_numbers<[1], [0], [0], [1], [0, 0, 1, 1], [], []>} : vector<256x72xbf16>, vector<72x8xbf16>, vector<256x8xf32> -> vector<256x8xf32>
    %c0_3 = arith.constant 0 : index
    %c0_4 = arith.constant 0 : index
    %3 = vector.load %arg3[%c0_3, %c0_4] : memref<1x8xf32, #tpu.memory_space<vmem>>, vector<1x8xf32>
    %4 = vector.broadcast %3 : vector<1x8xf32> to vector<256x8xf32>
    %5 = arith.addf %2, %4 : vector<256x8xf32>
    %cst_5 = arith.constant 0.000000e+00 : f32
    %cst_6 = arith.constant 6.000000e+00 : f32
    %6 = vector.broadcast %cst_5 : f32 to vector<256x8xf32>
    %7 = arith.maximumf %6, %5 : vector<256x8xf32>
    %8 = vector.broadcast %cst_6 : f32 to vector<256x8xf32>
    %9 = arith.minimumf %8, %7 : vector<256x8xf32>
    %c0_7 = arith.constant 0 : index
    %c0_8 = arith.constant 0 : index
    %10 = vector.load %arg4[%c0_7, %c0_8] : memref<256x8xf32, #tpu.memory_space<vmem>>, vector<256x8xf32>
    %11 = arith.addf %9, %10 : vector<256x8xf32>
    %c0_9 = arith.constant 0 : index
    %c0_10 = arith.constant 0 : index
    %12 = vector.load %arg5[%c0_9, %c0_10] : memref<256x8xf32, #tpu.memory_space<vmem>>, vector<256x8xf32>
    tpu.vector_store %arg5[%c0_9, %c0_10], %11 {strides = array<i32>} : memref<256x8xf32, #tpu.memory_space<vmem>>, vector<256x8xf32>,
    return
  }
  func.func @transform_0(%arg0: i32) -> (i32, i32) {
    %c0_i32 = arith.constant 0 : i32
    %c0_i32_0 = arith.constant 0 : i32
    return %arg0, %c0_i32 : i32, i32
  }
  func.func @transform_1(%arg0: i32) -> (i32, i32) {
    %c0_i32 = arith.constant 0 : i32
    %c0_i32_0 = arith.constant 0 : i32
    %c0_i32_1 = arith.constant 0 : i32
    return %c0_i32, %c0_i32_0 : i32, i32
  }
  func.func @transform_2(%arg0: i32) -> (i32, i32) {
    %c0_i32 = arith.constant 0 : i32
    %c0_i32_0 = arith.constant 0 : i32
    %c0_i32_1 = arith.constant 0 : i32
    return %c0_i32, %c0_i32_0 : i32, i32
  }
  func.func @transform_3(%arg0: i32) -> (i32, i32) {
    %c0_i32 = arith.constant 0 : i32
    %c0_i32_0 = arith.constant 0 : i32
    return %arg0, %c0_i32 : i32, i32
  }
  func.func @transform_4(%arg0: i32) -> (i32, i32) {
    %c0_i32 = arith.constant 0 : i32
    %c0_i32_0 = arith.constant 0 : i32
    return %arg0, %c0_i32 : i32, i32
  }
}

module attributes {stable_mosaic.version = 11 : i64} {
  func.func @_gemm_kernel(%arg0: i32, %arg1: memref<128x72xbf16, #tpu.memory_space<vmem>>, %arg2: memref<72x16xbf16, #tpu.memory_space<vmem>>, %arg3: memref<1x16xf32, #tpu.memory_space<vmem>>, %arg4: memref<128x16xf32, #tpu.memory_space<vmem>>) attributes {dimension_semantics = [#tpu.dimension_semantics<parallel>], iteration_bounds = array<i64: 1>, scalar_prefetch = 0 : i64, scratch_operands = 0 : i64, tpu.core_type = #tpu.core_type<tc>, window_params = [{transform_indices = @transform_0, window_bounds = array<i64: 128, 72>}, {pipeline_mode = #tpu.pipeline_mode<synchronous>, transform_indices = @transform_1, window_bounds = array<i64: 72, 16>}, {pipeline_mode = #tpu.pipeline_mode<synchronous>, transform_indices = @transform_2, window_bounds = array<i64: 1, 16>}, {transform_indices = @transform_3, window_bounds = array<i64: 128, 16>}]} {
    %c0 = arith.constant 0 : index
    %c0_0 = arith.constant 0 : index
    %0 = vector.load %arg1[%c0, %c0_0] : memref<128x72xbf16, #tpu.memory_space<vmem>>, vector<128x72xbf16>
    %c0_1 = arith.constant 0 : index
    %c0_2 = arith.constant 0 : index
    %1 = vector.load %arg2[%c0_1, %c0_2] : memref<72x16xbf16, #tpu.memory_space<vmem>>, vector<72x16xbf16>
    %cst = arith.constant dense<0.000000e+00> : vector<128x16xf32>
    %2 = tpu.matmul %0, %1, %cst {dimension_numbers = #tpu.dot_dimension_numbers<[1], [0], [0], [1], [0, 0, 1, 1], [], []>} : vector<128x72xbf16>, vector<72x16xbf16>, vector<128x16xf32> -> vector<128x16xf32>
    %c0_3 = arith.constant 0 : index
    %c0_4 = arith.constant 0 : index
    %3 = vector.load %arg3[%c0_3, %c0_4] : memref<1x16xf32, #tpu.memory_space<vmem>>, vector<1x16xf32>
    %4 = vector.broadcast %3 : vector<1x16xf32> to vector<128x16xf32>
    %5 = arith.addf %2, %4 : vector<128x16xf32>
    %cst_5 = arith.constant 0.000000e+00 : f32
    %cst_6 = arith.constant 6.000000e+00 : f32
    %6 = vector.broadcast %cst_5 : f32 to vector<128x16xf32>
    %7 = arith.maximumf %6, %5 : vector<128x16xf32>
    %8 = vector.broadcast %cst_6 : f32 to vector<128x16xf32>
    %9 = arith.minimumf %8, %7 : vector<128x16xf32>
    %c0_7 = arith.constant 0 : index
    %c0_8 = arith.constant 0 : index
    %10 = vector.load %arg4[%c0_7, %c0_8] : memref<128x16xf32, #tpu.memory_space<vmem>>, vector<128x16xf32>
    tpu.vector_store %arg4[%c0_7, %c0_8], %9 {strides = array<i32>} : memref<128x16xf32, #tpu.memory_space<vmem>>, vector<128x16xf32>,
    return
  }
  func.func @transform_0(%arg0: i32) -> (i32, i32) {
    %c0_i32 = arith.constant 0 : i32
    %c0_i32_0 = arith.constant 0 : i32
    return %arg0, %c0_i32 : i32, i32
  }
  func.func @transform_1(%arg0: i32) -> (i32, i32) {
    %c0_i32 = arith.constant 0 : i32
    %c0_i32_0 = arith.constant 0 : i32
    %c0_i32_1 = arith.constant 0 : i32
    return %c0_i32, %c0_i32_0 : i32, i32
  }
  func.func @transform_2(%arg0: i32) -> (i32, i32) {
    %c0_i32 = arith.constant 0 : i32
    %c0_i32_0 = arith.constant 0 : i32
    %c0_i32_1 = arith.constant 0 : i32
    return %c0_i32, %c0_i32_0 : i32, i32
  }
  func.func @transform_3(%arg0: i32) -> (i32, i32) {
    %c0_i32 = arith.constant 0 : i32
    %c0_i32_0 = arith.constant 0 : i32
    return %arg0, %c0_i32 : i32, i32
  }
}

module attributes {stable_mosaic.version = 11 : i64} {
  func.func @_gemm_kernel(%arg0: i32, %arg1: memref<128x8xbf16, #tpu.memory_space<vmem>>, %arg2: memref<8x16xbf16, #tpu.memory_space<vmem>>, %arg3: memref<1x16xf32, #tpu.memory_space<vmem>>, %arg4: memref<128x16xf32, #tpu.memory_space<vmem>>) attributes {dimension_semantics = [#tpu.dimension_semantics<parallel>], iteration_bounds = array<i64: 1>, scalar_prefetch = 0 : i64, scratch_operands = 0 : i64, tpu.core_type = #tpu.core_type<tc>, window_params = [{transform_indices = @transform_0, window_bounds = array<i64: 128, 8>}, {pipeline_mode = #tpu.pipeline_mode<synchronous>, transform_indices = @transform_1, window_bounds = array<i64: 8, 16>}, {pipeline_mode = #tpu.pipeline_mode<synchronous>, transform_indices = @transform_2, window_bounds = array<i64: 1, 16>}, {transform_indices = @transform_3, window_bounds = array<i64: 128, 16>}]} {
    %c0 = arith.constant 0 : index
    %c0_0 = arith.constant 0 : index
    %0 = vector.load %arg1[%c0, %c0_0] : memref<128x8xbf16, #tpu.memory_space<vmem>>, vector<128x8xbf16>
    %c0_1 = arith.constant 0 : index
    %c0_2 = arith.constant 0 : index
    %1 = vector.load %arg2[%c0_1, %c0_2] : memref<8x16xbf16, #tpu.memory_space<vmem>>, vector<8x16xbf16>
    %cst = arith.constant dense<0.000000e+00> : vector<128x16xf32>
    %2 = tpu.matmul %0, %1, %cst {dimension_numbers = #tpu.dot_dimension_numbers<[1], [0], [0], [1], [0, 0, 1, 1], [], []>} : vector<128x8xbf16>, vector<8x16xbf16>, vector<128x16xf32> -> vector<128x16xf32>
    %c0_3 = arith.constant 0 : index
    %c0_4 = arith.constant 0 : index
    %3 = vector.load %arg3[%c0_3, %c0_4] : memref<1x16xf32, #tpu.memory_space<vmem>>, vector<1x16xf32>
    %4 = vector.broadcast %3 : vector<1x16xf32> to vector<128x16xf32>
    %5 = arith.addf %2, %4 : vector<128x16xf32>
    %cst_5 = arith.constant 0.000000e+00 : f32
    %cst_6 = arith.constant 6.000000e+00 : f32
    %6 = vector.broadcast %cst_5 : f32 to vector<128x16xf32>
    %7 = arith.maximumf %6, %5 : vector<128x16xf32>
    %8 = vector.broadcast %cst_6 : f32 to vector<128x16xf32>
    %9 = arith.minimumf %8, %7 : vector<128x16xf32>
    %c0_7 = arith.constant 0 : index
    %c0_8 = arith.constant 0 : index
    %10 = vector.load %arg4[%c0_7, %c0_8] : memref<128x16xf32, #tpu.memory_space<vmem>>, vector<128x16xf32>
    tpu.vector_store %arg4[%c0_7, %c0_8], %9 {strides = array<i32>} : memref<128x16xf32, #tpu.memory_space<vmem>>, vector<128x16xf32>,
    return
  }
  func.func @transform_0(%arg0: i32) -> (i32, i32) {
    %c0_i32 = arith.constant 0 : i32
    %c0_i32_0 = arith.constant 0 : i32
    return %arg0, %c0_i32 : i32, i32
  }
  func.func @transform_1(%arg0: i32) -> (i32, i32) {
    %c0_i32 = arith.constant 0 : i32
    %c0_i32_0 = arith.constant 0 : i32
    %c0_i32_1 = arith.constant 0 : i32
    return %c0_i32, %c0_i32_0 : i32, i32
  }
  func.func @transform_2(%arg0: i32) -> (i32, i32) {
    %c0_i32 = arith.constant 0 : i32
    %c0_i32_0 = arith.constant 0 : i32
    %c0_i32_1 = arith.constant 0 : i32
    return %c0_i32, %c0_i32_0 : i32, i32
  }
  func.func @transform_3(%arg0: i32) -> (i32, i32) {
    %c0_i32 = arith.constant 0 : i32
    %c0_i32_0 = arith.constant 0 : i32
    return %arg0, %c0_i32 : i32, i32
  }
}

module attributes {stable_mosaic.version = 11 : i64} {
  func.func @_gemm_kernel(%arg0: i32, %arg1: memref<128x144xbf16, #tpu.memory_space<vmem>>, %arg2: memref<144x16xbf16, #tpu.memory_space<vmem>>, %arg3: memref<1x16xf32, #tpu.memory_space<vmem>>, %arg4: memref<128x16xf32, #tpu.memory_space<vmem>>, %arg5: memref<128x16xf32, #tpu.memory_space<vmem>>) attributes {dimension_semantics = [#tpu.dimension_semantics<parallel>], iteration_bounds = array<i64: 1>, scalar_prefetch = 0 : i64, scratch_operands = 0 : i64, tpu.core_type = #tpu.core_type<tc>, window_params = [{transform_indices = @transform_0, window_bounds = array<i64: 128, 144>}, {pipeline_mode = #tpu.pipeline_mode<synchronous>, transform_indices = @transform_1, window_bounds = array<i64: 144, 16>}, {pipeline_mode = #tpu.pipeline_mode<synchronous>, transform_indices = @transform_2, window_bounds = array<i64: 1, 16>}, {transform_indices = @transform_3, window_bounds = array<i64: 128, 16>}, {transform_indices = @transform_4, window_bounds = array<i64: 128, 16>}]} {
    %c0 = arith.constant 0 : index
    %c0_0 = arith.constant 0 : index
    %0 = vector.load %arg1[%c0, %c0_0] : memref<128x144xbf16, #tpu.memory_space<vmem>>, vector<128x144xbf16>
    %c0_1 = arith.constant 0 : index
    %c0_2 = arith.constant 0 : index
    %1 = vector.load %arg2[%c0_1, %c0_2] : memref<144x16xbf16, #tpu.memory_space<vmem>>, vector<144x16xbf16>
    %cst = arith.constant dense<0.000000e+00> : vector<128x16xf32>
    %2 = tpu.matmul %0, %1, %cst {dimension_numbers = #tpu.dot_dimension_numbers<[1], [0], [0], [1], [0, 0, 1, 1], [], []>} : vector<128x144xbf16>, vector<144x16xbf16>, vector<128x16xf32> -> vector<128x16xf32>
    %c0_3 = arith.constant 0 : index
    %c0_4 = arith.constant 0 : index
    %3 = vector.load %arg3[%c0_3, %c0_4] : memref<1x16xf32, #tpu.memory_space<vmem>>, vector<1x16xf32>
    %4 = vector.broadcast %3 : vector<1x16xf32> to vector<128x16xf32>
    %5 = arith.addf %2, %4 : vector<128x16xf32>
    %c0_5 = arith.constant 0 : index
    %c0_6 = arith.constant 0 : index
    %6 = vector.load %arg4[%c0_5, %c0_6] : memref<128x16xf32, #tpu.memory_space<vmem>>, vector<128x16xf32>
    %7 = arith.addf %5, %6 : vector<128x16xf32>
    %c0_7 = arith.constant 0 : index
    %c0_8 = arith.constant 0 : index
    %8 = vector.load %arg5[%c0_7, %c0_8] : memref<128x16xf32, #tpu.memory_space<vmem>>, vector<128x16xf32>
    tpu.vector_store %arg5[%c0_7, %c0_8], %7 {strides = array<i32>} : memref<128x16xf32, #tpu.memory_space<vmem>>, vector<128x16xf32>,
    return
  }
  func.func @transform_0(%arg0: i32) -> (i32, i32) {
    %c0_i32 = arith.constant 0 : i32
    %c0_i32_0 = arith.constant 0 : i32
    return %arg0, %c0_i32 : i32, i32
  }
  func.func @transform_1(%arg0: i32) -> (i32, i32) {
    %c0_i32 = arith.constant 0 : i32
    %c0_i32_0 = arith.constant 0 : i32
    %c0_i32_1 = arith.constant 0 : i32
    return %c0_i32, %c0_i32_0 : i32, i32
  }
  func.func @transform_2(%arg0: i32) -> (i32, i32) {
    %c0_i32 = arith.constant 0 : i32
    %c0_i32_0 = arith.constant 0 : i32
    %c0_i32_1 = arith.constant 0 : i32
    return %c0_i32, %c0_i32_0 : i32, i32
  }
  func.func @transform_3(%arg0: i32) -> (i32, i32) {
    %c0_i32 = arith.constant 0 : i32
    %c0_i32_0 = arith.constant 0 : i32
    return %arg0, %c0_i32 : i32, i32
  }
  func.func @transform_4(%arg0: i32) -> (i32, i32) {
    %c0_i32 = arith.constant 0 : i32
    %c0_i32_0 = arith.constant 0 : i32
    return %arg0, %c0_i32 : i32, i32
  }
}

module attributes {stable_mosaic.version = 11 : i64} {
  func.func @_gemm_kernel(%arg0: i32, %arg1: memref<32x144xbf16, #tpu.memory_space<vmem>>, %arg2: memref<144x32xbf16, #tpu.memory_space<vmem>>, %arg3: memref<1x32xf32, #tpu.memory_space<vmem>>, %arg4: memref<32x32xf32, #tpu.memory_space<vmem>>) attributes {dimension_semantics = [#tpu.dimension_semantics<parallel>], iteration_bounds = array<i64: 1>, scalar_prefetch = 0 : i64, scratch_operands = 0 : i64, tpu.core_type = #tpu.core_type<tc>, window_params = [{transform_indices = @transform_0, window_bounds = array<i64: 32, 144>}, {pipeline_mode = #tpu.pipeline_mode<synchronous>, transform_indices = @transform_1, window_bounds = array<i64: 144, 32>}, {pipeline_mode = #tpu.pipeline_mode<synchronous>, transform_indices = @transform_2, window_bounds = array<i64: 1, 32>}, {transform_indices = @transform_3, window_bounds = array<i64: 32, 32>}]} {
    %c0 = arith.constant 0 : index
    %c0_0 = arith.constant 0 : index
    %0 = vector.load %arg1[%c0, %c0_0] : memref<32x144xbf16, #tpu.memory_space<vmem>>, vector<32x144xbf16>
    %c0_1 = arith.constant 0 : index
    %c0_2 = arith.constant 0 : index
    %1 = vector.load %arg2[%c0_1, %c0_2] : memref<144x32xbf16, #tpu.memory_space<vmem>>, vector<144x32xbf16>
    %cst = arith.constant dense<0.000000e+00> : vector<32x32xf32>
    %2 = tpu.matmul %0, %1, %cst {dimension_numbers = #tpu.dot_dimension_numbers<[1], [0], [0], [1], [0, 0, 1, 1], [], []>} : vector<32x144xbf16>, vector<144x32xbf16>, vector<32x32xf32> -> vector<32x32xf32>
    %c0_3 = arith.constant 0 : index
    %c0_4 = arith.constant 0 : index
    %3 = vector.load %arg3[%c0_3, %c0_4] : memref<1x32xf32, #tpu.memory_space<vmem>>, vector<1x32xf32>
    %4 = vector.broadcast %3 : vector<1x32xf32> to vector<32x32xf32>
    %5 = arith.addf %2, %4 : vector<32x32xf32>
    %cst_5 = arith.constant 0.000000e+00 : f32
    %cst_6 = arith.constant 6.000000e+00 : f32
    %6 = vector.broadcast %cst_5 : f32 to vector<32x32xf32>
    %7 = arith.maximumf %6, %5 : vector<32x32xf32>
    %8 = vector.broadcast %cst_6 : f32 to vector<32x32xf32>
    %9 = arith.minimumf %8, %7 : vector<32x32xf32>
    %c0_7 = arith.constant 0 : index
    %c0_8 = arith.constant 0 : index
    %10 = vector.load %arg4[%c0_7, %c0_8] : memref<32x32xf32, #tpu.memory_space<vmem>>, vector<32x32xf32>
    tpu.vector_store %arg4[%c0_7, %c0_8], %9 {strides = array<i32>} : memref<32x32xf32, #tpu.memory_space<vmem>>, vector<32x32xf32>,
    return
  }
  func.func @transform_0(%arg0: i32) -> (i32, i32) {
    %c0_i32 = arith.constant 0 : i32
    %c0_i32_0 = arith.constant 0 : i32
    return %arg0, %c0_i32 : i32, i32
  }
  func.func @transform_1(%arg0: i32) -> (i32, i32) {
    %c0_i32 = arith.constant 0 : i32
    %c0_i32_0 = arith.constant 0 : i32
    %c0_i32_1 = arith.constant 0 : i32
    return %c0_i32, %c0_i32_0 : i32, i32
  }
  func.func @transform_2(%arg0: i32) -> (i32, i32) {
    %c0_i32 = arith.constant 0 : i32
    %c0_i32_0 = arith.constant 0 : i32
    %c0_i32_1 = arith.constant 0 : i32
    return %c0_i32, %c0_i32_0 : i32, i32
  }
  func.func @transform_3(%arg0: i32) -> (i32, i32) {
    %c0_i32 = arith.constant 0 : i32
    %c0_i32_0 = arith.constant 0 : i32
    return %arg0, %c0_i32 : i32, i32
  }
}

module attributes {stable_mosaic.version = 11 : i64} {
  func.func @_gemm_kernel(%arg0: i32, %arg1: memref<32x16xbf16, #tpu.memory_space<vmem>>, %arg2: memref<16x32xbf16, #tpu.memory_space<vmem>>, %arg3: memref<1x32xf32, #tpu.memory_space<vmem>>, %arg4: memref<32x32xf32, #tpu.memory_space<vmem>>) attributes {dimension_semantics = [#tpu.dimension_semantics<parallel>], iteration_bounds = array<i64: 1>, scalar_prefetch = 0 : i64, scratch_operands = 0 : i64, tpu.core_type = #tpu.core_type<tc>, window_params = [{transform_indices = @transform_0, window_bounds = array<i64: 32, 16>}, {pipeline_mode = #tpu.pipeline_mode<synchronous>, transform_indices = @transform_1, window_bounds = array<i64: 16, 32>}, {pipeline_mode = #tpu.pipeline_mode<synchronous>, transform_indices = @transform_2, window_bounds = array<i64: 1, 32>}, {transform_indices = @transform_3, window_bounds = array<i64: 32, 32>}]} {
    %c0 = arith.constant 0 : index
    %c0_0 = arith.constant 0 : index
    %0 = vector.load %arg1[%c0, %c0_0] : memref<32x16xbf16, #tpu.memory_space<vmem>>, vector<32x16xbf16>
    %c0_1 = arith.constant 0 : index
    %c0_2 = arith.constant 0 : index
    %1 = vector.load %arg2[%c0_1, %c0_2] : memref<16x32xbf16, #tpu.memory_space<vmem>>, vector<16x32xbf16>
    %cst = arith.constant dense<0.000000e+00> : vector<32x32xf32>
    %2 = tpu.matmul %0, %1, %cst {dimension_numbers = #tpu.dot_dimension_numbers<[1], [0], [0], [1], [0, 0, 1, 1], [], []>} : vector<32x16xbf16>, vector<16x32xbf16>, vector<32x32xf32> -> vector<32x32xf32>
    %c0_3 = arith.constant 0 : index
    %c0_4 = arith.constant 0 : index
    %3 = vector.load %arg3[%c0_3, %c0_4] : memref<1x32xf32, #tpu.memory_space<vmem>>, vector<1x32xf32>
    %4 = vector.broadcast %3 : vector<1x32xf32> to vector<32x32xf32>
    %5 = arith.addf %2, %4 : vector<32x32xf32>
    %cst_5 = arith.constant 0.000000e+00 : f32
    %cst_6 = arith.constant 6.000000e+00 : f32
    %6 = vector.broadcast %cst_5 : f32 to vector<32x32xf32>
    %7 = arith.maximumf %6, %5 : vector<32x32xf32>
    %8 = vector.broadcast %cst_6 : f32 to vector<32x32xf32>
    %9 = arith.minimumf %8, %7 : vector<32x32xf32>
    %c0_7 = arith.constant 0 : index
    %c0_8 = arith.constant 0 : index
    %10 = vector.load %arg4[%c0_7, %c0_8] : memref<32x32xf32, #tpu.memory_space<vmem>>, vector<32x32xf32>
    tpu.vector_store %arg4[%c0_7, %c0_8], %9 {strides = array<i32>} : memref<32x32xf32, #tpu.memory_space<vmem>>, vector<32x32xf32>,
    return
  }
  func.func @transform_0(%arg0: i32) -> (i32, i32) {
    %c0_i32 = arith.constant 0 : i32
    %c0_i32_0 = arith.constant 0 : i32
    return %arg0, %c0_i32 : i32, i32
  }
  func.func @transform_1(%arg0: i32) -> (i32, i32) {
    %c0_i32 = arith.constant 0 : i32
    %c0_i32_0 = arith.constant 0 : i32
    %c0_i32_1 = arith.constant 0 : i32
    return %c0_i32, %c0_i32_0 : i32, i32
  }
  func.func @transform_2(%arg0: i32) -> (i32, i32) {
    %c0_i32 = arith.constant 0 : i32
    %c0_i32_0 = arith.constant 0 : i32
    %c0_i32_1 = arith.constant 0 : i32
    return %c0_i32, %c0_i32_0 : i32, i32
  }
  func.func @transform_3(%arg0: i32) -> (i32, i32) {
    %c0_i32 = arith.constant 0 : i32
    %c0_i32_0 = arith.constant 0 : i32
    return %arg0, %c0_i32 : i32, i32
  }
}

module attributes {stable_mosaic.version = 11 : i64} {
  func.func @_gemm_kernel(%arg0: i32, %arg1: memref<32x288xbf16, #tpu.memory_space<vmem>>, %arg2: memref<288x32xbf16, #tpu.memory_space<vmem>>, %arg3: memref<1x32xf32, #tpu.memory_space<vmem>>, %arg4: memref<32x32xf32, #tpu.memory_space<vmem>>, %arg5: memref<32x32xf32, #tpu.memory_space<vmem>>) attributes {dimension_semantics = [#tpu.dimension_semantics<parallel>], iteration_bounds = array<i64: 1>, scalar_prefetch = 0 : i64, scratch_operands = 0 : i64, tpu.core_type = #tpu.core_type<tc>, window_params = [{transform_indices = @transform_0, window_bounds = array<i64: 32, 288>}, {pipeline_mode = #tpu.pipeline_mode<synchronous>, transform_indices = @transform_1, window_bounds = array<i64: 288, 32>}, {pipeline_mode = #tpu.pipeline_mode<synchronous>, transform_indices = @transform_2, window_bounds = array<i64: 1, 32>}, {transform_indices = @transform_3, window_bounds = array<i64: 32, 32>}, {transform_indices = @transform_4, window_bounds = array<i64: 32, 32>}]} {
    %c0 = arith.constant 0 : index
    %c0_0 = arith.constant 0 : index
    %0 = vector.load %arg1[%c0, %c0_0] : memref<32x288xbf16, #tpu.memory_space<vmem>>, vector<32x288xbf16>
    %c0_1 = arith.constant 0 : index
    %c0_2 = arith.constant 0 : index
    %1 = vector.load %arg2[%c0_1, %c0_2] : memref<288x32xbf16, #tpu.memory_space<vmem>>, vector<288x32xbf16>
    %cst = arith.constant dense<0.000000e+00> : vector<32x32xf32>
    %2 = tpu.matmul %0, %1, %cst {dimension_numbers = #tpu.dot_dimension_numbers<[1], [0], [0], [1], [0, 0, 1, 1], [], []>} : vector<32x288xbf16>, vector<288x32xbf16>, vector<32x32xf32> -> vector<32x32xf32>
    %c0_3 = arith.constant 0 : index
    %c0_4 = arith.constant 0 : index
    %3 = vector.load %arg3[%c0_3, %c0_4] : memref<1x32xf32, #tpu.memory_space<vmem>>, vector<1x32xf32>
    %4 = vector.broadcast %3 : vector<1x32xf32> to vector<32x32xf32>
    %5 = arith.addf %2, %4 : vector<32x32xf32>
    %c0_5 = arith.constant 0 : index
    %c0_6 = arith.constant 0 : index
    %6 = vector.load %arg4[%c0_5, %c0_6] : memref<32x32xf32, #tpu.memory_space<vmem>>, vector<32x32xf32>
    %7 = arith.addf %5, %6 : vector<32x32xf32>
    %c0_7 = arith.constant 0 : index
    %c0_8 = arith.constant 0 : index
    %8 = vector.load %arg5[%c0_7, %c0_8] : memref<32x32xf32, #tpu.memory_space<vmem>>, vector<32x32xf32>
    tpu.vector_store %arg5[%c0_7, %c0_8], %7 {strides = array<i32>} : memref<32x32xf32, #tpu.memory_space<vmem>>, vector<32x32xf32>,
    return
  }
  func.func @transform_0(%arg0: i32) -> (i32, i32) {
    %c0_i32 = arith.constant 0 : i32
    %c0_i32_0 = arith.constant 0 : i32
    return %arg0, %c0_i32 : i32, i32
  }
  func.func @transform_1(%arg0: i32) -> (i32, i32) {
    %c0_i32 = arith.constant 0 : i32
    %c0_i32_0 = arith.constant 0 : i32
    %c0_i32_1 = arith.constant 0 : i32
    return %c0_i32, %c0_i32_0 : i32, i32
  }
  func.func @transform_2(%arg0: i32) -> (i32, i32) {
    %c0_i32 = arith.constant 0 : i32
    %c0_i32_0 = arith.constant 0 : i32
    %c0_i32_1 = arith.constant 0 : i32
    return %c0_i32, %c0_i32_0 : i32, i32
  }
  func.func @transform_3(%arg0: i32) -> (i32, i32) {
    %c0_i32 = arith.constant 0 : i32
    %c0_i32_0 = arith.constant 0 : i32
    return %arg0, %c0_i32 : i32, i32
  }
  func.func @transform_4(%arg0: i32) -> (i32, i32) {
    %c0_i32 = arith.constant 0 : i32
    %c0_i32_0 = arith.constant 0 : i32
    return %arg0, %c0_i32 : i32, i32
  }
}

module attributes {stable_mosaic.version = 11 : i64} {
  func.func @_gemm_kernel(%arg0: i32, %arg1: memref<32x32xbf16, #tpu.memory_space<vmem>>, %arg2: memref<32x768xbf16, #tpu.memory_space<vmem>>, %arg3: memref<1x768xf32, #tpu.memory_space<vmem>>, %arg4: memref<32x768xf32, #tpu.memory_space<vmem>>) attributes {dimension_semantics = [#tpu.dimension_semantics<parallel>], iteration_bounds = array<i64: 1>, scalar_prefetch = 0 : i64, scratch_operands = 0 : i64, tpu.core_type = #tpu.core_type<tc>, window_params = [{transform_indices = @transform_0, window_bounds = array<i64: 32, 32>}, {pipeline_mode = #tpu.pipeline_mode<synchronous>, transform_indices = @transform_1, window_bounds = array<i64: 32, 768>}, {pipeline_mode = #tpu.pipeline_mode<synchronous>, transform_indices = @transform_2, window_bounds = array<i64: 1, 768>}, {transform_indices = @transform_3, window_bounds = array<i64: 32, 768>}]} {
    %c0 = arith.constant 0 : index
    %c0_0 = arith.constant 0 : index
    %0 = vector.load %arg1[%c0, %c0_0] : memref<32x32xbf16, #tpu.memory_space<vmem>>, vector<32x32xbf16>
    %c0_1 = arith.constant 0 : index
    %c0_2 = arith.constant 0 : index
    %1 = vector.load %arg2[%c0_1, %c0_2] : memref<32x768xbf16, #tpu.memory_space<vmem>>, vector<32x768xbf16>
    %cst = arith.constant dense<0.000000e+00> : vector<32x768xf32>
    %2 = tpu.matmul %0, %1, %cst {dimension_numbers = #tpu.dot_dimension_numbers<[1], [0], [0], [1], [0, 0, 1, 1], [], []>} : vector<32x32xbf16>, vector<32x768xbf16>, vector<32x768xf32> -> vector<32x768xf32>
    %c0_3 = arith.constant 0 : index
    %c0_4 = arith.constant 0 : index
    %3 = vector.load %arg3[%c0_3, %c0_4] : memref<1x768xf32, #tpu.memory_space<vmem>>, vector<1x768xf32>
    %4 = vector.broadcast %3 : vector<1x768xf32> to vector<32x768xf32>
    %5 = arith.addf %2, %4 : vector<32x768xf32>
    %c0_5 = arith.constant 0 : index
    %c0_6 = arith.constant 0 : index
    %6 = vector.load %arg4[%c0_5, %c0_6] : memref<32x768xf32, #tpu.memory_space<vmem>>, vector<32x768xf32>
    tpu.vector_store %arg4[%c0_5, %c0_6], %5 {strides = array<i32>} : memref<32x768xf32, #tpu.memory_space<vmem>>, vector<32x768xf32>,
    return
  }
  func.func @transform_0(%arg0: i32) -> (i32, i32) {
    %c0_i32 = arith.constant 0 : i32
    %c0_i32_0 = arith.constant 0 : i32
    return %arg0, %c0_i32 : i32, i32
  }
  func.func @transform_1(%arg0: i32) -> (i32, i32) {
    %c0_i32 = arith.constant 0 : i32
    %c0_i32_0 = arith.constant 0 : i32
    %c0_i32_1 = arith.constant 0 : i32
    return %c0_i32, %c0_i32_0 : i32, i32
  }
  func.func @transform_2(%arg0: i32) -> (i32, i32) {
    %c0_i32 = arith.constant 0 : i32
    %c0_i32_0 = arith.constant 0 : i32
    %c0_i32_1 = arith.constant 0 : i32
    return %c0_i32, %c0_i32_0 : i32, i32
  }
  func.func @transform_3(%arg0: i32) -> (i32, i32) {
    %c0_i32 = arith.constant 0 : i32
    %c0_i32_0 = arith.constant 0 : i32
    return %arg0, %c0_i32 : i32, i32
  }
}

module attributes {stable_mosaic.version = 11 : i64} {
  func.func @_attention_kernel(%arg0: i32, %arg1: memref<8x16x32xbf16, #tpu.memory_space<vmem>>, %arg2: memref<8x16x32xbf16, #tpu.memory_space<vmem>>, %arg3: memref<8x16x32xbf16, #tpu.memory_space<vmem>>, %arg4: memref<8x16x32xf32, #tpu.memory_space<vmem>>) attributes {dimension_semantics = [#tpu.dimension_semantics<parallel>], iteration_bounds = array<i64: 2>, scalar_prefetch = 0 : i64, scratch_operands = 0 : i64, tpu.core_type = #tpu.core_type<tc>, window_params = [{transform_indices = @transform_0, window_bounds = array<i64: 8, 16, 32>}, {transform_indices = @transform_1, window_bounds = array<i64: 8, 16, 32>}, {transform_indices = @transform_2, window_bounds = array<i64: 8, 16, 32>}, {transform_indices = @transform_3, window_bounds = array<i64: 8, 16, 32>}]} {
    %c0 = arith.constant 0 : index
    %c0_0 = arith.constant 0 : index
    %c0_1 = arith.constant 0 : index
    %0 = vector.load %arg1[%c0, %c0_0, %c0_1] : memref<8x16x32xbf16, #tpu.memory_space<vmem>>, vector<8x16x32xbf16>
    %c0_2 = arith.constant 0 : index
    %c0_3 = arith.constant 0 : index
    %c0_4 = arith.constant 0 : index
    %1 = vector.load %arg2[%c0_2, %c0_3, %c0_4] : memref<8x16x32xbf16, #tpu.memory_space<vmem>>, vector<8x16x32xbf16>
    %c0_5 = arith.constant 0 : index
    %c0_6 = arith.constant 0 : index
    %c0_7 = arith.constant 0 : index
    %2 = vector.load %arg3[%c0_5, %c0_6, %c0_7] : memref<8x16x32xbf16, #tpu.memory_space<vmem>>, vector<8x16x32xbf16>
    "tpu.trace_start"() <{level = 10 : i32, message = "bqd,bkd->bqk"}> : () -> ()
    %cst = arith.constant dense<0.000000e+00> : vector<8x16x16xf32>
    %3 = tpu.matmul %0, %1, %cst {dimension_numbers = #tpu.dot_dimension_numbers<[2], [2], [1], [1], [0, 0, 0, 1, 1, 1], [0], [0]>} : vector<8x16x32xbf16>, vector<8x16x32xbf16>, vector<8x16x16xf32> -> vector<8x16x16xf32>
    "tpu.trace_stop"() : () -> ()
    %cst_8 = arith.constant 0.176776692 : f32
    %4 = vector.broadcast %cst_8 : f32 to vector<8x16x16xf32>
    %5 = arith.mulf %3, %4 : vector<8x16x16xf32>
    %cst_9 = arith.constant dense<0xFF800000> : vector<8x16xf32>
    %6 = vector.multi_reduction <maximumf>, %5, %cst_9 [2] : vector<8x16x16xf32> to vector<8x16xf32>
    %7 = vector.shape_cast %6 : vector<8x16xf32> to vector<8x16x1xf32>
    %8 = vector.broadcast %7 : vector<8x16x1xf32> to vector<8x16x16xf32>
    %9 = arith.subf %5, %8 : vector<8x16x16xf32>
    %10 = math.exp %9 : vector<8x16x16xf32>
    %cst_10 = arith.constant dense<0.000000e+00> : vector<8x16xf32>
    %11 = vector.multi_reduction <add>, %10, %cst_10 [2] : vector<8x16x16xf32> to vector<8x16xf32>
    %12 = vector.shape_cast %11 : vector<8x16xf32> to vector<8x16x1xf32>
    %13 = tpu.reciprocal %12 {approx = true} : vector<8x16x1xf32> -> vector<8x16x1xf32>
    %14 = vector.broadcast %13 : vector<8x16x1xf32> to vector<8x16x16xf32>
    %15 = arith.mulf %10, %14 : vector<8x16x16xf32>
    %16 = arith.truncf %15 : vector<8x16x16xf32> to vector<8x16x16xbf16>
    "tpu.trace_start"() <{level = 10 : i32, message = "bqk,bkd->bqd"}> : () -> ()
    %cst_11 = arith.constant dense<0.000000e+00> : vector<8x16x32xf32>
    %17 = tpu.matmul %16, %2, %cst_11 {dimension_numbers = #tpu.dot_dimension_numbers<[2], [1], [1], [2], [0, 0, 0, 1, 1, 2], [0], [0]>} : vector<8x16x16xbf16>, vector<8x16x32xbf16>, vector<8x16x32xf32> -> vector<8x16x32xf32>
    "tpu.trace_stop"() : () -> ()
    %c0_12 = arith.constant 0 : index
    %c0_13 = arith.constant 0 : index
    %c0_14 = arith.constant 0 : index
    %18 = vector.load %arg4[%c0_12, %c0_13, %c0_14] : memref<8x16x32xf32, #tpu.memory_space<vmem>>, vector<8x16x32xf32>
    tpu.vector_store %arg4[%c0_12, %c0_13, %c0_14], %17 {strides = array<i32>} : memref<8x16x32xf32, #tpu.memory_space<vmem>>, vector<8x16x32xf32>,
    return
  }
  func.func @transform_0(%arg0: i32) -> (i32, i32, i32) {
    %c0_i32 = arith.constant 0 : i32
    %c0_i32_0 = arith.constant 0 : i32
    %c0_i32_1 = arith.constant 0 : i32
    return %arg0, %c0_i32, %c0_i32_0 : i32, i32, i32
  }
  func.func @transform_1(%arg0: i32) -> (i32, i32, i32) {
    %c0_i32 = arith.constant 0 : i32
    %c0_i32_0 = arith.constant 0 : i32
    %c0_i32_1 = arith.constant 0 : i32
    return %arg0, %c0_i32, %c0_i32_0 : i32, i32, i32
  }
  func.func @transform_2(%arg0: i32) -> (i32, i32, i32) {
    %c0_i32 = arith.constant 0 : i32
    %c0_i32_0 = arith.constant 0 : i32
    %c0_i32_1 = arith.constant 0 : i32
    return %arg0, %c0_i32, %c0_i32_0 : i32, i32, i32
  }
  func.func @transform_3(%arg0: i32) -> (i32, i32, i32) {
    %c0_i32 = arith.constant 0 : i32
    %c0_i32_0 = arith.constant 0 : i32
    %c0_i32_1 = arith.constant 0 : i32
    return %arg0, %c0_i32, %c0_i32_0 : i32, i32, i32
  }
}

module attributes {stable_mosaic.version = 11 : i64} {
  func.func @_gemm_kernel(%arg0: i32, %arg1: memref<32x256xbf16, #tpu.memory_space<vmem>>, %arg2: memref<256x32xbf16, #tpu.memory_space<vmem>>, %arg3: memref<1x32xf32, #tpu.memory_space<vmem>>, %arg4: memref<32x32xf32, #tpu.memory_space<vmem>>) attributes {dimension_semantics = [#tpu.dimension_semantics<parallel>], iteration_bounds = array<i64: 1>, scalar_prefetch = 0 : i64, scratch_operands = 0 : i64, tpu.core_type = #tpu.core_type<tc>, window_params = [{transform_indices = @transform_0, window_bounds = array<i64: 32, 256>}, {pipeline_mode = #tpu.pipeline_mode<synchronous>, transform_indices = @transform_1, window_bounds = array<i64: 256, 32>}, {pipeline_mode = #tpu.pipeline_mode<synchronous>, transform_indices = @transform_2, window_bounds = array<i64: 1, 32>}, {transform_indices = @transform_3, window_bounds = array<i64: 32, 32>}]} {
    %c0 = arith.constant 0 : index
    %c0_0 = arith.constant 0 : index
    %0 = vector.load %arg1[%c0, %c0_0] : memref<32x256xbf16, #tpu.memory_space<vmem>>, vector<32x256xbf16>
    %c0_1 = arith.constant 0 : index
    %c0_2 = arith.constant 0 : index
    %1 = vector.load %arg2[%c0_1, %c0_2] : memref<256x32xbf16, #tpu.memory_space<vmem>>, vector<256x32xbf16>
    %cst = arith.constant dense<0.000000e+00> : vector<32x32xf32>
    %2 = tpu.matmul %0, %1, %cst {dimension_numbers = #tpu.dot_dimension_numbers<[1], [0], [0], [1], [0, 0, 1, 1], [], []>} : vector<32x256xbf16>, vector<256x32xbf16>, vector<32x32xf32> -> vector<32x32xf32>
    %c0_3 = arith.constant 0 : index
    %c0_4 = arith.constant 0 : index
    %3 = vector.load %arg3[%c0_3, %c0_4] : memref<1x32xf32, #tpu.memory_space<vmem>>, vector<1x32xf32>
    %4 = vector.broadcast %3 : vector<1x32xf32> to vector<32x32xf32>
    %5 = arith.addf %2, %4 : vector<32x32xf32>
    %c0_5 = arith.constant 0 : index
    %c0_6 = arith.constant 0 : index
    %6 = vector.load %arg4[%c0_5, %c0_6] : memref<32x32xf32, #tpu.memory_space<vmem>>, vector<32x32xf32>
    tpu.vector_store %arg4[%c0_5, %c0_6], %5 {strides = array<i32>} : memref<32x32xf32, #tpu.memory_space<vmem>>, vector<32x32xf32>,
    return
  }
  func.func @transform_0(%arg0: i32) -> (i32, i32) {
    %c0_i32 = arith.constant 0 : i32
    %c0_i32_0 = arith.constant 0 : i32
    return %arg0, %c0_i32 : i32, i32
  }
  func.func @transform_1(%arg0: i32) -> (i32, i32) {
    %c0_i32 = arith.constant 0 : i32
    %c0_i32_0 = arith.constant 0 : i32
    %c0_i32_1 = arith.constant 0 : i32
    return %c0_i32, %c0_i32_0 : i32, i32
  }
  func.func @transform_2(%arg0: i32) -> (i32, i32) {
    %c0_i32 = arith.constant 0 : i32
    %c0_i32_0 = arith.constant 0 : i32
    %c0_i32_1 = arith.constant 0 : i32
    return %c0_i32, %c0_i32_0 : i32, i32
  }
  func.func @transform_3(%arg0: i32) -> (i32, i32) {
    %c0_i32 = arith.constant 0 : i32
    %c0_i32_0 = arith.constant 0 : i32
    return %arg0, %c0_i32 : i32, i32
  }
}

module attributes {stable_mosaic.version = 11 : i64} {
  func.func @_gemm_kernel(%arg0: i32, %arg1: memref<128x288xbf16, #tpu.memory_space<vmem>>, %arg2: memref<288x16xbf16, #tpu.memory_space<vmem>>, %arg3: memref<1x16xf32, #tpu.memory_space<vmem>>, %arg4: memref<128x16xf32, #tpu.memory_space<vmem>>, %arg5: memref<128x16xf32, #tpu.memory_space<vmem>>) attributes {dimension_semantics = [#tpu.dimension_semantics<parallel>], iteration_bounds = array<i64: 1>, scalar_prefetch = 0 : i64, scratch_operands = 0 : i64, tpu.core_type = #tpu.core_type<tc>, window_params = [{transform_indices = @transform_0, window_bounds = array<i64: 128, 288>}, {pipeline_mode = #tpu.pipeline_mode<synchronous>, transform_indices = @transform_1, window_bounds = array<i64: 288, 16>}, {pipeline_mode = #tpu.pipeline_mode<synchronous>, transform_indices = @transform_2, window_bounds = array<i64: 1, 16>}, {transform_indices = @transform_3, window_bounds = array<i64: 128, 16>}, {transform_indices = @transform_4, window_bounds = array<i64: 128, 16>}]} {
    %c0 = arith.constant 0 : index
    %c0_0 = arith.constant 0 : index
    %0 = vector.load %arg1[%c0, %c0_0] : memref<128x288xbf16, #tpu.memory_space<vmem>>, vector<128x288xbf16>
    %c0_1 = arith.constant 0 : index
    %c0_2 = arith.constant 0 : index
    %1 = vector.load %arg2[%c0_1, %c0_2] : memref<288x16xbf16, #tpu.memory_space<vmem>>, vector<288x16xbf16>
    %cst = arith.constant dense<0.000000e+00> : vector<128x16xf32>
    %2 = tpu.matmul %0, %1, %cst {dimension_numbers = #tpu.dot_dimension_numbers<[1], [0], [0], [1], [0, 0, 1, 1], [], []>} : vector<128x288xbf16>, vector<288x16xbf16>, vector<128x16xf32> -> vector<128x16xf32>
    %c0_3 = arith.constant 0 : index
    %c0_4 = arith.constant 0 : index
    %3 = vector.load %arg3[%c0_3, %c0_4] : memref<1x16xf32, #tpu.memory_space<vmem>>, vector<1x16xf32>
    %4 = vector.broadcast %3 : vector<1x16xf32> to vector<128x16xf32>
    %5 = arith.addf %2, %4 : vector<128x16xf32>
    %c0_5 = arith.constant 0 : index
    %c0_6 = arith.constant 0 : index
    %6 = vector.load %arg4[%c0_5, %c0_6] : memref<128x16xf32, #tpu.memory_space<vmem>>, vector<128x16xf32>
    %7 = arith.addf %5, %6 : vector<128x16xf32>
    %c0_7 = arith.constant 0 : index
    %c0_8 = arith.constant 0 : index
    %8 = vector.load %arg5[%c0_7, %c0_8] : memref<128x16xf32, #tpu.memory_space<vmem>>, vector<128x16xf32>
    tpu.vector_store %arg5[%c0_7, %c0_8], %7 {strides = array<i32>} : memref<128x16xf32, #tpu.memory_space<vmem>>, vector<128x16xf32>,
    return
  }
  func.func @transform_0(%arg0: i32) -> (i32, i32) {
    %c0_i32 = arith.constant 0 : i32
    %c0_i32_0 = arith.constant 0 : i32
    return %arg0, %c0_i32 : i32, i32
  }
  func.func @transform_1(%arg0: i32) -> (i32, i32) {
    %c0_i32 = arith.constant 0 : i32
    %c0_i32_0 = arith.constant 0 : i32
    %c0_i32_1 = arith.constant 0 : i32
    return %c0_i32, %c0_i32_0 : i32, i32
  }
  func.func @transform_2(%arg0: i32) -> (i32, i32) {
    %c0_i32 = arith.constant 0 : i32
    %c0_i32_0 = arith.constant 0 : i32
    %c0_i32_1 = arith.constant 0 : i32
    return %c0_i32, %c0_i32_0 : i32, i32
  }
  func.func @transform_3(%arg0: i32) -> (i32, i32) {
    %c0_i32 = arith.constant 0 : i32
    %c0_i32_0 = arith.constant 0 : i32
    return %arg0, %c0_i32 : i32, i32
  }
  func.func @transform_4(%arg0: i32) -> (i32, i32) {
    %c0_i32 = arith.constant 0 : i32
    %c0_i32_0 = arith.constant 0 : i32
    return %arg0, %c0_i32 : i32, i32
  }
}

module attributes {stable_mosaic.version = 11 : i64} {
  func.func @_gemm_kernel(%arg0: i32, %arg1: memref<128x144xbf16, #tpu.memory_space<vmem>>, %arg2: memref<144x16xbf16, #tpu.memory_space<vmem>>, %arg3: memref<1x16xf32, #tpu.memory_space<vmem>>, %arg4: memref<128x16xf32, #tpu.memory_space<vmem>>, %arg5: memref<128x16xf32, #tpu.memory_space<vmem>>) attributes {dimension_semantics = [#tpu.dimension_semantics<parallel>], iteration_bounds = array<i64: 1>, scalar_prefetch = 0 : i64, scratch_operands = 0 : i64, tpu.core_type = #tpu.core_type<tc>, window_params = [{transform_indices = @transform_0, window_bounds = array<i64: 128, 144>}, {pipeline_mode = #tpu.pipeline_mode<synchronous>, transform_indices = @transform_1, window_bounds = array<i64: 144, 16>}, {pipeline_mode = #tpu.pipeline_mode<synchronous>, transform_indices = @transform_2, window_bounds = array<i64: 1, 16>}, {transform_indices = @transform_3, window_bounds = array<i64: 128, 16>}, {transform_indices = @transform_4, window_bounds = array<i64: 128, 16>}]} {
    %c0 = arith.constant 0 : index
    %c0_0 = arith.constant 0 : index
    %0 = vector.load %arg1[%c0, %c0_0] : memref<128x144xbf16, #tpu.memory_space<vmem>>, vector<128x144xbf16>
    %c0_1 = arith.constant 0 : index
    %c0_2 = arith.constant 0 : index
    %1 = vector.load %arg2[%c0_1, %c0_2] : memref<144x16xbf16, #tpu.memory_space<vmem>>, vector<144x16xbf16>
    %cst = arith.constant dense<0.000000e+00> : vector<128x16xf32>
    %2 = tpu.matmul %0, %1, %cst {dimension_numbers = #tpu.dot_dimension_numbers<[1], [0], [0], [1], [0, 0, 1, 1], [], []>} : vector<128x144xbf16>, vector<144x16xbf16>, vector<128x16xf32> -> vector<128x16xf32>
    %c0_3 = arith.constant 0 : index
    %c0_4 = arith.constant 0 : index
    %3 = vector.load %arg3[%c0_3, %c0_4] : memref<1x16xf32, #tpu.memory_space<vmem>>, vector<1x16xf32>
    %4 = vector.broadcast %3 : vector<1x16xf32> to vector<128x16xf32>
    %5 = arith.addf %2, %4 : vector<128x16xf32>
    %cst_5 = arith.constant 0.000000e+00 : f32
    %cst_6 = arith.constant 6.000000e+00 : f32
    %6 = vector.broadcast %cst_5 : f32 to vector<128x16xf32>
    %7 = arith.maximumf %6, %5 : vector<128x16xf32>
    %8 = vector.broadcast %cst_6 : f32 to vector<128x16xf32>
    %9 = arith.minimumf %8, %7 : vector<128x16xf32>
    %c0_7 = arith.constant 0 : index
    %c0_8 = arith.constant 0 : index
    %10 = vector.load %arg4[%c0_7, %c0_8] : memref<128x16xf32, #tpu.memory_space<vmem>>, vector<128x16xf32>
    %11 = arith.addf %9, %10 : vector<128x16xf32>
    %c0_9 = arith.constant 0 : index
    %c0_10 = arith.constant 0 : index
    %12 = vector.load %arg5[%c0_9, %c0_10] : memref<128x16xf32, #tpu.memory_space<vmem>>, vector<128x16xf32>
    tpu.vector_store %arg5[%c0_9, %c0_10], %11 {strides = array<i32>} : memref<128x16xf32, #tpu.memory_space<vmem>>, vector<128x16xf32>,
    return
  }
  func.func @transform_0(%arg0: i32) -> (i32, i32) {
    %c0_i32 = arith.constant 0 : i32
    %c0_i32_0 = arith.constant 0 : i32
    return %arg0, %c0_i32 : i32, i32
  }
  func.func @transform_1(%arg0: i32) -> (i32, i32) {
    %c0_i32 = arith.constant 0 : i32
    %c0_i32_0 = arith.constant 0 : i32
    %c0_i32_1 = arith.constant 0 : i32
    return %c0_i32, %c0_i32_0 : i32, i32
  }
  func.func @transform_2(%arg0: i32) -> (i32, i32) {
    %c0_i32 = arith.constant 0 : i32
    %c0_i32_0 = arith.constant 0 : i32
    %c0_i32_1 = arith.constant 0 : i32
    return %c0_i32, %c0_i32_0 : i32, i32
  }
  func.func @transform_3(%arg0: i32) -> (i32, i32) {
    %c0_i32 = arith.constant 0 : i32
    %c0_i32_0 = arith.constant 0 : i32
    return %arg0, %c0_i32 : i32, i32
  }
  func.func @transform_4(%arg0: i32) -> (i32, i32) {
    %c0_i32 = arith.constant 0 : i32
    %c0_i32_0 = arith.constant 0 : i32
    return %arg0, %c0_i32 : i32, i32
  }
}

module attributes {stable_mosaic.version = 11 : i64} {
  func.func @_gemm_kernel(%arg0: i32, %arg1: memref<256x144xbf16, #tpu.memory_space<vmem>>, %arg2: memref<144x8xbf16, #tpu.memory_space<vmem>>, %arg3: memref<1x8xf32, #tpu.memory_space<vmem>>, %arg4: memref<256x8xf32, #tpu.memory_space<vmem>>, %arg5: memref<256x8xf32, #tpu.memory_space<vmem>>) attributes {dimension_semantics = [#tpu.dimension_semantics<parallel>], iteration_bounds = array<i64: 2>, scalar_prefetch = 0 : i64, scratch_operands = 0 : i64, tpu.core_type = #tpu.core_type<tc>, window_params = [{transform_indices = @transform_0, window_bounds = array<i64: 256, 144>}, {pipeline_mode = #tpu.pipeline_mode<synchronous>, transform_indices = @transform_1, window_bounds = array<i64: 144, 8>}, {pipeline_mode = #tpu.pipeline_mode<synchronous>, transform_indices = @transform_2, window_bounds = array<i64: 1, 8>}, {transform_indices = @transform_3, window_bounds = array<i64: 256, 8>}, {transform_indices = @transform_4, window_bounds = array<i64: 256, 8>}]} {
    %c0 = arith.constant 0 : index
    %c0_0 = arith.constant 0 : index
    %0 = vector.load %arg1[%c0, %c0_0] : memref<256x144xbf16, #tpu.memory_space<vmem>>, vector<256x144xbf16>
    %c0_1 = arith.constant 0 : index
    %c0_2 = arith.constant 0 : index
    %1 = vector.load %arg2[%c0_1, %c0_2] : memref<144x8xbf16, #tpu.memory_space<vmem>>, vector<144x8xbf16>
    %cst = arith.constant dense<0.000000e+00> : vector<256x8xf32>
    %2 = tpu.matmul %0, %1, %cst {dimension_numbers = #tpu.dot_dimension_numbers<[1], [0], [0], [1], [0, 0, 1, 1], [], []>} : vector<256x144xbf16>, vector<144x8xbf16>, vector<256x8xf32> -> vector<256x8xf32>
    %c0_3 = arith.constant 0 : index
    %c0_4 = arith.constant 0 : index
    %3 = vector.load %arg3[%c0_3, %c0_4] : memref<1x8xf32, #tpu.memory_space<vmem>>, vector<1x8xf32>
    %4 = vector.broadcast %3 : vector<1x8xf32> to vector<256x8xf32>
    %5 = arith.addf %2, %4 : vector<256x8xf32>
    %c0_5 = arith.constant 0 : index
    %c0_6 = arith.constant 0 : index
    %6 = vector.load %arg4[%c0_5, %c0_6] : memref<256x8xf32, #tpu.memory_space<vmem>>, vector<256x8xf32>
    %7 = arith.addf %5, %6 : vector<256x8xf32>
    %c0_7 = arith.constant 0 : index
    %c0_8 = arith.constant 0 : index
    %8 = vector.load %arg5[%c0_7, %c0_8] : memref<256x8xf32, #tpu.memory_space<vmem>>, vector<256x8xf32>
    tpu.vector_store %arg5[%c0_7, %c0_8], %7 {strides = array<i32>} : memref<256x8xf32, #tpu.memory_space<vmem>>, vector<256x8xf32>,
    return
  }
  func.func @transform_0(%arg0: i32) -> (i32, i32) {
    %c0_i32 = arith.constant 0 : i32
    %c0_i32_0 = arith.constant 0 : i32
    return %arg0, %c0_i32 : i32, i32
  }
  func.func @transform_1(%arg0: i32) -> (i32, i32) {
    %c0_i32 = arith.constant 0 : i32
    %c0_i32_0 = arith.constant 0 : i32
    %c0_i32_1 = arith.constant 0 : i32
    return %c0_i32, %c0_i32_0 : i32, i32
  }
  func.func @transform_2(%arg0: i32) -> (i32, i32) {
    %c0_i32 = arith.constant 0 : i32
    %c0_i32_0 = arith.constant 0 : i32
    %c0_i32_1 = arith.constant 0 : i32
    return %c0_i32, %c0_i32_0 : i32, i32
  }
  func.func @transform_3(%arg0: i32) -> (i32, i32) {
    %c0_i32 = arith.constant 0 : i32
    %c0_i32_0 = arith.constant 0 : i32
    return %arg0, %c0_i32 : i32, i32
  }
  func.func @transform_4(%arg0: i32) -> (i32, i32) {
    %c0_i32 = arith.constant 0 : i32
    %c0_i32_0 = arith.constant 0 : i32
    return %arg0, %c0_i32 : i32, i32
  }
}

module attributes {stable_mosaic.version = 11 : i64} {
  func.func @_gemm_kernel(%arg0: i32, %arg1: memref<256x72xbf16, #tpu.memory_space<vmem>>, %arg2: memref<72x8xbf16, #tpu.memory_space<vmem>>, %arg3: memref<1x8xf32, #tpu.memory_space<vmem>>, %arg4: memref<256x8xf32, #tpu.memory_space<vmem>>, %arg5: memref<1x8xf32, #tpu.memory_space<vmem>>, %arg6: memref<1x8xf32, #tpu.memory_space<vmem>>, %arg7: memref<256x8xf32, #tpu.memory_space<vmem>>) attributes {dimension_semantics = [#tpu.dimension_semantics<parallel>], iteration_bounds = array<i64: 2>, scalar_prefetch = 0 : i64, scratch_operands = 0 : i64, tpu.core_type = #tpu.core_type<tc>, window_params = [{transform_indices = @transform_0, window_bounds = array<i64: 256, 72>}, {pipeline_mode = #tpu.pipeline_mode<synchronous>, transform_indices = @transform_1, window_bounds = array<i64: 72, 8>}, {pipeline_mode = #tpu.pipeline_mode<synchronous>, transform_indices = @transform_2, window_bounds = array<i64: 1, 8>}, {transform_indices = @transform_3, window_bounds = array<i64: 256, 8>}, {pipeline_mode = #tpu.pipeline_mode<synchronous>, transform_indices = @transform_4, window_bounds = array<i64: 1, 8>}, {pipeline_mode = #tpu.pipeline_mode<synchronous>, transform_indices = @transform_5, window_bounds = array<i64: 1, 8>}, {transform_indices = @transform_6, window_bounds = array<i64: 256, 8>}]} {
    %c0 = arith.constant 0 : index
    %c0_0 = arith.constant 0 : index
    %0 = vector.load %arg1[%c0, %c0_0] : memref<256x72xbf16, #tpu.memory_space<vmem>>, vector<256x72xbf16>
    %c0_1 = arith.constant 0 : index
    %c0_2 = arith.constant 0 : index
    %1 = vector.load %arg2[%c0_1, %c0_2] : memref<72x8xbf16, #tpu.memory_space<vmem>>, vector<72x8xbf16>
    %cst = arith.constant dense<0.000000e+00> : vector<256x8xf32>
    %2 = tpu.matmul %0, %1, %cst {dimension_numbers = #tpu.dot_dimension_numbers<[1], [0], [0], [1], [0, 0, 1, 1], [], []>} : vector<256x72xbf16>, vector<72x8xbf16>, vector<256x8xf32> -> vector<256x8xf32>
    %c0_3 = arith.constant 0 : index
    %c0_4 = arith.constant 0 : index
    %3 = vector.load %arg3[%c0_3, %c0_4] : memref<1x8xf32, #tpu.memory_space<vmem>>, vector<1x8xf32>
    %4 = vector.broadcast %3 : vector<1x8xf32> to vector<256x8xf32>
    %5 = arith.addf %2, %4 : vector<256x8xf32>
    %cst_5 = arith.constant 0.000000e+00 : f32
    %cst_6 = arith.constant 6.000000e+00 : f32
    %6 = vector.broadcast %cst_5 : f32 to vector<256x8xf32>
    %7 = arith.maximumf %6, %5 : vector<256x8xf32>
    %8 = vector.broadcast %cst_6 : f32 to vector<256x8xf32>
    %9 = arith.minimumf %8, %7 : vector<256x8xf32>
    %c0_7 = arith.constant 0 : index
    %c0_8 = arith.constant 0 : index
    %10 = vector.load %arg4[%c0_7, %c0_8] : memref<256x8xf32, #tpu.memory_space<vmem>>, vector<256x8xf32>
    %11 = arith.addf %9, %10 : vector<256x8xf32>
    %c0_9 = arith.constant 0 : index
    %c0_10 = arith.constant 0 : index
    %12 = vector.load %arg5[%c0_9, %c0_10] : memref<1x8xf32, #tpu.memory_space<vmem>>, vector<1x8xf32>
    %13 = vector.broadcast %12 : vector<1x8xf32> to vector<256x8xf32>
    %14 = arith.mulf %11, %13 : vector<256x8xf32>
    %c0_11 = arith.constant 0 : index
    %c0_12 = arith.constant 0 : index
    %15 = vector.load %arg6[%c0_11, %c0_12] : memref<1x8xf32, #tpu.memory_space<vmem>>, vector<1x8xf32>
    %16 = vector.broadcast %15 : vector<1x8xf32> to vector<256x8xf32>
    %17 = arith.addf %14, %16 : vector<256x8xf32>
    %c0_13 = arith.constant 0 : index
    %c0_14 = arith.constant 0 : index
    %18 = vector.load %arg7[%c0_13, %c0_14] : memref<256x8xf32, #tpu.memory_space<vmem>>, vector<256x8xf32>
    tpu.vector_store %arg7[%c0_13, %c0_14], %17 {strides = array<i32>} : memref<256x8xf32, #tpu.memory_space<vmem>>, vector<256x8xf32>,
    return
  }
  func.func @transform_0(%arg0: i32) -> (i32, i32) {
    %c0_i32 = arith.constant 0 : i32
    %c0_i32_0 = arith.constant 0 : i32
    return %arg0, %c0_i32 : i32, i32
  }
  func.func @transform_1(%arg0: i32) -> (i32, i32) {
    %c0_i32 = arith.constant 0 : i32
    %c0_i32_0 = arith.constant 0 : i32
    %c0_i32_1 = arith.constant 0 : i32
    return %c0_i32, %c0_i32_0 : i32, i32
  }
  func.func @transform_2(%arg0: i32) -> (i32, i32) {
    %c0_i32 = arith.constant 0 : i32
    %c0_i32_0 = arith.constant 0 : i32
    %c0_i32_1 = arith.constant 0 : i32
    return %c0_i32, %c0_i32_0 : i32, i32
  }
  func.func @transform_3(%arg0: i32) -> (i32, i32) {
    %c0_i32 = arith.constant 0 : i32
    %c0_i32_0 = arith.constant 0 : i32
    return %arg0, %c0_i32 : i32, i32
  }
  func.func @transform_4(%arg0: i32) -> (i32, i32) {
    %c0_i32 = arith.constant 0 : i32
    %c0_i32_0 = arith.constant 0 : i32
    %c0_i32_1 = arith.constant 0 : i32
    return %c0_i32, %c0_i32_0 : i32, i32
  }
  func.func @transform_5(%arg0: i32) -> (i32, i32) {
    %c0_i32 = arith.constant 0 : i32
    %c0_i32_0 = arith.constant 0 : i32
    %c0_i32_1 = arith.constant 0 : i32
    return %c0_i32, %c0_i32_0 : i32, i32
  }
  func.func @transform_6(%arg0: i32) -> (i32, i32) {
    %c0_i32 = arith.constant 0 : i32
    %c0_i32_0 = arith.constant 0 : i32
    return %arg0, %c0_i32 : i32, i32
  }
}

module attributes {stable_mosaic.version = 11 : i64} {
  func.func @_head_logsoftmax_kernel(%arg0: i32, %arg1: memref<8x512xf32, #tpu.memory_space<vmem>>, %arg2: memref<2x8xf32, #tpu.memory_space<vmem>>, %arg3: memref<2x1xf32, #tpu.memory_space<vmem>>, %arg4: memref<2x512xf32, #tpu.memory_space<vmem>>) attributes {dimension_semantics = [#tpu.dimension_semantics<arbitrary>], iteration_bounds = array<i64: 1>, scalar_prefetch = 0 : i64, scratch_operands = 0 : i64, tpu.core_type = #tpu.core_type<tc>, window_params = [{pipeline_mode = #tpu.pipeline_mode<synchronous>, transform_indices = @transform_0, window_bounds = array<i64: 8, 512>}, {pipeline_mode = #tpu.pipeline_mode<synchronous>, transform_indices = @transform_1, window_bounds = array<i64: 2, 8>}, {pipeline_mode = #tpu.pipeline_mode<synchronous>, transform_indices = @transform_2, window_bounds = array<i64: 2, 1>}, {pipeline_mode = #tpu.pipeline_mode<synchronous>, transform_indices = @transform_3, window_bounds = array<i64: 2, 512>}]} {
    %c0 = arith.constant 0 : index
    %c0_0 = arith.constant 0 : index
    %0 = vector.load %arg2[%c0, %c0_0] : memref<2x8xf32, #tpu.memory_space<vmem>>, vector<2x8xf32>
    %c0_1 = arith.constant 0 : index
    %c0_2 = arith.constant 0 : index
    %1 = vector.load %arg1[%c0_1, %c0_2] : memref<8x512xf32, #tpu.memory_space<vmem>>, vector<8x512xf32>
    %cst = arith.constant dense<0.000000e+00> : vector<2x512xf32>
    %2 = tpu.matmul %0, %1, %cst {dimension_numbers = #tpu.dot_dimension_numbers<[1], [0], [0], [1], [0, 0, 1, 1], [], []>} : vector<2x8xf32>, vector<8x512xf32>, vector<2x512xf32> -> vector<2x512xf32>
    %c0_3 = arith.constant 0 : index
    %c0_4 = arith.constant 0 : index
    %3 = vector.load %arg3[%c0_3, %c0_4] : memref<2x1xf32, #tpu.memory_space<vmem>>, vector<2x1xf32>
    %4 = vector.broadcast %3 : vector<2x1xf32> to vector<2x512xf32>
    %5 = arith.addf %2, %4 : vector<2x512xf32>
    %cst_5 = arith.constant dense<0xFF800000> : vector<512xf32>
    %6 = vector.multi_reduction <maximumf>, %5, %cst_5 [0] : vector<2x512xf32> to vector<512xf32>
    %7 = vector.shape_cast %6 : vector<512xf32> to vector<1x512xf32>
    %8 = vector.broadcast %7 : vector<1x512xf32> to vector<2x512xf32>
    %9 = arith.subf %5, %8 : vector<2x512xf32>
    %10 = math.exp %9 : vector<2x512xf32>
    %cst_6 = arith.constant dense<0.000000e+00> : vector<512xf32>
    %11 = vector.multi_reduction <add>, %10, %cst_6 [0] : vector<2x512xf32> to vector<512xf32>
    %12 = vector.shape_cast %11 : vector<512xf32> to vector<1x512xf32>
    %13 = math.log %12 : vector<1x512xf32>
    %14 = arith.addf %7, %13 : vector<1x512xf32>
    %15 = vector.broadcast %14 : vector<1x512xf32> to vector<2x512xf32>
    %16 = arith.subf %5, %15 : vector<2x512xf32>
    %c0_7 = arith.constant 0 : index
    %c0_8 = arith.constant 0 : index
    %17 = vector.load %arg4[%c0_7, %c0_8] : memref<2x512xf32, #tpu.memory_space<vmem>>, vector<2x512xf32>
    tpu.vector_store %arg4[%c0_7, %c0_8], %16 {strides = array<i32>} : memref<2x512xf32, #tpu.memory_space<vmem>>, vector<2x512xf32>,
    return
  }
  func.func @transform_0(%arg0: i32) -> (i32, i32) {
    %c0_i32 = arith.constant 0 : i32
    %c0_i32_0 = arith.constant 0 : i32
    %c0_i32_1 = arith.constant 0 : i32
    return %c0_i32, %c0_i32_0 : i32, i32
  }
  func.func @transform_1(%arg0: i32) -> (i32, i32) {
    %c0_i32 = arith.constant 0 : i32
    %c0_i32_0 = arith.constant 0 : i32
    %c0_i32_1 = arith.constant 0 : i32
    return %c0_i32, %c0_i32_0 : i32, i32
  }
  func.func @transform_2(%arg0: i32) -> (i32, i32) {
    %c0_i32 = arith.constant 0 : i32
    %c0_i32_0 = arith.constant 0 : i32
    %c0_i32_1 = arith.constant 0 : i32
    return %c0_i32, %c0_i32_0 : i32, i32
  }
  func.func @transform_3(%arg0: i32) -> (i32, i32) {
    %c0_i32 = arith.constant 0 : i32
    %c0_i32_0 = arith.constant 0 : i32
    %c0_i32_1 = arith.constant 0 : i32
    return %c0_i32, %c0_i32_0 : i32, i32
  }
}

</mosaic_0001>

<bundles_post_ra>
// kernel: att_net_forward.19
= control target key start
LH: loop header
LB: loop body
LE: loop exit
PB: predicated region body
PF: predicated region fallthrough
CT: control target
= control target key end

     0   :  { %s686_s12 = smov 0   ;;  %s832_s0 = inlined_call_operand.vmem [shape: bf16[512,9], index: 0, kind: input, shape index: {}]   ;;  %s833_s1 = inlined_call_operand.vmem [shape: bf16[9,8], index: 1, kind: input, shape index: {}]   ;;  %s834_s2 = inlined_call_operand.vmem [shape: f32[1,8], index: 2, kind: input, shape index: {}]   ;;  %s835_s3 = inlined_call_operand.vmem [shape: f32[512,8], index: 3, kind: output, shape index: {}]  }
   0x1 LB: > { %s532_s13 = sadd.s32 4294967295, %s663_s12   ;;  %p536_p0 = scmp.ge.s32.totalorder %s663_s12, 1  ;;  %s663_s12 = sphi %s686_s12, %s13_s12  }
   0x2   : > { %p138_p1 = scmp.lt.s32.totalorder %s663_s12, 3 }
   0x4   : > { %p139_p2 = pnand %p536_p0, %p138_p1 }
   0x5   : > { %s537_s18 = sshll.u32 (!%p139_p2), %s532_s13, 5 }
   0x6   : > { %142 = sbr.rel (%p139_p2) target bundleno = 213 (0xd5), region = 32  ;;  %p163_p3 = scmp.lt.s32.totalorder (!%p139_p2), %s537_s18, 63 }
   0xb   : > { %v607_v0 = vld [vmem:[%s833_s1] sm:$0xf]  ;;  %v643_v1 = vld [vmem:[%s833_s1] sm:$0x10]  ;;  %vm347_vm0 = vcmask 1043456   ;;  %vm348_vm1 = vcmask 1044480  }
   0xc   : > { %v608_v2 = vor.u32 %v643_v1, %v607_v0  ;;  %v665_v3 = vmov 65535   ;;  %s837_s18 = smov (!%p163_p3, %s537_s18), 63  ;;  %vm298_vm2 = vcmask 72704   ;;  %v726_v23 = vld [vmem:[%s834_s2] ss:$0 sm:$0xff]  ;;  %vm443_vm3 = vcmask 64512  }
   0xd   : > { %v349_v4 = vsel %vm347_vm0, 4294967295, %v665_v3  ;;  %s538_s19 = sshll.u32 %s837_s18, 2  ;;  %s540_s23 = sshll.u32 %s837_s18, 3 }
   0xe   : > { %v350_v5 = vsel %vm348_vm1, %v349_v4, 0  ;;  %s166_s22 = scalar_lea.vmem %s832_s0, %s538_s19  ;;  %s731_s28 = scalar_lea.vmem %s835_s3, %s540_s23 }
   0xf   : > { %v352_v6 = vand.u32 %v608_v2, %v350_v5  ;;  %v627_v7 = vld [vmem:[%s166_s22] sm:$0xff]  ;;  %v628_v11 = vld [vmem:[%s166_s22 + $0x8] sm:$0xff]  ;;  %v629_v15 = vld [vmem:[%s166_s22 + $0x10] sm:$0xff] }
  0x10   : > { %v631_v8 = vld [vmem:[%s166_s22 + $0x20] sm:$0xff]  ;;  %v632_v12 = vld [vmem:[%s166_s22 + $0x28] sm:$0xff]  ;;  %v633_v16 = vld [vmem:[%s166_s22 + $0x30] sm:$0xff] }
  0x11   : > { %361 = vmatpush.bf16.msra.mxu0 %v352_v6  ;;  %644 = vmatpush.bf16.msra.mxu1 %v352_v6  ;;  %v635_v9 = vld [vmem:[%s166_s22 + $0x40] sm:$0xff]  ;;  %v636_v13 = vld [vmem:[%s166_s22 + $0x48] sm:$0xff]  ;;  %v637_v17 = vld [vmem:[%s166_s22 + $0x50] sm:$0xff] }
  0x12   : > { %645 = vmatpush.bf16.msra.mxu2 %v352_v6  ;;  %646 = vmatpush.bf16.msra.mxu3 %v352_v6  ;;  %v639_v10 = vld [vmem:[%s166_s22 + $0x60] sm:$0xff]  ;;  %v640_v14 = vld [vmem:[%s166_s22 + $0x68] sm:$0xff]  ;;  %v641_v18 = vld [vmem:[%s166_s22 + $0x70] sm:$0xff] }
  0x13   : > { %v630_v19 = vld [vmem:[%s166_s22 + $0x18] sm:$0xff] }
  0x14   : > { %609 = vmatmul.msk.bf16.vlgmr.msra.gmra.mxu0 %vm298_vm2, %v627_v7  ;;  %613 = vmatmul.msk.bf16.vlgmr.msra.gmra.mxu1 %vm298_vm2, %v631_v8  ;;  %v634_v20 = vld [vmem:[%s166_s22 + $0x38] sm:$0xff] }
  0x15   : > { %617 = vmatmul.msk.bf16.vlgmr.msra.gmra.mxu2 %vm298_vm2, %v635_v9  ;;  %621 = vmatmul.msk.bf16.vlgmr.msra.gmra.mxu3 %vm298_vm2, %v639_v10  ;;  %v638_v21 = vld [vmem:[%s166_s22 + $0x58] sm:$0xff] }
  0x16   : > { %v642_v22 = vld [vmem:[%s166_s22 + $0x78] sm:$0xff] }
  0x24   : > { %610 = vmatmul.msk.bf16.gmra.mxu0 %vm298_vm2, %v628_v11  ;;  %614 = vmatmul.msk.bf16.gmra.mxu1 %vm298_vm2, %v632_v12 }
  0x25   : > { %618 = vmatmul.msk.bf16.gmra.mxu2 %vm298_vm2, %v636_v13  ;;  %622 = vmatmul.msk.bf16.gmra.mxu3 %vm298_vm2, %v640_v14 }
  0x34   : > { %611 = vmatmul.msk.bf16.gmra.mxu0 %vm298_vm2, %v629_v15  ;;  %615 = vmatmul.msk.bf16.gmra.mxu1 %vm298_vm2, %v633_v16 }
  0x35   : > { %619 = vmatmul.msk.bf16.gmra.mxu2 %vm298_vm2, %v637_v17  ;;  %623 = vmatmul.msk.bf16.gmra.mxu3 %vm298_vm2, %v641_v18 }
  0x44   : > { %612 = vmatmul.msk.bf16.gmra.mxu0 %vm298_vm2, %v630_v19  ;;  %616 = vmatmul.msk.bf16.gmra.mxu1 %vm298_vm2, %v634_v20 }
  0x45   : > { %620 = vmatmul.msk.bf16.gmra.mxu2 %vm298_vm2, %v638_v21  ;;  %624 = vmatmul.msk.bf16.gmra.mxu3 %vm298_vm2, %v642_v22 }
  0x91   : > { %v363_v24 = vpop.f32.mrf.mxu0  ;;  %v383_v25 = vpop.f32.mrf.mxu1 }
  0x92   : > { %v364_v26 = vadd.f32 %v726_v23, %v363_v24  ;;  %v384_v27 = vadd.f32 %v726_v23, %v383_v25 }
  0x94   : > { %444 = vst.msk [vmem:[%s731_s28] sm:$0xff] %vm443_vm3, %v364_v26 }
  0x95   : > { %452 = vst.msk [vmem:[%s731_s28 + $0x40] sm:$0xff] %vm443_vm3, %v384_v27 }
  0x98   : > { %v403_v28 = vpop.f32.mrf.mxu2  ;;  %v423_v29 = vpop.f32.mrf.mxu3 }
  0x99   : > { %v404_v30 = vadd.f32 %v726_v23, %v403_v28  ;;  %v424_v31 = vadd.f32 %v726_v23, %v423_v29  ;;  %v365_v32 = vpop.f32.mrf.mxu0  ;;  %v385_v33 = vpop.f32.mrf.mxu1 }
  0x9a   : > { %v366_v34 = vadd.f32 %v726_v23, %v365_v32  ;;  %v386_v35 = vadd.f32 %v726_v23, %v385_v33 }
  0x9b   : > { %460 = vst.msk [vmem:[%s731_s28 + $0x80] sm:$0xff] %vm443_vm3, %v404_v30 }
  0x9c   : > { %468 = vst.msk [vmem:[%s731_s28 + $0xc0] sm:$0xff] %vm443_vm3, %v424_v31 }
  0x9d   : > { %445 = vst.msk [vmem:[%s731_s28 + $0x8] sm:$0xff] %vm443_vm3, %v366_v34 }
  0x9e   : > { %453 = vst.msk [vmem:[%s731_s28 + $0x48] sm:$0xff] %vm443_vm3, %v386_v35 }
  0xa0   : > { %v405_v36 = vpop.f32.mrf.mxu2  ;;  %v425_v37 = vpop.f32.mrf.mxu3 }
  0xa1   : > { %v406_v38 = vadd.f32 %v726_v23, %v405_v36  ;;  %v426_v39 = vadd.f32 %v726_v23, %v425_v37  ;;  %v368_v40 = vpop.f32.mrf.mxu0  ;;  %v388_v41 = vpop.f32.mrf.mxu1 }
  0xa2   : > { %v369_v42 = vadd.f32 %v726_v23, %v368_v40  ;;  %v389_v43 = vadd.f32 %v726_v23, %v388_v41 }
  0xa3   : > { %461 = vst.msk [vmem:[%s731_s28 + $0x88] sm:$0xff] %vm443_vm3, %v406_v38 }
  0xa4   : > { %469 = vst.msk [vmem:[%s731_s28 + $0xc8] sm:$0xff] %vm443_vm3, %v426_v39 }
  0xa5   : > { %446 = vst.msk [vmem:[%s731_s28 + $0x10] sm:$0xff] %vm443_vm3, %v369_v42 }
  0xa6   : > { %454 = vst.msk [vmem:[%s731_s28 + $0x50] sm:$0xff] %vm443_vm3, %v389_v43 }
  0xa8   : > { %v408_v44 = vpop.f32.mrf.mxu2  ;;  %v428_v45 = vpop.f32.mrf.mxu3 }
  0xa9   : > { %v409_v46 = vadd.f32 %v726_v23, %v408_v44  ;;  %v429_v47 = vadd.f32 %v726_v23, %v428_v45  ;;  %v370_v48 = vpop.f32.mrf.mxu0  ;;  %v390_v49 = vpop.f32.mrf.mxu1 }
  0xaa   : > { %v371_v50 = vadd.f32 %v726_v23, %v370_v48  ;;  %v391_v51 = vadd.f32 %v726_v23, %v390_v49 }
  0xab   : > { %462 = vst.msk [vmem:[%s731_s28 + $0x90] sm:$0xff] %vm443_vm3, %v409_v46 }
  0xac   : > { %470 = vst.msk [vmem:[%s731_s28 + $0xd0] sm:$0xff] %vm443_vm3, %v429_v47 }
  0xad   : > { %447 = vst.msk [vmem:[%s731_s28 + $0x18] sm:$0xff] %vm443_vm3, %v371_v50 }
  0xae   : > { %455 = vst.msk [vmem:[%s731_s28 + $0x58] sm:$0xff] %vm443_vm3, %v391_v51 }
  0xb0   : > { %v410_v52 = vpop.f32.mrf.mxu2  ;;  %v430_v53 = vpop.f32.mrf.mxu3 }
  0xb1   : > { %v411_v54 = vadd.f32 %v726_v23, %v410_v52  ;;  %v431_v55 = vadd.f32 %v726_v23, %v430_v53  ;;  %v373_v56 = vpop.f32.mrf.mxu0  ;;  %v393_v57 = vpop.f32.mrf.mxu1 }
  0xb2   : > { %v374_v58 = vadd.f32 %v726_v23, %v373_v56  ;;  %v394_v59 = vadd.f32 %v726_v23, %v393_v57 }
  0xb3   : > { %463 = vst.msk [vmem:[%s731_s28 + $0x98] sm:$0xff] %vm443_vm3, %v411_v54 }
  0xb4   : > { %471 = vst.msk [vmem:[%s731_s28 + $0xd8] sm:$0xff] %vm443_vm3, %v431_v55 }
  0xb5   : > { %448 = vst.msk [vmem:[%s731_s28 + $0x20] sm:$0xff] %vm443_vm3, %v374_v58 }
  0xb6   : > { %456 = vst.msk [vmem:[%s731_s28 + $0x60] sm:$0xff] %vm443_vm3, %v394_v59 }
  0xb8   : > { %v413_v60 = vpop.f32.mrf.mxu2  ;;  %v433_v61 = vpop.f32.mrf.mxu3 }
  0xb9   : > { %v414_v62 = vadd.f32 %v726_v23, %v413_v60  ;;  %v434_v63 = vadd.f32 %v726_v23, %v433_v61  ;;  %v375_v0 = vpop.f32.mrf.mxu0  ;;  %v395_v1 = vpop.f32.mrf.mxu1 }
  0xba   : > { %v376_v2 = vadd.f32 %v726_v23, %v375_v0  ;;  %v396_v3 = vadd.f32 %v726_v23, %v395_v1 }
  0xbb   : > { %464 = vst.msk [vmem:[%s731_s28 + $0xa0] sm:$0xff] %vm443_vm3, %v414_v62 }
  0xbc   : > { %472 = vst.msk [vmem:[%s731_s28 + $0xe0] sm:$0xff] %vm443_vm3, %v434_v63 }
  0xbd   : > { %449 = vst.msk [vmem:[%s731_s28 + $0x28] sm:$0xff] %vm443_vm3, %v376_v2 }
  0xbe   : > { %457 = vst.msk [vmem:[%s731_s28 + $0x68] sm:$0xff] %vm443_vm3, %v396_v3 }
  0xc0   : > { %v415_v4 = vpop.f32.mrf.mxu2  ;;  %v435_v5 = vpop.f32.mrf.mxu3 }
  0xc1   : > { %v416_v6 = vadd.f32 %v726_v23, %v415_v4  ;;  %v436_v7 = vadd.f32 %v726_v23, %v435_v5  ;;  %v378_v8 = vpop.f32.mrf.mxu0  ;;  %v398_v9 = vpop.f32.mrf.mxu1 }
  0xc2   : > { %v379_v10 = vadd.f32 %v726_v23, %v378_v8  ;;  %v399_v11 = vadd.f32 %v726_v23, %v398_v9 }
  0xc3   : > { %465 = vst.msk [vmem:[%s731_s28 + $0xa8] sm:$0xff] %vm443_vm3, %v416_v6 }
  0xc4   : > { %473 = vst.msk [vmem:[%s731_s28 + $0xe8] sm:$0xff] %vm443_vm3, %v436_v7 }
  0xc5   : > { %450 = vst.msk [vmem:[%s731_s28 + $0x30] sm:$0xff] %vm443_vm3, %v379_v10 }
  0xc6   : > { %458 = vst.msk [vmem:[%s731_s28 + $0x70] sm:$0xff] %vm443_vm3, %v399_v11 }
  0xc8   : > { %v418_v12 = vpop.f32.mrf.mxu2  ;;  %v438_v13 = vpop.f32.mrf.mxu3 }
  0xc9   : > { %v419_v14 = vadd.f32 %v726_v23, %v418_v12  ;;  %v439_v15 = vadd.f32 %v726_v23, %v438_v13  ;;  %v380_v16 = vpop.f32.mrf.mxu0  ;;  %v400_v17 = vpop.f32.mrf.mxu1 }
  0xca   : > { %v381_v18 = vadd.f32 %v726_v23, %v380_v16  ;;  %v401_v19 = vadd.f32 %v726_v23, %v400_v17 }
  0xcb   : > { %466 = vst.msk [vmem:[%s731_s28 + $0xb0] sm:$0xff] %vm443_vm3, %v419_v14 }
  0xcc   : > { %474 = vst.msk [vmem:[%s731_s28 + $0xf0] sm:$0xff] %vm443_vm3, %v439_v15 }
  0xcd   : > { %451 = vst.msk [vmem:[%s731_s28 + $0x38] sm:$0xff] %vm443_vm3, %v381_v18 }
  0xce   : > { %459 = vst.msk [vmem:[%s731_s28 + $0x78] sm:$0xff] %vm443_vm3, %v401_v19 }
  0xd0   : > { %v420_v20 = vpop.f32.mrf.mxu2  ;;  %v440_v21 = vpop.f32.mrf.mxu3 }
  0xd1   : > { %v421_v22 = vadd.f32 %v726_v23, %v420_v20  ;;  %v441_v24 = vadd.f32 %v726_v23, %v440_v21 }
  0xd3   : > { %467 = vst.msk [vmem:[%s731_s28 + $0xb8] sm:$0xff] %vm443_vm3, %v421_v22 }
  0xd4   : > { %475 = vst.msk [vmem:[%s731_s28 + $0xf8] sm:$0xff] %vm443_vm3, %v441_v24 }
  0xd5 PF: > { %s13_s12 = sadd.s32 1, %s663_s12  }
  0xd6   : > { %p10_p4 = scmp.ge.s32.totalorder %s13_s12, 4  }
  0xd8   :  { %12 = sbr.rel (!%p10_p4) target bundleno = 1 (0x1), region = 62 }

// kernel: att_net_forward.20
= control target key start
LH: loop header
LB: loop body
LE: loop exit
PB: predicated region body
PF: predicated region fallthrough
CT: control target
= control target key end

     0   :  { %s801_s12 = smov 0   ;;  %s974_s0 = inlined_call_operand.vmem [shape: bf16[512,72], index: 0, kind: input, shape index: {}]   ;;  %s975_s1 = inlined_call_operand.vmem [shape: bf16[72,8], index: 1, kind: input, shape index: {}]   ;;  %s976_s2 = inlined_call_operand.vmem [shape: f32[1,8], index: 2, kind: input, shape index: {}]   ;;  %s977_s3 = inlined_call_operand.vmem [shape: f32[512,8], index: 3, kind: output, shape index: {}]  }
   0x1 LB: > { %s622_s13 = sadd.s32 4294967295, %s779_s12   ;;  %p626_p0 = scmp.ge.s32.totalorder %s779_s12, 1  ;;  %s779_s12 = sphi %s801_s12, %s13_s12  }
   0x2   : > { %p138_p1 = scmp.lt.s32.totalorder %s779_s12, 3 }
   0x4   : > { %p139_p2 = pnand %p626_p0, %p138_p1 }
   0x5   : > { %s627_s16 = sshll.u32 (!%p139_p2), %s622_s13, 5 }
   0x6   : > { %142 = sbr.rel (%p139_p2) target bundleno = 233 (0xe9), region = 32  ;;  %p163_p3 = scmp.lt.s32.totalorder (!%p139_p2), %s627_s16, 63 }
   0xb   : > { %v215_v0 = vld [vmem:[%s975_s1 + $0x20] sm:$0xf]  ;;  %vm376_vm0 = vcmask 1043456   ;;  %v748_v4 = vld [vmem:[%s975_s1 + $0x18] sm:$0xff]  ;;  %v747_v5 = vld [vmem:[%s975_s1 + $0x10] sm:$0xff]  ;;  %s979_s16 = smov (!%p163_p3, %s627_s16), 63 }
   0xc   : > { %v317_v1 = vunpack.c.l.b16 %v215_v0  ;;  %v746_v6 = vld [vmem:[%s975_s1 + $0x8] sm:$0xff]  ;;  %s628_s23 = sshll.u32 %s979_s16, 2  ;;  %v745_v7 = vld [vmem:[%s975_s1] sm:$0xff]  ;;  %vm327_vm1 = vcmask 588800   ;;  %s630_s4 = sshll.u32 %s979_s16, 3  ;;  %vm533_vm2 = vcmask 64512  }
   0xd   : > { %s830_s28 = scalar_lea.vmem %s974_s0, %s628_s23  ;;  %v867_v24 = vld [vmem:[%s976_s2] ss:$0 sm:$0xff]  ;;  %s875_s7 = scalar_lea.vmem %s977_s3, %s630_s4 }
   0xe   : > { %v322_v2 = vpack.c.b16 %v317_v1, %v317_v1  ;;  %v729_v8 = vld [vmem:[%s830_s28] sm:$0xff]  ;;  %v730_v12 = vld [vmem:[%s830_s28 + $0x8] sm:$0xff]  ;;  %v731_v16 = vld [vmem:[%s830_s28 + $0x10] sm:$0xff] }
   0xf   : > { %v733_v9 = vld [vmem:[%s830_s28 + $0x20] sm:$0xff]  ;;  %v734_v13 = vld [vmem:[%s830_s28 + $0x28] sm:$0xff]  ;;  %v735_v17 = vld [vmem:[%s830_s28 + $0x30] sm:$0xff] }
  0x10   : > { %v378_v3 = vsel %vm376_vm0, %v322_v2, 0  ;;  %v737_v10 = vld [vmem:[%s830_s28 + $0x40] sm:$0xff]  ;;  %v738_v14 = vld [vmem:[%s830_s28 + $0x48] sm:$0xff]  ;;  %v739_v18 = vld [vmem:[%s830_s28 + $0x50] sm:$0xff] }
  0x11   : > { %383 = vmatpush.bf16.msra.mxu0 %v378_v3  ;;  %749 = vmatpush.bf16.msra.mxu1 %v378_v3  ;;  %v741_v11 = vld [vmem:[%s830_s28 + $0x60] sm:$0xff]  ;;  %v742_v15 = vld [vmem:[%s830_s28 + $0x68] sm:$0xff]  ;;  %v743_v19 = vld [vmem:[%s830_s28 + $0x70] sm:$0xff] }
  0x12   : > { %750 = vmatpush.bf16.msra.mxu2 %v378_v3  ;;  %751 = vmatpush.bf16.msra.mxu3 %v378_v3  ;;  %v732_v20 = vld [vmem:[%s830_s28 + $0x18] sm:$0xff] }
  0x13   : > { %v736_v21 = vld [vmem:[%s830_s28 + $0x38] sm:$0xff] }
  0x14   : > { %v740_v22 = vld [vmem:[%s830_s28 + $0x58] sm:$0xff] }
  0x15   : > { %384 = vmatpush.bf16.msra.mxu0 %v748_v4  ;;  %752 = vmatpush.bf16.msra.mxu1 %v748_v4  ;;  %v744_v23 = vld [vmem:[%s830_s28 + $0x78] sm:$0xff] }
  0x16   : > { %753 = vmatpush.bf16.msra.mxu2 %v748_v4  ;;  %754 = vmatpush.bf16.msra.mxu3 %v748_v4 }
  0x19   : > { %385 = vmatpush.bf16.msra.mxu0 %v747_v5  ;;  %755 = vmatpush.bf16.msra.mxu1 %v747_v5 }
  0x1a   : > { %756 = vmatpush.bf16.msra.mxu2 %v747_v5  ;;  %757 = vmatpush.bf16.msra.mxu3 %v747_v5 }
  0x1d   : > { %386 = vmatpush.bf16.msra.mxu0 %v746_v6  ;;  %758 = vmatpush.bf16.msra.mxu1 %v746_v6 }
  0x1e   : > { %759 = vmatpush.bf16.msra.mxu2 %v746_v6  ;;  %760 = vmatpush.bf16.msra.mxu3 %v746_v6 }
  0x21   : > { %387 = vmatpush.bf16.msra.mxu0 %v745_v7  ;;  %761 = vmatpush.bf16.msra.mxu1 %v745_v7 }
  0x22   : > { %762 = vmatpush.bf16.msra.mxu2 %v745_v7  ;;  %763 = vmatpush.bf16.msra.mxu3 %v745_v7 }
  0x24   : > { %711 = vmatmul.msk.bf16.vlgmr.msra.gmra.mxu0 %vm327_vm1, %v729_v8  ;;  %715 = vmatmul.msk.bf16.vlgmr.msra.gmra.mxu1 %vm327_vm1, %v733_v9 }
  0x25   : > { %719 = vmatmul.msk.bf16.vlgmr.msra.gmra.mxu2 %vm327_vm1, %v737_v10  ;;  %723 = vmatmul.msk.bf16.vlgmr.msra.gmra.mxu3 %vm327_vm1, %v741_v11 }
  0x34   : > { %712 = vmatmul.msk.bf16.gmra.mxu0 %vm327_vm1, %v730_v12  ;;  %716 = vmatmul.msk.bf16.gmra.mxu1 %vm327_vm1, %v734_v13 }
  0x35   : > { %720 = vmatmul.msk.bf16.gmra.mxu2 %vm327_vm1, %v738_v14  ;;  %724 = vmatmul.msk.bf16.gmra.mxu3 %vm327_vm1, %v742_v15 }
  0x44   : > { %713 = vmatmul.msk.bf16.gmra.mxu0 %vm327_vm1, %v731_v16  ;;  %717 = vmatmul.msk.bf16.gmra.mxu1 %vm327_vm1, %v735_v17 }
  0x45   : > { %721 = vmatmul.msk.bf16.gmra.mxu2 %vm327_vm1, %v739_v18  ;;  %725 = vmatmul.msk.bf16.gmra.mxu3 %vm327_vm1, %v743_v19 }
  0x54   : > { %714 = vmatmul.msk.bf16.gmra.mxu0 %vm327_vm1, %v732_v20  ;;  %718 = vmatmul.msk.bf16.gmra.mxu1 %vm327_vm1, %v736_v21 }
  0x55   : > { %722 = vmatmul.msk.bf16.gmra.mxu2 %vm327_vm1, %v740_v22  ;;  %726 = vmatmul.msk.bf16.gmra.mxu3 %vm327_vm1, %v744_v23 }
  0xa1   : > { %v389_v25 = vpop.f32.mrf.mxu0  ;;  %v409_v26 = vpop.f32.mrf.mxu1 }
  0xa2   : > { %v390_v27 = vadd.f32 %v867_v24, %v389_v25  ;;  %v410_v28 = vadd.f32 %v867_v24, %v409_v26 }
  0xa4   : > { %v469_v29 = vmax.f32 %v390_v27, 0.0  ;;  %v477_v30 = vmax.f32 %v410_v28, 0.0 }
  0xa6   : > { %v501_v31 = vmin.f32 %v469_v29, 6.0  ;;  %v509_v32 = vmin.f32 %v477_v30, 6.0 }
  0xa8   : > { %534 = vst.msk [vmem:[%s875_s7] sm:$0xff] %vm533_vm2, %v501_v31  ;;  %v429_v33 = vpop.f32.mrf.mxu2  ;;  %v449_v34 = vpop.f32.mrf.mxu3 }
  0xa9   : > { %542 = vst.msk [vmem:[%s875_s7 + $0x40] sm:$0xff] %vm533_vm2, %v509_v32  ;;  %v430_v35 = vadd.f32 %v867_v24, %v429_v33  ;;  %v450_v36 = vadd.f32 %v867_v24, %v449_v34  ;;  %v391_v37 = vpop.f32.mrf.mxu0  ;;  %v411_v38 = vpop.f32.mrf.mxu1 }
  0xaa   : > { %v392_v39 = vadd.f32 %v867_v24, %v391_v37  ;;  %v412_v40 = vadd.f32 %v867_v24, %v411_v38 }
  0xab   : > { %v485_v41 = vmax.f32 %v430_v35, 0.0  ;;  %v493_v42 = vmax.f32 %v450_v36, 0.0 }
  0xac   : > { %v470_v43 = vmax.f32 %v392_v39, 0.0  ;;  %v478_v44 = vmax.f32 %v412_v40, 0.0 }
  0xad   : > { %v517_v45 = vmin.f32 %v485_v41, 6.0  ;;  %v525_v46 = vmin.f32 %v493_v42, 6.0 }
  0xae   : > { %v502_v47 = vmin.f32 %v470_v43, 6.0  ;;  %v510_v48 = vmin.f32 %v478_v44, 6.0 }
  0xaf   : > { %550 = vst.msk [vmem:[%s875_s7 + $0x80] sm:$0xff] %vm533_vm2, %v517_v45 }
  0xb0   : > { %558 = vst.msk [vmem:[%s875_s7 + $0xc0] sm:$0xff] %vm533_vm2, %v525_v46  ;;  %v431_v49 = vpop.f32.mrf.mxu2  ;;  %v451_v50 = vpop.f32.mrf.mxu3 }
  0xb1   : > { %535 = vst.msk [vmem:[%s875_s7 + $0x8] sm:$0xff] %vm533_vm2, %v502_v47  ;;  %v432_v51 = vadd.f32 %v867_v24, %v431_v49  ;;  %v452_v52 = vadd.f32 %v867_v24, %v451_v50  ;;  %v394_v53 = vpop.f32.mrf.mxu0  ;;  %v414_v54 = vpop.f32.mrf.mxu1 }
  0xb2   : > { %543 = vst.msk [vmem:[%s875_s7 + $0x48] sm:$0xff] %vm533_vm2, %v510_v48  ;;  %v395_v55 = vadd.f32 %v867_v24, %v394_v53  ;;  %v415_v56 = vadd.f32 %v867_v24, %v414_v54 }
  0xb3   : > { %v486_v57 = vmax.f32 %v432_v51, 0.0  ;;  %v494_v58 = vmax.f32 %v452_v52, 0.0 }
  0xb4   : > { %v471_v59 = vmax.f32 %v395_v55, 0.0  ;;  %v479_v60 = vmax.f32 %v415_v56, 0.0 }
  0xb5   : > { %v518_v61 = vmin.f32 %v486_v57, 6.0  ;;  %v526_v62 = vmin.f32 %v494_v58, 6.0 }
  0xb6   : > { %v503_v63 = vmin.f32 %v471_v59, 6.0  ;;  %v511_v0 = vmin.f32 %v479_v60, 6.0 }
  0xb7   : > { %551 = vst.msk [vmem:[%s875_s7 + $0x88] sm:$0xff] %vm533_vm2, %v518_v61 }
  0xb8   : > { %559 = vst.msk [vmem:[%s875_s7 + $0xc8] sm:$0xff] %vm533_vm2, %v526_v62  ;;  %v434_v1 = vpop.f32.mrf.mxu2  ;;  %v454_v2 = vpop.f32.mrf.mxu3 }
  0xb9   : > { %536 = vst.msk [vmem:[%s875_s7 + $0x10] sm:$0xff] %vm533_vm2, %v503_v63  ;;  %v435_v3 = vadd.f32 %v867_v24, %v434_v1  ;;  %v455_v4 = vadd.f32 %v867_v24, %v454_v2  ;;  %v396_v5 = vpop.f32.mrf.mxu0  ;;  %v416_v6 = vpop.f32.mrf.mxu1 }
  0xba   : > { %544 = vst.msk [vmem:[%s875_s7 + $0x50] sm:$0xff] %vm533_vm2, %v511_v0  ;;  %v397_v7 = vadd.f32 %v867_v24, %v396_v5  ;;  %v417_v8 = vadd.f32 %v867_v24, %v416_v6 }
  0xbb   : > { %v487_v9 = vmax.f32 %v435_v3, 0.0  ;;  %v495_v10 = vmax.f32 %v455_v4, 0.0 }
  0xbc   : > { %v472_v11 = vmax.f32 %v397_v7, 0.0  ;;  %v480_v12 = vmax.f32 %v417_v8, 0.0 }
  0xbd   : > { %v519_v13 = vmin.f32 %v487_v9, 6.0  ;;  %v527_v14 = vmin.f32 %v495_v10, 6.0 }
  0xbe   : > { %v504_v15 = vmin.f32 %v472_v11, 6.0  ;;  %v512_v16 = vmin.f32 %v480_v12, 6.0 }
  0xbf   : > { %552 = vst.msk [vmem:[%s875_s7 + $0x90] sm:$0xff] %vm533_vm2, %v519_v13 }
  0xc0   : > { %560 = vst.msk [vmem:[%s875_s7 + $0xd0] sm:$0xff] %vm533_vm2, %v527_v14  ;;  %v436_v17 = vpop.f32.mrf.mxu2  ;;  %v456_v18 = vpop.f32.mrf.mxu3 }
  0xc1   : > { %537 = vst.msk [vmem:[%s875_s7 + $0x18] sm:$0xff] %vm533_vm2, %v504_v15  ;;  %v437_v19 = vadd.f32 %v867_v24, %v436_v17  ;;  %v457_v20 = vadd.f32 %v867_v24, %v456_v18  ;;  %v399_v21 = vpop.f32.mrf.mxu0  ;;  %v419_v22 = vpop.f32.mrf.mxu1 }
  0xc2   : > { %545 = vst.msk [vmem:[%s875_s7 + $0x58] sm:$0xff] %vm533_vm2, %v512_v16  ;;  %v400_v23 = vadd.f32 %v867_v24, %v399_v21  ;;  %v420_v25 = vadd.f32 %v867_v24, %v419_v22 }
  0xc3   : > { %v488_v26 = vmax.f32 %v437_v19, 0.0  ;;  %v496_v27 = vmax.f32 %v457_v20, 0.0 }
  0xc4   : > { %v473_v28 = vmax.f32 %v400_v23, 0.0  ;;  %v481_v29 = vmax.f32 %v420_v25, 0.0 }
  0xc5   : > { %v520_v30 = vmin.f32 %v488_v26, 6.0  ;;  %v528_v31 = vmin.f32 %v496_v27, 6.0 }
  0xc6   : > { %v505_v32 = vmin.f32 %v473_v28, 6.0  ;;  %v513_v33 = vmin.f32 %v481_v29, 6.0 }
  0xc7   : > { %553 = vst.msk [vmem:[%s875_s7 + $0x98] sm:$0xff] %vm533_vm2, %v520_v30 }
  0xc8   : > { %561 = vst.msk [vmem:[%s875_s7 + $0xd8] sm:$0xff] %vm533_vm2, %v528_v31  ;;  %v439_v34 = vpop.f32.mrf.mxu2  ;;  %v459_v35 = vpop.f32.mrf.mxu3 }
  0xc9   : > { %538 = vst.msk [vmem:[%s875_s7 + $0x20] sm:$0xff] %vm533_vm2, %v505_v32  ;;  %v440_v36 = vadd.f32 %v867_v24, %v439_v34  ;;  %v460_v37 = vadd.f32 %v867_v24, %v459_v35  ;;  %v401_v38 = vpop.f32.mrf.mxu0  ;;  %v421_v39 = vpop.f32.mrf.mxu1 }
  0xca   : > { %546 = vst.msk [vmem:[%s875_s7 + $0x60] sm:$0xff] %vm533_vm2, %v513_v33  ;;  %v402_v40 = vadd.f32 %v867_v24, %v401_v38  ;;  %v422_v41 = vadd.f32 %v867_v24, %v421_v39 }
  0xcb   : > { %v489_v42 = vmax.f32 %v440_v36, 0.0  ;;  %v497_v43 = vmax.f32 %v460_v37, 0.0 }
  0xcc   : > { %v474_v44 = vmax.f32 %v402_v40, 0.0  ;;  %v482_v45 = vmax.f32 %v422_v41, 0.0 }
  0xcd   : > { %v521_v46 = vmin.f32 %v489_v42, 6.0  ;;  %v529_v47 = vmin.f32 %v497_v43, 6.0 }
  0xce   : > { %v506_v48 = vmin.f32 %v474_v44, 6.0  ;;  %v514_v49 = vmin.f32 %v482_v45, 6.0 }
  0xcf   : > { %554 = vst.msk [vmem:[%s875_s7 + $0xa0] sm:$0xff] %vm533_vm2, %v521_v46 }
  0xd0   : > { %562 = vst.msk [vmem:[%s875_s7 + $0xe0] sm:$0xff] %vm533_vm2, %v529_v47  ;;  %v441_v50 = vpop.f32.mrf.mxu2  ;;  %v461_v51 = vpop.f32.mrf.mxu3 }
  0xd1   : > { %539 = vst.msk [vmem:[%s875_s7 + $0x28] sm:$0xff] %vm533_vm2, %v506_v48  ;;  %v442_v52 = vadd.f32 %v867_v24, %v441_v50  ;;  %v462_v53 = vadd.f32 %v867_v24, %v461_v51  ;;  %v404_v54 = vpop.f32.mrf.mxu0  ;;  %v424_v55 = vpop.f32.mrf.mxu1 }
  0xd2   : > { %547 = vst.msk [vmem:[%s875_s7 + $0x68] sm:$0xff] %vm533_vm2, %v514_v49  ;;  %v405_v56 = vadd.f32 %v867_v24, %v404_v54  ;;  %v425_v57 = vadd.f32 %v867_v24, %v424_v55 }
  0xd3   : > { %v490_v58 = vmax.f32 %v442_v52, 0.0  ;;  %v498_v59 = vmax.f32 %v462_v53, 0.0 }
  0xd4   : > { %v475_v60 = vmax.f32 %v405_v56, 0.0  ;;  %v483_v61 = vmax.f32 %v425_v57, 0.0 }
  0xd5   : > { %v522_v62 = vmin.f32 %v490_v58, 6.0  ;;  %v530_v63 = vmin.f32 %v498_v59, 6.0 }
  0xd6   : > { %v507_v0 = vmin.f32 %v475_v60, 6.0  ;;  %v515_v1 = vmin.f32 %v483_v61, 6.0 }
  0xd7   : > { %555 = vst.msk [vmem:[%s875_s7 + $0xa8] sm:$0xff] %vm533_vm2, %v522_v62 }
  0xd8   : > { %563 = vst.msk [vmem:[%s875_s7 + $0xe8] sm:$0xff] %vm533_vm2, %v530_v63  ;;  %v444_v2 = vpop.f32.mrf.mxu2  ;;  %v464_v3 = vpop.f32.mrf.mxu3 }
  0xd9   : > { %540 = vst.msk [vmem:[%s875_s7 + $0x30] sm:$0xff] %vm533_vm2, %v507_v0  ;;  %v445_v4 = vadd.f32 %v867_v24, %v444_v2  ;;  %v465_v5 = vadd.f32 %v867_v24, %v464_v3  ;;  %v406_v6 = vpop.f32.mrf.mxu0  ;;  %v426_v7 = vpop.f32.mrf.mxu1 }
  0xda   : > { %548 = vst.msk [vmem:[%s875_s7 + $0x70] sm:$0xff] %vm533_vm2, %v515_v1  ;;  %v407_v8 = vadd.f32 %v867_v24, %v406_v6  ;;  %v427_v9 = vadd.f32 %v867_v24, %v426_v7 }
  0xdb   : > { %v491_v10 = vmax.f32 %v445_v4, 0.0  ;;  %v499_v11 = vmax.f32 %v465_v5, 0.0 }
  0xdc   : > { %v476_v12 = vmax.f32 %v407_v8, 0.0  ;;  %v484_v13 = vmax.f32 %v427_v9, 0.0 }
  0xdd   : > { %v523_v14 = vmin.f32 %v491_v10, 6.0  ;;  %v531_v15 = vmin.f32 %v499_v11, 6.0 }
  0xde   : > { %v508_v16 = vmin.f32 %v476_v12, 6.0  ;;  %v516_v17 = vmin.f32 %v484_v13, 6.0 }
  0xdf   : > { %556 = vst.msk [vmem:[%s875_s7 + $0xb0] sm:$0xff] %vm533_vm2, %v523_v14 }
  0xe0   : > { %564 = vst.msk [vmem:[%s875_s7 + $0xf0] sm:$0xff] %vm533_vm2, %v531_v15  ;;  %v446_v18 = vpop.f32.mrf.mxu2  ;;  %v466_v19 = vpop.f32.mrf.mxu3 }
  0xe1   : > { %541 = vst.msk [vmem:[%s875_s7 + $0x38] sm:$0xff] %vm533_vm2, %v508_v16  ;;  %v447_v20 = vadd.f32 %v867_v24, %v446_v18  ;;  %v467_v21 = vadd.f32 %v867_v24, %v466_v19 }
  0xe2   : > { %549 = vst.msk [vmem:[%s875_s7 + $0x78] sm:$0xff] %vm533_vm2, %v516_v17 }
  0xe3   : > { %v492_v22 = vmax.f32 %v447_v20, 0.0  ;;  %v500_v23 = vmax.f32 %v467_v21, 0.0 }
  0xe5   : > { %v524_v25 = vmin.f32 %v492_v22, 6.0  ;;  %v532_v26 = vmin.f32 %v500_v23, 6.0 }
  0xe7   : > { %557 = vst.msk [vmem:[%s875_s7 + $0xb8] sm:$0xff] %vm533_vm2, %v524_v25 }
  0xe8   : > { %565 = vst.msk [vmem:[%s875_s7 + $0xf8] sm:$0xff] %vm533_vm2, %v532_v26 }
  0xe9 PF: > { %s13_s12 = sadd.s32 1, %s779_s12  }
  0xea   : > { %p10_p4 = scmp.ge.s32.totalorder %s13_s12, 4  }
  0xec   :  { %12 = sbr.rel (!%p10_p4) target bundleno = 1 (0x1), region = 62 }

// kernel: att_net_forward.21
= control target key start
LH: loop header
LB: loop body
LE: loop exit
PB: predicated region body
PF: predicated region fallthrough
CT: control target
= control target key end

     0   :  { %s737_s12 = smov 0   ;;  %s910_s0 = inlined_call_operand.vmem [shape: bf16[512,72], index: 0, kind: input, shape index: {}]   ;;  %s911_s1 = inlined_call_operand.vmem [shape: bf16[72,8], index: 1, kind: input, shape index: {}]   ;;  %s912_s2 = inlined_call_operand.vmem [shape: f32[1,8], index: 2, kind: input, shape index: {}]   ;;  %s913_s3 = inlined_call_operand.vmem [shape: f32[512,8], index: 3, kind: output, shape index: {}]  }
   0x1 LB: > { %s558_s13 = sadd.s32 4294967295, %s715_s12   ;;  %p562_p0 = scmp.ge.s32.totalorder %s715_s12, 1  ;;  %s715_s12 = sphi %s737_s12, %s13_s12  }
   0x2   : > { %p138_p1 = scmp.lt.s32.totalorder %s715_s12, 3 }
   0x4   : > { %p139_p2 = pnand %p562_p0, %p138_p1 }
   0x5   : > { %s563_s16 = sshll.u32 (!%p139_p2), %s558_s13, 5 }
   0x6   : > { %142 = sbr.rel (%p139_p2) target bundleno = 229 (0xe5), region = 32  ;;  %p163_p3 = scmp.lt.s32.totalorder (!%p139_p2), %s563_s16, 63 }
   0xb   : > { %v215_v0 = vld [vmem:[%s911_s1 + $0x20] sm:$0xf]  ;;  %vm376_vm0 = vcmask 1043456   ;;  %v684_v4 = vld [vmem:[%s911_s1 + $0x18] sm:$0xff]  ;;  %v683_v5 = vld [vmem:[%s911_s1 + $0x10] sm:$0xff]  ;;  %s915_s16 = smov (!%p163_p3, %s563_s16), 63 }
   0xc   : > { %v317_v1 = vunpack.c.l.b16 %v215_v0  ;;  %v682_v6 = vld [vmem:[%s911_s1 + $0x8] sm:$0xff]  ;;  %s564_s23 = sshll.u32 %s915_s16, 2  ;;  %v681_v7 = vld [vmem:[%s911_s1] sm:$0xff]  ;;  %vm327_vm1 = vcmask 588800   ;;  %s566_s29 = sshll.u32 %s915_s16, 3  ;;  %vm469_vm2 = vcmask 64512  }
   0xd   : > { %s766_s28 = scalar_lea.vmem %s910_s0, %s564_s23  ;;  %v804_v24 = vld [vmem:[%s912_s2] ss:$0 sm:$0xff]  ;;  %s809_s7 = scalar_lea.vmem %s913_s3, %s566_s29 }
   0xe   : > { %v322_v2 = vpack.c.b16 %v317_v1, %v317_v1  ;;  %v665_v8 = vld [vmem:[%s766_s28] sm:$0xff]  ;;  %v666_v12 = vld [vmem:[%s766_s28 + $0x8] sm:$0xff]  ;;  %v667_v16 = vld [vmem:[%s766_s28 + $0x10] sm:$0xff] }
   0xf   : > { %v669_v9 = vld [vmem:[%s766_s28 + $0x20] sm:$0xff]  ;;  %v670_v13 = vld [vmem:[%s766_s28 + $0x28] sm:$0xff]  ;;  %v671_v17 = vld [vmem:[%s766_s28 + $0x30] sm:$0xff] }
  0x10   : > { %v378_v3 = vsel %vm376_vm0, %v322_v2, 0  ;;  %v673_v10 = vld [vmem:[%s766_s28 + $0x40] sm:$0xff]  ;;  %v674_v14 = vld [vmem:[%s766_s28 + $0x48] sm:$0xff]  ;;  %v675_v18 = vld [vmem:[%s766_s28 + $0x50] sm:$0xff] }
  0x11   : > { %383 = vmatpush.bf16.msra.mxu0 %v378_v3  ;;  %685 = vmatpush.bf16.msra.mxu1 %v378_v3  ;;  %v677_v11 = vld [vmem:[%s766_s28 + $0x60] sm:$0xff]  ;;  %v678_v15 = vld [vmem:[%s766_s28 + $0x68] sm:$0xff]  ;;  %v679_v19 = vld [vmem:[%s766_s28 + $0x70] sm:$0xff] }
  0x12   : > { %686 = vmatpush.bf16.msra.mxu2 %v378_v3  ;;  %687 = vmatpush.bf16.msra.mxu3 %v378_v3  ;;  %v668_v20 = vld [vmem:[%s766_s28 + $0x18] sm:$0xff] }
  0x13   : > { %v672_v21 = vld [vmem:[%s766_s28 + $0x38] sm:$0xff] }
  0x14   : > { %v676_v22 = vld [vmem:[%s766_s28 + $0x58] sm:$0xff] }
  0x15   : > { %384 = vmatpush.bf16.msra.mxu0 %v684_v4  ;;  %688 = vmatpush.bf16.msra.mxu1 %v684_v4  ;;  %v680_v23 = vld [vmem:[%s766_s28 + $0x78] sm:$0xff] }
  0x16   : > { %689 = vmatpush.bf16.msra.mxu2 %v684_v4  ;;  %690 = vmatpush.bf16.msra.mxu3 %v684_v4 }
  0x19   : > { %385 = vmatpush.bf16.msra.mxu0 %v683_v5  ;;  %691 = vmatpush.bf16.msra.mxu1 %v683_v5 }
  0x1a   : > { %692 = vmatpush.bf16.msra.mxu2 %v683_v5  ;;  %693 = vmatpush.bf16.msra.mxu3 %v683_v5 }
  0x1d   : > { %386 = vmatpush.bf16.msra.mxu0 %v682_v6  ;;  %694 = vmatpush.bf16.msra.mxu1 %v682_v6 }
  0x1e   : > { %695 = vmatpush.bf16.msra.mxu2 %v682_v6  ;;  %696 = vmatpush.bf16.msra.mxu3 %v682_v6 }
  0x21   : > { %387 = vmatpush.bf16.msra.mxu0 %v681_v7  ;;  %697 = vmatpush.bf16.msra.mxu1 %v681_v7 }
  0x22   : > { %698 = vmatpush.bf16.msra.mxu2 %v681_v7  ;;  %699 = vmatpush.bf16.msra.mxu3 %v681_v7 }
  0x24   : > { %647 = vmatmul.msk.bf16.vlgmr.msra.gmra.mxu0 %vm327_vm1, %v665_v8  ;;  %651 = vmatmul.msk.bf16.vlgmr.msra.gmra.mxu1 %vm327_vm1, %v669_v9 }
  0x25   : > { %655 = vmatmul.msk.bf16.vlgmr.msra.gmra.mxu2 %vm327_vm1, %v673_v10  ;;  %659 = vmatmul.msk.bf16.vlgmr.msra.gmra.mxu3 %vm327_vm1, %v677_v11 }
  0x34   : > { %648 = vmatmul.msk.bf16.gmra.mxu0 %vm327_vm1, %v666_v12  ;;  %652 = vmatmul.msk.bf16.gmra.mxu1 %vm327_vm1, %v670_v13 }
  0x35   : > { %656 = vmatmul.msk.bf16.gmra.mxu2 %vm327_vm1, %v674_v14  ;;  %660 = vmatmul.msk.bf16.gmra.mxu3 %vm327_vm1, %v678_v15 }
  0x44   : > { %649 = vmatmul.msk.bf16.gmra.mxu0 %vm327_vm1, %v667_v16  ;;  %653 = vmatmul.msk.bf16.gmra.mxu1 %vm327_vm1, %v671_v17 }
  0x45   : > { %657 = vmatmul.msk.bf16.gmra.mxu2 %vm327_vm1, %v675_v18  ;;  %661 = vmatmul.msk.bf16.gmra.mxu3 %vm327_vm1, %v679_v19 }
  0x54   : > { %650 = vmatmul.msk.bf16.gmra.mxu0 %vm327_vm1, %v668_v20  ;;  %654 = vmatmul.msk.bf16.gmra.mxu1 %vm327_vm1, %v672_v21 }
  0x55   : > { %658 = vmatmul.msk.bf16.gmra.mxu2 %vm327_vm1, %v676_v22  ;;  %662 = vmatmul.msk.bf16.gmra.mxu3 %vm327_vm1, %v680_v23 }
  0xa1   : > { %v389_v25 = vpop.f32.mrf.mxu0  ;;  %v409_v26 = vpop.f32.mrf.mxu1 }
  0xa2   : > { %v390_v27 = vadd.f32 %v804_v24, %v389_v25  ;;  %v410_v28 = vadd.f32 %v804_v24, %v409_v26 }
  0xa4   : > { %470 = vst.msk [vmem:[%s809_s7] sm:$0xff] %vm469_vm2, %v390_v27 }
  0xa5   : > { %478 = vst.msk [vmem:[%s809_s7 + $0x40] sm:$0xff] %vm469_vm2, %v410_v28 }
  0xa8   : > { %v429_v29 = vpop.f32.mrf.mxu2  ;;  %v449_v30 = vpop.f32.mrf.mxu3 }
  0xa9   : > { %v430_v31 = vadd.f32 %v804_v24, %v429_v29  ;;  %v450_v32 = vadd.f32 %v804_v24, %v449_v30  ;;  %v391_v33 = vpop.f32.mrf.mxu0  ;;  %v411_v34 = vpop.f32.mrf.mxu1 }
  0xaa   : > { %v392_v35 = vadd.f32 %v804_v24, %v391_v33  ;;  %v412_v36 = vadd.f32 %v804_v24, %v411_v34 }
  0xab   : > { %486 = vst.msk [vmem:[%s809_s7 + $0x80] sm:$0xff] %vm469_vm2, %v430_v31 }
  0xac   : > { %494 = vst.msk [vmem:[%s809_s7 + $0xc0] sm:$0xff] %vm469_vm2, %v450_v32 }
  0xad   : > { %471 = vst.msk [vmem:[%s809_s7 + $0x8] sm:$0xff] %vm469_vm2, %v392_v35 }
  0xae   : > { %479 = vst.msk [vmem:[%s809_s7 + $0x48] sm:$0xff] %vm469_vm2, %v412_v36 }
  0xb0   : > { %v431_v37 = vpop.f32.mrf.mxu2  ;;  %v451_v38 = vpop.f32.mrf.mxu3 }
  0xb1   : > { %v432_v39 = vadd.f32 %v804_v24, %v431_v37  ;;  %v452_v40 = vadd.f32 %v804_v24, %v451_v38  ;;  %v394_v41 = vpop.f32.mrf.mxu0  ;;  %v414_v42 = vpop.f32.mrf.mxu1 }
  0xb2   : > { %v395_v43 = vadd.f32 %v804_v24, %v394_v41  ;;  %v415_v44 = vadd.f32 %v804_v24, %v414_v42 }
  0xb3   : > { %487 = vst.msk [vmem:[%s809_s7 + $0x88] sm:$0xff] %vm469_vm2, %v432_v39 }
  0xb4   : > { %495 = vst.msk [vmem:[%s809_s7 + $0xc8] sm:$0xff] %vm469_vm2, %v452_v40 }
  0xb5   : > { %472 = vst.msk [vmem:[%s809_s7 + $0x10] sm:$0xff] %vm469_vm2, %v395_v43 }
  0xb6   : > { %480 = vst.msk [vmem:[%s809_s7 + $0x50] sm:$0xff] %vm469_vm2, %v415_v44 }
  0xb8   : > { %v434_v45 = vpop.f32.mrf.mxu2  ;;  %v454_v46 = vpop.f32.mrf.mxu3 }
  0xb9   : > { %v435_v47 = vadd.f32 %v804_v24, %v434_v45  ;;  %v455_v48 = vadd.f32 %v804_v24, %v454_v46  ;;  %v396_v49 = vpop.f32.mrf.mxu0  ;;  %v416_v50 = vpop.f32.mrf.mxu1 }
  0xba   : > { %v397_v51 = vadd.f32 %v804_v24, %v396_v49  ;;  %v417_v52 = vadd.f32 %v804_v24, %v416_v50 }
  0xbb   : > { %488 = vst.msk [vmem:[%s809_s7 + $0x90] sm:$0xff] %vm469_vm2, %v435_v47 }
  0xbc   : > { %496 = vst.msk [vmem:[%s809_s7 + $0xd0] sm:$0xff] %vm469_vm2, %v455_v48 }
  0xbd   : > { %473 = vst.msk [vmem:[%s809_s7 + $0x18] sm:$0xff] %vm469_vm2, %v397_v51 }
  0xbe   : > { %481 = vst.msk [vmem:[%s809_s7 + $0x58] sm:$0xff] %vm469_vm2, %v417_v52 }
  0xc0   : > { %v436_v53 = vpop.f32.mrf.mxu2  ;;  %v456_v54 = vpop.f32.mrf.mxu3 }
  0xc1   : > { %v437_v55 = vadd.f32 %v804_v24, %v436_v53  ;;  %v457_v56 = vadd.f32 %v804_v24, %v456_v54  ;;  %v399_v57 = vpop.f32.mrf.mxu0  ;;  %v419_v58 = vpop.f32.mrf.mxu1 }
  0xc2   : > { %v400_v59 = vadd.f32 %v804_v24, %v399_v57  ;;  %v420_v60 = vadd.f32 %v804_v24, %v419_v58 }
  0xc3   : > { %489 = vst.msk [vmem:[%s809_s7 + $0x98] sm:$0xff] %vm469_vm2, %v437_v55 }
  0xc4   : > { %497 = vst.msk [vmem:[%s809_s7 + $0xd8] sm:$0xff] %vm469_vm2, %v457_v56 }
  0xc5   : > { %474 = vst.msk [vmem:[%s809_s7 + $0x20] sm:$0xff] %vm469_vm2, %v400_v59 }
  0xc6   : > { %482 = vst.msk [vmem:[%s809_s7 + $0x60] sm:$0xff] %vm469_vm2, %v420_v60 }
  0xc8   : > { %v439_v61 = vpop.f32.mrf.mxu2  ;;  %v459_v62 = vpop.f32.mrf.mxu3 }
  0xc9   : > { %v440_v63 = vadd.f32 %v804_v24, %v439_v61  ;;  %v460_v0 = vadd.f32 %v804_v24, %v459_v62  ;;  %v401_v1 = vpop.f32.mrf.mxu0  ;;  %v421_v2 = vpop.f32.mrf.mxu1 }
  0xca   : > { %v402_v3 = vadd.f32 %v804_v24, %v401_v1  ;;  %v422_v4 = vadd.f32 %v804_v24, %v421_v2 }
  0xcb   : > { %490 = vst.msk [vmem:[%s809_s7 + $0xa0] sm:$0xff] %vm469_vm2, %v440_v63 }
  0xcc   : > { %498 = vst.msk [vmem:[%s809_s7 + $0xe0] sm:$0xff] %vm469_vm2, %v460_v0 }
  0xcd   : > { %475 = vst.msk [vmem:[%s809_s7 + $0x28] sm:$0xff] %vm469_vm2, %v402_v3 }
  0xce   : > { %483 = vst.msk [vmem:[%s809_s7 + $0x68] sm:$0xff] %vm469_vm2, %v422_v4 }
  0xd0   : > { %v441_v5 = vpop.f32.mrf.mxu2  ;;  %v461_v6 = vpop.f32.mrf.mxu3 }
  0xd1   : > { %v442_v7 = vadd.f32 %v804_v24, %v441_v5  ;;  %v462_v8 = vadd.f32 %v804_v24, %v461_v6  ;;  %v404_v9 = vpop.f32.mrf.mxu0  ;;  %v424_v10 = vpop.f32.mrf.mxu1 }
  0xd2   : > { %v405_v11 = vadd.f32 %v804_v24, %v404_v9  ;;  %v425_v12 = vadd.f32 %v804_v24, %v424_v10 }
  0xd3   : > { %491 = vst.msk [vmem:[%s809_s7 + $0xa8] sm:$0xff] %vm469_vm2, %v442_v7 }
  0xd4   : > { %499 = vst.msk [vmem:[%s809_s7 + $0xe8] sm:$0xff] %vm469_vm2, %v462_v8 }
  0xd5   : > { %476 = vst.msk [vmem:[%s809_s7 + $0x30] sm:$0xff] %vm469_vm2, %v405_v11 }
  0xd6   : > { %484 = vst.msk [vmem:[%s809_s7 + $0x70] sm:$0xff] %vm469_vm2, %v425_v12 }
  0xd8   : > { %v444_v13 = vpop.f32.mrf.mxu2  ;;  %v464_v14 = vpop.f32.mrf.mxu3 }
  0xd9   : > { %v445_v15 = vadd.f32 %v804_v24, %v444_v13  ;;  %v465_v16 = vadd.f32 %v804_v24, %v464_v14  ;;  %v406_v17 = vpop.f32.mrf.mxu0  ;;  %v426_v18 = vpop.f32.mrf.mxu1 }
  0xda   : > { %v407_v19 = vadd.f32 %v804_v24, %v406_v17  ;;  %v427_v20 = vadd.f32 %v804_v24, %v426_v18 }
  0xdb   : > { %492 = vst.msk [vmem:[%s809_s7 + $0xb0] sm:$0xff] %vm469_vm2, %v445_v15 }
  0xdc   : > { %500 = vst.msk [vmem:[%s809_s7 + $0xf0] sm:$0xff] %vm469_vm2, %v465_v16 }
  0xdd   : > { %477 = vst.msk [vmem:[%s809_s7 + $0x38] sm:$0xff] %vm469_vm2, %v407_v19 }
  0xde   : > { %485 = vst.msk [vmem:[%s809_s7 + $0x78] sm:$0xff] %vm469_vm2, %v427_v20 }
  0xe0   : > { %v446_v21 = vpop.f32.mrf.mxu2  ;;  %v466_v22 = vpop.f32.mrf.mxu3 }
  0xe1   : > { %v447_v23 = vadd.f32 %v804_v24, %v446_v21  ;;  %v467_v25 = vadd.f32 %v804_v24, %v466_v22 }
  0xe3   : > { %493 = vst.msk [vmem:[%s809_s7 + $0xb8] sm:$0xff] %vm469_vm2, %v447_v23 }
  0xe4   : > { %501 = vst.msk [vmem:[%s809_s7 + $0xf8] sm:$0xff] %vm469_vm2, %v467_v25 }
  0xe5 PF: > { %s13_s12 = sadd.s32 1, %s715_s12  }
  0xe6   : > { %p10_p4 = scmp.ge.s32.totalorder %s13_s12, 4  }
  0xe8   :  { %12 = sbr.rel (!%p10_p4) target bundleno = 1 (0x1), region = 62 }

// kernel: att_net_forward.22
= control target key start
LH: loop header
LB: loop body
LE: loop exit
PB: predicated region body
PF: predicated region fallthrough
CT: control target
= control target key end

     0   :  { %s933_s15 = smov 0   ;;  %s1143_s0 = inlined_call_operand.vmem [shape: bf16[512,72], index: 0, kind: input, shape index: {}]   ;;  %s1144_s1 = inlined_call_operand.vmem [shape: bf16[72,8], index: 1, kind: input, shape index: {}]   ;;  %s1145_s2 = inlined_call_operand.vmem [shape: f32[1,8], index: 2, kind: input, shape index: {}]   ;;  %s1146_s3 = inlined_call_operand.vmem [shape: f32[512,8], index: 3, kind: input, shape index: {}]   ;;  %s1147_s4 = inlined_call_operand.vmem [shape: f32[512,8], index: 4, kind: output, shape index: {}]  }
   0x1 LB: > { %s747_s16 = sadd.s32 4294967295, %s906_s15   ;;  %p751_p0 = scmp.ge.s32.totalorder %s906_s15, 1  ;;  %s906_s15 = sphi %s933_s15, %s14_s15  }
   0x2   : > { %p174_p1 = scmp.lt.s32.totalorder %s906_s15, 3 }
   0x4   : > { %p175_p2 = pnand %p751_p0, %p174_p1 }
   0x5   : > { %s752_s19 = sshll.u32 (!%p175_p2), %s747_s16, 5 }
   0x6   : > { %178 = sbr.rel (%p175_p2) target bundleno = 235 (0xeb), region = 36  ;;  %p206_p3 = scmp.lt.s32.totalorder (!%p175_p2), %s752_s19, 63 }
   0xb   : > { %v264_v0 = vld [vmem:[%s1144_s1 + $0x20] sm:$0xf]  ;;  %vm425_vm0 = vcmask 1043456   ;;  %v875_v4 = vld [vmem:[%s1144_s1 + $0x18] sm:$0xff]  ;;  %v874_v5 = vld [vmem:[%s1144_s1 + $0x10] sm:$0xff]  ;;  %s1149_s19 = smov (!%p206_p3, %s752_s19), 63 }
   0xc   : > { %v366_v1 = vunpack.c.l.b16 %v264_v0  ;;  %v873_v6 = vld [vmem:[%s1144_s1 + $0x8] sm:$0xff]  ;;  %s753_s26 = sshll.u32 %s1149_s19, 2  ;;  %v872_v7 = vld [vmem:[%s1144_s1] sm:$0xff]  ;;  %vm376_vm1 = vcmask 588800   ;;  %s755_s8 = sshll.u32 %s1149_s19, 3  ;;  %vm646_vm2 = vcmask 64512  }
   0xd   : > { %s962_s5 = scalar_lea.vmem %s1143_s0, %s753_s26  ;;  %v999_v24 = vld [vmem:[%s1145_s2] ss:$0 sm:$0xff]  ;;  %s1005_s11 = scalar_lea.vmem %s1146_s3, %s755_s8 }
   0xe   : > { %v371_v2 = vpack.c.b16 %v366_v1, %v366_v1  ;;  %v856_v8 = vld [vmem:[%s962_s5] sm:$0xff]  ;;  %v857_v12 = vld [vmem:[%s962_s5 + $0x8] sm:$0xff]  ;;  %v858_v16 = vld [vmem:[%s962_s5 + $0x10] sm:$0xff]  ;;  %s1014_s14 = scalar_lea.vmem %s1147_s4, %s755_s8 }
   0xf   : > { %v860_v9 = vld [vmem:[%s962_s5 + $0x20] sm:$0xff]  ;;  %v861_v13 = vld [vmem:[%s962_s5 + $0x28] sm:$0xff]  ;;  %v862_v17 = vld [vmem:[%s962_s5 + $0x30] sm:$0xff] }
  0x10   : > { %v427_v3 = vsel %vm425_vm0, %v371_v2, 0  ;;  %v864_v10 = vld [vmem:[%s962_s5 + $0x40] sm:$0xff]  ;;  %v865_v14 = vld [vmem:[%s962_s5 + $0x48] sm:$0xff]  ;;  %v866_v18 = vld [vmem:[%s962_s5 + $0x50] sm:$0xff] }
  0x11   : > { %432 = vmatpush.bf16.msra.mxu0 %v427_v3  ;;  %876 = vmatpush.bf16.msra.mxu1 %v427_v3  ;;  %v868_v11 = vld [vmem:[%s962_s5 + $0x60] sm:$0xff]  ;;  %v869_v15 = vld [vmem:[%s962_s5 + $0x68] sm:$0xff]  ;;  %v870_v19 = vld [vmem:[%s962_s5 + $0x70] sm:$0xff] }
  0x12   : > { %877 = vmatpush.bf16.msra.mxu2 %v427_v3  ;;  %878 = vmatpush.bf16.msra.mxu3 %v427_v3  ;;  %v859_v20 = vld [vmem:[%s962_s5 + $0x18] sm:$0xff]  ;;  %v582_v31 = vld [vmem:[%s1005_s11] sm:$0xff]  ;;  %v583_v53 = vld [vmem:[%s1005_s11 + $0x8] sm:$0xff] }
  0x13   : > { %v863_v21 = vld [vmem:[%s962_s5 + $0x38] sm:$0xff]  ;;  %v590_v32 = vld [vmem:[%s1005_s11 + $0x40] sm:$0xff]  ;;  %v591_v54 = vld [vmem:[%s1005_s11 + $0x48] sm:$0xff] }
  0x14   : > { %v867_v22 = vld [vmem:[%s962_s5 + $0x58] sm:$0xff]  ;;  %v598_v47 = vld [vmem:[%s1005_s11 + $0x80] sm:$0xff] }
  0x15   : > { %433 = vmatpush.bf16.msra.mxu0 %v875_v4  ;;  %879 = vmatpush.bf16.msra.mxu1 %v875_v4  ;;  %v871_v23 = vld [vmem:[%s962_s5 + $0x78] sm:$0xff]  ;;  %v606_v48 = vld [vmem:[%s1005_s11 + $0xc0] sm:$0xff] }
  0x16   : > { %880 = vmatpush.bf16.msra.mxu2 %v875_v4  ;;  %881 = vmatpush.bf16.msra.mxu3 %v875_v4 }
  0x19   : > { %434 = vmatpush.bf16.msra.mxu0 %v874_v5  ;;  %882 = vmatpush.bf16.msra.mxu1 %v874_v5 }
  0x1a   : > { %883 = vmatpush.bf16.msra.mxu2 %v874_v5  ;;  %884 = vmatpush.bf16.msra.mxu3 %v874_v5 }
  0x1d   : > { %435 = vmatpush.bf16.msra.mxu0 %v873_v6  ;;  %885 = vmatpush.bf16.msra.mxu1 %v873_v6 }
  0x1e   : > { %886 = vmatpush.bf16.msra.mxu2 %v873_v6  ;;  %887 = vmatpush.bf16.msra.mxu3 %v873_v6 }
  0x21   : > { %436 = vmatpush.bf16.msra.mxu0 %v872_v7  ;;  %888 = vmatpush.bf16.msra.mxu1 %v872_v7 }
  0x22   : > { %889 = vmatpush.bf16.msra.mxu2 %v872_v7  ;;  %890 = vmatpush.bf16.msra.mxu3 %v872_v7  ;;  %v599_v7 = vld [vmem:[%s1005_s11 + $0x88] sm:$0xff] }
  0x24   : > { %838 = vmatmul.msk.bf16.vlgmr.msra.gmra.mxu0 %vm376_vm1, %v856_v8  ;;  %842 = vmatmul.msk.bf16.vlgmr.msra.gmra.mxu1 %vm376_vm1, %v860_v9  ;;  %v607_v8 = vld [vmem:[%s1005_s11 + $0xc8] sm:$0xff] }
  0x25   : > { %846 = vmatmul.msk.bf16.vlgmr.msra.gmra.mxu2 %vm376_vm1, %v864_v10  ;;  %850 = vmatmul.msk.bf16.vlgmr.msra.gmra.mxu3 %vm376_vm1, %v868_v11 }
  0x34   : > { %839 = vmatmul.msk.bf16.gmra.mxu0 %vm376_vm1, %v857_v12  ;;  %843 = vmatmul.msk.bf16.gmra.mxu1 %vm376_vm1, %v861_v13  ;;  %v584_v13 = vld [vmem:[%s1005_s11 + $0x10] sm:$0xff] }
  0x35   : > { %847 = vmatmul.msk.bf16.gmra.mxu2 %vm376_vm1, %v865_v14  ;;  %851 = vmatmul.msk.bf16.gmra.mxu3 %vm376_vm1, %v869_v15  ;;  %v592_v14 = vld [vmem:[%s1005_s11 + $0x50] sm:$0xff] }
  0x44   : > { %840 = vmatmul.msk.bf16.gmra.mxu0 %vm376_vm1, %v858_v16  ;;  %844 = vmatmul.msk.bf16.gmra.mxu1 %vm376_vm1, %v862_v17 }
  0x45   : > { %848 = vmatmul.msk.bf16.gmra.mxu2 %vm376_vm1, %v866_v18  ;;  %852 = vmatmul.msk.bf16.gmra.mxu3 %vm376_vm1, %v870_v19 }
  0x54   : > { %841 = vmatmul.msk.bf16.gmra.mxu0 %vm376_vm1, %v859_v20  ;;  %845 = vmatmul.msk.bf16.gmra.mxu1 %vm376_vm1, %v863_v21 }
  0x55   : > { %849 = vmatmul.msk.bf16.gmra.mxu2 %vm376_vm1, %v867_v22  ;;  %853 = vmatmul.msk.bf16.gmra.mxu3 %vm376_vm1, %v871_v23 }
  0xa1   : > { %v438_v25 = vpop.f32.mrf.mxu0  ;;  %v458_v26 = vpop.f32.mrf.mxu1 }
  0xa2   : > { %v439_v27 = vadd.f32 %v999_v24, %v438_v25  ;;  %v459_v28 = vadd.f32 %v999_v24, %v458_v26 }
  0xa4   : > { %v518_v29 = vmax.f32 %v439_v27, 0.0  ;;  %v526_v30 = vmax.f32 %v459_v28, 0.0 }
  0xa6   : > { %v550_v33 = vmin.f32 %v518_v29, 6.0  ;;  %v558_v34 = vmin.f32 %v526_v30, 6.0 }
  0xa8   : > { %v614_v35 = vadd.f32 %v582_v31, %v550_v33  ;;  %v622_v36 = vadd.f32 %v590_v32, %v558_v34  ;;  %v478_v37 = vpop.f32.mrf.mxu2  ;;  %v498_v38 = vpop.f32.mrf.mxu3  ;;  %v600_v32 = vld [vmem:[%s1005_s11 + $0x90] sm:$0xff] }
  0xa9   : > { %v479_v39 = vadd.f32 %v999_v24, %v478_v37  ;;  %v499_v40 = vadd.f32 %v999_v24, %v498_v38  ;;  %v440_v41 = vpop.f32.mrf.mxu0  ;;  %v460_v42 = vpop.f32.mrf.mxu1  ;;  %v608_v33 = vld [vmem:[%s1005_s11 + $0xd0] sm:$0xff]  ;;  %v585_v38 = vld [vmem:[%s1005_s11 + $0x18] sm:$0xff] }
  0xaa   : > { %647 = vst.msk [vmem:[%s1014_s14] sm:$0xff] %vm646_vm2, %v614_v35  ;;  %v441_v43 = vadd.f32 %v999_v24, %v440_v41  ;;  %v461_v44 = vadd.f32 %v999_v24, %v460_v42 }
  0xab   : > { %655 = vst.msk [vmem:[%s1014_s14 + $0x40] sm:$0xff] %vm646_vm2, %v622_v36  ;;  %v534_v45 = vmax.f32 %v479_v39, 0.0  ;;  %v542_v46 = vmax.f32 %v499_v40, 0.0  ;;  %v593_v39 = vld [vmem:[%s1005_s11 + $0x58] sm:$0xff] }
  0xac   : > { %v519_v49 = vmax.f32 %v441_v43, 0.0  ;;  %v527_v50 = vmax.f32 %v461_v44, 0.0 }
  0xad   : > { %v566_v51 = vmin.f32 %v534_v45, 6.0  ;;  %v574_v52 = vmin.f32 %v542_v46, 6.0 }
  0xae   : > { %v551_v55 = vmin.f32 %v519_v49, 6.0  ;;  %v559_v56 = vmin.f32 %v527_v50, 6.0 }
  0xaf   : > { %v630_v57 = vadd.f32 %v598_v47, %v566_v51  ;;  %v638_v58 = vadd.f32 %v606_v48, %v574_v52 }
  0xb0   : > { %v615_v59 = vadd.f32 %v583_v53, %v551_v55  ;;  %v623_v60 = vadd.f32 %v591_v54, %v559_v56  ;;  %v480_v61 = vpop.f32.mrf.mxu2  ;;  %v500_v62 = vpop.f32.mrf.mxu3  ;;  %v601_v56 = vld [vmem:[%s1005_s11 + $0x98] sm:$0xff] }
  0xb1   : > { %663 = vst.msk [vmem:[%s1014_s14 + $0x80] sm:$0xff] %vm646_vm2, %v630_v57  ;;  %v481_v63 = vadd.f32 %v999_v24, %v480_v61  ;;  %v501_v0 = vadd.f32 %v999_v24, %v500_v62  ;;  %v443_v1 = vpop.f32.mrf.mxu0  ;;  %v463_v2 = vpop.f32.mrf.mxu1  ;;  %v609_v57 = vld [vmem:[%s1005_s11 + $0xd8] sm:$0xff]  ;;  %v586_v62 = vld [vmem:[%s1005_s11 + $0x20] sm:$0xff] }
  0xb2   : > { %671 = vst.msk [vmem:[%s1014_s14 + $0xc0] sm:$0xff] %vm646_vm2, %v638_v58  ;;  %v444_v3 = vadd.f32 %v999_v24, %v443_v1  ;;  %v464_v4 = vadd.f32 %v999_v24, %v463_v2 }
  0xb3   : > { %648 = vst.msk [vmem:[%s1014_s14 + $0x8] sm:$0xff] %vm646_vm2, %v615_v59  ;;  %v535_v5 = vmax.f32 %v481_v63, 0.0  ;;  %v543_v6 = vmax.f32 %v501_v0, 0.0  ;;  %v594_v63 = vld [vmem:[%s1005_s11 + $0x60] sm:$0xff] }
  0xb4   : > { %656 = vst.msk [vmem:[%s1014_s14 + $0x48] sm:$0xff] %vm646_vm2, %v623_v60  ;;  %v520_v9 = vmax.f32 %v444_v3, 0.0  ;;  %v528_v10 = vmax.f32 %v464_v4, 0.0 }
  0xb5   : > { %v567_v11 = vmin.f32 %v535_v5, 6.0  ;;  %v575_v12 = vmin.f32 %v543_v6, 6.0 }
  0xb6   : > { %v552_v15 = vmin.f32 %v520_v9, 6.0  ;;  %v560_v16 = vmin.f32 %v528_v10, 6.0 }
  0xb7   : > { %v631_v17 = vadd.f32 %v599_v7, %v567_v11  ;;  %v639_v18 = vadd.f32 %v607_v8, %v575_v12 }
  0xb8   : > { %v616_v19 = vadd.f32 %v584_v13, %v552_v15  ;;  %v624_v20 = vadd.f32 %v592_v14, %v560_v16  ;;  %v483_v21 = vpop.f32.mrf.mxu2  ;;  %v503_v22 = vpop.f32.mrf.mxu3  ;;  %v602_v16 = vld [vmem:[%s1005_s11 + $0xa0] sm:$0xff] }
  0xb9   : > { %664 = vst.msk [vmem:[%s1014_s14 + $0x88] sm:$0xff] %vm646_vm2, %v631_v17  ;;  %v484_v23 = vadd.f32 %v999_v24, %v483_v21  ;;  %v504_v25 = vadd.f32 %v999_v24, %v503_v22  ;;  %v445_v26 = vpop.f32.mrf.mxu0  ;;  %v465_v27 = vpop.f32.mrf.mxu1  ;;  %v610_v17 = vld [vmem:[%s1005_s11 + $0xe0] sm:$0xff]  ;;  %v587_v22 = vld [vmem:[%s1005_s11 + $0x28] sm:$0xff] }
  0xba   : > { %672 = vst.msk [vmem:[%s1014_s14 + $0xc8] sm:$0xff] %vm646_vm2, %v639_v18  ;;  %v446_v28 = vadd.f32 %v999_v24, %v445_v26  ;;  %v466_v29 = vadd.f32 %v999_v24, %v465_v27 }
  0xbb   : > { %649 = vst.msk [vmem:[%s1014_s14 + $0x10] sm:$0xff] %vm646_vm2, %v616_v19  ;;  %v536_v30 = vmax.f32 %v484_v23, 0.0  ;;  %v544_v31 = vmax.f32 %v504_v25, 0.0  ;;  %v595_v23 = vld [vmem:[%s1005_s11 + $0x68] sm:$0xff] }
  0xbc   : > { %657 = vst.msk [vmem:[%s1014_s14 + $0x50] sm:$0xff] %vm646_vm2, %v624_v20  ;;  %v521_v34 = vmax.f32 %v446_v28, 0.0  ;;  %v529_v35 = vmax.f32 %v466_v29, 0.0 }
  0xbd   : > { %v568_v36 = vmin.f32 %v536_v30, 6.0  ;;  %v576_v37 = vmin.f32 %v544_v31, 6.0 }
  0xbe   : > { %v553_v40 = vmin.f32 %v521_v34, 6.0  ;;  %v561_v41 = vmin.f32 %v529_v35, 6.0 }
  0xbf   : > { %v632_v42 = vadd.f32 %v600_v32, %v568_v36  ;;  %v640_v43 = vadd.f32 %v608_v33, %v576_v37 }
  0xc0   : > { %v617_v44 = vadd.f32 %v585_v38, %v553_v40  ;;  %v625_v45 = vadd.f32 %v593_v39, %v561_v41  ;;  %v485_v46 = vpop.f32.mrf.mxu2  ;;  %v505_v47 = vpop.f32.mrf.mxu3  ;;  %v603_v41 = vld [vmem:[%s1005_s11 + $0xa8] sm:$0xff] }
  0xc1   : > { %665 = vst.msk [vmem:[%s1014_s14 + $0x90] sm:$0xff] %vm646_vm2, %v632_v42  ;;  %v486_v48 = vadd.f32 %v999_v24, %v485_v46  ;;  %v506_v49 = vadd.f32 %v999_v24, %v505_v47  ;;  %v448_v50 = vpop.f32.mrf.mxu0  ;;  %v468_v51 = vpop.f32.mrf.mxu1  ;;  %v611_v42 = vld [vmem:[%s1005_s11 + $0xe8] sm:$0xff]  ;;  %v588_v47 = vld [vmem:[%s1005_s11 + $0x30] sm:$0xff] }
  0xc2   : > { %673 = vst.msk [vmem:[%s1014_s14 + $0xd0] sm:$0xff] %vm646_vm2, %v640_v43  ;;  %v449_v52 = vadd.f32 %v999_v24, %v448_v50  ;;  %v469_v53 = vadd.f32 %v999_v24, %v468_v51 }
  0xc3   : > { %650 = vst.msk [vmem:[%s1014_s14 + $0x18] sm:$0xff] %vm646_vm2, %v617_v44  ;;  %v537_v54 = vmax.f32 %v486_v48, 0.0  ;;  %v545_v55 = vmax.f32 %v506_v49, 0.0  ;;  %v596_v48 = vld [vmem:[%s1005_s11 + $0x70] sm:$0xff] }
  0xc4   : > { %658 = vst.msk [vmem:[%s1014_s14 + $0x58] sm:$0xff] %vm646_vm2, %v625_v45  ;;  %v522_v58 = vmax.f32 %v449_v52, 0.0  ;;  %v530_v59 = vmax.f32 %v469_v53, 0.0 }
  0xc5   : > { %v569_v60 = vmin.f32 %v537_v54, 6.0  ;;  %v577_v61 = vmin.f32 %v545_v55, 6.0 }
  0xc6   : > { %v554_v0 = vmin.f32 %v522_v58, 6.0  ;;  %v562_v1 = vmin.f32 %v530_v59, 6.0 }
  0xc7   : > { %v633_v2 = vadd.f32 %v601_v56, %v569_v60  ;;  %v641_v3 = vadd.f32 %v609_v57, %v577_v61 }
  0xc8   : > { %v618_v4 = vadd.f32 %v586_v62, %v554_v0  ;;  %v626_v5 = vadd.f32 %v594_v63, %v562_v1  ;;  %v488_v6 = vpop.f32.mrf.mxu2  ;;  %v508_v7 = vpop.f32.mrf.mxu3  ;;  %v604_v1 = vld [vmem:[%s1005_s11 + $0xb0] sm:$0xff] }
  0xc9   : > { %666 = vst.msk [vmem:[%s1014_s14 + $0x98] sm:$0xff] %vm646_vm2, %v633_v2  ;;  %v489_v8 = vadd.f32 %v999_v24, %v488_v6  ;;  %v509_v9 = vadd.f32 %v999_v24, %v508_v7  ;;  %v450_v10 = vpop.f32.mrf.mxu0  ;;  %v470_v11 = vpop.f32.mrf.mxu1  ;;  %v612_v2 = vld [vmem:[%s1005_s11 + $0xf0] sm:$0xff]  ;;  %v589_v7 = vld [vmem:[%s1005_s11 + $0x38] sm:$0xff] }
  0xca   : > { %674 = vst.msk [vmem:[%s1014_s14 + $0xd8] sm:$0xff] %vm646_vm2, %v641_v3  ;;  %v451_v12 = vadd.f32 %v999_v24, %v450_v10  ;;  %v471_v13 = vadd.f32 %v999_v24, %v470_v11 }
  0xcb   : > { %651 = vst.msk [vmem:[%s1014_s14 + $0x20] sm:$0xff] %vm646_vm2, %v618_v4  ;;  %v538_v14 = vmax.f32 %v489_v8, 0.0  ;;  %v546_v15 = vmax.f32 %v509_v9, 0.0  ;;  %v597_v8 = vld [vmem:[%s1005_s11 + $0x78] sm:$0xff] }
  0xcc   : > { %659 = vst.msk [vmem:[%s1014_s14 + $0x60] sm:$0xff] %vm646_vm2, %v626_v5  ;;  %v523_v18 = vmax.f32 %v451_v12, 0.0  ;;  %v531_v19 = vmax.f32 %v471_v13, 0.0 }
  0xcd   : > { %v570_v20 = vmin.f32 %v538_v14, 6.0  ;;  %v578_v21 = vmin.f32 %v546_v15, 6.0 }
  0xce   : > { %v555_v25 = vmin.f32 %v523_v18, 6.0  ;;  %v563_v26 = vmin.f32 %v531_v19, 6.0 }
  0xcf   : > { %v634_v27 = vadd.f32 %v602_v16, %v570_v20  ;;  %v642_v28 = vadd.f32 %v610_v17, %v578_v21  ;;  %v605_v21 = vld [vmem:[%s1005_s11 + $0xb8] sm:$0xff] }
  0xd0   : > { %v619_v29 = vadd.f32 %v587_v22, %v555_v25  ;;  %v627_v30 = vadd.f32 %v595_v23, %v563_v26  ;;  %v490_v31 = vpop.f32.mrf.mxu2  ;;  %v510_v32 = vpop.f32.mrf.mxu3  ;;  %v613_v22 = vld [vmem:[%s1005_s11 + $0xf8] sm:$0xff] }
  0xd1   : > { %667 = vst.msk [vmem:[%s1014_s14 + $0xa0] sm:$0xff] %vm646_vm2, %v634_v27  ;;  %v491_v33 = vadd.f32 %v999_v24, %v490_v31  ;;  %v511_v34 = vadd.f32 %v999_v24, %v510_v32  ;;  %v453_v35 = vpop.f32.mrf.mxu0  ;;  %v473_v36 = vpop.f32.mrf.mxu1 }
  0xd2   : > { %675 = vst.msk [vmem:[%s1014_s14 + $0xe0] sm:$0xff] %vm646_vm2, %v642_v28  ;;  %v454_v37 = vadd.f32 %v999_v24, %v453_v35  ;;  %v474_v38 = vadd.f32 %v999_v24, %v473_v36 }
  0xd3   : > { %652 = vst.msk [vmem:[%s1014_s14 + $0x28] sm:$0xff] %vm646_vm2, %v619_v29  ;;  %v539_v39 = vmax.f32 %v491_v33, 0.0  ;;  %v547_v40 = vmax.f32 %v511_v34, 0.0 }
  0xd4   : > { %660 = vst.msk [vmem:[%s1014_s14 + $0x68] sm:$0xff] %vm646_vm2, %v627_v30  ;;  %v524_v43 = vmax.f32 %v454_v37, 0.0  ;;  %v532_v44 = vmax.f32 %v474_v38, 0.0 }
  0xd5   : > { %v571_v45 = vmin.f32 %v539_v39, 6.0  ;;  %v579_v46 = vmin.f32 %v547_v40, 6.0 }
  0xd6   : > { %v556_v49 = vmin.f32 %v524_v43, 6.0  ;;  %v564_v50 = vmin.f32 %v532_v44, 6.0 }
  0xd7   : > { %v635_v51 = vadd.f32 %v603_v41, %v571_v45  ;;  %v643_v52 = vadd.f32 %v611_v42, %v579_v46 }
  0xd8   : > { %v620_v53 = vadd.f32 %v588_v47, %v556_v49  ;;  %v628_v54 = vadd.f32 %v596_v48, %v564_v50  ;;  %v493_v55 = vpop.f32.mrf.mxu2  ;;  %v513_v56 = vpop.f32.mrf.mxu3 }
  0xd9   : > { %668 = vst.msk [vmem:[%s1014_s14 + $0xa8] sm:$0xff] %vm646_vm2, %v635_v51  ;;  %v494_v57 = vadd.f32 %v999_v24, %v493_v55  ;;  %v514_v58 = vadd.f32 %v999_v24, %v513_v56  ;;  %v455_v59 = vpop.f32.mrf.mxu0  ;;  %v475_v60 = vpop.f32.mrf.mxu1 }
  0xda   : > { %676 = vst.msk [vmem:[%s1014_s14 + $0xe8] sm:$0xff] %vm646_vm2, %v643_v52  ;;  %v456_v61 = vadd.f32 %v999_v24, %v455_v59  ;;  %v476_v62 = vadd.f32 %v999_v24, %v475_v60 }
  0xdb   : > { %653 = vst.msk [vmem:[%s1014_s14 + $0x30] sm:$0xff] %vm646_vm2, %v620_v53  ;;  %v540_v63 = vmax.f32 %v494_v57, 0.0  ;;  %v548_v0 = vmax.f32 %v514_v58, 0.0 }
  0xdc   : > { %661 = vst.msk [vmem:[%s1014_s14 + $0x70] sm:$0xff] %vm646_vm2, %v628_v54  ;;  %v525_v3 = vmax.f32 %v456_v61, 0.0  ;;  %v533_v4 = vmax.f32 %v476_v62, 0.0 }
  0xdd   : > { %v572_v5 = vmin.f32 %v540_v63, 6.0  ;;  %v580_v6 = vmin.f32 %v548_v0, 6.0 }
  0xde   : > { %v557_v9 = vmin.f32 %v525_v3, 6.0  ;;  %v565_v10 = vmin.f32 %v533_v4, 6.0 }
  0xdf   : > { %v636_v11 = vadd.f32 %v604_v1, %v572_v5  ;;  %v644_v12 = vadd.f32 %v612_v2, %v580_v6 }
  0xe0   : > { %v621_v13 = vadd.f32 %v589_v7, %v557_v9  ;;  %v629_v14 = vadd.f32 %v597_v8, %v565_v10  ;;  %v495_v15 = vpop.f32.mrf.mxu2  ;;  %v515_v16 = vpop.f32.mrf.mxu3 }
  0xe1   : > { %669 = vst.msk [vmem:[%s1014_s14 + $0xb0] sm:$0xff] %vm646_vm2, %v636_v11  ;;  %v496_v17 = vadd.f32 %v999_v24, %v495_v15  ;;  %v516_v18 = vadd.f32 %v999_v24, %v515_v16 }
  0xe2   : > { %677 = vst.msk [vmem:[%s1014_s14 + $0xf0] sm:$0xff] %vm646_vm2, %v644_v12 }
  0xe3   : > { %654 = vst.msk [vmem:[%s1014_s14 + $0x38] sm:$0xff] %vm646_vm2, %v621_v13  ;;  %v541_v19 = vmax.f32 %v496_v17, 0.0  ;;  %v549_v20 = vmax.f32 %v516_v18, 0.0 }
  0xe4   : > { %662 = vst.msk [vmem:[%s1014_s14 + $0x78] sm:$0xff] %vm646_vm2, %v629_v14 }
  0xe5   : > { %v573_v23 = vmin.f32 %v541_v19, 6.0  ;;  %v581_v25 = vmin.f32 %v549_v20, 6.0 }
  0xe7   : > { %v637_v26 = vadd.f32 %v605_v21, %v573_v23  ;;  %v645_v27 = vadd.f32 %v613_v22, %v581_v25 }
  0xe9   : > { %670 = vst.msk [vmem:[%s1014_s14 + $0xb8] sm:$0xff] %vm646_vm2, %v637_v26 }
  0xea   : > { %678 = vst.msk [vmem:[%s1014_s14 + $0xf8] sm:$0xff] %vm646_vm2, %v645_v27 }
  0xeb PF: > { %s14_s15 = sadd.s32 1, %s906_s15  }
  0xec   : > { %p11_p4 = scmp.ge.s32.totalorder %s14_s15, 4  }
  0xee   :  { %13 = sbr.rel (!%p11_p4) target bundleno = 1 (0x1), region = 69 }

// kernel: att_net_forward.23
= control target key start
LH: loop header
LB: loop body
LE: loop exit
PB: predicated region body
PF: predicated region fallthrough
CT: control target
= control target key end

     0   :  { %vm136_vm0 = vcmask 1043456   ;;  %vm111_vm1 = vcmask 588800   ;;  %vm221_vm2 = vcmask 130048   ;;  %s478_s1 = inlined_call_operand.vmem [shape: bf16[72,16], index: 1, kind: input, shape index: {}]   ;;  %s479_s2 = inlined_call_operand.vmem [shape: f32[1,16], index: 2, kind: input, shape index: {}]   ;;  %s480_s0 = inlined_call_operand.vmem [shape: bf16[128,72], index: 0, kind: input, shape index: {}]   ;;  %s481_s3 = inlined_call_operand.vmem [shape: f32[128,16], index: 3, kind: output, shape index: {}]  }
   0x1   :  { %v39_v0 = vld [vmem:[%s478_s1 + $0x20] sm:$0xf]  ;;  %v309_v4 = vld [vmem:[%s478_s1 + $0x18] sm:$0xff]  ;;  %v308_v5 = vld [vmem:[%s478_s1 + $0x10] sm:$0xff] }
   0x2   :  { %v101_v1 = vunpack.c.l.b16 %v39_v0  ;;  %v307_v6 = vld [vmem:[%s478_s1 + $0x8] sm:$0xff]  ;;  %v306_v7 = vld [vmem:[%s478_s1] sm:$0xff]  ;;  %v300_v9 = vld [vmem:[%s480_s0 + $0x10] sm:$0xff] }
   0x3   :  { %v298_v8 = vld [vmem:[%s480_s0] sm:$0xff]  ;;  %v304_v11 = vld [vmem:[%s480_s0 + $0x30] sm:$0xff]  ;;  %v299_v12 = vld [vmem:[%s480_s0 + $0x8] sm:$0xff] }
   0x4   :  { %v106_v2 = vpack.c.b16 %v101_v1, %v101_v1  ;;  %v302_v10 = vld [vmem:[%s480_s0 + $0x20] sm:$0xff]  ;;  %v301_v13 = vld [vmem:[%s480_s0 + $0x18] sm:$0xff]  ;;  %v303_v14 = vld [vmem:[%s480_s0 + $0x28] sm:$0xff] }
   0x5   :  { %v305_v15 = vld [vmem:[%s480_s0 + $0x38] sm:$0xff]  ;;  %v396_v16 = vld [vmem:[%s479_s2] ss:$0 sm:$0xff] }
   0x6   :  { %v138_v3 = vsel %vm136_vm0, %v106_v2, 0 }
   0x7   :  { %143 = vmatpush.bf16.msra.mxu0 %v138_v3  ;;  %310 = vmatpush.bf16.msra.mxu1 %v138_v3 }
   0x8   :  { %311 = vmatpush.bf16.msra.mxu2 %v138_v3  ;;  %312 = vmatpush.bf16.msra.mxu3 %v138_v3 }
   0xb   :  { %144 = vmatpush.bf16.msra.mxu0 %v309_v4  ;;  %313 = vmatpush.bf16.msra.mxu1 %v309_v4 }
   0xc   :  { %314 = vmatpush.bf16.msra.mxu2 %v309_v4  ;;  %315 = vmatpush.bf16.msra.mxu3 %v309_v4 }
   0xf   :  { %145 = vmatpush.bf16.msra.mxu0 %v308_v5  ;;  %316 = vmatpush.bf16.msra.mxu1 %v308_v5 }
  0x10   :  { %317 = vmatpush.bf16.msra.mxu2 %v308_v5  ;;  %318 = vmatpush.bf16.msra.mxu3 %v308_v5 }
  0x13   :  { %146 = vmatpush.bf16.msra.mxu0 %v307_v6  ;;  %319 = vmatpush.bf16.msra.mxu1 %v307_v6 }
  0x14   :  { %320 = vmatpush.bf16.msra.mxu2 %v307_v6  ;;  %321 = vmatpush.bf16.msra.mxu3 %v307_v6 }
  0x17   :  { %147 = vmatpush.bf16.msra.mxu0 %v306_v7  ;;  %322 = vmatpush.bf16.msra.mxu1 %v306_v7 }
  0x18   :  { %323 = vmatpush.bf16.msra.mxu2 %v306_v7  ;;  %324 = vmatpush.bf16.msra.mxu3 %v306_v7 }
  0x1a   :  { %290 = vmatmul.msk.bf16.vlgmr.msra.gmra.mxu0 %vm111_vm1, %v298_v8  ;;  %292 = vmatmul.msk.bf16.vlgmr.msra.gmra.mxu1 %vm111_vm1, %v300_v9 }
  0x1b   :  { %294 = vmatmul.msk.bf16.vlgmr.msra.gmra.mxu2 %vm111_vm1, %v302_v10  ;;  %296 = vmatmul.msk.bf16.vlgmr.msra.gmra.mxu3 %vm111_vm1, %v304_v11 }
  0x2a   :  { %291 = vmatmul.msk.bf16.gmra.mxu0 %vm111_vm1, %v299_v12  ;;  %293 = vmatmul.msk.bf16.gmra.mxu1 %vm111_vm1, %v301_v13 }
  0x2b   :  { %295 = vmatmul.msk.bf16.gmra.mxu2 %vm111_vm1, %v303_v14  ;;  %297 = vmatmul.msk.bf16.gmra.mxu3 %vm111_vm1, %v305_v15 }
  0x97   :  { %v149_v17 = vpop.f32.mrf.mxu0  ;;  %v159_v18 = vpop.f32.mrf.mxu1 }
  0x98   :  { %v150_v19 = vadd.f32 %v396_v16, %v149_v17  ;;  %v160_v20 = vadd.f32 %v396_v16, %v159_v18 }
  0x9a   :  { %v189_v21 = vmax.f32 %v150_v19, 0.0  ;;  %v193_v22 = vmax.f32 %v160_v20, 0.0 }
  0x9c   :  { %v205_v23 = vmin.f32 %v189_v21, 6.0  ;;  %v209_v24 = vmin.f32 %v193_v22, 6.0 }
  0x9e   :  { %222 = vst.msk [vmem:[%s481_s3] sm:$0xff] %vm221_vm2, %v205_v23  ;;  %v169_v25 = vpop.f32.mrf.mxu2  ;;  %v179_v26 = vpop.f32.mrf.mxu3 }
  0x9f   :  { %226 = vst.msk [vmem:[%s481_s3 + $0x20] sm:$0xff] %vm221_vm2, %v209_v24  ;;  %v170_v27 = vadd.f32 %v396_v16, %v169_v25  ;;  %v180_v28 = vadd.f32 %v396_v16, %v179_v26  ;;  %v151_v29 = vpop.f32.mrf.mxu0  ;;  %v161_v30 = vpop.f32.mrf.mxu1 }
  0xa0   :  { %v152_v31 = vadd.f32 %v396_v16, %v151_v29  ;;  %v162_v32 = vadd.f32 %v396_v16, %v161_v30 }
  0xa1   :  { %v197_v33 = vmax.f32 %v170_v27, 0.0  ;;  %v201_v34 = vmax.f32 %v180_v28, 0.0 }
  0xa2   :  { %v190_v35 = vmax.f32 %v152_v31, 0.0  ;;  %v194_v36 = vmax.f32 %v162_v32, 0.0 }
  0xa3   :  { %v213_v37 = vmin.f32 %v197_v33, 6.0  ;;  %v217_v38 = vmin.f32 %v201_v34, 6.0 }
  0xa4   :  { %v206_v39 = vmin.f32 %v190_v35, 6.0  ;;  %v210_v40 = vmin.f32 %v194_v36, 6.0 }
  0xa5   :  { %230 = vst.msk [vmem:[%s481_s3 + $0x40] sm:$0xff] %vm221_vm2, %v213_v37 }
  0xa6   :  { %234 = vst.msk [vmem:[%s481_s3 + $0x60] sm:$0xff] %vm221_vm2, %v217_v38  ;;  %v171_v41 = vpop.f32.mrf.mxu2  ;;  %v181_v42 = vpop.f32.mrf.mxu3 }
  0xa7   :  { %223 = vst.msk [vmem:[%s481_s3 + $0x8] sm:$0xff] %vm221_vm2, %v206_v39  ;;  %v172_v43 = vadd.f32 %v396_v16, %v171_v41  ;;  %v182_v44 = vadd.f32 %v396_v16, %v181_v42  ;;  %v154_v45 = vpop.f32.mrf.mxu0  ;;  %v164_v46 = vpop.f32.mrf.mxu1 }
  0xa8   :  { %227 = vst.msk [vmem:[%s481_s3 + $0x28] sm:$0xff] %vm221_vm2, %v210_v40  ;;  %v155_v47 = vadd.f32 %v396_v16, %v154_v45  ;;  %v165_v48 = vadd.f32 %v396_v16, %v164_v46 }
  0xa9   :  { %v198_v49 = vmax.f32 %v172_v43, 0.0  ;;  %v202_v50 = vmax.f32 %v182_v44, 0.0 }
  0xaa   :  { %v191_v51 = vmax.f32 %v155_v47, 0.0  ;;  %v195_v52 = vmax.f32 %v165_v48, 0.0 }
  0xab   :  { %v214_v53 = vmin.f32 %v198_v49, 6.0  ;;  %v218_v54 = vmin.f32 %v202_v50, 6.0 }
  0xac   :  { %v207_v55 = vmin.f32 %v191_v51, 6.0  ;;  %v211_v56 = vmin.f32 %v195_v52, 6.0 }
  0xad   :  { %231 = vst.msk [vmem:[%s481_s3 + $0x48] sm:$0xff] %vm221_vm2, %v214_v53 }
  0xae   :  { %235 = vst.msk [vmem:[%s481_s3 + $0x68] sm:$0xff] %vm221_vm2, %v218_v54  ;;  %v174_v57 = vpop.f32.mrf.mxu2  ;;  %v184_v58 = vpop.f32.mrf.mxu3 }
  0xaf   :  { %224 = vst.msk [vmem:[%s481_s3 + $0x10] sm:$0xff] %vm221_vm2, %v207_v55  ;;  %v175_v59 = vadd.f32 %v396_v16, %v174_v57  ;;  %v185_v60 = vadd.f32 %v396_v16, %v184_v58  ;;  %v156_v61 = vpop.f32.mrf.mxu0  ;;  %v166_v62 = vpop.f32.mrf.mxu1 }
  0xb0   :  { %228 = vst.msk [vmem:[%s481_s3 + $0x30] sm:$0xff] %vm221_vm2, %v211_v56  ;;  %v157_v63 = vadd.f32 %v396_v16, %v156_v61  ;;  %v167_v0 = vadd.f32 %v396_v16, %v166_v62 }
  0xb1   :  { %v199_v1 = vmax.f32 %v175_v59, 0.0  ;;  %v203_v2 = vmax.f32 %v185_v60, 0.0 }
  0xb2   :  { %v192_v3 = vmax.f32 %v157_v63, 0.0  ;;  %v196_v4 = vmax.f32 %v167_v0, 0.0 }
  0xb3   :  { %v215_v5 = vmin.f32 %v199_v1, 6.0  ;;  %v219_v6 = vmin.f32 %v203_v2, 6.0 }
  0xb4   :  { %v208_v7 = vmin.f32 %v192_v3, 6.0  ;;  %v212_v8 = vmin.f32 %v196_v4, 6.0 }
  0xb5   :  { %232 = vst.msk [vmem:[%s481_s3 + $0x50] sm:$0xff] %vm221_vm2, %v215_v5 }
  0xb6   :  { %236 = vst.msk [vmem:[%s481_s3 + $0x70] sm:$0xff] %vm221_vm2, %v219_v6  ;;  %v176_v9 = vpop.f32.mrf.mxu2  ;;  %v186_v10 = vpop.f32.mrf.mxu3 }
  0xb7   :  { %225 = vst.msk [vmem:[%s481_s3 + $0x18] sm:$0xff] %vm221_vm2, %v208_v7  ;;  %v177_v11 = vadd.f32 %v396_v16, %v176_v9  ;;  %v187_v12 = vadd.f32 %v396_v16, %v186_v10 }
  0xb8   :  { %229 = vst.msk [vmem:[%s481_s3 + $0x38] sm:$0xff] %vm221_vm2, %v212_v8 }
  0xb9   :  { %v200_v13 = vmax.f32 %v177_v11, 0.0  ;;  %v204_v14 = vmax.f32 %v187_v12, 0.0 }
  0xbb   :  { %v216_v15 = vmin.f32 %v200_v13, 6.0  ;;  %v220_v17 = vmin.f32 %v204_v14, 6.0 }
  0xbd   :  { %233 = vst.msk [vmem:[%s481_s3 + $0x58] sm:$0xff] %vm221_vm2, %v216_v15 }
  0xbe   :  { %237 = vst.msk [vmem:[%s481_s3 + $0x78] sm:$0xff] %vm221_vm2, %v220_v17 }

// kernel: att_net_forward.24
= control target key start
LH: loop header
LB: loop body
LE: loop exit
PB: predicated region body
PF: predicated region fallthrough
CT: control target
= control target key end

     0   :  { %vm101_vm0 = vcmask 1043456   ;;  %vm76_vm1 = vcmask 64512   ;;  %vm186_vm2 = vcmask 130048   ;;  %s399_s1 = inlined_call_operand.vmem [shape: bf16[8,16], index: 1, kind: input, shape index: {}]   ;;  %s400_s0 = inlined_call_operand.vmem [shape: bf16[128,8], index: 0, kind: input, shape index: {}]   ;;  %s401_s2 = inlined_call_operand.vmem [shape: f32[1,16], index: 2, kind: input, shape index: {}]   ;;  %s402_s3 = inlined_call_operand.vmem [shape: f32[128,16], index: 3, kind: output, shape index: {}]  }
   0x1   :  { %v31_v0 = vld [vmem:[%s399_s1] sm:$0xf]  ;;  %v249_v3 = vld [vmem:[%s400_s0 + $0x10] sm:$0xff]  ;;  %v248_v6 = vld [vmem:[%s400_s0 + $0x8] sm:$0xff] }
   0x2   :  { %v103_v1 = vsel %vm101_vm0, %v31_v0, 0  ;;  %v247_v2 = vld [vmem:[%s400_s0] sm:$0xff]  ;;  %v253_v5 = vld [vmem:[%s400_s0 + $0x30] sm:$0xff]  ;;  %v250_v7 = vld [vmem:[%s400_s0 + $0x18] sm:$0xff] }
   0x3   :  { %112 = vmatpush.bf16.msra.mxu0 %v103_v1  ;;  %255 = vmatpush.bf16.msra.mxu1 %v103_v1  ;;  %v251_v4 = vld [vmem:[%s400_s0 + $0x20] sm:$0xff]  ;;  %v252_v8 = vld [vmem:[%s400_s0 + $0x28] sm:$0xff]  ;;  %v254_v9 = vld [vmem:[%s400_s0 + $0x38] sm:$0xff] }
   0x4   :  { %256 = vmatpush.bf16.msra.mxu2 %v103_v1  ;;  %257 = vmatpush.bf16.msra.mxu3 %v103_v1  ;;  %v317_v10 = vld [vmem:[%s401_s2] ss:$0 sm:$0xff] }
   0x6   :  { %239 = vmatmul.msk.bf16.vlgmr.msra.gmra.mxu0 %vm76_vm1, %v247_v2  ;;  %241 = vmatmul.msk.bf16.vlgmr.msra.gmra.mxu1 %vm76_vm1, %v249_v3 }
   0x7   :  { %243 = vmatmul.msk.bf16.vlgmr.msra.gmra.mxu2 %vm76_vm1, %v251_v4  ;;  %245 = vmatmul.msk.bf16.vlgmr.msra.gmra.mxu3 %vm76_vm1, %v253_v5 }
  0x16   :  { %240 = vmatmul.msk.bf16.gmra.mxu0 %vm76_vm1, %v248_v6  ;;  %242 = vmatmul.msk.bf16.gmra.mxu1 %vm76_vm1, %v250_v7 }
  0x17   :  { %244 = vmatmul.msk.bf16.gmra.mxu2 %vm76_vm1, %v252_v8  ;;  %246 = vmatmul.msk.bf16.gmra.mxu3 %vm76_vm1, %v254_v9 }
  0x83   :  { %v114_v11 = vpop.f32.mrf.mxu0  ;;  %v124_v12 = vpop.f32.mrf.mxu1 }
  0x84   :  { %v115_v13 = vadd.f32 %v317_v10, %v114_v11  ;;  %v125_v14 = vadd.f32 %v317_v10, %v124_v12 }
  0x86   :  { %v154_v15 = vmax.f32 %v115_v13, 0.0  ;;  %v158_v16 = vmax.f32 %v125_v14, 0.0 }
  0x88   :  { %v170_v17 = vmin.f32 %v154_v15, 6.0  ;;  %v174_v18 = vmin.f32 %v158_v16, 6.0 }
  0x8a   :  { %187 = vst.msk [vmem:[%s402_s3] sm:$0xff] %vm186_vm2, %v170_v17  ;;  %v134_v19 = vpop.f32.mrf.mxu2  ;;  %v144_v20 = vpop.f32.mrf.mxu3 }
  0x8b   :  { %191 = vst.msk [vmem:[%s402_s3 + $0x20] sm:$0xff] %vm186_vm2, %v174_v18  ;;  %v135_v21 = vadd.f32 %v317_v10, %v134_v19  ;;  %v145_v22 = vadd.f32 %v317_v10, %v144_v20  ;;  %v116_v23 = vpop.f32.mrf.mxu0  ;;  %v126_v24 = vpop.f32.mrf.mxu1 }
  0x8c   :  { %v117_v25 = vadd.f32 %v317_v10, %v116_v23  ;;  %v127_v26 = vadd.f32 %v317_v10, %v126_v24 }
  0x8d   :  { %v162_v27 = vmax.f32 %v135_v21, 0.0  ;;  %v166_v28 = vmax.f32 %v145_v22, 0.0 }
  0x8e   :  { %v155_v29 = vmax.f32 %v117_v25, 0.0  ;;  %v159_v30 = vmax.f32 %v127_v26, 0.0 }
  0x8f   :  { %v178_v31 = vmin.f32 %v162_v27, 6.0  ;;  %v182_v32 = vmin.f32 %v166_v28, 6.0 }
  0x90   :  { %v171_v33 = vmin.f32 %v155_v29, 6.0  ;;  %v175_v34 = vmin.f32 %v159_v30, 6.0 }
  0x91   :  { %195 = vst.msk [vmem:[%s402_s3 + $0x40] sm:$0xff] %vm186_vm2, %v178_v31 }
  0x92   :  { %199 = vst.msk [vmem:[%s402_s3 + $0x60] sm:$0xff] %vm186_vm2, %v182_v32  ;;  %v136_v35 = vpop.f32.mrf.mxu2  ;;  %v146_v36 = vpop.f32.mrf.mxu3 }
  0x93   :  { %188 = vst.msk [vmem:[%s402_s3 + $0x8] sm:$0xff] %vm186_vm2, %v171_v33  ;;  %v137_v37 = vadd.f32 %v317_v10, %v136_v35  ;;  %v147_v38 = vadd.f32 %v317_v10, %v146_v36  ;;  %v119_v39 = vpop.f32.mrf.mxu0  ;;  %v129_v40 = vpop.f32.mrf.mxu1 }
  0x94   :  { %192 = vst.msk [vmem:[%s402_s3 + $0x28] sm:$0xff] %vm186_vm2, %v175_v34  ;;  %v120_v41 = vadd.f32 %v317_v10, %v119_v39  ;;  %v130_v42 = vadd.f32 %v317_v10, %v129_v40 }
  0x95   :  { %v163_v43 = vmax.f32 %v137_v37, 0.0  ;;  %v167_v44 = vmax.f32 %v147_v38, 0.0 }
  0x96   :  { %v156_v45 = vmax.f32 %v120_v41, 0.0  ;;  %v160_v46 = vmax.f32 %v130_v42, 0.0 }
  0x97   :  { %v179_v47 = vmin.f32 %v163_v43, 6.0  ;;  %v183_v48 = vmin.f32 %v167_v44, 6.0 }
  0x98   :  { %v172_v49 = vmin.f32 %v156_v45, 6.0  ;;  %v176_v50 = vmin.f32 %v160_v46, 6.0 }
  0x99   :  { %196 = vst.msk [vmem:[%s402_s3 + $0x48] sm:$0xff] %vm186_vm2, %v179_v47 }
  0x9a   :  { %200 = vst.msk [vmem:[%s402_s3 + $0x68] sm:$0xff] %vm186_vm2, %v183_v48  ;;  %v139_v51 = vpop.f32.mrf.mxu2  ;;  %v149_v52 = vpop.f32.mrf.mxu3 }
  0x9b   :  { %189 = vst.msk [vmem:[%s402_s3 + $0x10] sm:$0xff] %vm186_vm2, %v172_v49  ;;  %v140_v53 = vadd.f32 %v317_v10, %v139_v51  ;;  %v150_v54 = vadd.f32 %v317_v10, %v149_v52  ;;  %v121_v55 = vpop.f32.mrf.mxu0  ;;  %v131_v56 = vpop.f32.mrf.mxu1 }
  0x9c   :  { %193 = vst.msk [vmem:[%s402_s3 + $0x30] sm:$0xff] %vm186_vm2, %v176_v50  ;;  %v122_v57 = vadd.f32 %v317_v10, %v121_v55  ;;  %v132_v58 = vadd.f32 %v317_v10, %v131_v56 }
  0x9d   :  { %v164_v59 = vmax.f32 %v140_v53, 0.0  ;;  %v168_v60 = vmax.f32 %v150_v54, 0.0 }
  0x9e   :  { %v157_v61 = vmax.f32 %v122_v57, 0.0  ;;  %v161_v62 = vmax.f32 %v132_v58, 0.0 }
  0x9f   :  { %v180_v63 = vmin.f32 %v164_v59, 6.0  ;;  %v184_v0 = vmin.f32 %v168_v60, 6.0 }
  0xa0   :  { %v173_v1 = vmin.f32 %v157_v61, 6.0  ;;  %v177_v2 = vmin.f32 %v161_v62, 6.0 }
  0xa1   :  { %197 = vst.msk [vmem:[%s402_s3 + $0x50] sm:$0xff] %vm186_vm2, %v180_v63 }
  0xa2   :  { %201 = vst.msk [vmem:[%s402_s3 + $0x70] sm:$0xff] %vm186_vm2, %v184_v0  ;;  %v141_v3 = vpop.f32.mrf.mxu2  ;;  %v151_v4 = vpop.f32.mrf.mxu3 }
  0xa3   :  { %190 = vst.msk [vmem:[%s402_s3 + $0x18] sm:$0xff] %vm186_vm2, %v173_v1  ;;  %v142_v5 = vadd.f32 %v317_v10, %v141_v3  ;;  %v152_v6 = vadd.f32 %v317_v10, %v151_v4 }
  0xa4   :  { %194 = vst.msk [vmem:[%s402_s3 + $0x38] sm:$0xff] %vm186_vm2, %v177_v2 }
  0xa5   :  { %v165_v7 = vmax.f32 %v142_v5, 0.0  ;;  %v169_v8 = vmax.f32 %v152_v6, 0.0 }
  0xa7   :  { %v181_v9 = vmin.f32 %v165_v7, 6.0  ;;  %v185_v11 = vmin.f32 %v169_v8, 6.0 }
  0xa9   :  { %198 = vst.msk [vmem:[%s402_s3 + $0x58] sm:$0xff] %vm186_vm2, %v181_v9 }
  0xaa   :  { %202 = vst.msk [vmem:[%s402_s3 + $0x78] sm:$0xff] %vm186_vm2, %v185_v11 }

// kernel: att_net_forward.25
= control target key start
LH: loop header
LB: loop body
LE: loop exit
PB: predicated region body
PF: predicated region fallthrough
CT: control target
= control target key end

     0   :  { %vm182_vm0 = vcmask 130048   ;;  %s789_s1 = inlined_call_operand.vmem [shape: bf16[144,16], index: 1, kind: input, shape index: {}]   ;;  %s790_s0 = inlined_call_operand.vmem [shape: bf16[128,144], index: 0, kind: input, shape index: {}]   ;;  %s791_s2 = inlined_call_operand.vmem [shape: f32[1,16], index: 2, kind: input, shape index: {}]   ;;  %s792_s3 = inlined_call_operand.vmem [shape: f32[128,16], index: 3, kind: input, shape index: {}]   ;;  %s793_s4 = inlined_call_operand.vmem [shape: f32[128,16], index: 4, kind: output, shape index: {}]  }
   0x1   :  { %v488_v0 = vld [vmem:[%s789_s1 + $0x38] sm:$0xff]  ;;  %v489_v1 = vld [vmem:[%s789_s1 + $0x40] sm:$0xff]  ;;  %v361_v3 = vld [vmem:[%s790_s0 + $0x8] sm:$0xf0] }
   0x2   :  { %v465_v2 = vld [vmem:[%s790_s0 + $0x4] sm:$0xf]  ;;  %207 = vmatpush.bf16.msra.mxu0 %v488_v0  ;;  %490 = vmatpush.bf16.msra.mxu2 %v488_v0  ;;  %v487_v5 = vld [vmem:[%s789_s1 + $0x30] sm:$0xff]  ;;  %v486_v6 = vld [vmem:[%s789_s1 + $0x28] sm:$0xff] }
   0x3   :  { %v364_v4 = vor.u32 %v465_v2, %v361_v3  ;;  %263 = vmatpush.bf16.msra.mxu1 %v489_v1  ;;  %498 = vmatpush.bf16.msra.mxu3 %v489_v1  ;;  %v475_v7 = vld [vmem:[%s790_s0 + $0x54] sm:$0xf]  ;;  %v401_v8 = vld [vmem:[%s790_s0 + $0x58] sm:$0xf0]  ;;  %v485_v10 = vld [vmem:[%s789_s1 + $0x20] sm:$0xff] }
   0x4   :  { %v404_v9 = vor.u32 %v475_v7, %v401_v8  ;;  %v484_v11 = vld [vmem:[%s789_s1 + $0x18] sm:$0xff]  ;;  %v467_v12 = vld [vmem:[%s790_s0 + $0x14] sm:$0xf]  ;;  %v482_v16 = vld [vmem:[%s789_s1 + $0x8] sm:$0xff] }
   0x5   :  { %v369_v13 = vld [vmem:[%s790_s0 + $0x18] sm:$0xf0]  ;;  %v483_v15 = vld [vmem:[%s789_s1 + $0x10] sm:$0xff]  ;;  %v477_v17 = vld [vmem:[%s790_s0 + $0x64] sm:$0xf] }
   0x6   :  { %457 = vmatmul.msk.bf16.vlgmr.msra.gmra.mxu1 %vm182_vm0, %v364_v4  ;;  %208 = vmatpush.bf16.msra.mxu0 %v487_v5  ;;  %v372_v14 = vor.u32 %v467_v12, %v369_v13  ;;  %v409_v18 = vld [vmem:[%s790_s0 + $0x68] sm:$0xf0]  ;;  %v481_v20 = vld [vmem:[%s789_s1] sm:$0xff]  ;;  %v466_v22 = vld [vmem:[%s790_s0 + $0x4] sm:$0xf0] }
   0x7   :  { %491 = vmatpush.bf16.msra.mxu2 %v487_v5  ;;  %462 = vmatmul.msk.bf16.vlgmr.msra.gmra.mxu3 %vm182_vm0, %v404_v9  ;;  %v412_v19 = vor.u32 %v477_v17, %v409_v18  ;;  %v359_v21 = vld [vmem:[%s790_s0] sm:$0xf]  ;;  %v474_v24 = vld [vmem:[%s790_s0 + $0x44] sm:$0xf0]  ;;  %v469_v27 = vld [vmem:[%s790_s0 + $0x24] sm:$0xf] }
   0x8   :  { %v391_v23 = vld [vmem:[%s790_s0 + $0x40] sm:$0xf]  ;;  %v360_v25 = vor.u32 %v466_v22, %v359_v21  ;;  %v377_v28 = vld [vmem:[%s790_s0 + $0x28] sm:$0xf0]  ;;  %v479_v30 = vld [vmem:[%s790_s0 + $0x74] sm:$0xf] }
   0x9   :  { %v392_v26 = vor.u32 %v474_v24, %v391_v23  ;;  %v380_v29 = vor.u32 %v469_v27, %v377_v28  ;;  %v417_v31 = vld [vmem:[%s790_s0 + $0x78] sm:$0xf0]  ;;  %v367_v33 = vld [vmem:[%s790_s0 + $0x10] sm:$0xf]  ;;  %v468_v34 = vld [vmem:[%s790_s0 + $0x14] sm:$0xf0] }
   0xa   :  { %209 = vmatpush.bf16.msra.mxu0 %v486_v6  ;;  %v420_v32 = vor.u32 %v479_v30, %v417_v31  ;;  %v399_v35 = vld [vmem:[%s790_s0 + $0x50] sm:$0xf]  ;;  %v476_v36 = vld [vmem:[%s790_s0 + $0x54] sm:$0xf0]  ;;  %v368_v37 = vor.u32 %v468_v34, %v367_v33  ;;  %v471_v39 = vld [vmem:[%s790_s0 + $0x34] sm:$0xf] }
   0xb   :  { %492 = vmatpush.bf16.msra.mxu2 %v486_v6  ;;  %v400_v38 = vor.u32 %v476_v36, %v399_v35  ;;  %v385_v40 = vld [vmem:[%s790_s0 + $0x38] sm:$0xf0]  ;;  %v375_v42 = vld [vmem:[%s790_s0 + $0x20] sm:$0xf]  ;;  %v470_v43 = vld [vmem:[%s790_s0 + $0x24] sm:$0xf0] }
   0xc   :  { %v388_v41 = vor.u32 %v471_v39, %v385_v40  ;;  %v407_v44 = vld [vmem:[%s790_s0 + $0x60] sm:$0xf]  ;;  %v478_v45 = vld [vmem:[%s790_s0 + $0x64] sm:$0xf0]  ;;  %v376_v46 = vor.u32 %v470_v43, %v375_v42  ;;  %v473_v48 = vld [vmem:[%s790_s0 + $0x44] sm:$0xf] }
   0xd   :  { %v408_v47 = vor.u32 %v478_v45, %v407_v44  ;;  %v393_v49 = vld [vmem:[%s790_s0 + $0x48] sm:$0xf0]  ;;  %v383_v51 = vld [vmem:[%s790_s0 + $0x30] sm:$0xf]  ;;  %v472_v52 = vld [vmem:[%s790_s0 + $0x34] sm:$0xf0] }
   0xe   :  { %210 = vmatpush.bf16.msra.mxu0 %v485_v10  ;;  %v396_v50 = vor.u32 %v473_v48, %v393_v49  ;;  %v415_v53 = vld [vmem:[%s790_s0 + $0x70] sm:$0xf]  ;;  %v480_v54 = vld [vmem:[%s790_s0 + $0x74] sm:$0xf0]  ;;  %v384_v55 = vor.u32 %v472_v52, %v383_v51  ;;  %v659_v61 = vld [vmem:[%s791_s2] ss:$0 sm:$0xff] }
   0xf   :  { %493 = vmatpush.bf16.msra.mxu2 %v485_v10  ;;  %v416_v56 = vor.u32 %v480_v54, %v415_v53  ;;  %v305_v0 = vld [vmem:[%s792_s3] sm:$0xff]  ;;  %v306_v7 = vld [vmem:[%s792_s3 + $0x8] sm:$0xff]  ;;  %v315_v22 = vld [vmem:[%s792_s3 + $0x50] sm:$0xff] }
  0x10   :  { %v316_v34 = vld [vmem:[%s792_s3 + $0x58] sm:$0xff]  ;;  %v313_v44 = vld [vmem:[%s792_s3 + $0x40] sm:$0xff]  ;;  %v310_v53 = vld [vmem:[%s792_s3 + $0x28] sm:$0xff] }
  0x12   :  { %211 = vmatpush.bf16.msra.mxu0 %v484_v11 }
  0x13   :  { %494 = vmatpush.bf16.msra.mxu2 %v484_v11 }
  0x16   :  { %458 = vmatmul.msk.bf16.gmra.mxu1 %vm182_vm0, %v372_v14  ;;  %212 = vmatpush.bf16.msra.mxu0 %v483_v15 }
  0x17   :  { %495 = vmatpush.bf16.msra.mxu2 %v483_v15  ;;  %463 = vmatmul.msk.bf16.gmra.mxu3 %vm182_vm0, %v412_v19  ;;  %v307_v15 = vld [vmem:[%s792_s3 + $0x10] sm:$0xff] }
  0x1a   :  { %213 = vmatpush.bf16.msra.mxu0 %v482_v16 }
  0x1b   :  { %496 = vmatpush.bf16.msra.mxu2 %v482_v16 }
  0x1e   :  { %214 = vmatpush.bf16.msra.mxu0 %v481_v20 }
  0x1f   :  { %497 = vmatpush.bf16.msra.mxu2 %v481_v20 }
  0x21   :  { %215 = vmatmul.bf16.vlgmr.msra.gmra.mxu0 %v360_v25 }
  0x22   :  { %235 = vmatmul.bf16.vlgmr.msra.gmra.mxu2 %v392_v26  ;;  %v308_v26 = vld [vmem:[%s792_s3 + $0x18] sm:$0xff] }
  0x26   :  { %459 = vmatmul.msk.bf16.gmra.mxu1 %vm182_vm0, %v380_v29 }
  0x27   :  { %464 = vmatmul.msk.bf16.gmra.mxu3 %vm182_vm0, %v420_v32 }
  0x31   :  { %220 = vmatmul.bf16.gmra.mxu0 %v368_v37  ;;  %v309_v37 = vld [vmem:[%s792_s3 + $0x20] sm:$0xff] }
  0x32   :  { %240 = vmatmul.bf16.gmra.mxu2 %v400_v38 }
  0x36   :  { %460 = vmatmul.msk.bf16.gmra.mxu1 %vm182_vm0, %v388_v41 }
  0x41   :  { %225 = vmatmul.bf16.gmra.mxu0 %v376_v46 }
  0x42   :  { %245 = vmatmul.bf16.gmra.mxu2 %v408_v47 }
  0x46   :  { %461 = vmatmul.msk.bf16.gmra.mxu1 %vm182_vm0, %v396_v50  ;;  %v317_v50 = vld [vmem:[%s792_s3 + $0x60] sm:$0xff] }
  0x51   :  { %230 = vmatmul.bf16.gmra.mxu0 %v384_v55 }
  0x52   :  { %250 = vmatmul.bf16.gmra.mxu2 %v416_v56 }
  0x83   :  { %v265_v57 = vpop.f32.mrf.mxu1 }
  0x8a   :  { %v290_v12 = vpop.f32.mrf.mxu3 }
  0x8b   :  { %v267_v58 = vpop.f32.mrf.mxu1 }
  0x92   :  { %v292_v24 = vpop.f32.mrf.mxu3 }
  0x93   :  { %v270_v59 = vpop.f32.mrf.mxu1 }
  0x9a   :  { %v295_v39 = vpop.f32.mrf.mxu3 }
  0x9b   :  { %v272_v60 = vpop.f32.mrf.mxu1 }
  0x9e   :  { %v216_v62 = vpop.f32.mrf.mxu0 }
  0x9f   :  { %v217_v63 = vadd.f32 %v659_v61, %v216_v62 }
  0xa1   :  { %v266_v1 = vadd.f32 %v265_v57, %v217_v63 }
  0xa3   :  { %v321_v2 = vadd.f32 %v305_v0, %v266_v1  ;;  %v275_v3 = vpop.f32.mrf.mxu1 }
  0xa5   :  { %337 = vst.msk [vmem:[%s793_s4] sm:$0xff] %vm182_vm0, %v321_v2  ;;  %v236_v4 = vpop.f32.mrf.mxu2 }
  0xa6   :  { %v218_v5 = vpop.f32.mrf.mxu0  ;;  %v237_v40 = vadd.f32 %v659_v61, %v236_v4 }
  0xa7   :  { %v219_v6 = vadd.f32 %v659_v61, %v218_v5 }
  0xa9   :  { %v268_v8 = vadd.f32 %v267_v58, %v219_v6  ;;  %v297_v58 = vpop.f32.mrf.mxu3  ;;  %v311_v6 = vld [vmem:[%s792_s3 + $0x30] sm:$0xff] }
  0xab   :  { %v322_v9 = vadd.f32 %v306_v7, %v268_v8  ;;  %v277_v10 = vpop.f32.mrf.mxu1 }
  0xad   :  { %338 = vst.msk [vmem:[%s793_s4 + $0x8] sm:$0xff] %vm182_vm0, %v322_v9  ;;  %v238_v11 = vpop.f32.mrf.mxu2 }
  0xae   :  { %v221_v13 = vpop.f32.mrf.mxu0  ;;  %v239_v55 = vadd.f32 %v659_v61, %v238_v11 }
  0xaf   :  { %v222_v14 = vadd.f32 %v659_v61, %v221_v13 }
  0xb1   :  { %v271_v16 = vadd.f32 %v270_v59, %v222_v14  ;;  %v319_v14 = vld [vmem:[%s792_s3 + $0x70] sm:$0xff] }
  0xb3   :  { %v323_v17 = vadd.f32 %v307_v15, %v271_v16  ;;  %v280_v18 = vpop.f32.mrf.mxu1 }
  0xb5   :  { %339 = vst.msk [vmem:[%s793_s4 + $0x10] sm:$0xff] %vm182_vm0, %v323_v17  ;;  %v241_v19 = vpop.f32.mrf.mxu2  ;;  %v312_v17 = vld [vmem:[%s792_s3 + $0x38] sm:$0xff] }
  0xb6   :  { %v242_v20 = vadd.f32 %v659_v61, %v241_v19  ;;  %v223_v21 = vpop.f32.mrf.mxu0 }
  0xb7   :  { %v224_v23 = vadd.f32 %v659_v61, %v223_v21 }
  0xb8   :  { %v291_v25 = vadd.f32 %v290_v12, %v242_v20 }
  0xb9   :  { %v273_v27 = vadd.f32 %v272_v60, %v224_v23  ;;  %v314_v60 = vld [vmem:[%s792_s3 + $0x48] sm:$0xff] }
  0xba   :  { %v331_v28 = vadd.f32 %v315_v22, %v291_v25 }
  0xbb   :  { %v324_v29 = vadd.f32 %v308_v26, %v273_v27  ;;  %v282_v30 = vpop.f32.mrf.mxu1 }
  0xbc   :  { %347 = vst.msk [vmem:[%s793_s4 + $0x50] sm:$0xff] %vm182_vm0, %v331_v28 }
  0xbd   :  { %340 = vst.msk [vmem:[%s793_s4 + $0x18] sm:$0xff] %vm182_vm0, %v324_v29  ;;  %v243_v31 = vpop.f32.mrf.mxu2 }
  0xbe   :  { %v244_v32 = vadd.f32 %v659_v61, %v243_v31  ;;  %v226_v33 = vpop.f32.mrf.mxu0 }
  0xbf   :  { %v227_v35 = vadd.f32 %v659_v61, %v226_v33 }
  0xc0   :  { %v293_v36 = vadd.f32 %v292_v24, %v244_v32  ;;  %v320_v24 = vld [vmem:[%s792_s3 + $0x78] sm:$0xff] }
  0xc1   :  { %v276_v38 = vadd.f32 %v275_v3, %v227_v35  ;;  %v318_v3 = vld [vmem:[%s792_s3 + $0x68] sm:$0xff] }
  0xc2   :  { %v332_v41 = vadd.f32 %v316_v34, %v293_v36 }
  0xc3   :  { %v325_v42 = vadd.f32 %v309_v37, %v276_v38  ;;  %v285_v43 = vpop.f32.mrf.mxu1 }
  0xc4   :  { %348 = vst.msk [vmem:[%s793_s4 + $0x58] sm:$0xff] %vm182_vm0, %v332_v41  ;;  %v286_v45 = vadd.f32 %v285_v43, %v237_v40 }
  0xc5   :  { %341 = vst.msk [vmem:[%s793_s4 + $0x20] sm:$0xff] %vm182_vm0, %v325_v42  ;;  %v246_v46 = vpop.f32.mrf.mxu2 }
  0xc6   :  { %v329_v47 = vadd.f32 %v313_v44, %v286_v45  ;;  %v247_v48 = vadd.f32 %v659_v61, %v246_v46  ;;  %v228_v49 = vpop.f32.mrf.mxu0 }
  0xc7   :  { %v229_v51 = vadd.f32 %v659_v61, %v228_v49 }
  0xc8   :  { %345 = vst.msk [vmem:[%s793_s4 + $0x40] sm:$0xff] %vm182_vm0, %v329_v47  ;;  %v296_v52 = vadd.f32 %v295_v39, %v247_v48 }
  0xc9   :  { %v278_v54 = vadd.f32 %v277_v10, %v229_v51  ;;  %v300_v10 = vpop.f32.mrf.mxu3 }
  0xca   :  { %v333_v56 = vadd.f32 %v317_v50, %v296_v52 }
  0xcb   :  { %v326_v57 = vadd.f32 %v310_v53, %v278_v54  ;;  %v287_v59 = vpop.f32.mrf.mxu1 }
  0xcc   :  { %349 = vst.msk [vmem:[%s793_s4 + $0x60] sm:$0xff] %vm182_vm0, %v333_v56  ;;  %v288_v62 = vadd.f32 %v287_v59, %v239_v55 }
  0xcd   :  { %342 = vst.msk [vmem:[%s793_s4 + $0x28] sm:$0xff] %vm182_vm0, %v326_v57  ;;  %v248_v63 = vpop.f32.mrf.mxu2 }
  0xce   :  { %v330_v0 = vadd.f32 %v314_v60, %v288_v62  ;;  %v249_v1 = vadd.f32 %v659_v61, %v248_v63  ;;  %v231_v2 = vpop.f32.mrf.mxu0 }
  0xcf   :  { %v232_v4 = vadd.f32 %v659_v61, %v231_v2 }
  0xd0   :  { %346 = vst.msk [vmem:[%s793_s4 + $0x48] sm:$0xff] %vm182_vm0, %v330_v0  ;;  %v298_v5 = vadd.f32 %v297_v58, %v249_v1 }
  0xd1   :  { %v281_v7 = vadd.f32 %v280_v18, %v232_v4  ;;  %v302_v23 = vpop.f32.mrf.mxu3 }
  0xd2   :  { %v334_v8 = vadd.f32 %v318_v3, %v298_v5 }
  0xd3   :  { %v327_v9 = vadd.f32 %v311_v6, %v281_v7 }
  0xd4   :  { %350 = vst.msk [vmem:[%s793_s4 + $0x68] sm:$0xff] %vm182_vm0, %v334_v8 }
  0xd5   :  { %343 = vst.msk [vmem:[%s793_s4 + $0x30] sm:$0xff] %vm182_vm0, %v327_v9  ;;  %v251_v11 = vpop.f32.mrf.mxu2 }
  0xd6   :  { %v252_v12 = vadd.f32 %v659_v61, %v251_v11  ;;  %v233_v13 = vpop.f32.mrf.mxu0 }
  0xd7   :  { %v234_v15 = vadd.f32 %v659_v61, %v233_v13 }
  0xd8   :  { %v301_v16 = vadd.f32 %v300_v10, %v252_v12 }
  0xd9   :  { %v283_v18 = vadd.f32 %v282_v30, %v234_v15 }
  0xda   :  { %v335_v19 = vadd.f32 %v319_v14, %v301_v16 }
  0xdb   :  { %v328_v20 = vadd.f32 %v312_v17, %v283_v18 }
  0xdc   :  { %351 = vst.msk [vmem:[%s793_s4 + $0x70] sm:$0xff] %vm182_vm0, %v335_v19 }
  0xdd   :  { %344 = vst.msk [vmem:[%s793_s4 + $0x38] sm:$0xff] %vm182_vm0, %v328_v20  ;;  %v253_v21 = vpop.f32.mrf.mxu2 }
  0xde   :  { %v254_v22 = vadd.f32 %v659_v61, %v253_v21 }
  0xe0   :  { %v303_v25 = vadd.f32 %v302_v23, %v254_v22 }
  0xe2   :  { %v336_v26 = vadd.f32 %v320_v24, %v303_v25 }
  0xe4   :  { %352 = vst.msk [vmem:[%s793_s4 + $0x78] sm:$0xff] %vm182_vm0, %v336_v26 }

// kernel: att_net_forward.26
= control target key start
LH: loop header
LB: loop body
LE: loop exit
PB: predicated region body
PF: predicated region fallthrough
CT: control target
= control target key end

     0   :  { %vm113_vm0 = vcmask 130048   ;;  %vm166_vm1 = vcmask 261120   ;;  %s343_s1 = inlined_call_operand.vmem [shape: bf16[144,32], index: 1, kind: input, shape index: {}]   ;;  %s344_s0 = inlined_call_operand.vmem [shape: bf16[32,144], index: 0, kind: input, shape index: {}]   ;;  %s345_s2 = inlined_call_operand.vmem [shape: f32[1,32], index: 2, kind: input, shape index: {}]   ;;  %s346_s3 = inlined_call_operand.vmem [shape: f32[32,32], index: 3, kind: output, shape index: {}]  }
   0x1   :  { %v240_v0 = vld [vmem:[%s343_s1 + $0x38] sm:$0xff]  ;;  %v241_v1 = vld [vmem:[%s343_s1 + $0x40] sm:$0xff]  ;;  %v239_v3 = vld [vmem:[%s343_s1 + $0x30] sm:$0xff] }
   0x2   :  { %v229_v2 = vld [vmem:[%s344_s0 + $0x4] sm:$0xf]  ;;  %120 = vmatpush.bf16.msra.mxu0 %v240_v0  ;;  %242 = vmatpush.bf16.msra.mxu2 %v240_v0  ;;  %v179_v4 = vld [vmem:[%s344_s0 + $0x8] sm:$0xf0]  ;;  %v236_v8 = vld [vmem:[%s343_s1 + $0x18] sm:$0xff] }
   0x3   :  { %146 = vmatpush.bf16.msra.mxu1 %v241_v1  ;;  %v182_v5 = vor.u32 %v229_v2, %v179_v4  ;;  %v238_v6 = vld [vmem:[%s343_s1 + $0x28] sm:$0xff]  ;;  %v237_v7 = vld [vmem:[%s343_s1 + $0x20] sm:$0xff]  ;;  %v231_v9 = vld [vmem:[%s344_s0 + $0x14] sm:$0xf] }
   0x4   :  { %v187_v10 = vld [vmem:[%s344_s0 + $0x18] sm:$0xf0]  ;;  %v235_v11 = vld [vmem:[%s343_s1 + $0x10] sm:$0xff]  ;;  %v234_v13 = vld [vmem:[%s343_s1 + $0x8] sm:$0xff] }
   0x5   :  { %v190_v12 = vor.u32 %v231_v9, %v187_v10  ;;  %v233_v14 = vld [vmem:[%s343_s1] sm:$0xff]  ;;  %v230_v16 = vld [vmem:[%s344_s0 + $0x4] sm:$0xf0]  ;;  %v185_v17 = vld [vmem:[%s344_s0 + $0x10] sm:$0xf] }
   0x6   :  { %121 = vmatpush.bf16.msra.mxu0 %v239_v3  ;;  %243 = vmatpush.bf16.msra.mxu2 %v239_v3  ;;  %v177_v15 = vld [vmem:[%s344_s0] sm:$0xf]  ;;  %v232_v18 = vld [vmem:[%s344_s0 + $0x14] sm:$0xf0] }
   0x7   :  { %227 = vmatmul.msk.bf16.vlgmr.msra.gmra.mxu1 %vm113_vm0, %v182_v5  ;;  %v178_v19 = vor.u32 %v230_v16, %v177_v15  ;;  %v186_v20 = vor.u32 %v232_v18, %v185_v17  ;;  %v250_v23 = vld [vmem:[%s345_s2] ss:$0 sm:$0xff] }
   0xa   :  { %122 = vmatpush.bf16.msra.mxu0 %v238_v6  ;;  %244 = vmatpush.bf16.msra.mxu2 %v238_v6 }
   0xe   :  { %123 = vmatpush.bf16.msra.mxu0 %v237_v7  ;;  %245 = vmatpush.bf16.msra.mxu2 %v237_v7 }
  0x12   :  { %124 = vmatpush.bf16.msra.mxu0 %v236_v8  ;;  %246 = vmatpush.bf16.msra.mxu2 %v236_v8 }
  0x16   :  { %125 = vmatpush.bf16.msra.mxu0 %v235_v11  ;;  %247 = vmatpush.bf16.msra.mxu2 %v235_v11 }
  0x17   :  { %228 = vmatmul.msk.bf16.gmra.mxu1 %vm113_vm0, %v190_v12 }
  0x1a   :  { %126 = vmatpush.bf16.msra.mxu0 %v234_v13  ;;  %248 = vmatpush.bf16.msra.mxu2 %v234_v13 }
  0x1e   :  { %127 = vmatpush.bf16.msra.mxu0 %v233_v14  ;;  %249 = vmatpush.bf16.msra.mxu2 %v233_v14 }
  0x21   :  { %128 = vmatmul.bf16.vlgmr.msra.gmra.mxu0 %v178_v19  ;;  %133 = vmatmul.bf16.vlgmr.msra.gmra.mxu2 %v186_v20 }
  0x84   :  { %v148_v21 = vpop.f32.mrf.mxu1 }
  0x8c   :  { %v150_v22 = vpop.f32.mrf.mxu1 }
  0x94   :  { %v153_v28 = vpop.f32.mrf.mxu1 }
  0x9c   :  { %v155_v42 = vpop.f32.mrf.mxu1 }
  0x9e   :  { %v129_v24 = vpop.f32.mrf.mxu0 }
  0x9f   :  { %v130_v25 = vadd.f32 %v250_v23, %v129_v24 }
  0xa1   :  { %v149_v26 = vadd.f32 %v148_v21, %v130_v25 }
  0xa3   :  { %v158_v27 = vmax.f32 %v149_v26, 0.0 }
  0xa4   :  { %v134_v29 = vpop.f32.mrf.mxu2 }
  0xa5   :  { %v162_v30 = vmin.f32 %v158_v27, 6.0  ;;  %v135_v31 = vadd.f32 %v250_v23, %v134_v29 }
  0xa6   :  { %v131_v32 = vpop.f32.mrf.mxu0 }
  0xa7   :  { %167 = vst.msk [vmem:[%s346_s3] sm:$0xff] %vm166_vm1, %v162_v30  ;;  %v154_v33 = vadd.f32 %v153_v28, %v135_v31  ;;  %v132_v34 = vadd.f32 %v250_v23, %v131_v32 }
  0xa9   :  { %v160_v35 = vmax.f32 %v154_v33, 0.0  ;;  %v151_v36 = vadd.f32 %v150_v22, %v132_v34 }
  0xab   :  { %v164_v37 = vmin.f32 %v160_v35, 6.0  ;;  %v159_v38 = vmax.f32 %v151_v36, 0.0 }
  0xac   :  { %v136_v39 = vpop.f32.mrf.mxu2 }
  0xad   :  { %169 = vst.msk [vmem:[%s346_s3 + $0x10] sm:$0xff] %vm166_vm1, %v164_v37  ;;  %v163_v40 = vmin.f32 %v159_v38, 6.0  ;;  %v137_v41 = vadd.f32 %v250_v23, %v136_v39 }
  0xaf   :  { %168 = vst.msk [vmem:[%s346_s3 + $0x8] sm:$0xff] %vm166_vm1, %v163_v40  ;;  %v156_v43 = vadd.f32 %v155_v42, %v137_v41 }
  0xb1   :  { %v161_v44 = vmax.f32 %v156_v43, 0.0 }
  0xb3   :  { %v165_v45 = vmin.f32 %v161_v44, 6.0 }
  0xb5   :  { %170 = vst.msk [vmem:[%s346_s3 + $0x18] sm:$0xff] %vm166_vm1, %v165_v45 }

// kernel: att_net_forward.27
= control target key start
LH: loop header
LB: loop body
LE: loop exit
PB: predicated region body
PF: predicated region fallthrough
CT: control target
= control target key end

     0   :  { %vm41_vm0 = vcmask 130048   ;;  %vm75_vm1 = vcmask 261120   ;;  %s147_s1 = inlined_call_operand.vmem [shape: bf16[16,32], index: 1, kind: input, shape index: {}]   ;;  %s148_s0 = inlined_call_operand.vmem [shape: bf16[32,16], index: 0, kind: input, shape index: {}]   ;;  %s149_s2 = inlined_call_operand.vmem [shape: f32[1,32], index: 2, kind: input, shape index: {}]   ;;  %s150_s3 = inlined_call_operand.vmem [shape: f32[32,32], index: 3, kind: output, shape index: {}]  }
   0x1   :  { %v100_v0 = vld [vmem:[%s147_s1] sm:$0xff]  ;;  %v99_v2 = vld [vmem:[%s148_s0 + $0x8] sm:$0xff] }
   0x2   :  { %v98_v1 = vld [vmem:[%s148_s0] sm:$0xff]  ;;  %55 = vmatpush.bf16.msra.mxu0 %v100_v0  ;;  %101 = vmatpush.bf16.msra.mxu1 %v100_v0 }
   0x3   :  { %v102_v3 = vld [vmem:[%s149_s2] ss:$0 sm:$0xff] }
   0x5   :  { %96 = vmatmul.msk.bf16.vlgmr.msra.gmra.mxu0 %vm41_vm0, %v98_v1  ;;  %97 = vmatmul.msk.bf16.vlgmr.msra.gmra.mxu1 %vm41_vm0, %v99_v2 }
  0x82   :  { %v57_v4 = vpop.f32.mrf.mxu0  ;;  %v62_v5 = vpop.f32.mrf.mxu1 }
  0x83   :  { %v58_v6 = vadd.f32 %v102_v3, %v57_v4  ;;  %v63_v7 = vadd.f32 %v102_v3, %v62_v5 }
  0x85   :  { %v67_v8 = vmax.f32 %v58_v6, 0.0  ;;  %v69_v9 = vmax.f32 %v63_v7, 0.0 }
  0x87   :  { %v71_v10 = vmin.f32 %v67_v8, 6.0  ;;  %v73_v11 = vmin.f32 %v69_v9, 6.0 }
  0x89   :  { %76 = vst.msk [vmem:[%s150_s3] sm:$0xff] %vm75_vm1, %v71_v10 }
  0x8a   :  { %78 = vst.msk [vmem:[%s150_s3 + $0x10] sm:$0xff] %vm75_vm1, %v73_v11  ;;  %v59_v12 = vpop.f32.mrf.mxu0  ;;  %v64_v13 = vpop.f32.mrf.mxu1 }
  0x8b   :  { %v60_v14 = vadd.f32 %v102_v3, %v59_v12  ;;  %v65_v15 = vadd.f32 %v102_v3, %v64_v13 }
  0x8d   :  { %v68_v16 = vmax.f32 %v60_v14, 0.0  ;;  %v70_v17 = vmax.f32 %v65_v15, 0.0 }
  0x8f   :  { %v72_v18 = vmin.f32 %v68_v16, 6.0  ;;  %v74_v19 = vmin.f32 %v70_v17, 6.0 }
  0x91   :  { %77 = vst.msk [vmem:[%s150_s3 + $0x8] sm:$0xff] %vm75_vm1, %v72_v18 }
  0x92   :  { %79 = vst.msk [vmem:[%s150_s3 + $0x18] sm:$0xff] %vm75_vm1, %v74_v19 }

// kernel: att_net_forward.28
= control target key start
LH: loop header
LB: loop body
LE: loop exit
PB: predicated region body
PF: predicated region fallthrough
CT: control target
= control target key end

     0   :  { %vm204_vm0 = vcmask 261120   ;;  %s563_s1 = inlined_call_operand.vmem [shape: bf16[288,32], index: 1, kind: input, shape index: {}]   ;;  %s564_s0 = inlined_call_operand.vmem [shape: bf16[32,288], index: 0, kind: input, shape index: {}]   ;;  %s565_s2 = inlined_call_operand.vmem [shape: f32[1,32], index: 2, kind: input, shape index: {}]   ;;  %s566_s3 = inlined_call_operand.vmem [shape: f32[32,32], index: 3, kind: input, shape index: {}]   ;;  %s567_s4 = inlined_call_operand.vmem [shape: f32[32,32], index: 4, kind: output, shape index: {}]  }
   0x1   :  { %v395_v0 = vld [vmem:[%s563_s1 + $0x38] sm:$0xff]  ;;  %v394_v2 = vld [vmem:[%s563_s1 + $0x30] sm:$0xff]  ;;  %v405_v3 = vld [vmem:[%s563_s1 + $0x88] sm:$0xff] }
   0x2   :  { %v403_v1 = vld [vmem:[%s563_s1 + $0x78] sm:$0xff]  ;;  %211 = vmatpush.bf16.msra.mxu0 %v395_v0  ;;  %406 = vmatpush.bf16.msra.mxu3 %v395_v0  ;;  %v402_v4 = vld [vmem:[%s563_s1 + $0x70] sm:$0xff]  ;;  %v404_v5 = vld [vmem:[%s563_s1 + $0x80] sm:$0xff] }
   0x3   :  { %230 = vmatpush.bf16.msra.mxu1 %v403_v1  ;;  %255 = vmatpush.bf16.msra.mxu2 %v405_v3  ;;  %v294_v6 = vld [vmem:[%s564_s0 + $0x8] sm:$0xf]  ;;  %v384_v7 = vld [vmem:[%s564_s0 + $0x10] sm:$0xf0]  ;;  %v392_v11 = vld [vmem:[%s563_s1 + $0x20] sm:$0xff] }
   0x4   :  { %v393_v8 = vld [vmem:[%s563_s1 + $0x28] sm:$0xff]  ;;  %v295_v10 = vor.u32 %v384_v7, %v294_v6  ;;  %v400_v12 = vld [vmem:[%s563_s1 + $0x60] sm:$0xff]  ;;  %v391_v13 = vld [vmem:[%s563_s1 + $0x18] sm:$0xff] }
   0x5   :  { %v401_v9 = vld [vmem:[%s563_s1 + $0x68] sm:$0xff]  ;;  %v399_v14 = vld [vmem:[%s563_s1 + $0x58] sm:$0xff]  ;;  %v390_v15 = vld [vmem:[%s563_s1 + $0x10] sm:$0xff] }
   0x6   :  { %212 = vmatpush.bf16.msra.mxu0 %v394_v2  ;;  %407 = vmatpush.bf16.msra.mxu3 %v394_v2  ;;  %v398_v16 = vld [vmem:[%s563_s1 + $0x50] sm:$0xff]  ;;  %v306_v17 = vld [vmem:[%s564_s0 + $0x20] sm:$0xf]  ;;  %v387_v18 = vld [vmem:[%s564_s0 + $0x28] sm:$0xf0] }
   0x7   :  { %231 = vmatpush.bf16.msra.mxu1 %v402_v4  ;;  %256 = vmatpush.bf16.msra.mxu2 %v404_v5  ;;  %v389_v19 = vld [vmem:[%s563_s1 + $0x8] sm:$0xff]  ;;  %v307_v21 = vor.u32 %v387_v18, %v306_v17  ;;  %v388_v22 = vld [vmem:[%s563_s1] sm:$0xff]  ;;  %v298_v25 = vld [vmem:[%s564_s0 + $0x18] sm:$0xf] }
   0x8   :  { %v397_v20 = vld [vmem:[%s563_s1 + $0x48] sm:$0xff]  ;;  %v286_v23 = vld [vmem:[%s564_s0] sm:$0xf]  ;;  %v386_v26 = vld [vmem:[%s564_s0 + $0x20] sm:$0xf0] }
   0x9   :  { %v383_v24 = vld [vmem:[%s564_s0 + $0x8] sm:$0xf0]  ;;  %v396_v27 = vld [vmem:[%s563_s1 + $0x40] sm:$0xff]  ;;  %v288_v29 = vld [vmem:[%s564_s0 + $0xc] sm:$0xf0]  ;;  %v299_v31 = vor.u32 %v386_v26, %v298_v25 }
   0xa   :  { %213 = vmatpush.bf16.msra.mxu0 %v393_v8  ;;  %408 = vmatpush.bf16.msra.mxu3 %v393_v8  ;;  %v382_v28 = vld [vmem:[%s564_s0 + $0x4] sm:$0xf]  ;;  %v287_v30 = vor.u32 %v383_v24, %v286_v23  ;;  %v385_v33 = vld [vmem:[%s564_s0 + $0x1c] sm:$0xf]  ;;  %v300_v34 = vld [vmem:[%s564_s0 + $0x24] sm:$0xf0] }
   0xb   :  { %232 = vmatpush.bf16.msra.mxu1 %v401_v9  ;;  %380 = vmatmul.msk.bf16.vlgmr.msra.gmra.mxu2 %vm204_vm0, %v295_v10  ;;  %v291_v32 = vor.u32 %v382_v28, %v288_v29  ;;  %v303_v35 = vor.u32 %v385_v33, %v300_v34  ;;  %v414_v37 = vld [vmem:[%s565_s2] ss:$0 sm:$0xff]  ;;  %v269_v51 = vld [vmem:[%s566_s3 + $0x8] sm:$0xff]  ;;  %v270_v58 = vld [vmem:[%s566_s3 + $0x10] sm:$0xff] }
   0xc   :  { %v268_v42 = vld [vmem:[%s566_s3] sm:$0xff]  ;;  %v271_v2 = vld [vmem:[%s566_s3 + $0x18] sm:$0xff] }
   0xe   :  { %214 = vmatpush.bf16.msra.mxu0 %v392_v11  ;;  %409 = vmatpush.bf16.msra.mxu3 %v392_v11 }
   0xf   :  { %233 = vmatpush.bf16.msra.mxu1 %v400_v12 }
  0x12   :  { %215 = vmatpush.bf16.msra.mxu0 %v391_v13  ;;  %410 = vmatpush.bf16.msra.mxu3 %v391_v13 }
  0x13   :  { %234 = vmatpush.bf16.msra.mxu1 %v399_v14 }
  0x16   :  { %216 = vmatpush.bf16.msra.mxu0 %v390_v15  ;;  %411 = vmatpush.bf16.msra.mxu3 %v390_v15 }
  0x17   :  { %235 = vmatpush.bf16.msra.mxu1 %v398_v16 }
  0x1a   :  { %217 = vmatpush.bf16.msra.mxu0 %v389_v19  ;;  %412 = vmatpush.bf16.msra.mxu3 %v389_v19 }
  0x1b   :  { %236 = vmatpush.bf16.msra.mxu1 %v397_v20  ;;  %381 = vmatmul.msk.bf16.gmra.mxu2 %vm204_vm0, %v307_v21 }
  0x1e   :  { %218 = vmatpush.bf16.msra.mxu0 %v388_v22  ;;  %413 = vmatpush.bf16.msra.mxu3 %v388_v22 }
  0x1f   :  { %237 = vmatpush.bf16.msra.mxu1 %v396_v27 }
  0x21   :  { %219 = vmatmul.bf16.vlgmr.msra.gmra.mxu0 %v287_v30  ;;  %224 = vmatmul.bf16.vlgmr.msra.gmra.mxu3 %v299_v31 }
  0x22   :  { %238 = vmatmul.bf16.vlgmr.msra.gmra.mxu1 %v291_v32 }
  0x32   :  { %243 = vmatmul.bf16.gmra.mxu1 %v303_v35 }
  0x8e   :  { %v258_v36 = vpop.f32.mrf.mxu2 }
  0x96   :  { %v260_v45 = vpop.f32.mrf.mxu2 }
  0x9e   :  { %v220_v38 = vpop.f32.mrf.mxu0  ;;  %v263_v55 = vpop.f32.mrf.mxu2 }
  0x9f   :  { %v221_v39 = vadd.f32 %v414_v37, %v220_v38  ;;  %v239_v40 = vpop.f32.mrf.mxu1 }
  0xa1   :  { %v240_v41 = vadd.f32 %v239_v40, %v221_v39 }
  0xa3   :  { %v259_v43 = vadd.f32 %v258_v36, %v240_v41 }
  0xa4   :  { %v225_v49 = vpop.f32.mrf.mxu3 }
  0xa5   :  { %v272_v44 = vadd.f32 %v268_v42, %v259_v43  ;;  %v226_v53 = vadd.f32 %v414_v37, %v225_v49 }
  0xa6   :  { %v222_v46 = vpop.f32.mrf.mxu0  ;;  %v265_v1 = vpop.f32.mrf.mxu2 }
  0xa7   :  { %276 = vst.msk [vmem:[%s567_s4] sm:$0xff] %vm204_vm0, %v272_v44  ;;  %v223_v47 = vadd.f32 %v414_v37, %v222_v46  ;;  %v241_v48 = vpop.f32.mrf.mxu1 }
  0xa9   :  { %v242_v50 = vadd.f32 %v241_v48, %v223_v47 }
  0xab   :  { %v261_v52 = vadd.f32 %v260_v45, %v242_v50 }
  0xac   :  { %v227_v60 = vpop.f32.mrf.mxu3 }
  0xad   :  { %v273_v54 = vadd.f32 %v269_v51, %v261_v52  ;;  %v228_v62 = vadd.f32 %v414_v37, %v227_v60 }
  0xaf   :  { %277 = vst.msk [vmem:[%s567_s4 + $0x8] sm:$0xff] %vm204_vm0, %v273_v54  ;;  %v244_v56 = vpop.f32.mrf.mxu1 }
  0xb0   :  { %v245_v57 = vadd.f32 %v244_v56, %v226_v53 }
  0xb2   :  { %v264_v59 = vadd.f32 %v263_v55, %v245_v57 }
  0xb4   :  { %v274_v61 = vadd.f32 %v270_v58, %v264_v59 }
  0xb6   :  { %278 = vst.msk [vmem:[%s567_s4 + $0x10] sm:$0xff] %vm204_vm0, %v274_v61 }
  0xb7   :  { %v246_v63 = vpop.f32.mrf.mxu1 }
  0xb8   :  { %v247_v0 = vadd.f32 %v246_v63, %v228_v62 }
  0xba   :  { %v266_v3 = vadd.f32 %v265_v1, %v247_v0 }
  0xbc   :  { %v275_v4 = vadd.f32 %v271_v2, %v266_v3 }
  0xbe   :  { %279 = vst.msk [vmem:[%s567_s4 + $0x18] sm:$0xff] %vm204_vm0, %v275_v4 }

// kernel: att_net_forward.29
= control target key start
LH: loop header
LB: loop body
LE: loop exit
PB: predicated region body
PF: predicated region fallthrough
CT: control target
= control target key end

     0   :  { %vm115_vm0 = vcmask 261120   ;;  %s535_s1 = inlined_call_operand.vmem [shape: bf16[32,768], index: 1, kind: input, shape index: {}]   ;;  %s536_s0 = inlined_call_operand.vmem [shape: bf16[32,32], index: 0, kind: input, shape index: {}]   ;;  %s537_s2 = inlined_call_operand.vmem [shape: f32[1,768], index: 2, kind: input, shape index: {}]   ;;  %s538_s3 = inlined_call_operand.vmem [shape: f32[32,768], index: 3, kind: output, shape index: {}]  }
   0x1   :  { %v298_v0 = vld [vmem:[%s535_s1 + $0x30] sm:$0xf]  ;;  %v343_v1 = vld [vmem:[%s535_s1 + $0x44] sm:$0xf0]  ;;  %v340_v2 = vld [vmem:[%s535_s1 + $0x34] sm:$0xf] }
   0x2   :  { %v299_v3 = vor.u32 %v343_v1, %v298_v0  ;;  %v300_v4 = vld [vmem:[%s535_s1 + $0x48] sm:$0xf0]  ;;  %v274_v5 = vld [vmem:[%s535_s1] sm:$0xf]  ;;  %v337_v6 = vld [vmem:[%s535_s1 + $0x14] sm:$0xf0] }
   0x3   :  { %v303_v7 = vor.u32 %v340_v2, %v300_v4  ;;  %v334_v8 = vld [vmem:[%s535_s1 + $0x4] sm:$0xf]  ;;  %v276_v9 = vld [vmem:[%s535_s1 + $0x18] sm:$0xf0]  ;;  %v275_v10 = vor.u32 %v337_v6, %v274_v5  ;;  %v306_v11 = vld [vmem:[%s535_s1 + $0x38] sm:$0xf] }
   0x4   :  { %128 = vmatpush.bf16.msra.mxu0 %v299_v3  ;;  %346 = vmatpush.bf16.msra.mxu2 %v299_v3  ;;  %v344_v12 = vld [vmem:[%s535_s1 + $0x4c] sm:$0xf0]  ;;  %v279_v13 = vor.u32 %v334_v8, %v276_v9  ;;  %v332_v14 = vld [vmem:[%s536_s0] sm:$0xff]  ;;  %v333_v15 = vld [vmem:[%s536_s0 + $0x8] sm:$0xff] }
   0x5   :  { %147 = vmatpush.bf16.msra.mxu1 %v303_v7  ;;  %348 = vmatpush.bf16.msra.mxu3 %v303_v7  ;;  %v341_v16 = vld [vmem:[%s535_s1 + $0x3c] sm:$0xf]  ;;  %v308_v17 = vld [vmem:[%s535_s1 + $0x50] sm:$0xf0]  ;;  %v314_v18 = vld [vmem:[%s535_s1 + $0x40] sm:$0xf]  ;;  %v307_v19 = vor.u32 %v344_v12, %v306_v11 }
   0x6   :  { %v311_v20 = vor.u32 %v341_v16, %v308_v17  ;;  %v345_v21 = vld [vmem:[%s535_s1 + $0x54] sm:$0xf0]  ;;  %v342_v22 = vld [vmem:[%s535_s1 + $0x44] sm:$0xf]  ;;  %v316_v23 = vld [vmem:[%s535_s1 + $0x58] sm:$0xf0] }
   0x7   :  { %v282_v24 = vld [vmem:[%s535_s1 + $0x8] sm:$0xf]  ;;  %v338_v25 = vld [vmem:[%s535_s1 + $0x1c] sm:$0xf0]  ;;  %v335_v26 = vld [vmem:[%s535_s1 + $0xc] sm:$0xf]  ;;  %v315_v28 = vor.u32 %v345_v21, %v314_v18  ;;  %v319_v29 = vor.u32 %v342_v22, %v316_v23 }
   0x8   :  { %129 = vmatpush.bf16.msra.mxu0 %v275_v10  ;;  %347 = vmatpush.bf16.msra.mxu2 %v275_v10  ;;  %v284_v27 = vld [vmem:[%s535_s1 + $0x20] sm:$0xf0]  ;;  %v290_v30 = vld [vmem:[%s535_s1 + $0x10] sm:$0xf]  ;;  %v283_v31 = vor.u32 %v338_v25, %v282_v24  ;;  %v339_v33 = vld [vmem:[%s535_s1 + $0x24] sm:$0xf0] }
   0x9   :  { %148 = vmatpush.bf16.msra.mxu1 %v279_v13  ;;  %349 = vmatpush.bf16.msra.mxu3 %v279_v13  ;;  %v287_v32 = vor.u32 %v335_v26, %v284_v27  ;;  %v336_v34 = vld [vmem:[%s535_s1 + $0x14] sm:$0xf]  ;;  %v292_v35 = vld [vmem:[%s535_s1 + $0x28] sm:$0xf0]  ;;  %v291_v36 = vor.u32 %v339_v33, %v290_v30  ;;  %v31_v38 = vld [vmem:[%s537_s2] sm:$0x3f] }
   0xa   :  { %v295_v37 = vor.u32 %v336_v34, %v292_v35  ;;  %v33_v39 = vperm.slane %v31_v38, 0  ;;  %v34_v40 = vperm.slane %v31_v38, 1  ;;  %v37_v53 = vperm.slane %v31_v38, 4 }
   0xb   :  { %320 = vmatmul.msk.bf16.vlgmr.msra.gmra.mxu0 %vm115_vm0, %v332_v14  ;;  %321 = vmatmul.msk.bf16.vlgmr.msra.gmra.mxu2 %vm115_vm0, %v333_v15  ;;  %v38_v55 = vperm.slane %v31_v38, 5  ;;  %v35_v63 = vperm.slane %v31_v38, 2  ;;  %v36_v0 = vperm.slane %v31_v38, 3 }
   0xc   :  { %166 = vmatpush.bf16.msrb.mxu2 %v307_v19  ;;  %322 = vmatmul.msk.bf16.vlgmr.msra.gmra.mxu1 %vm115_vm0, %v332_v14 }
   0xd   :  { %185 = vmatpush.bf16.msrb.mxu3 %v311_v20  ;;  %204 = vmatpush.bf16.msrb.mxu0 %v315_v28 }
   0xe   :  { %323 = vmatmul.msk.bf16.vlgmr.msra.gmra.mxu3 %vm115_vm0, %v333_v15  ;;  %223 = vmatpush.bf16.msrb.mxu1 %v319_v29 }
  0x10   :  { %167 = vmatpush.bf16.msrb.mxu2 %v283_v31 }
  0x11   :  { %186 = vmatpush.bf16.msrb.mxu3 %v287_v32  ;;  %205 = vmatpush.bf16.msrb.mxu0 %v291_v36 }
  0x12   :  { %224 = vmatpush.bf16.msrb.mxu1 %v295_v37 }
  0x1b   :  { %324 = vmatmul.msk.bf16.vlgmr.msrb.gmra.mxu2 %vm115_vm0, %v332_v14  ;;  %328 = vmatmul.msk.bf16.vlgmr.msrb.gmra.mxu0 %vm115_vm0, %v332_v14 }
  0x1c   :  { %330 = vmatmul.msk.bf16.vlgmr.msrb.gmra.mxu1 %vm115_vm0, %v332_v14 }
  0x1e   :  { %326 = vmatmul.msk.bf16.vlgmr.msrb.gmra.mxu3 %vm115_vm0, %v332_v14 }
  0x2b   :  { %325 = vmatmul.msk.bf16.gmra.mxu2 %vm115_vm0, %v333_v15  ;;  %329 = vmatmul.msk.bf16.gmra.mxu0 %vm115_vm0, %v333_v15 }
  0x2c   :  { %331 = vmatmul.msk.bf16.gmra.mxu1 %vm115_vm0, %v333_v15 }
  0x2e   :  { %327 = vmatmul.msk.bf16.gmra.mxu3 %vm115_vm0, %v333_v15 }
  0x88   :  { %v131_v41 = vpop.f32.mrf.mxu0 }
  0x89   :  { %v132_v42 = vadd.f32 %v131_v41, %v33_v39  ;;  %v150_v43 = vpop.f32.mrf.mxu1 }
  0x8a   :  { %v151_v44 = vadd.f32 %v150_v43, %v34_v40 }
  0x8b   :  { %236 = vst [vmem:[%s538_s3] sm:$0xff] %v132_v42 }
  0x8c   :  { %237 = vst [vmem:[%s538_s3 + $0x8] sm:$0xff] %v151_v44 }
  0x8e   :  { %v136_v45 = vpop.f32.mrf.mxu2 }
  0x8f   :  { %v137_v46 = vadd.f32 %v136_v45, %v33_v39 }
  0x90   :  { %v133_v49 = vpop.f32.mrf.mxu0 }
  0x91   :  { %v155_v47 = vpop.f32.mrf.mxu3  ;;  %248 = vst [vmem:[%s538_s3 + $0x60] sm:$0xff] %v137_v46  ;;  %v134_v50 = vadd.f32 %v133_v49, %v33_v39  ;;  %v152_v51 = vpop.f32.mrf.mxu1 }
  0x92   :  { %v156_v48 = vadd.f32 %v155_v47, %v34_v40  ;;  %v153_v52 = vadd.f32 %v152_v51, %v34_v40 }
  0x93   :  { %242 = vst [vmem:[%s538_s3 + $0x30] sm:$0xff] %v134_v50 }
  0x94   :  { %249 = vst [vmem:[%s538_s3 + $0x68] sm:$0xff] %v156_v48 }
  0x95   :  { %243 = vst [vmem:[%s538_s3 + $0x38] sm:$0xff] %v153_v52 }
  0x96   :  { %v138_v54 = vpop.f32.mrf.mxu2 }
  0x97   :  { %v139_v56 = vadd.f32 %v138_v54, %v33_v39 }
  0x98   :  { %v207_v59 = vpop.f32.mrf.mxu0 }
  0x99   :  { %v157_v57 = vpop.f32.mrf.mxu3  ;;  %254 = vst [vmem:[%s538_s3 + $0x90] sm:$0xff] %v139_v56  ;;  %v208_v60 = vadd.f32 %v207_v59, %v37_v53  ;;  %v226_v61 = vpop.f32.mrf.mxu1 }
  0x9a   :  { %v158_v58 = vadd.f32 %v157_v57, %v34_v40  ;;  %v227_v62 = vadd.f32 %v226_v61, %v38_v55 }
  0x9b   :  { %240 = vst [vmem:[%s538_s3 + $0x20] sm:$0xff] %v208_v60 }
  0x9c   :  { %255 = vst [vmem:[%s538_s3 + $0x98] sm:$0xff] %v158_v58 }
  0x9d   :  { %241 = vst [vmem:[%s538_s3 + $0x28] sm:$0xff] %v227_v62 }
  0x9e   :  { %v169_v1 = vpop.f32.mrf.mxu2 }
  0x9f   :  { %v170_v2 = vadd.f32 %v169_v1, %v35_v63 }
  0xa0   :  { %v209_v5 = vpop.f32.mrf.mxu0 }
  0xa1   :  { %v188_v3 = vpop.f32.mrf.mxu3  ;;  %238 = vst [vmem:[%s538_s3 + $0x10] sm:$0xff] %v170_v2  ;;  %v210_v6 = vadd.f32 %v209_v5, %v37_v53  ;;  %v228_v7 = vpop.f32.mrf.mxu1 }
  0xa2   :  { %v189_v4 = vadd.f32 %v188_v3, %v36_v0  ;;  %v229_v8 = vadd.f32 %v228_v7, %v38_v55 }
  0xa3   :  { %246 = vst [vmem:[%s538_s3 + $0x50] sm:$0xff] %v210_v6 }
  0xa4   :  { %239 = vst [vmem:[%s538_s3 + $0x18] sm:$0xff] %v189_v4 }
  0xa5   :  { %247 = vst [vmem:[%s538_s3 + $0x58] sm:$0xff] %v229_v8 }
  0xa6   :  { %v171_v9 = vpop.f32.mrf.mxu2 }
  0xa7   :  { %v172_v10 = vadd.f32 %v171_v9, %v35_v63 }
  0xa8   :  { %v212_v13 = vpop.f32.mrf.mxu0 }
  0xa9   :  { %v190_v11 = vpop.f32.mrf.mxu3  ;;  %244 = vst [vmem:[%s538_s3 + $0x40] sm:$0xff] %v172_v10  ;;  %v213_v14 = vadd.f32 %v212_v13, %v37_v53  ;;  %v231_v15 = vpop.f32.mrf.mxu1 }
  0xaa   :  { %v191_v12 = vadd.f32 %v190_v11, %v36_v0  ;;  %v232_v16 = vadd.f32 %v231_v15, %v38_v55 }
  0xab   :  { %252 = vst [vmem:[%s538_s3 + $0x80] sm:$0xff] %v213_v14 }
  0xac   :  { %245 = vst [vmem:[%s538_s3 + $0x48] sm:$0xff] %v191_v12 }
  0xad   :  { %253 = vst [vmem:[%s538_s3 + $0x88] sm:$0xff] %v232_v16 }
  0xae   :  { %v174_v17 = vpop.f32.mrf.mxu2 }
  0xaf   :  { %v175_v18 = vadd.f32 %v174_v17, %v35_v63 }
  0xb0   :  { %v214_v21 = vpop.f32.mrf.mxu0 }
  0xb1   :  { %v193_v19 = vpop.f32.mrf.mxu3  ;;  %250 = vst [vmem:[%s538_s3 + $0x70] sm:$0xff] %v175_v18  ;;  %v215_v22 = vadd.f32 %v214_v21, %v37_v53  ;;  %v233_v23 = vpop.f32.mrf.mxu1 }
  0xb2   :  { %v194_v20 = vadd.f32 %v193_v19, %v36_v0  ;;  %v234_v24 = vadd.f32 %v233_v23, %v38_v55 }
  0xb3   :  { %258 = vst [vmem:[%s538_s3 + $0xb0] sm:$0xff] %v215_v22 }
  0xb4   :  { %251 = vst [vmem:[%s538_s3 + $0x78] sm:$0xff] %v194_v20 }
  0xb5   :  { %259 = vst [vmem:[%s538_s3 + $0xb8] sm:$0xff] %v234_v24 }
  0xb6   :  { %v176_v25 = vpop.f32.mrf.mxu2 }
  0xb7   :  { %v177_v26 = vadd.f32 %v176_v25, %v35_v63 }
  0xb9   :  { %v195_v27 = vpop.f32.mrf.mxu3  ;;  %256 = vst [vmem:[%s538_s3 + $0xa0] sm:$0xff] %v177_v26 }
  0xba   :  { %v196_v28 = vadd.f32 %v195_v27, %v36_v0 }
  0xbc   :  { %257 = vst [vmem:[%s538_s3 + $0xa8] sm:$0xff] %v196_v28 }

// kernel: att_net_forward.30
= control target key start
LH: loop header
LB: loop body
LE: loop exit
PB: predicated region body
PF: predicated region fallthrough
CT: control target
= control target key end

     0   :  { %s1309_s12 = smov 0   ;;  %s1569_s0 = inlined_call_operand.vmem [shape: bf16[16,16,32], index: 0, kind: input, shape index: {}]   ;;  %s1570_s1 = inlined_call_operand.vmem [shape: bf16[16,16,32], index: 1, kind: input, shape index: {}]   ;;  %s1571_s2 = inlined_call_operand.vmem [shape: bf16[16,16,32], index: 2, kind: input, shape index: {}]   ;;  %s1572_s3 = inlined_call_operand.vmem [shape: f32[16,16,32], index: 3, kind: output, shape index: {}]  }
   0x1 LB: > { %s1050_s13 = sadd.s32 4294967295, %s1287_s12   ;;  %p1054_p0 = scmp.ge.s32.totalorder %s1287_s12, 1  ;;  %s1287_s12 = sphi %s1309_s12, %s13_s12  }
   0x2   : > { %p163_p1 = scmp.lt.s32.totalorder %s1287_s12, 3 }
   0x4   : > { %p164_p2 = pnand %p1054_p0, %p163_p1 }
   0x5   : > { %s1055_s14 = sshll.u32 (!%p164_p2), %s1050_s13, 3 }
   0x6   : > { %167 = sbr.rel (%p164_p2) target bundleno = 590 (0x24e), region = 32  ;;  %p202_p3 = scmp.lt.s32.totalorder (!%p164_p2), %s1055_s14, 15 }
   0xb   : > { %s1574_s14 = smov (!%p202_p3, %s1055_s14), 15  ;;  %vm288_vm0 = vcmask 261120   ;;  %vm535_vm1 = vcmask 130048  }
   0xc   : > { %s1320_s15 = sshll.u32 %s1574_s14, 3  ;;  %s1184_s25 = sshll.u32 %s1574_s14, 4 }
   0xd   : > { %s213_s18 = scalar_lea.vmem %s1570_s1, %s1320_s15  ;;  %s206_s21 = scalar_lea.vmem %s1569_s0, %s1320_s15 }
   0xe   : > { %v1193_v0 = vld [vmem:[%s213_s18] sm:$0xff]  ;;  %v1194_v1 = vld [vmem:[%s213_s18 + $0x8] sm:$0xff]  ;;  %v1195_v2 = vld [vmem:[%s213_s18 + $0x10] sm:$0xff]  ;;  %s1494_s24 = scalar_lea.vmem %s1571_s2, %s1320_s15  ;;  %s1532_s28 = scalar_lea.vmem %s1572_s3, %s1184_s25 }
   0xf   : > { %v1196_v3 = vld [vmem:[%s213_s18 + $0x18] sm:$0xff]  ;;  %v293_v4 = vsel %vm288_vm0, %v1193_v0, 0  ;;  %v323_v5 = vsel %vm288_vm0, %v1194_v1, 0  ;;  %v353_v6 = vsel %vm288_vm0, %v1195_v2, 0  ;;  %v1199_v7 = vld [vmem:[%s213_s18 + $0x30] sm:$0xff]  ;;  %v1197_v10 = vld [vmem:[%s213_s18 + $0x20] sm:$0xff] }
  0x10   : > { %302 = vmatpush.bf16.xpose.msra.mxu0 %v293_v4  ;;  %332 = vmatpush.bf16.xpose.msra.mxu1 %v323_v5  ;;  %v383_v8 = vsel %vm288_vm0, %v1196_v3, 0  ;;  %v1200_v9 = vld [vmem:[%s213_s18 + $0x38] sm:$0xff]  ;;  %v473_v11 = vsel %vm288_vm0, %v1199_v7, 0  ;;  %v1198_v12 = vld [vmem:[%s213_s18 + $0x28] sm:$0xff]  ;;  %v413_v14 = vsel %vm288_vm0, %v1197_v10, 0  ;;  %v1185_v15 = vld [vmem:[%s206_s21] sm:$0xff] }
  0x11   : > { %362 = vmatpush.bf16.xpose.msra.mxu2 %v353_v6  ;;  %392 = vmatpush.bf16.xpose.msra.mxu3 %v383_v8  ;;  %v503_v13 = vsel %vm288_vm0, %v1200_v9, 0  ;;  %v1186_v16 = vld [vmem:[%s206_s21 + $0x8] sm:$0xff]  ;;  %v443_v17 = vsel %vm288_vm0, %v1198_v12, 0  ;;  %v1187_v18 = vld [vmem:[%s206_s21 + $0x10] sm:$0xff]  ;;  %v1188_v19 = vld [vmem:[%s206_s21 + $0x18] sm:$0xff] }
  0x12   : > { %v1189_v20 = vld [vmem:[%s206_s21 + $0x20] sm:$0xff]  ;;  %v1190_v21 = vld [vmem:[%s206_s21 + $0x28] sm:$0xff]  ;;  %v1191_v22 = vld [vmem:[%s206_s21 + $0x30] sm:$0xff] }
  0x13   : > { %v1192_v23 = vld [vmem:[%s206_s21 + $0x38] sm:$0xff] }
  0x17   : > { %1075 = vmatmul.msk.bf16.vlgmr.msra.gmra.mxu0 %vm288_vm0, %v1185_v15  ;;  %1084 = vmatmul.msk.bf16.vlgmr.msra.gmra.mxu1 %vm288_vm0, %v1186_v16 }
  0x18   : > { %422 = vmatpush.bf16.xpose.msrb.mxu0 %v413_v14  ;;  %452 = vmatpush.bf16.xpose.msrb.mxu1 %v443_v17 }
  0x19   : > { %482 = vmatpush.bf16.xpose.msrb.mxu2 %v473_v11  ;;  %512 = vmatpush.bf16.xpose.msrb.mxu3 %v503_v13 }
  0x1a   : > { %1093 = vmatmul.msk.bf16.vlgmr.msra.gmra.mxu2 %vm288_vm0, %v1187_v18  ;;  %1102 = vmatmul.msk.bf16.vlgmr.msra.gmra.mxu3 %vm288_vm0, %v1188_v19 }
  0x27   : > { %1111 = vmatmul.msk.bf16.vlgmr.msrb.gmra.mxu0 %vm288_vm0, %v1189_v20  ;;  %1120 = vmatmul.msk.bf16.vlgmr.msrb.gmra.mxu1 %vm288_vm0, %v1190_v21 }
  0x2a   : > { %1129 = vmatmul.msk.bf16.vlgmr.msrb.gmra.mxu2 %vm288_vm0, %v1191_v22  ;;  %1138 = vmatmul.msk.bf16.vlgmr.msrb.gmra.mxu3 %vm288_vm0, %v1192_v23 }
  0x94   : > { %v304_v24 = vpop.f32.mrf.mxu0  ;;  %v334_v25 = vpop.f32.mrf.mxu1 }
  0x95   : > { %v1346_v26 = vmul.f32 0.17677669, %v304_v24  ;;  %v1348_v27 = vmul.f32 0.17677669, %v334_v25 }
  0x97   : > { %v542_v28 = vsel %vm535_vm1, %v1348_v27, -inf  ;;  %v536_v29 = vsel %vm535_vm1, %v1346_v26, -inf }
  0x98   : > { %543 = vmax.xlane.f32.xlu0 %v542_v28  ;;  %537 = vmax.xlane.f32.xlu2 %v536_v29 }
  0x9c   : > { %v306_v34 = vpop.f32.mrf.mxu0  ;;  %v336_v43 = vpop.f32.mrf.mxu1 }
  0x9d   : > { %v364_v30 = vpop.f32.mrf.mxu2  ;;  %v394_v31 = vpop.f32.mrf.mxu3  ;;  %v1358_v35 = vmul.f32 0.17677669, %v306_v34  ;;  %v1376_v48 = vmul.f32 0.17677669, %v336_v43 }
  0x9e   : > { %v1354_v32 = vmul.f32 0.17677669, %v364_v30  ;;  %v1356_v33 = vmul.f32 0.17677669, %v394_v31 }
  0x9f   : > { %v539_v38 = vsel %vm535_vm1, %v1358_v35, -inf  ;;  %v545_v54 = vsel %vm535_vm1, %v1376_v48, -inf }
  0xa0   : > { %v554_v36 = vsel %vm535_vm1, %v1356_v33, -inf  ;;  %v548_v37 = vsel %vm535_vm1, %v1354_v32, -inf  ;;  %540 = vmax.xlane.f32.xlu2 %v539_v38 }
  0xa1   : > { %555 = vmax.xlane.f32.xlu1 %v554_v36  ;;  %549 = vmax.xlane.f32.xlu0 %v548_v37 }
  0xa4   : > { %v424_v46 = vpop.f32.mrf.mxu0  ;;  %v454_v53 = vpop.f32.mrf.mxu1 }
  0xa5   : > { %v366_v39 = vpop.f32.mrf.mxu2  ;;  %v396_v40 = vpop.f32.mrf.mxu3  ;;  %v1374_v47 = vmul.f32 0.17677669, %v424_v46  ;;  %v1400_v3 = vmul.f32 0.17677669, %v454_v53 }
  0xa6   : > { %v1366_v41 = vmul.f32 0.17677669, %v366_v39  ;;  %v1368_v42 = vmul.f32 0.17677669, %v396_v40 }
  0xa7   : > { %v560_v52 = vsel %vm535_vm1, %v1374_v47, -inf  ;;  %v566_v5 = vsel %vm535_vm1, %v1400_v3, -inf }
  0xa8   : > { %v557_v44 = vsel %vm535_vm1, %v1368_v42, -inf  ;;  %v551_v45 = vsel %vm535_vm1, %v1366_v41, -inf }
  0xa9   : > { %558 = vmax.xlane.f32.xlu1 %v557_v44  ;;  %552 = vmax.xlane.f32.xlu0 %v551_v45 }
  0xac   : > { %v426_v63 = vpop.f32.mrf.mxu0  ;;  %v456_v1 = vpop.f32.mrf.mxu1 }
  0xad   : > { %v484_v49 = vpop.f32.mrf.mxu2  ;;  %v514_v50 = vpop.f32.mrf.mxu3  ;;  %v1398_v2 = vmul.f32 0.17677669, %v426_v63  ;;  %v1402_v4 = vmul.f32 0.17677669, %v456_v1 }
  0xae   : > { %v1378_v51 = vmul.f32 0.17677669, %v484_v49  ;;  %v1386_v56 = vmul.f32 0.17677669, %v514_v50 }
  0xaf   : > { %v563_v6 = vsel %vm535_vm1, %v1398_v2, -inf  ;;  %v569_v7 = vsel %vm535_vm1, %v1402_v4, -inf }
  0xb0   : > { %v572_v55 = vsel %vm535_vm1, %v1378_v51, -inf  ;;  %v578_v61 = vsel %vm535_vm1, %v1386_v56, -inf }
  0xb1   : > { %546 = vmax.xlane.f32.xlu1 %v545_v54  ;;  %573 = vmax.xlane.f32.xlu2 %v572_v55 }
  0xb2   : > { %561 = vmax.xlane.f32.xlu0 %v560_v52 }
  0xb5   : > { %v486_v57 = vpop.f32.mrf.mxu2  ;;  %v516_v58 = vpop.f32.mrf.mxu3 }
  0xb6   : > { %v1388_v59 = vmul.f32 0.17677669, %v486_v57  ;;  %v1390_v60 = vmul.f32 0.17677669, %v516_v58 }
  0xb8   : > { %v581_v62 = vsel %vm535_vm1, %v1390_v60, -inf  ;;  %v575_v0 = vsel %vm535_vm1, %v1388_v59, -inf }
  0xb9   : > { %579 = vmax.xlane.f32.xlu1 %v578_v61  ;;  %582 = vmax.xlane.f32.xlu2 %v581_v62 }
  0xba   : > { %576 = vmax.xlane.f32.xlu0 %v575_v0 }
  0xc1   : > { %567 = vmax.xlane.f32.xlu2 %v566_v5  ;;  %564 = vmax.xlane.f32.xlu1 %v563_v6 }
  0xc2   : > { %570 = vmax.xlane.f32.xlu0 %v569_v7 }
 0x10b   : > { %v544_v8 = vpop.xlane.xlu0 %543  ;;  %v538_v9 = vpop.xlane.xlu2 %537 }
 0x10c   : > { %v586_v10 = vsub.f32 %v1348_v27, %v544_v8  ;;  %v584_v11 = vsub.f32 %v1346_v26, %v538_v9 }
 0x10e   : > { %v604_v12 = vmul.f32 1.442695, %v586_v10  ;;  %v600_v13 = vmul.f32 1.442695, %v584_v11 }
 0x110   : > { %1217 = vpow2.f32 %v604_v12 }
 0x111   : > { %1219 = vpow2.f32 %v600_v13 }
 0x113   : > { %v541_v17 = vpop.xlane.xlu2 %540 }
 0x114   : > { %v556_v14 = vpop.xlane.xlu1 %555  ;;  %v550_v16 = vpop.xlane.xlu0 %549  ;;  %v585_v20 = vsub.f32 %v1358_v35, %v541_v17 }
 0x115   : > { %v590_v15 = vsub.f32 %v1356_v33, %v556_v14  ;;  %v588_v18 = vsub.f32 %v1354_v32, %v550_v16 }
 0x116   : > { %v1415_v21 = vpop.eup %1217  ;;  %v602_v26 = vmul.f32 1.442695, %v585_v20 }
 0x117   : > { %v612_v19 = vmul.f32 1.442695, %v590_v15  ;;  %v608_v22 = vmul.f32 1.442695, %v588_v18  ;;  %v1417_v23 = vpop.eup %1219  ;;  %v638_v24 = vsel %vm535_vm1, %v1415_v21, 0.0 }
 0x118   : > { %v632_v25 = vsel %vm535_vm1, %v1417_v23, 0.0  ;;  %639 = vadd.xlane.f32.xlu1 %v638_v24 }
 0x119   : > { %1221 = vpow2.f32 %v612_v19  ;;  %633 = vadd.xlane.f32.xlu2 %v632_v25 }
 0x11a   : > { %1223 = vpow2.f32 %v608_v22 }
 0x11b   : > { %1225 = vpow2.f32 %v602_v26  ;;  %v1201_v26 = vld [vmem:[%s1494_s24] sm:$0xff] }
 0x11c   : > { %v559_v27 = vpop.xlane.xlu1 %558  ;;  %v553_v29 = vpop.xlane.xlu0 %552  ;;  %749 = vmatpush.bf16.msra.mxu0 %v1201_v26 }
 0x11d   : > { %v591_v28 = vsub.f32 %v1368_v42, %v559_v27  ;;  %v589_v30 = vsub.f32 %v1366_v41, %v553_v29  ;;  %v1203_v27 = vld [vmem:[%s1494_s24 + $0x10] sm:$0xff] }
 0x11e   : > { %805 = vmatpush.bf16.msra.mxu2 %v1203_v27 }
 0x11f   : > { %v1425_v31 = vpop.eup %1221  ;;  %v614_v32 = vmul.f32 1.442695, %v591_v28  ;;  %v610_v34 = vmul.f32 1.442695, %v589_v30  ;;  %v1204_v28 = vld [vmem:[%s1494_s24 + $0x18] sm:$0xff]  ;;  %v1202_v30 = vld [vmem:[%s1494_s24 + $0x8] sm:$0xff] }
 0x120   : > { %v1427_v33 = vpop.eup %1223  ;;  %v650_v35 = vsel %vm535_vm1, %v1425_v31, 0.0  ;;  %833 = vmatpush.bf16.msra.mxu3 %v1204_v28  ;;  %777 = vmatpush.bf16.msra.mxu1 %v1202_v30 }
 0x121   : > { %1227 = vpow2.f32 %v614_v32  ;;  %651 = vadd.xlane.f32.xlu0 %v650_v35  ;;  %v644_v36 = vsel %vm535_vm1, %v1427_v33, 0.0  ;;  %v1433_v39 = vpop.eup %1225 }
 0x122   : > { %1229 = vpow2.f32 %v610_v34  ;;  %645 = vadd.xlane.f32.xlu1 %v644_v36  ;;  %v635_v52 = vsel %vm535_vm1, %v1433_v39, 0.0  ;;  %v1207_v36 = vld [vmem:[%s1494_s24 + $0x30] sm:$0xff] }
 0x123   : > { %917 = vmatpush.bf16.msrb.mxu2 %v1207_v36 }
 0x124   : > { %v547_v37 = vpop.xlane.xlu1 %546  ;;  %v574_v38 = vpop.xlane.xlu2 %573 }
 0x125   : > { %v587_v40 = vsub.f32 %v1376_v48, %v547_v37  ;;  %v596_v41 = vsub.f32 %v1378_v51, %v574_v38  ;;  %v562_v42 = vpop.xlane.xlu0 %561  ;;  %v1208_v37 = vld [vmem:[%s1494_s24 + $0x38] sm:$0xff] }
 0x126   : > { %v592_v43 = vsub.f32 %v1374_v47, %v562_v42  ;;  %945 = vmatpush.bf16.msrb.mxu3 %v1208_v37 }
 0x127   : > { %v1438_v44 = vpop.eup %1227  ;;  %v606_v45 = vmul.f32 1.442695, %v587_v40  ;;  %v624_v46 = vmul.f32 1.442695, %v596_v41 }
 0x128   : > { %v1440_v49 = vpop.eup %1229  ;;  %v616_v50 = vmul.f32 1.442695, %v592_v43  ;;  %v653_v51 = vsel %vm535_vm1, %v1438_v44, 0.0 }
 0x129   : > { %1231 = vpow2.f32 %v606_v45  ;;  %636 = vadd.xlane.f32.xlu0 %v635_v52  ;;  %v647_v48 = vsel %vm535_vm1, %v1440_v49, 0.0  ;;  %v1205_v52 = vld [vmem:[%s1494_s24 + $0x20] sm:$0xff] }
 0x12a   : > { %1233 = vpow2.f32 %v624_v46  ;;  %648 = vadd.xlane.f32.xlu2 %v647_v48  ;;  %654 = vadd.xlane.f32.xlu1 %v653_v51  ;;  %v1206_v48 = vld [vmem:[%s1494_s24 + $0x28] sm:$0xff] }
 0x12b   : > { %1235 = vpow2.f32 %v616_v50  ;;  %861 = vmatpush.bf16.msrb.mxu0 %v1205_v52  ;;  %889 = vmatpush.bf16.msrb.mxu1 %v1206_v48 }
 0x12c   : > { %v580_v47 = vpop.xlane.xlu1 %579  ;;  %v583_v53 = vpop.xlane.xlu2 %582 }
 0x12d   : > { %v598_v54 = vsub.f32 %v1386_v56, %v580_v47  ;;  %v599_v55 = vsub.f32 %v1390_v60, %v583_v53  ;;  %v577_v57 = vpop.xlane.xlu0 %576 }
 0x12e   : > { %v597_v58 = vsub.f32 %v1388_v59, %v577_v57 }
 0x12f   : > { %v1451_v61 = vpop.eup %1231  ;;  %v628_v62 = vmul.f32 1.442695, %v598_v54  ;;  %v630_v63 = vmul.f32 1.442695, %v599_v55 }
 0x130   : > { %v1453_v0 = vpop.eup %1233  ;;  %v626_v1 = vmul.f32 1.442695, %v597_v58  ;;  %v641_v56 = vsel %vm535_vm1, %v1451_v61, 0.0 }
 0x131   : > { %v1455_v5 = vpop.eup %1235  ;;  %1237 = vpow2.f32 %v628_v62  ;;  %v668_v6 = vsel %vm535_vm1, %v1453_v0, 0.0 }
 0x132   : > { %1239 = vpow2.f32 %v630_v63  ;;  %669 = vadd.xlane.f32.xlu0 %v668_v6  ;;  %642 = vadd.xlane.f32.xlu2 %v641_v56  ;;  %v656_v59 = vsel %vm535_vm1, %v1455_v5, 0.0 }
 0x133   : > { %1241 = vpow2.f32 %v626_v1  ;;  %657 = vadd.xlane.f32.xlu1 %v656_v59 }
 0x134   : > { %v568_v60 = vpop.xlane.xlu2 %567  ;;  %v565_v7 = vpop.xlane.xlu1 %564 }
 0x135   : > { %v594_v8 = vsub.f32 %v1400_v3, %v568_v60  ;;  %v593_v9 = vsub.f32 %v1398_v2, %v565_v7  ;;  %v571_v10 = vpop.xlane.xlu0 %570 }
 0x136   : > { %v595_v11 = vsub.f32 %v1402_v4, %v571_v10 }
 0x137   : > { %v1466_v12 = vpop.eup %1237  ;;  %v620_v13 = vmul.f32 1.442695, %v594_v8  ;;  %v618_v14 = vmul.f32 1.442695, %v593_v9 }
 0x138   : > { %v1468_v15 = vpop.eup %1239  ;;  %v622_v16 = vmul.f32 1.442695, %v595_v11  ;;  %v674_v3 = vsel %vm535_vm1, %v1466_v12, 0.0 }
 0x139   : > { %v1470_v17 = vpop.eup %1241  ;;  %1243 = vpow2.f32 %v620_v13  ;;  %v677_v18 = vsel %vm535_vm1, %v1468_v15, 0.0 }
 0x13a   : > { %1245 = vpow2.f32 %v618_v14  ;;  %678 = vadd.xlane.f32.xlu0 %v677_v18  ;;  %675 = vadd.xlane.f32.xlu2 %v674_v3  ;;  %v671_v2 = vsel %vm535_vm1, %v1470_v17, 0.0 }
 0x13b   : > { %1247 = vpow2.f32 %v622_v16  ;;  %672 = vadd.xlane.f32.xlu1 %v671_v2 }
 0x13f   : > { %v1478_v4 = vpop.eup %1243 }
 0x140   : > { %v1480_v19 = vpop.eup %1245  ;;  %v662_v20 = vsel %vm535_vm1, %v1478_v4, 0.0 }
 0x141   : > { %v1484_v22 = vpop.eup %1247  ;;  %v659_v24 = vsel %vm535_vm1, %v1480_v19, 0.0 }
 0x142   : > { %663 = vadd.xlane.f32.xlu0 %v662_v20  ;;  %v665_v25 = vsel %vm535_vm1, %v1484_v22, 0.0  ;;  %660 = vadd.xlane.f32.xlu2 %v659_v24 }
 0x143   : > { %666 = vadd.xlane.f32.xlu1 %v665_v25 }
 0x18b   : > { %v640_v29 = vpop.xlane.xlu1 %639 }
 0x18c   : > { %v634_v32 = vpop.xlane.xlu2 %633 }
 0x18d   : > { %1249 = vrcp.f32 %v634_v32 }
 0x193   : > { %v1250_v40 = vpop.eup %1249 }
 0x194   : > { %v652_v34 = vpop.xlane.xlu0 %651  ;;  %v696_v46 = vmul.f32 %v1250_v40, %v1417_v23 }
 0x195   : > { %v646_v35 = vpop.xlane.xlu1 %645 }
 0x196   : > { %1251 = vrcp.f32 %v646_v35  ;;  %v712_v54 = vpack.c.bf16 %v696_v46, %v696_v46 }
 0x197   : > { %1253 = vrcp.f32 %v652_v34 }
 0x198   : > { %v730_v60 = vunpack.c.l.b16 %v712_v54 }
 0x19c   : > { %v637_v38 = vpop.xlane.xlu0 %636  ;;  %v1252_v43 = vpop.eup %1251 }
 0x19d   : > { %1255 = vrcp.f32 %v637_v38  ;;  %v649_v41 = vpop.xlane.xlu2 %648  ;;  %v655_v42 = vpop.xlane.xlu1 %654  ;;  %v700_v50 = vmul.f32 %v1252_v43, %v1427_v33 }
 0x19e   : > { %1257 = vrcp.f32 %v649_v41  ;;  %v1254_v45 = vpop.eup %1253 }
 0x19f   : > { %1259 = vrcp.f32 %v655_v42  ;;  %v702_v51 = vmul.f32 %v1254_v45, %v1425_v31  ;;  %v716_v58 = vpack.c.bf16 %v700_v50, %v700_v50 }
 0x1a0   : > { %1261 = vrcp.f32 %v640_v29 }
 0x1a1   : > { %v718_v6 = vpack.c.bf16 %v702_v51, %v702_v51 }
 0x1a3   : > { %v1256_v47 = vpop.eup %1255  ;;  %v814_v11 = vunpack.c.l.b16 %v718_v6 }
 0x1a4   : > { %v1258_v53 = vpop.eup %1257  ;;  %v697_v55 = vmul.f32 %v1256_v47, %v1433_v39  ;;  %v786_v39 = vunpack.c.l.b16 %v716_v58 }
 0x1a5   : > { %v1260_v57 = vpop.eup %1259  ;;  %v701_v62 = vmul.f32 %v1258_v53, %v1440_v49  ;;  %v670_v63 = vpop.xlane.xlu0 %669 }
 0x1a6   : > { %v643_v23 = vpop.xlane.xlu2 %642  ;;  %v1262_v1 = vpop.eup %1261  ;;  %v713_v33 = vpack.c.bf16 %v697_v55, %v697_v55  ;;  %v703_v56 = vmul.f32 %v1260_v57, %v1438_v44 }
 0x1a7   : > { %v658_v59 = vpop.xlane.xlu1 %657  ;;  %v717_v31 = vpack.c.bf16 %v701_v62, %v701_v62  ;;  %1263 = vrcp.f32 %v643_v23  ;;  %v698_v9 = vmul.f32 %v1262_v1, %v1415_v21 }
 0x1a8   : > { %v731_v7 = vunpack.c.l.b16 %v713_v33  ;;  %v719_v8 = vpack.c.bf16 %v703_v56, %v703_v56  ;;  %1265 = vrcp.f32 %v670_v63 }
 0x1a9   : > { %v787_v10 = vunpack.c.l.b16 %v717_v31  ;;  %v714_v2 = vpack.c.bf16 %v698_v9, %v698_v9 }
 0x1aa   : > { %v732_v13 = vpack.c.b16 %v731_v7, %v730_v60  ;;  %v815_v49 = vunpack.c.l.b16 %v719_v8 }
 0x1ab   : > { %v788_v14 = vpack.c.b16 %v787_v10, %v786_v39  ;;  %v758_v26 = vunpack.c.l.b16 %v714_v2 }
 0x1ac   : > { %v816_v16 = vpack.c.b16 %v815_v49, %v814_v11  ;;  %1143 = vmatmul.msk.bf16.vlgmr.msra.gmra.mxu0 %vm535_vm1, %v732_v13 }
 0x1ad   : > { %v1264_v18 = vpop.eup %1263  ;;  %v679_v44 = vpop.xlane.xlu0 %678  ;;  %1153 = vmatmul.msk.bf16.vlgmr.msra.gmra.mxu2 %vm535_vm1, %v788_v14 }
 0x1ae   : > { %v676_v3 = vpop.xlane.xlu2 %675  ;;  %v699_v20 = vmul.f32 %v1264_v18, %v1451_v61  ;;  %1267 = vrcp.f32 %v679_v44  ;;  %1158 = vmatmul.msk.bf16.vlgmr.msra.gmra.mxu3 %vm535_vm1, %v816_v16  ;;  %v1266_v24 = vpop.eup %1265 }
 0x1af   : > { %v673_v21 = vpop.xlane.xlu1 %672  ;;  %1269 = vrcp.f32 %v676_v3  ;;  %v708_v28 = vmul.f32 %v1266_v24, %v1453_v0 }
 0x1b0   : > { %v715_v25 = vpack.c.bf16 %v699_v20, %v699_v20  ;;  %1271 = vrcp.f32 %v673_v21 }
 0x1b1   : > { %1273 = vrcp.f32 %v658_v59  ;;  %v724_v41 = vpack.c.bf16 %v708_v28, %v708_v28 }
 0x1b2   : > { %v759_v27 = vunpack.c.l.b16 %v715_v25 }
 0x1b3   : > { %v898_v52 = vunpack.c.l.b16 %v724_v41 }
 0x1b4   : > { %v1268_v29 = vpop.eup %1267  ;;  %v760_v30 = vpack.c.b16 %v759_v27, %v758_v26 }
 0x1b5   : > { %v1270_v32 = vpop.eup %1269  ;;  %v711_v34 = vmul.f32 %v1268_v29, %v1468_v15  ;;  %v664_v35 = vpop.xlane.xlu0 %663 }
 0x1b6   : > { %v661_v61 = vpop.xlane.xlu2 %660  ;;  %v1272_v36 = vpop.eup %1271  ;;  %v710_v37 = vmul.f32 %v1270_v32, %v1466_v12  ;;  %1275 = vrcp.f32 %v664_v35  ;;  %1148 = vmatmul.msk.bf16.vlgmr.msra.gmra.mxu1 %vm535_vm1, %v760_v30 }
 0x1b7   : > { %v667_v38 = vpop.xlane.xlu1 %666  ;;  %v1274_v40 = vpop.eup %1273  ;;  %v727_v42 = vpack.c.bf16 %v711_v34, %v711_v34  ;;  %v709_v43 = vmul.f32 %v1272_v36, %v1470_v17  ;;  %1277 = vrcp.f32 %v661_v61 }
 0x1b8   : > { %v726_v0 = vpack.c.bf16 %v710_v37, %v710_v37  ;;  %1279 = vrcp.f32 %v667_v38  ;;  %v704_v15 = vmul.f32 %v1274_v40, %v1455_v5 }
 0x1b9   : > { %v725_v45 = vpack.c.bf16 %v709_v43, %v709_v43  ;;  %v927_v46 = vunpack.c.l.b16 %v727_v42 }
 0x1ba   : > { %v926_v50 = vunpack.c.l.b16 %v726_v0  ;;  %v720_v57 = vpack.c.bf16 %v704_v15, %v704_v15 }
 0x1bb   : > { %v899_v48 = vunpack.c.l.b16 %v725_v45 }
 0x1bc   : > { %v1276_v12 = vpop.eup %1275  ;;  %v928_v51 = vpack.c.b16 %v927_v46, %v926_v50  ;;  %v842_v23 = vunpack.c.l.b16 %v720_v57 }
 0x1bd   : > { %v1278_v47 = vpop.eup %1277  ;;  %v900_v53 = vpack.c.b16 %v899_v48, %v898_v52  ;;  %v706_v54 = vmul.f32 %v1276_v12, %v1478_v4 }
 0x1be   : > { %v1280_v55 = vpop.eup %1279  ;;  %v705_v17 = vmul.f32 %v1278_v47, %v1480_v19  ;;  %1178 = vmatmul.msk.bf16.vlgmr.msrb.gmra.mxu3 %vm535_vm1, %v928_v51 }
 0x1bf   : > { %v722_v58 = vpack.c.bf16 %v706_v54, %v706_v54  ;;  %v707_v5 = vmul.f32 %v1280_v55, %v1484_v22  ;;  %1173 = vmatmul.msk.bf16.vlgmr.msrb.gmra.mxu2 %vm535_vm1, %v900_v53 }
 0x1c0   : > { %v721_v62 = vpack.c.bf16 %v705_v17, %v705_v17 }
 0x1c1   : > { %v723_v63 = vpack.c.bf16 %v707_v5, %v707_v5  ;;  %v870_v6 = vunpack.c.l.b16 %v722_v58 }
 0x1c2   : > { %v843_v1 = vunpack.c.l.b16 %v721_v62 }
 0x1c3   : > { %v871_v33 = vunpack.c.l.b16 %v723_v63 }
 0x1c4   : > { %v844_v56 = vpack.c.b16 %v843_v1, %v842_v23 }
 0x1c5   : > { %v872_v4 = vpack.c.b16 %v871_v33, %v870_v6 }
 0x1c6   : > { %1163 = vmatmul.msk.bf16.vlgmr.msrb.gmra.mxu0 %vm535_vm1, %v844_v56 }
 0x1c7   : > { %1168 = vmatmul.msk.bf16.vlgmr.msrb.gmra.mxu1 %vm535_vm1, %v872_v4 }
 0x229   : > { %v751_v19 = vpop.f32.mrf.mxu0 }
 0x22a   : > { %952 = vst.msk [vmem:[%s1532_s28] sm:$0xff] %vm288_vm0, %v751_v19 }
 0x230   : > { %v807_v22 = vpop.f32.mrf.mxu2 }
 0x231   : > { %v753_v59 = vpop.f32.mrf.mxu0  ;;  %956 = vst.msk [vmem:[%s1532_s28 + $0x20] sm:$0xff] %vm288_vm0, %v807_v22  ;;  %v835_v31 = vpop.f32.mrf.mxu3 }
 0x232   : > { %953 = vst.msk [vmem:[%s1532_s28 + $0x8] sm:$0xff] %vm288_vm0, %v753_v59 }
 0x233   : > { %958 = vst.msk [vmem:[%s1532_s28 + $0x30] sm:$0xff] %vm288_vm0, %v835_v31  ;;  %v779_v60 = vpop.f32.mrf.mxu1 }
 0x234   : > { %954 = vst.msk [vmem:[%s1532_s28 + $0x10] sm:$0xff] %vm288_vm0, %v779_v60 }
 0x238   : > { %v809_v7 = vpop.f32.mrf.mxu2 }
 0x239   : > { %957 = vst.msk [vmem:[%s1532_s28 + $0x28] sm:$0xff] %vm288_vm0, %v809_v7  ;;  %v837_v8 = vpop.f32.mrf.mxu3 }
 0x23a   : > { %959 = vst.msk [vmem:[%s1532_s28 + $0x38] sm:$0xff] %vm288_vm0, %v837_v8 }
 0x23b   : > { %v781_v9 = vpop.f32.mrf.mxu1 }
 0x23c   : > { %955 = vst.msk [vmem:[%s1532_s28 + $0x18] sm:$0xff] %vm288_vm0, %v781_v9 }
 0x241   : > { %v947_v39 = vpop.f32.mrf.mxu3 }
 0x242   : > { %v919_v10 = vpop.f32.mrf.mxu2  ;;  %966 = vst.msk [vmem:[%s1532_s28 + $0x70] sm:$0xff] %vm288_vm0, %v947_v39 }
 0x243   : > { %964 = vst.msk [vmem:[%s1532_s28 + $0x60] sm:$0xff] %vm288_vm0, %v919_v10  ;;  %v863_v11 = vpop.f32.mrf.mxu0 }
 0x244   : > { %960 = vst.msk [vmem:[%s1532_s28 + $0x40] sm:$0xff] %vm288_vm0, %v863_v11  ;;  %v891_v13 = vpop.f32.mrf.mxu1 }
 0x245   : > { %962 = vst.msk [vmem:[%s1532_s28 + $0x50] sm:$0xff] %vm288_vm0, %v891_v13 }
 0x249   : > { %v949_v49 = vpop.f32.mrf.mxu3 }
 0x24a   : > { %v921_v14 = vpop.f32.mrf.mxu2  ;;  %967 = vst.msk [vmem:[%s1532_s28 + $0x78] sm:$0xff] %vm288_vm0, %v949_v49 }
 0x24b   : > { %965 = vst.msk [vmem:[%s1532_s28 + $0x68] sm:$0xff] %vm288_vm0, %v921_v14  ;;  %v865_v16 = vpop.f32.mrf.mxu0 }
 0x24c   : > { %961 = vst.msk [vmem:[%s1532_s28 + $0x48] sm:$0xff] %vm288_vm0, %v865_v16  ;;  %v893_v18 = vpop.f32.mrf.mxu1 }
 0x24d   : > { %963 = vst.msk [vmem:[%s1532_s28 + $0x58] sm:$0xff] %vm288_vm0, %v893_v18 }
 0x24e PF: > { %s13_s12 = sadd.s32 1, %s1287_s12  }
 0x24f   : > { %p10_p4 = scmp.ge.s32.totalorder %s13_s12, 4  }
 0x251   :  { %12 = sbr.rel (!%p10_p4) target bundleno = 1 (0x1), region = 68 }

// kernel: att_net_forward.31
= control target key start
LH: loop header
LB: loop body
LE: loop exit
PB: predicated region body
PF: predicated region fallthrough
CT: control target
= control target key end

     0   :  { %vm208_vm0 = vcmask 261120   ;;  %s445_s1 = inlined_call_operand.vmem [shape: bf16[256,32], index: 1, kind: input, shape index: {}]   ;;  %s446_s2 = inlined_call_operand.vmem [shape: f32[1,32], index: 2, kind: input, shape index: {}]   ;;  %s447_s0 = inlined_call_operand.vmem [shape: bf16[32,256], index: 0, kind: input, shape index: {}]   ;;  %s448_s3 = inlined_call_operand.vmem [shape: f32[32,32], index: 3, kind: output, shape index: {}]  }
   0x1   :  { %v308_v0 = vld [vmem:[%s445_s1 + $0x38] sm:$0xff]  ;;  %v307_v2 = vld [vmem:[%s445_s1 + $0x30] sm:$0xff]  ;;  %v306_v4 = vld [vmem:[%s445_s1 + $0x28] sm:$0xff] }
   0x2   :  { %v316_v1 = vld [vmem:[%s445_s1 + $0x78] sm:$0xff]  ;;  %170 = vmatpush.bf16.msra.mxu0 %v308_v0  ;;  %317 = vmatpush.bf16.msra.mxu2 %v308_v0  ;;  %v315_v3 = vld [vmem:[%s445_s1 + $0x70] sm:$0xff]  ;;  %v314_v5 = vld [vmem:[%s445_s1 + $0x68] sm:$0xff] }
   0x3   :  { %189 = vmatpush.bf16.msra.mxu1 %v316_v1  ;;  %325 = vmatpush.bf16.msra.mxu3 %v316_v1  ;;  %v305_v6 = vld [vmem:[%s445_s1 + $0x20] sm:$0xff]  ;;  %v304_v8 = vld [vmem:[%s445_s1 + $0x18] sm:$0xff]  ;;  %v303_v10 = vld [vmem:[%s445_s1 + $0x10] sm:$0xff] }
   0x4   :  { %v313_v7 = vld [vmem:[%s445_s1 + $0x60] sm:$0xff]  ;;  %v312_v9 = vld [vmem:[%s445_s1 + $0x58] sm:$0xff]  ;;  %v311_v11 = vld [vmem:[%s445_s1 + $0x50] sm:$0xff] }
   0x5   :  { %v302_v12 = vld [vmem:[%s445_s1 + $0x8] sm:$0xff]  ;;  %v301_v14 = vld [vmem:[%s445_s1] sm:$0xff]  ;;  %v227_v18 = vld [vmem:[%s447_s0 + $0x10] sm:$0xf] }
   0x6   :  { %171 = vmatpush.bf16.msra.mxu0 %v307_v2  ;;  %318 = vmatpush.bf16.msra.mxu2 %v307_v2  ;;  %v310_v13 = vld [vmem:[%s445_s1 + $0x48] sm:$0xff]  ;;  %v309_v15 = vld [vmem:[%s445_s1 + $0x40] sm:$0xff]  ;;  %v300_v19 = vld [vmem:[%s447_s0 + $0x14] sm:$0xf0] }
   0x7   :  { %190 = vmatpush.bf16.msra.mxu1 %v315_v3  ;;  %326 = vmatpush.bf16.msra.mxu3 %v315_v3  ;;  %v219_v16 = vld [vmem:[%s447_s0] sm:$0xf]  ;;  %v298_v17 = vld [vmem:[%s447_s0 + $0x4] sm:$0xf0]  ;;  %v297_v20 = vld [vmem:[%s447_s0 + $0x4] sm:$0xf]  ;;  %v228_v25 = vor.u32 %v300_v19, %v227_v18 }
   0x8   :  { %v221_v21 = vld [vmem:[%s447_s0 + $0x8] sm:$0xf0]  ;;  %v299_v22 = vld [vmem:[%s447_s0 + $0x14] sm:$0xf]  ;;  %v229_v23 = vld [vmem:[%s447_s0 + $0x18] sm:$0xf0]  ;;  %v220_v24 = vor.u32 %v298_v17, %v219_v16 }
   0x9   :  { %v224_v26 = vor.u32 %v297_v20, %v221_v21  ;;  %v232_v27 = vor.u32 %v299_v22, %v229_v23  ;;  %v333_v28 = vld [vmem:[%s446_s2] ss:$0 sm:$0xff] }
   0xa   :  { %172 = vmatpush.bf16.msra.mxu0 %v306_v4  ;;  %319 = vmatpush.bf16.msra.mxu2 %v306_v4 }
   0xb   :  { %191 = vmatpush.bf16.msra.mxu1 %v314_v5  ;;  %327 = vmatpush.bf16.msra.mxu3 %v314_v5 }
   0xe   :  { %173 = vmatpush.bf16.msra.mxu0 %v305_v6  ;;  %320 = vmatpush.bf16.msra.mxu2 %v305_v6 }
   0xf   :  { %192 = vmatpush.bf16.msra.mxu1 %v313_v7  ;;  %328 = vmatpush.bf16.msra.mxu3 %v313_v7 }
  0x12   :  { %174 = vmatpush.bf16.msra.mxu0 %v304_v8  ;;  %321 = vmatpush.bf16.msra.mxu2 %v304_v8 }
  0x13   :  { %193 = vmatpush.bf16.msra.mxu1 %v312_v9  ;;  %329 = vmatpush.bf16.msra.mxu3 %v312_v9 }
  0x16   :  { %175 = vmatpush.bf16.msra.mxu0 %v303_v10  ;;  %322 = vmatpush.bf16.msra.mxu2 %v303_v10 }
  0x17   :  { %194 = vmatpush.bf16.msra.mxu1 %v311_v11  ;;  %330 = vmatpush.bf16.msra.mxu3 %v311_v11 }
  0x1a   :  { %176 = vmatpush.bf16.msra.mxu0 %v302_v12  ;;  %323 = vmatpush.bf16.msra.mxu2 %v302_v12 }
  0x1b   :  { %195 = vmatpush.bf16.msra.mxu1 %v310_v13  ;;  %331 = vmatpush.bf16.msra.mxu3 %v310_v13 }
  0x1e   :  { %177 = vmatpush.bf16.msra.mxu0 %v301_v14  ;;  %324 = vmatpush.bf16.msra.mxu2 %v301_v14 }
  0x1f   :  { %196 = vmatpush.bf16.msra.mxu1 %v309_v15  ;;  %332 = vmatpush.bf16.msra.mxu3 %v309_v15 }
  0x21   :  { %178 = vmatmul.bf16.vlgmr.msra.gmra.mxu0 %v220_v24  ;;  %183 = vmatmul.bf16.vlgmr.msra.gmra.mxu2 %v228_v25 }
  0x22   :  { %197 = vmatmul.bf16.vlgmr.msra.gmra.mxu1 %v224_v26  ;;  %202 = vmatmul.bf16.vlgmr.msra.gmra.mxu3 %v232_v27 }
  0x9e   :  { %v179_v29 = vpop.f32.mrf.mxu0 }
  0x9f   :  { %v180_v30 = vadd.f32 %v333_v28, %v179_v29  ;;  %v198_v31 = vpop.f32.mrf.mxu1 }
  0xa1   :  { %v199_v32 = vadd.f32 %v198_v31, %v180_v30 }
  0xa3   :  { %209 = vst.msk [vmem:[%s448_s3] sm:$0xff] %vm208_vm0, %v199_v32 }
  0xa4   :  { %v184_v33 = vpop.f32.mrf.mxu2 }
  0xa5   :  { %v185_v34 = vadd.f32 %v333_v28, %v184_v33  ;;  %v203_v35 = vpop.f32.mrf.mxu3 }
  0xa6   :  { %v181_v36 = vpop.f32.mrf.mxu0 }
  0xa7   :  { %v204_v37 = vadd.f32 %v203_v35, %v185_v34  ;;  %v182_v38 = vadd.f32 %v333_v28, %v181_v36  ;;  %v200_v39 = vpop.f32.mrf.mxu1 }
  0xa9   :  { %211 = vst.msk [vmem:[%s448_s3 + $0x10] sm:$0xff] %vm208_vm0, %v204_v37  ;;  %v201_v40 = vadd.f32 %v200_v39, %v182_v38 }
  0xab   :  { %210 = vst.msk [vmem:[%s448_s3 + $0x8] sm:$0xff] %vm208_vm0, %v201_v40 }
  0xac   :  { %v186_v41 = vpop.f32.mrf.mxu2 }
  0xad   :  { %v187_v42 = vadd.f32 %v333_v28, %v186_v41  ;;  %v205_v43 = vpop.f32.mrf.mxu3 }
  0xaf   :  { %v206_v44 = vadd.f32 %v205_v43, %v187_v42 }
  0xb1   :  { %212 = vst.msk [vmem:[%s448_s3 + $0x18] sm:$0xff] %vm208_vm0, %v206_v44 }

// kernel: att_net_forward.32
= control target key start
LH: loop header
LB: loop body
LE: loop exit
PB: predicated region body
PF: predicated region fallthrough
CT: control target
= control target key end

     0   :  { %vm318_vm0 = vcmask 261120   ;;  %vm522_vm1 = vcmask 130048   ;;  %s1145_s1 = inlined_call_operand.vmem [shape: bf16[288,16], index: 1, kind: input, shape index: {}]   ;;  %s1146_s0 = inlined_call_operand.vmem [shape: bf16[128,288], index: 0, kind: input, shape index: {}]   ;;  %s1147_s2 = inlined_call_operand.vmem [shape: f32[1,16], index: 2, kind: input, shape index: {}]   ;;  %s1148_s3 = inlined_call_operand.vmem [shape: f32[128,16], index: 3, kind: input, shape index: {}]   ;;  %s1149_s4 = inlined_call_operand.vmem [shape: f32[128,16], index: 4, kind: output, shape index: {}]  }
   0x1   :  { %v750_v0 = vld [vmem:[%s1145_s1 + $0x38] sm:$0xff]  ;;  %v760_v1 = vld [vmem:[%s1145_s1 + $0x88] sm:$0xff]  ;;  %v749_v3 = vld [vmem:[%s1145_s1 + $0x30] sm:$0xff] }
   0x2   :  { %v758_v2 = vld [vmem:[%s1145_s1 + $0x78] sm:$0xff]  ;;  %343 = vmatpush.bf16.msra.mxu0 %v750_v0  ;;  %761 = vmatpush.bf16.msra.mxu3 %v750_v0  ;;  %v759_v4 = vld [vmem:[%s1145_s1 + $0x80] sm:$0xff]  ;;  %v757_v5 = vld [vmem:[%s1145_s1 + $0x70] sm:$0xff] }
   0x3   :  { %447 = vmatpush.bf16.msra.mxu2 %v760_v1  ;;  %392 = vmatpush.bf16.msra.mxu1 %v758_v2  ;;  %v553_v6 = vld [vmem:[%s1146_s0 + $0x8] sm:$0xf]  ;;  %v721_v7 = vld [vmem:[%s1146_s0 + $0x10] sm:$0xf0]  ;;  %v747_v11 = vld [vmem:[%s1145_s1 + $0x20] sm:$0xff] }
   0x4   :  { %v554_v8 = vor.u32 %v721_v7, %v553_v6  ;;  %v748_v9 = vld [vmem:[%s1145_s1 + $0x28] sm:$0xff]  ;;  %v755_v12 = vld [vmem:[%s1145_s1 + $0x60] sm:$0xff]  ;;  %v746_v13 = vld [vmem:[%s1145_s1 + $0x18] sm:$0xff] }
   0x5   :  { %v756_v10 = vld [vmem:[%s1145_s1 + $0x68] sm:$0xff]  ;;  %v754_v14 = vld [vmem:[%s1145_s1 + $0x58] sm:$0xff]  ;;  %v745_v15 = vld [vmem:[%s1145_s1 + $0x10] sm:$0xff] }
   0x6   :  { %344 = vmatpush.bf16.msra.mxu0 %v749_v3  ;;  %762 = vmatpush.bf16.msra.mxu3 %v749_v3  ;;  %v753_v16 = vld [vmem:[%s1145_s1 + $0x50] sm:$0xff]  ;;  %v565_v17 = vld [vmem:[%s1146_s0 + $0x20] sm:$0xf]  ;;  %v724_v18 = vld [vmem:[%s1146_s0 + $0x28] sm:$0xf0] }
   0x7   :  { %448 = vmatpush.bf16.msra.mxu2 %v759_v4  ;;  %393 = vmatpush.bf16.msra.mxu1 %v757_v5  ;;  %v566_v19 = vor.u32 %v724_v18, %v565_v17  ;;  %v744_v20 = vld [vmem:[%s1145_s1 + $0x8] sm:$0xff]  ;;  %v743_v22 = vld [vmem:[%s1145_s1] sm:$0xff]  ;;  %v617_v26 = vld [vmem:[%s1146_s0 + $0x90] sm:$0xf] }
   0x8   :  { %v752_v21 = vld [vmem:[%s1145_s1 + $0x48] sm:$0xff]  ;;  %v751_v23 = vld [vmem:[%s1145_s1 + $0x40] sm:$0xff]  ;;  %v738_v27 = vld [vmem:[%s1146_s0 + $0x98] sm:$0xf0] }
   0x9   :  { %v545_v24 = vld [vmem:[%s1146_s0] sm:$0xf]  ;;  %v720_v25 = vld [vmem:[%s1146_s0 + $0x8] sm:$0xf0]  ;;  %v719_v28 = vld [vmem:[%s1146_s0 + $0x4] sm:$0xf]  ;;  %v618_v31 = vor.u32 %v738_v27, %v617_v26 }
   0xa   :  { %711 = vmatmul.msk.bf16.vlgmr.msra.gmra.mxu2 %vm318_vm0, %v554_v8  ;;  %345 = vmatpush.bf16.msra.mxu0 %v748_v9  ;;  %v547_v29 = vld [vmem:[%s1146_s0 + $0xc] sm:$0xf0]  ;;  %v546_v30 = vor.u32 %v720_v25, %v545_v24  ;;  %v577_v33 = vld [vmem:[%s1146_s0 + $0x38] sm:$0xf]  ;;  %v727_v34 = vld [vmem:[%s1146_s0 + $0x40] sm:$0xf0] }
   0xb   :  { %763 = vmatpush.bf16.msra.mxu3 %v748_v9  ;;  %394 = vmatpush.bf16.msra.mxu1 %v756_v10  ;;  %v550_v32 = vor.u32 %v719_v28, %v547_v29  ;;  %v578_v35 = vor.u32 %v727_v34, %v577_v33  ;;  %v557_v36 = vld [vmem:[%s1146_s0 + $0x18] sm:$0xf]  ;;  %v723_v37 = vld [vmem:[%s1146_s0 + $0x20] sm:$0xf0]  ;;  %v629_v38 = vld [vmem:[%s1146_s0 + $0xa8] sm:$0xf] }
   0xc   :  { %v741_v39 = vld [vmem:[%s1146_s0 + $0xb0] sm:$0xf0]  ;;  %v722_v40 = vld [vmem:[%s1146_s0 + $0x1c] sm:$0xf]  ;;  %v559_v41 = vld [vmem:[%s1146_s0 + $0x24] sm:$0xf0]  ;;  %v558_v42 = vor.u32 %v723_v37, %v557_v36 }
   0xd   :  { %v630_v43 = vor.u32 %v741_v39, %v629_v38  ;;  %v562_v44 = vor.u32 %v722_v40, %v559_v41  ;;  %v589_v45 = vld [vmem:[%s1146_s0 + $0x50] sm:$0xf]  ;;  %v730_v46 = vld [vmem:[%s1146_s0 + $0x58] sm:$0xf0]  ;;  %v737_v50 = vld [vmem:[%s1146_s0 + $0x94] sm:$0xf] }
   0xe   :  { %346 = vmatpush.bf16.msra.mxu0 %v747_v11  ;;  %v590_v47 = vor.u32 %v730_v46, %v589_v45  ;;  %v569_v48 = vld [vmem:[%s1146_s0 + $0x30] sm:$0xf]  ;;  %v726_v49 = vld [vmem:[%s1146_s0 + $0x38] sm:$0xf0]  ;;  %v619_v51 = vld [vmem:[%s1146_s0 + $0x9c] sm:$0xf0] }
   0xf   :  { %764 = vmatpush.bf16.msra.mxu3 %v747_v11  ;;  %395 = vmatpush.bf16.msra.mxu1 %v755_v12  ;;  %v725_v52 = vld [vmem:[%s1146_s0 + $0x34] sm:$0xf]  ;;  %v571_v53 = vld [vmem:[%s1146_s0 + $0x3c] sm:$0xf0]  ;;  %v570_v54 = vor.u32 %v726_v49, %v569_v48  ;;  %v622_v55 = vor.u32 %v737_v50, %v619_v51  ;;  %v601_v57 = vld [vmem:[%s1146_s0 + $0x68] sm:$0xf] }
  0x10   :  { %v574_v56 = vor.u32 %v725_v52, %v571_v53  ;;  %v733_v58 = vld [vmem:[%s1146_s0 + $0x70] sm:$0xf0]  ;;  %v581_v60 = vld [vmem:[%s1146_s0 + $0x48] sm:$0xf]  ;;  %v740_v62 = vld [vmem:[%s1146_s0 + $0xac] sm:$0xf] }
  0x11   :  { %v602_v59 = vor.u32 %v733_v58, %v601_v57  ;;  %v729_v61 = vld [vmem:[%s1146_s0 + $0x50] sm:$0xf0]  ;;  %v631_v63 = vld [vmem:[%s1146_s0 + $0xb4] sm:$0xf0]  ;;  %v728_v0 = vld [vmem:[%s1146_s0 + $0x4c] sm:$0xf] }
  0x12   :  { %347 = vmatpush.bf16.msra.mxu0 %v746_v13  ;;  %v583_v1 = vld [vmem:[%s1146_s0 + $0x54] sm:$0xf0]  ;;  %v634_v3 = vor.u32 %v740_v62, %v631_v63  ;;  %v736_v6 = vld [vmem:[%s1146_s0 + $0x88] sm:$0xf0]  ;;  %v593_v8 = vld [vmem:[%s1146_s0 + $0x60] sm:$0xf] }
  0x13   :  { %765 = vmatpush.bf16.msra.mxu3 %v746_v13  ;;  %396 = vmatpush.bf16.msra.mxu1 %v754_v14  ;;  %v586_v4 = vor.u32 %v728_v0, %v583_v1  ;;  %v732_v9 = vld [vmem:[%s1146_s0 + $0x68] sm:$0xf0]  ;;  %v595_v11 = vld [vmem:[%s1146_s0 + $0x6c] sm:$0xf0]  ;;  %v605_v17 = vld [vmem:[%s1146_s0 + $0x78] sm:$0xf] }
  0x14   :  { %v735_v18 = vld [vmem:[%s1146_s0 + $0x80] sm:$0xf0]  ;;  %v742_v24 = vld [vmem:[%s1146_s0 + $0xb8] sm:$0xf0]  ;;  %v1012_v28 = vld [vmem:[%s1147_s2] ss:$0 sm:$0xff] }
  0x15   :  { %v490_v34 = vld [vmem:[%s1148_s3] sm:$0xff]  ;;  %v492_v50 = vld [vmem:[%s1148_s3 + $0x10] sm:$0xff]  ;;  %v493_v58 = vld [vmem:[%s1148_s3 + $0x18] sm:$0xff] }
  0x16   :  { %348 = vmatpush.bf16.msra.mxu0 %v745_v15 }
  0x17   :  { %766 = vmatpush.bf16.msra.mxu3 %v745_v15  ;;  %397 = vmatpush.bf16.msra.mxu1 %v753_v16  ;;  %v739_v15 = vld [vmem:[%s1146_s0 + $0xa0] sm:$0xf0] }
  0x1a   :  { %712 = vmatmul.msk.bf16.gmra.mxu2 %vm318_vm0, %v566_v19  ;;  %349 = vmatpush.bf16.msra.mxu0 %v744_v20  ;;  %v734_v19 = vld [vmem:[%s1146_s0 + $0x7c] sm:$0xf] }
  0x1b   :  { %767 = vmatpush.bf16.msra.mxu3 %v744_v20  ;;  %398 = vmatpush.bf16.msra.mxu1 %v752_v21  ;;  %v607_v20 = vld [vmem:[%s1146_s0 + $0x84] sm:$0xf0] }
  0x1e   :  { %350 = vmatpush.bf16.msra.mxu0 %v743_v22 }
  0x1f   :  { %768 = vmatpush.bf16.msra.mxu3 %v743_v22  ;;  %399 = vmatpush.bf16.msra.mxu1 %v751_v23  ;;  %v610_v22 = vor.u32 %v734_v19, %v607_v20 }
  0x21   :  { %351 = vmatmul.bf16.vlgmr.msra.gmra.mxu0 %v546_v30 }
  0x22   :  { %381 = vmatmul.bf16.vlgmr.msra.gmra.mxu3 %v618_v31  ;;  %400 = vmatmul.bf16.vlgmr.msra.gmra.mxu1 %v550_v32 }
  0x23   :  { %769 = vmatpush.bf16.msrb.mxu3 %v758_v2  ;;  %v582_v2 = vor.u32 %v729_v61, %v581_v60 }
  0x27   :  { %770 = vmatpush.bf16.msrb.mxu3 %v757_v5  ;;  %v613_v5 = vld [vmem:[%s1146_s0 + $0x80] sm:$0xf] }
  0x28   :  { %v614_v7 = vor.u32 %v736_v6, %v613_v5 }
  0x2a   :  { %713 = vmatmul.msk.bf16.gmra.mxu2 %vm318_vm0, %v578_v35 }
  0x2b   :  { %771 = vmatpush.bf16.msrb.mxu3 %v756_v10  ;;  %v731_v10 = vld [vmem:[%s1146_s0 + $0x64] sm:$0xf] }
  0x2c   :  { %v598_v13 = vor.u32 %v731_v10, %v595_v11 }
  0x2f   :  { %772 = vmatpush.bf16.msrb.mxu3 %v755_v12  ;;  %v594_v12 = vor.u32 %v732_v9, %v593_v8 }
  0x31   :  { %356 = vmatmul.bf16.gmra.mxu0 %v558_v42  ;;  %v491_v42 = vld [vmem:[%s1148_s3 + $0x8] sm:$0xff] }
  0x32   :  { %386 = vmatmul.bf16.gmra.mxu3 %v630_v43  ;;  %405 = vmatmul.bf16.gmra.mxu1 %v562_v44 }
  0x33   :  { %773 = vmatpush.bf16.msrb.mxu3 %v754_v14  ;;  %v625_v14 = vld [vmem:[%s1146_s0 + $0x98] sm:$0xf] }
  0x37   :  { %774 = vmatpush.bf16.msrb.mxu3 %v753_v16  ;;  %v626_v16 = vor.u32 %v739_v15, %v625_v14 }
  0x3a   :  { %714 = vmatmul.msk.bf16.gmra.mxu2 %vm318_vm0, %v590_v47 }
  0x3b   :  { %775 = vmatpush.bf16.msrb.mxu3 %v752_v21  ;;  %v606_v21 = vor.u32 %v735_v18, %v605_v17 }
  0x3f   :  { %776 = vmatpush.bf16.msrb.mxu3 %v751_v23  ;;  %v637_v23 = vld [vmem:[%s1146_s0 + $0xb0] sm:$0xf] }
  0x40   :  { %v638_v25 = vor.u32 %v742_v24, %v637_v23 }
  0x41   :  { %361 = vmatmul.bf16.gmra.mxu0 %v570_v54 }
  0x42   :  { %430 = vmatmul.bf16.vlgmr.msrb.gmra.mxu3 %v622_v55  ;;  %410 = vmatmul.bf16.gmra.mxu1 %v574_v56 }
  0x4a   :  { %715 = vmatmul.msk.bf16.gmra.mxu2 %vm318_vm0, %v602_v59 }
  0x51   :  { %366 = vmatmul.bf16.gmra.mxu0 %v582_v2 }
  0x52   :  { %435 = vmatmul.bf16.gmra.mxu3 %v634_v3  ;;  %415 = vmatmul.bf16.gmra.mxu1 %v586_v4  ;;  %v494_v3 = vld [vmem:[%s1148_s3 + $0x20] sm:$0xff] }
  0x5a   :  { %716 = vmatmul.msk.bf16.gmra.mxu2 %vm318_vm0, %v614_v7 }
  0x61   :  { %371 = vmatmul.bf16.gmra.mxu0 %v594_v12  ;;  %v495_v12 = vld [vmem:[%s1148_s3 + $0x28] sm:$0xff] }
  0x62   :  { %420 = vmatmul.bf16.gmra.mxu1 %v598_v13 }
  0x6a   :  { %717 = vmatmul.msk.bf16.gmra.mxu2 %vm318_vm0, %v626_v16 }
  0x71   :  { %376 = vmatmul.bf16.gmra.mxu0 %v606_v21  ;;  %v496_v21 = vld [vmem:[%s1148_s3 + $0x30] sm:$0xff] }
  0x72   :  { %425 = vmatmul.bf16.gmra.mxu1 %v610_v22 }
  0x7a   :  { %718 = vmatmul.msk.bf16.gmra.mxu2 %vm318_vm0, %v638_v25 }
  0x8d   :  { %v450_v26 = vpop.f32.mrf.mxu2 }
  0x95   :  { %v452_v27 = vpop.f32.mrf.mxu2 }
  0x9d   :  { %v455_v29 = vpop.f32.mrf.mxu2 }
  0x9e   :  { %v352_v30 = vpop.f32.mrf.mxu0 }
  0x9f   :  { %v353_v31 = vadd.f32 %v1012_v28, %v352_v30  ;;  %v401_v32 = vpop.f32.mrf.mxu1 }
  0xa1   :  { %v402_v33 = vadd.f32 %v401_v32, %v353_v31  ;;  %v497_v31 = vld [vmem:[%s1148_s3 + $0x38] sm:$0xff] }
  0xa3   :  { %v451_v35 = vadd.f32 %v450_v26, %v402_v33 }
  0xa5   :  { %v506_v36 = vadd.f32 %v490_v34, %v451_v35  ;;  %v457_v37 = vpop.f32.mrf.mxu2  ;;  %v382_v59 = vpop.f32.mrf.mxu3 }
  0xa6   :  { %v354_v38 = vpop.f32.mrf.mxu0 }
  0xa7   :  { %523 = vst.msk [vmem:[%s1149_s4] sm:$0xff] %vm522_vm1, %v506_v36  ;;  %v355_v39 = vadd.f32 %v1012_v28, %v354_v38  ;;  %v403_v40 = vpop.f32.mrf.mxu1 }
  0xa9   :  { %v404_v41 = vadd.f32 %v403_v40, %v355_v39  ;;  %v498_v39 = vld [vmem:[%s1148_s3 + $0x40] sm:$0xff] }
  0xab   :  { %v453_v43 = vadd.f32 %v452_v27, %v404_v41 }
  0xad   :  { %v507_v44 = vadd.f32 %v491_v42, %v453_v43  ;;  %v460_v45 = vpop.f32.mrf.mxu2  ;;  %v384_v5 = vpop.f32.mrf.mxu3 }
  0xae   :  { %v357_v46 = vpop.f32.mrf.mxu0 }
  0xaf   :  { %524 = vst.msk [vmem:[%s1149_s4 + $0x8] sm:$0xff] %vm522_vm1, %v507_v44  ;;  %v358_v47 = vadd.f32 %v1012_v28, %v357_v46  ;;  %v406_v48 = vpop.f32.mrf.mxu1 }
  0xb1   :  { %v407_v49 = vadd.f32 %v406_v48, %v358_v47  ;;  %v383_v47 = vadd.f32 %v1012_v28, %v382_v59 }
  0xb3   :  { %v456_v51 = vadd.f32 %v455_v29, %v407_v49  ;;  %v499_v49 = vld [vmem:[%s1148_s3 + $0x48] sm:$0xff] }
  0xb5   :  { %v508_v52 = vadd.f32 %v492_v50, %v456_v51  ;;  %v462_v53 = vpop.f32.mrf.mxu2  ;;  %v1058_v17 = vpop.f32.mrf.mxu3 }
  0xb6   :  { %v359_v54 = vpop.f32.mrf.mxu0 }
  0xb7   :  { %525 = vst.msk [vmem:[%s1149_s4 + $0x10] sm:$0xff] %vm522_vm1, %v508_v52  ;;  %v360_v55 = vadd.f32 %v1012_v28, %v359_v54  ;;  %v408_v56 = vpop.f32.mrf.mxu1 }
  0xb9   :  { %v409_v57 = vadd.f32 %v408_v56, %v360_v55  ;;  %v502_v55 = vld [vmem:[%s1148_s3 + $0x60] sm:$0xff] }
  0xbb   :  { %v458_v60 = vadd.f32 %v457_v37, %v409_v57 }
  0xbd   :  { %v509_v61 = vadd.f32 %v493_v58, %v458_v60  ;;  %v465_v62 = vpop.f32.mrf.mxu2  ;;  %v389_v29 = vpop.f32.mrf.mxu3  ;;  %v385_v60 = vadd.f32 %v1012_v28, %v384_v5 }
  0xbe   :  { %v362_v63 = vpop.f32.mrf.mxu0 }
  0xbf   :  { %526 = vst.msk [vmem:[%s1149_s4 + $0x18] sm:$0xff] %vm522_vm1, %v509_v61  ;;  %v363_v0 = vadd.f32 %v1012_v28, %v362_v63  ;;  %v411_v1 = vpop.f32.mrf.mxu1  ;;  %v500_v63 = vld [vmem:[%s1148_s3 + $0x50] sm:$0xff] }
  0xc1   :  { %v412_v2 = vadd.f32 %v411_v1, %v363_v0 }
  0xc3   :  { %v461_v4 = vadd.f32 %v460_v45, %v412_v2 }
  0xc5   :  { %v510_v6 = vadd.f32 %v494_v3, %v461_v4  ;;  %v467_v7 = vpop.f32.mrf.mxu2  ;;  %v431_v40 = vpop.f32.mrf.mxu3  ;;  %v503_v4 = vld [vmem:[%s1148_s3 + $0x68] sm:$0xff] }
  0xc6   :  { %v364_v8 = vpop.f32.mrf.mxu0  ;;  %v432_v51 = vadd.f32 %v431_v40, %v383_v47 }
  0xc7   :  { %527 = vst.msk [vmem:[%s1149_s4 + $0x20] sm:$0xff] %vm522_vm1, %v510_v6  ;;  %v365_v9 = vadd.f32 %v1012_v28, %v364_v8  ;;  %v413_v10 = vpop.f32.mrf.mxu1 }
  0xc9   :  { %v414_v11 = vadd.f32 %v413_v10, %v365_v9  ;;  %v388_v10 = vadd.f32 %v1012_v28, %v1058_v17 }
  0xcb   :  { %v463_v13 = vadd.f32 %v462_v53, %v414_v11 }
  0xcd   :  { %v511_v14 = vadd.f32 %v495_v12, %v463_v13  ;;  %v470_v15 = vpop.f32.mrf.mxu2  ;;  %v433_v52 = vpop.f32.mrf.mxu3  ;;  %v501_v13 = vld [vmem:[%s1148_s3 + $0x58] sm:$0xff] }
  0xce   :  { %v367_v16 = vpop.f32.mrf.mxu0  ;;  %v434_v1 = vadd.f32 %v433_v52, %v385_v60 }
  0xcf   :  { %528 = vst.msk [vmem:[%s1149_s4 + $0x28] sm:$0xff] %vm522_vm1, %v511_v14  ;;  %v368_v18 = vadd.f32 %v1012_v28, %v367_v16  ;;  %v416_v19 = vpop.f32.mrf.mxu1 }
  0xd1   :  { %v417_v20 = vadd.f32 %v416_v19, %v368_v18  ;;  %v504_v19 = vld [vmem:[%s1148_s3 + $0x70] sm:$0xff] }
  0xd3   :  { %v466_v22 = vadd.f32 %v465_v62, %v417_v20  ;;  %v390_v20 = vadd.f32 %v1012_v28, %v389_v29 }
  0xd5   :  { %v512_v23 = vadd.f32 %v496_v21, %v466_v22  ;;  %v472_v24 = vpop.f32.mrf.mxu2 }
  0xd6   :  { %v369_v25 = vpop.f32.mrf.mxu0 }
  0xd7   :  { %529 = vst.msk [vmem:[%s1149_s4 + $0x30] sm:$0xff] %vm522_vm1, %v512_v23  ;;  %v370_v26 = vadd.f32 %v1012_v28, %v369_v25  ;;  %v418_v27 = vpop.f32.mrf.mxu1  ;;  %v505_v25 = vld [vmem:[%s1148_s3 + $0x78] sm:$0xff] }
  0xd9   :  { %v419_v30 = vadd.f32 %v418_v27, %v370_v26 }
  0xdb   :  { %v468_v32 = vadd.f32 %v467_v7, %v419_v30  ;;  %v436_v7 = vpop.f32.mrf.mxu3 }
  0xdd   :  { %v513_v33 = vadd.f32 %v497_v31, %v468_v32  ;;  %v475_v34 = vpop.f32.mrf.mxu2 }
  0xde   :  { %v372_v35 = vpop.f32.mrf.mxu0 }
  0xdf   :  { %530 = vst.msk [vmem:[%s1149_s4 + $0x38] sm:$0xff] %vm522_vm1, %v513_v33  ;;  %v373_v36 = vadd.f32 %v1012_v28, %v372_v35  ;;  %v421_v37 = vpop.f32.mrf.mxu1 }
  0xe1   :  { %v422_v38 = vadd.f32 %v421_v37, %v373_v36 }
  0xe3   :  { %v471_v41 = vadd.f32 %v470_v15, %v422_v38  ;;  %v437_v15 = vadd.f32 %v436_v7, %v388_v10  ;;  %v438_v22 = vpop.f32.mrf.mxu3 }
  0xe4   :  { %v439_v23 = vadd.f32 %v438_v22, %v390_v20 }
  0xe5   :  { %v514_v42 = vadd.f32 %v498_v39, %v471_v41  ;;  %v477_v43 = vpop.f32.mrf.mxu2 }
  0xe6   :  { %v374_v44 = vpop.f32.mrf.mxu0 }
  0xe7   :  { %531 = vst.msk [vmem:[%s1149_s4 + $0x40] sm:$0xff] %vm522_vm1, %v514_v42  ;;  %v375_v45 = vadd.f32 %v1012_v28, %v374_v44  ;;  %v423_v46 = vpop.f32.mrf.mxu1 }
  0xe9   :  { %v424_v48 = vadd.f32 %v423_v46, %v375_v45 }
  0xeb   :  { %v473_v50 = vadd.f32 %v472_v24, %v424_v48 }
  0xed   :  { %v515_v53 = vadd.f32 %v499_v49, %v473_v50  ;;  %v480_v54 = vpop.f32.mrf.mxu2 }
  0xee   :  { %v481_v56 = vadd.f32 %v480_v54, %v432_v51  ;;  %v377_v57 = vpop.f32.mrf.mxu0 }
  0xef   :  { %532 = vst.msk [vmem:[%s1149_s4 + $0x48] sm:$0xff] %vm522_vm1, %v515_v53  ;;  %v378_v58 = vadd.f32 %v1012_v28, %v377_v57  ;;  %v426_v59 = vpop.f32.mrf.mxu1 }
  0xf0   :  { %v518_v61 = vadd.f32 %v502_v55, %v481_v56 }
  0xf1   :  { %v427_v62 = vadd.f32 %v426_v59, %v378_v58 }
  0xf2   :  { %535 = vst.msk [vmem:[%s1149_s4 + $0x60] sm:$0xff] %vm522_vm1, %v518_v61 }
  0xf3   :  { %v476_v0 = vadd.f32 %v475_v34, %v427_v62 }
  0xf5   :  { %v516_v2 = vadd.f32 %v500_v63, %v476_v0  ;;  %v482_v3 = vpop.f32.mrf.mxu2 }
  0xf6   :  { %v483_v5 = vadd.f32 %v482_v3, %v434_v1  ;;  %v379_v6 = vpop.f32.mrf.mxu0 }
  0xf7   :  { %533 = vst.msk [vmem:[%s1149_s4 + $0x50] sm:$0xff] %vm522_vm1, %v516_v2  ;;  %v380_v8 = vadd.f32 %v1012_v28, %v379_v6  ;;  %v428_v9 = vpop.f32.mrf.mxu1 }
  0xf8   :  { %v519_v11 = vadd.f32 %v503_v4, %v483_v5 }
  0xf9   :  { %v429_v12 = vadd.f32 %v428_v9, %v380_v8 }
  0xfa   :  { %536 = vst.msk [vmem:[%s1149_s4 + $0x68] sm:$0xff] %vm522_vm1, %v519_v11 }
  0xfb   :  { %v478_v14 = vadd.f32 %v477_v43, %v429_v12 }
  0xfd   :  { %v517_v16 = vadd.f32 %v501_v13, %v478_v14  ;;  %v485_v18 = vpop.f32.mrf.mxu2 }
  0xfe   :  { %v486_v17 = vadd.f32 %v485_v18, %v437_v15 }
  0xff   :  { %534 = vst.msk [vmem:[%s1149_s4 + $0x58] sm:$0xff] %vm522_vm1, %v517_v16 }
 0x100   :  { %v520_v21 = vadd.f32 %v504_v19, %v486_v17 }
 0x102   :  { %537 = vst.msk [vmem:[%s1149_s4 + $0x70] sm:$0xff] %vm522_vm1, %v520_v21 }
 0x105   :  { %v487_v24 = vpop.f32.mrf.mxu2 }
 0x106   :  { %v488_v26 = vadd.f32 %v487_v24, %v439_v23 }
 0x108   :  { %v521_v27 = vadd.f32 %v505_v25, %v488_v26 }
 0x10a   :  { %538 = vst.msk [vmem:[%s1149_s4 + $0x78] sm:$0xff] %vm522_vm1, %v521_v27 }

// kernel: att_net_forward.33
= control target key start
LH: loop header
LB: loop body
LE: loop exit
PB: predicated region body
PF: predicated region fallthrough
CT: control target
= control target key end

     0   :  { %vm182_vm0 = vcmask 130048   ;;  %s827_s1 = inlined_call_operand.vmem [shape: bf16[144,16], index: 1, kind: input, shape index: {}]   ;;  %s828_s0 = inlined_call_operand.vmem [shape: bf16[128,144], index: 0, kind: input, shape index: {}]   ;;  %s829_s2 = inlined_call_operand.vmem [shape: f32[1,16], index: 2, kind: input, shape index: {}]   ;;  %s830_s3 = inlined_call_operand.vmem [shape: f32[128,16], index: 3, kind: input, shape index: {}]   ;;  %s831_s4 = inlined_call_operand.vmem [shape: f32[128,16], index: 4, kind: output, shape index: {}]  }
   0x1   :  { %v520_v0 = vld [vmem:[%s827_s1 + $0x38] sm:$0xff]  ;;  %v521_v1 = vld [vmem:[%s827_s1 + $0x40] sm:$0xff]  ;;  %v393_v3 = vld [vmem:[%s828_s0 + $0x8] sm:$0xf0] }
   0x2   :  { %v497_v2 = vld [vmem:[%s828_s0 + $0x4] sm:$0xf]  ;;  %207 = vmatpush.bf16.msra.mxu0 %v520_v0  ;;  %522 = vmatpush.bf16.msra.mxu2 %v520_v0  ;;  %v519_v5 = vld [vmem:[%s827_s1 + $0x30] sm:$0xff]  ;;  %v518_v6 = vld [vmem:[%s827_s1 + $0x28] sm:$0xff] }
   0x3   :  { %v396_v4 = vor.u32 %v497_v2, %v393_v3  ;;  %263 = vmatpush.bf16.msra.mxu1 %v521_v1  ;;  %530 = vmatpush.bf16.msra.mxu3 %v521_v1  ;;  %v507_v7 = vld [vmem:[%s828_s0 + $0x54] sm:$0xf]  ;;  %v433_v8 = vld [vmem:[%s828_s0 + $0x58] sm:$0xf0]  ;;  %v517_v10 = vld [vmem:[%s827_s1 + $0x20] sm:$0xff] }
   0x4   :  { %v436_v9 = vor.u32 %v507_v7, %v433_v8  ;;  %v516_v11 = vld [vmem:[%s827_s1 + $0x18] sm:$0xff]  ;;  %v499_v12 = vld [vmem:[%s828_s0 + $0x14] sm:$0xf]  ;;  %v514_v16 = vld [vmem:[%s827_s1 + $0x8] sm:$0xff] }
   0x5   :  { %v401_v13 = vld [vmem:[%s828_s0 + $0x18] sm:$0xf0]  ;;  %v515_v15 = vld [vmem:[%s827_s1 + $0x10] sm:$0xff]  ;;  %v509_v17 = vld [vmem:[%s828_s0 + $0x64] sm:$0xf] }
   0x6   :  { %489 = vmatmul.msk.bf16.vlgmr.msra.gmra.mxu1 %vm182_vm0, %v396_v4  ;;  %208 = vmatpush.bf16.msra.mxu0 %v519_v5  ;;  %v404_v14 = vor.u32 %v499_v12, %v401_v13  ;;  %v441_v18 = vld [vmem:[%s828_s0 + $0x68] sm:$0xf0]  ;;  %v513_v20 = vld [vmem:[%s827_s1] sm:$0xff]  ;;  %v498_v22 = vld [vmem:[%s828_s0 + $0x4] sm:$0xf0] }
   0x7   :  { %523 = vmatpush.bf16.msra.mxu2 %v519_v5  ;;  %494 = vmatmul.msk.bf16.vlgmr.msra.gmra.mxu3 %vm182_vm0, %v436_v9  ;;  %v444_v19 = vor.u32 %v509_v17, %v441_v18  ;;  %v391_v21 = vld [vmem:[%s828_s0] sm:$0xf]  ;;  %v506_v24 = vld [vmem:[%s828_s0 + $0x44] sm:$0xf0]  ;;  %v501_v27 = vld [vmem:[%s828_s0 + $0x24] sm:$0xf] }
   0x8   :  { %v423_v23 = vld [vmem:[%s828_s0 + $0x40] sm:$0xf]  ;;  %v392_v25 = vor.u32 %v498_v22, %v391_v21  ;;  %v409_v28 = vld [vmem:[%s828_s0 + $0x28] sm:$0xf0]  ;;  %v511_v30 = vld [vmem:[%s828_s0 + $0x74] sm:$0xf] }
   0x9   :  { %v424_v26 = vor.u32 %v506_v24, %v423_v23  ;;  %v412_v29 = vor.u32 %v501_v27, %v409_v28  ;;  %v449_v31 = vld [vmem:[%s828_s0 + $0x78] sm:$0xf0]  ;;  %v399_v33 = vld [vmem:[%s828_s0 + $0x10] sm:$0xf]  ;;  %v500_v34 = vld [vmem:[%s828_s0 + $0x14] sm:$0xf0] }
   0xa   :  { %209 = vmatpush.bf16.msra.mxu0 %v518_v6  ;;  %v452_v32 = vor.u32 %v511_v30, %v449_v31  ;;  %v431_v35 = vld [vmem:[%s828_s0 + $0x50] sm:$0xf]  ;;  %v508_v36 = vld [vmem:[%s828_s0 + $0x54] sm:$0xf0]  ;;  %v400_v37 = vor.u32 %v500_v34, %v399_v33  ;;  %v503_v39 = vld [vmem:[%s828_s0 + $0x34] sm:$0xf] }
   0xb   :  { %524 = vmatpush.bf16.msra.mxu2 %v518_v6  ;;  %v432_v38 = vor.u32 %v508_v36, %v431_v35  ;;  %v417_v40 = vld [vmem:[%s828_s0 + $0x38] sm:$0xf0]  ;;  %v407_v42 = vld [vmem:[%s828_s0 + $0x20] sm:$0xf]  ;;  %v502_v43 = vld [vmem:[%s828_s0 + $0x24] sm:$0xf0] }
   0xc   :  { %v420_v41 = vor.u32 %v503_v39, %v417_v40  ;;  %v439_v44 = vld [vmem:[%s828_s0 + $0x60] sm:$0xf]  ;;  %v510_v45 = vld [vmem:[%s828_s0 + $0x64] sm:$0xf0]  ;;  %v408_v46 = vor.u32 %v502_v43, %v407_v42  ;;  %v505_v48 = vld [vmem:[%s828_s0 + $0x44] sm:$0xf] }
   0xd   :  { %v440_v47 = vor.u32 %v510_v45, %v439_v44  ;;  %v425_v49 = vld [vmem:[%s828_s0 + $0x48] sm:$0xf0]  ;;  %v415_v51 = vld [vmem:[%s828_s0 + $0x30] sm:$0xf]  ;;  %v504_v52 = vld [vmem:[%s828_s0 + $0x34] sm:$0xf0] }
   0xe   :  { %210 = vmatpush.bf16.msra.mxu0 %v517_v10  ;;  %v428_v50 = vor.u32 %v505_v48, %v425_v49  ;;  %v447_v53 = vld [vmem:[%s828_s0 + $0x70] sm:$0xf]  ;;  %v512_v54 = vld [vmem:[%s828_s0 + $0x74] sm:$0xf0]  ;;  %v416_v55 = vor.u32 %v504_v52, %v415_v51  ;;  %v691_v61 = vld [vmem:[%s829_s2] ss:$0 sm:$0xff] }
   0xf   :  { %525 = vmatpush.bf16.msra.mxu2 %v517_v10  ;;  %v448_v56 = vor.u32 %v512_v54, %v447_v53  ;;  %v337_v3 = vld [vmem:[%s830_s3] sm:$0xff]  ;;  %v338_v12 = vld [vmem:[%s830_s3 + $0x8] sm:$0xff]  ;;  %v339_v22 = vld [vmem:[%s830_s3 + $0x10] sm:$0xff] }
  0x10   :  { %v347_v33 = vld [vmem:[%s830_s3 + $0x50] sm:$0xff]  ;;  %v341_v54 = vld [vmem:[%s830_s3 + $0x20] sm:$0xff] }
  0x12   :  { %211 = vmatpush.bf16.msra.mxu0 %v516_v11 }
  0x13   :  { %526 = vmatpush.bf16.msra.mxu2 %v516_v11 }
  0x16   :  { %490 = vmatmul.msk.bf16.gmra.mxu1 %vm182_vm0, %v404_v14  ;;  %212 = vmatpush.bf16.msra.mxu0 %v515_v15 }
  0x17   :  { %527 = vmatpush.bf16.msra.mxu2 %v515_v15  ;;  %495 = vmatmul.msk.bf16.gmra.mxu3 %vm182_vm0, %v444_v19 }
  0x1a   :  { %213 = vmatpush.bf16.msra.mxu0 %v514_v16 }
  0x1b   :  { %528 = vmatpush.bf16.msra.mxu2 %v514_v16 }
  0x1e   :  { %214 = vmatpush.bf16.msra.mxu0 %v513_v20 }
  0x1f   :  { %529 = vmatpush.bf16.msra.mxu2 %v513_v20 }
  0x21   :  { %215 = vmatmul.bf16.vlgmr.msra.gmra.mxu0 %v392_v25 }
  0x22   :  { %235 = vmatmul.bf16.vlgmr.msra.gmra.mxu2 %v424_v26 }
  0x26   :  { %491 = vmatmul.msk.bf16.gmra.mxu1 %vm182_vm0, %v412_v29 }
  0x27   :  { %496 = vmatmul.msk.bf16.gmra.mxu3 %vm182_vm0, %v452_v32 }
  0x31   :  { %220 = vmatmul.bf16.gmra.mxu0 %v400_v37  ;;  %v340_v37 = vld [vmem:[%s830_s3 + $0x18] sm:$0xff] }
  0x32   :  { %240 = vmatmul.bf16.gmra.mxu2 %v432_v38 }
  0x36   :  { %492 = vmatmul.msk.bf16.gmra.mxu1 %vm182_vm0, %v420_v41 }
  0x41   :  { %225 = vmatmul.bf16.gmra.mxu0 %v408_v46 }
  0x42   :  { %245 = vmatmul.bf16.gmra.mxu2 %v440_v47 }
  0x46   :  { %493 = vmatmul.msk.bf16.gmra.mxu1 %vm182_vm0, %v428_v50  ;;  %v348_v50 = vld [vmem:[%s830_s3 + $0x58] sm:$0xff] }
  0x51   :  { %230 = vmatmul.bf16.gmra.mxu0 %v416_v55 }
  0x52   :  { %250 = vmatmul.bf16.gmra.mxu2 %v448_v56 }
  0x83   :  { %v265_v57 = vpop.f32.mrf.mxu1 }
  0x8a   :  { %v290_v15 = vpop.f32.mrf.mxu3 }
  0x8b   :  { %v267_v58 = vpop.f32.mrf.mxu1 }
  0x92   :  { %v292_v29 = vpop.f32.mrf.mxu3 }
  0x93   :  { %v270_v59 = vpop.f32.mrf.mxu1 }
  0x9a   :  { %v295_v47 = vpop.f32.mrf.mxu3 }
  0x9b   :  { %v272_v60 = vpop.f32.mrf.mxu1 }
  0x9e   :  { %v216_v62 = vpop.f32.mrf.mxu0 }
  0x9f   :  { %v217_v63 = vadd.f32 %v691_v61, %v216_v62 }
  0xa1   :  { %v266_v0 = vadd.f32 %v265_v57, %v217_v63 }
  0xa3   :  { %v305_v1 = vmax.f32 %v266_v0, 0.0  ;;  %v275_v2 = vpop.f32.mrf.mxu1  ;;  %v345_v0 = vld [vmem:[%s830_s3 + $0x40] sm:$0xff] }
  0xa5   :  { %v321_v4 = vmin.f32 %v305_v1, 6.0  ;;  %v236_v5 = vpop.f32.mrf.mxu2 }
  0xa6   :  { %v218_v6 = vpop.f32.mrf.mxu0  ;;  %v237_v48 = vadd.f32 %v691_v61, %v236_v5 }
  0xa7   :  { %v353_v7 = vadd.f32 %v337_v3, %v321_v4  ;;  %v219_v8 = vadd.f32 %v691_v61, %v218_v6 }
  0xa9   :  { %369 = vst.msk [vmem:[%s831_s4] sm:$0xff] %vm182_vm0, %v353_v7  ;;  %v268_v9 = vadd.f32 %v267_v58, %v219_v8  ;;  %v349_v8 = vld [vmem:[%s830_s3 + $0x60] sm:$0xff] }
  0xab   :  { %v306_v10 = vmax.f32 %v268_v9, 0.0  ;;  %v277_v11 = vpop.f32.mrf.mxu1 }
  0xad   :  { %v322_v13 = vmin.f32 %v306_v10, 6.0  ;;  %v238_v14 = vpop.f32.mrf.mxu2  ;;  %v297_v10 = vpop.f32.mrf.mxu3 }
  0xae   :  { %v221_v16 = vpop.f32.mrf.mxu0  ;;  %v239_v5 = vadd.f32 %v691_v61, %v238_v14 }
  0xaf   :  { %v354_v17 = vadd.f32 %v338_v12, %v322_v13  ;;  %v222_v18 = vadd.f32 %v691_v61, %v221_v16 }
  0xb1   :  { %370 = vst.msk [vmem:[%s831_s4 + $0x8] sm:$0xff] %vm182_vm0, %v354_v17  ;;  %v271_v19 = vadd.f32 %v270_v59, %v222_v18 }
  0xb3   :  { %v307_v20 = vmax.f32 %v271_v19, 0.0  ;;  %v710_v21 = vpop.f32.mrf.mxu1 }
  0xb5   :  { %v323_v23 = vmin.f32 %v307_v20, 6.0  ;;  %v241_v24 = vpop.f32.mrf.mxu2 }
  0xb6   :  { %v242_v25 = vadd.f32 %v691_v61, %v241_v24  ;;  %v223_v26 = vpop.f32.mrf.mxu0 }
  0xb7   :  { %v355_v27 = vadd.f32 %v339_v22, %v323_v23  ;;  %v224_v28 = vadd.f32 %v691_v61, %v223_v26  ;;  %v346_v23 = vld [vmem:[%s830_s3 + $0x48] sm:$0xff] }
  0xb8   :  { %v291_v30 = vadd.f32 %v290_v15, %v242_v25 }
  0xb9   :  { %371 = vst.msk [vmem:[%s831_s4 + $0x10] sm:$0xff] %vm182_vm0, %v355_v27  ;;  %v273_v31 = vadd.f32 %v272_v60, %v224_v28 }
  0xba   :  { %v315_v32 = vmax.f32 %v291_v30, 0.0  ;;  %v350_v30 = vld [vmem:[%s830_s3 + $0x68] sm:$0xff] }
  0xbb   :  { %v308_v34 = vmax.f32 %v273_v31, 0.0  ;;  %v724_v35 = vpop.f32.mrf.mxu1 }
  0xbc   :  { %v331_v36 = vmin.f32 %v315_v32, 6.0 }
  0xbd   :  { %v324_v38 = vmin.f32 %v308_v34, 6.0  ;;  %v243_v39 = vpop.f32.mrf.mxu2 }
  0xbe   :  { %v363_v40 = vadd.f32 %v347_v33, %v331_v36  ;;  %v244_v41 = vadd.f32 %v691_v61, %v243_v39  ;;  %v226_v42 = vpop.f32.mrf.mxu0  ;;  %v343_v33 = vld [vmem:[%s830_s3 + $0x30] sm:$0xff]  ;;  %v300_v36 = vpop.f32.mrf.mxu3 }
  0xbf   :  { %v356_v43 = vadd.f32 %v340_v37, %v324_v38  ;;  %v227_v44 = vadd.f32 %v691_v61, %v226_v42 }
  0xc0   :  { %379 = vst.msk [vmem:[%s831_s4 + $0x50] sm:$0xff] %vm182_vm0, %v363_v40  ;;  %v293_v45 = vadd.f32 %v292_v29, %v244_v41 }
  0xc1   :  { %372 = vst.msk [vmem:[%s831_s4 + $0x18] sm:$0xff] %vm182_vm0, %v356_v43  ;;  %v276_v46 = vadd.f32 %v275_v2, %v227_v44 }
  0xc2   :  { %v316_v49 = vmax.f32 %v293_v45, 0.0  ;;  %v351_v45 = vld [vmem:[%s830_s3 + $0x70] sm:$0xff] }
  0xc3   :  { %v309_v51 = vmax.f32 %v276_v46, 0.0  ;;  %v285_v52 = vpop.f32.mrf.mxu1 }
  0xc4   :  { %v332_v53 = vmin.f32 %v316_v49, 6.0  ;;  %v286_v55 = vadd.f32 %v285_v52, %v237_v48  ;;  %v344_v48 = vld [vmem:[%s830_s3 + $0x38] sm:$0xff] }
  0xc5   :  { %v325_v56 = vmin.f32 %v309_v51, 6.0  ;;  %v246_v57 = vpop.f32.mrf.mxu2 }
  0xc6   :  { %v364_v58 = vadd.f32 %v348_v50, %v332_v53  ;;  %v313_v59 = vmax.f32 %v286_v55, 0.0  ;;  %v247_v60 = vadd.f32 %v691_v61, %v246_v57  ;;  %v228_v62 = vpop.f32.mrf.mxu0 }
  0xc7   :  { %v357_v63 = vadd.f32 %v341_v54, %v325_v56  ;;  %v229_v1 = vadd.f32 %v691_v61, %v228_v62  ;;  %v302_v54 = vpop.f32.mrf.mxu3  ;;  %v352_v56 = vld [vmem:[%s830_s3 + $0x78] sm:$0xff] }
  0xc8   :  { %380 = vst.msk [vmem:[%s831_s4 + $0x58] sm:$0xff] %vm182_vm0, %v364_v58  ;;  %v329_v2 = vmin.f32 %v313_v59, 6.0  ;;  %v296_v3 = vadd.f32 %v295_v47, %v247_v60 }
  0xc9   :  { %373 = vst.msk [vmem:[%s831_s4 + $0x20] sm:$0xff] %vm182_vm0, %v357_v63  ;;  %v278_v4 = vadd.f32 %v277_v11, %v229_v1  ;;  %v342_v11 = vld [vmem:[%s830_s3 + $0x28] sm:$0xff] }
  0xca   :  { %v361_v6 = vadd.f32 %v345_v0, %v329_v2  ;;  %v317_v7 = vmax.f32 %v296_v3, 0.0 }
  0xcb   :  { %v310_v9 = vmax.f32 %v278_v4, 0.0  ;;  %v287_v12 = vpop.f32.mrf.mxu1 }
  0xcc   :  { %377 = vst.msk [vmem:[%s831_s4 + $0x40] sm:$0xff] %vm182_vm0, %v361_v6  ;;  %v333_v13 = vmin.f32 %v317_v7, 6.0  ;;  %v288_v14 = vadd.f32 %v287_v12, %v239_v5 }
  0xcd   :  { %v326_v15 = vmin.f32 %v310_v9, 6.0  ;;  %v248_v16 = vpop.f32.mrf.mxu2 }
  0xce   :  { %v365_v17 = vadd.f32 %v349_v8, %v333_v13  ;;  %v314_v18 = vmax.f32 %v288_v14, 0.0  ;;  %v249_v19 = vadd.f32 %v691_v61, %v248_v16  ;;  %v231_v20 = vpop.f32.mrf.mxu0 }
  0xcf   :  { %v358_v22 = vadd.f32 %v342_v11, %v326_v15  ;;  %v232_v24 = vadd.f32 %v691_v61, %v231_v20 }
  0xd0   :  { %381 = vst.msk [vmem:[%s831_s4 + $0x60] sm:$0xff] %vm182_vm0, %v365_v17  ;;  %v330_v25 = vmin.f32 %v314_v18, 6.0  ;;  %v298_v26 = vadd.f32 %v297_v10, %v249_v19 }
  0xd1   :  { %374 = vst.msk [vmem:[%s831_s4 + $0x28] sm:$0xff] %vm182_vm0, %v358_v22  ;;  %v281_v27 = vadd.f32 %v710_v21, %v232_v24 }
  0xd2   :  { %v362_v28 = vadd.f32 %v346_v23, %v330_v25  ;;  %v318_v29 = vmax.f32 %v298_v26, 0.0 }
  0xd3   :  { %v311_v31 = vmax.f32 %v281_v27, 0.0 }
  0xd4   :  { %378 = vst.msk [vmem:[%s831_s4 + $0x48] sm:$0xff] %vm182_vm0, %v362_v28  ;;  %v334_v32 = vmin.f32 %v318_v29, 6.0 }
  0xd5   :  { %v327_v34 = vmin.f32 %v311_v31, 6.0  ;;  %v251_v21 = vpop.f32.mrf.mxu2 }
  0xd6   :  { %v366_v37 = vadd.f32 %v350_v30, %v334_v32  ;;  %v252_v38 = vadd.f32 %v691_v61, %v251_v21  ;;  %v233_v39 = vpop.f32.mrf.mxu0 }
  0xd7   :  { %v359_v40 = vadd.f32 %v343_v33, %v327_v34  ;;  %v234_v41 = vadd.f32 %v691_v61, %v233_v39 }
  0xd8   :  { %382 = vst.msk [vmem:[%s831_s4 + $0x68] sm:$0xff] %vm182_vm0, %v366_v37  ;;  %v301_v42 = vadd.f32 %v300_v36, %v252_v38 }
  0xd9   :  { %375 = vst.msk [vmem:[%s831_s4 + $0x30] sm:$0xff] %vm182_vm0, %v359_v40  ;;  %v283_v43 = vadd.f32 %v724_v35, %v234_v41 }
  0xda   :  { %v319_v44 = vmax.f32 %v301_v42, 0.0 }
  0xdb   :  { %v312_v46 = vmax.f32 %v283_v43, 0.0 }
  0xdc   :  { %v335_v47 = vmin.f32 %v319_v44, 6.0 }
  0xdd   :  { %v328_v49 = vmin.f32 %v312_v46, 6.0  ;;  %v253_v50 = vpop.f32.mrf.mxu2 }
  0xde   :  { %v367_v51 = vadd.f32 %v351_v45, %v335_v47  ;;  %v254_v52 = vadd.f32 %v691_v61, %v253_v50 }
  0xdf   :  { %v360_v53 = vadd.f32 %v344_v48, %v328_v49 }
  0xe0   :  { %383 = vst.msk [vmem:[%s831_s4 + $0x70] sm:$0xff] %vm182_vm0, %v367_v51  ;;  %v303_v35 = vadd.f32 %v302_v54, %v254_v52 }
  0xe1   :  { %376 = vst.msk [vmem:[%s831_s4 + $0x38] sm:$0xff] %vm182_vm0, %v360_v53 }
  0xe2   :  { %v320_v55 = vmax.f32 %v303_v35, 0.0 }
  0xe4   :  { %v336_v57 = vmin.f32 %v320_v55, 6.0 }
  0xe6   :  { %v368_v61 = vadd.f32 %v352_v56, %v336_v57 }
  0xe8   :  { %384 = vst.msk [vmem:[%s831_s4 + $0x78] sm:$0xff] %vm182_vm0, %v368_v61 }

// kernel: att_net_forward.34
= control target key start
LH: loop header
LB: loop body
LE: loop exit
PB: predicated region body
PF: predicated region fallthrough
CT: control target
= control target key end

     0   :  { %s1158_s15 = smov 0   ;;  %s1435_s0 = inlined_call_operand.vmem [shape: bf16[512,144], index: 0, kind: input, shape index: {}]   ;;  %s1436_s1 = inlined_call_operand.vmem [shape: bf16[144,8], index: 1, kind: input, shape index: {}]   ;;  %s1437_s2 = inlined_call_operand.vmem [shape: f32[1,8], index: 2, kind: input, shape index: {}]   ;;  %s1438_s3 = inlined_call_operand.vmem [shape: f32[512,8], index: 3, kind: input, shape index: {}]   ;;  %s1439_s4 = inlined_call_operand.vmem [shape: f32[512,8], index: 4, kind: output, shape index: {}]  }
   0x1 LB: > { %s871_s16 = sadd.s32 4294967295, %s1131_s15   ;;  %p875_p0 = scmp.ge.s32.totalorder %s1131_s15, 1  ;;  %s1131_s15 = sphi %s1158_s15, %s14_s15  }
   0x2   : > { %p175_p1 = scmp.lt.s32.totalorder %s1131_s15, 3 }
   0x4   : > { %p176_p2 = pnand %p875_p0, %p175_p1 }
   0x5   : > { %s876_s21 = sshll.u32 (!%p176_p2), %s871_s16, 5 }
   0x6   : > { %179 = sbr.rel (%p176_p2) target bundleno = 302 (0x12e), region = 36  ;;  %p208_p3 = scmp.lt.s32.totalorder (!%p176_p2), %s876_s21, 63 }
   0xb   : > { %v1105_v0 = vld [vmem:[%s1436_s1 + $0x38] sm:$0xff]  ;;  %v1106_v1 = vld [vmem:[%s1436_s1 + $0x40] sm:$0xff]  ;;  %v1104_v2 = vld [vmem:[%s1436_s1 + $0x30] sm:$0xff]  ;;  %s1441_s21 = smov (!%p208_p3, %s876_s21), 63  ;;  %vm479_vm0 = vcmask 130048   ;;  %vm770_vm1 = vcmask 64512  }
   0xc   : > { %528 = vmatpush.bf16.msra.mxu0 %v1105_v0  ;;  %1107 = vmatpush.bf16.msra.mxu2 %v1105_v0  ;;  %s1175_s24 = sshll.u32 %s1441_s21, 3  ;;  %v1103_v3 = vld [vmem:[%s1436_s1 + $0x28] sm:$0xff]  ;;  %v1102_v7 = vld [vmem:[%s1436_s1 + $0x20] sm:$0xff]  ;;  %v1101_v11 = vld [vmem:[%s1436_s1 + $0x18] sm:$0xff] }
   0xd   : > { %624 = vmatpush.bf16.msra.mxu1 %v1106_v1  ;;  %1115 = vmatpush.bf16.msra.mxu3 %v1106_v1  ;;  %s1181_s27 = scalar_lea.vmem %s1435_s0, %s1175_s24  ;;  %v1100_v12 = vld [vmem:[%s1436_s1 + $0x10] sm:$0xff]  ;;  %v1099_v16 = vld [vmem:[%s1436_s1 + $0x8] sm:$0xff]  ;;  %v1098_v19 = vld [vmem:[%s1436_s1] sm:$0xff]  ;;  %s1290_s19 = scalar_lea.vmem %s1438_s3, %s1175_s24 }
   0xe   : > { %v1066_v4 = vld [vmem:[%s1181_s27 + $0x4] sm:$0xf]  ;;  %v887_v5 = vld [vmem:[%s1181_s27 + $0x8] sm:$0xf0]  ;;  %v1084_v8 = vld [vmem:[%s1181_s27 + $0x94] sm:$0xf]  ;;  %s1298_s22 = scalar_lea.vmem %s1439_s4, %s1175_s24 }
   0xf   : > { %v890_v6 = vor.u32 %v1066_v4, %v887_v5  ;;  %v959_v9 = vld [vmem:[%s1181_s27 + $0x98] sm:$0xf0]  ;;  %v1068_v13 = vld [vmem:[%s1181_s27 + $0x14] sm:$0xf]  ;;  %v1086_v17 = vld [vmem:[%s1181_s27 + $0xa4] sm:$0xf] }
  0x10   : > { %529 = vmatpush.bf16.msra.mxu0 %v1104_v2  ;;  %1108 = vmatpush.bf16.msra.mxu2 %v1104_v2  ;;  %v962_v10 = vor.u32 %v1084_v8, %v959_v9  ;;  %v895_v14 = vld [vmem:[%s1181_s27 + $0x18] sm:$0xf0]  ;;  %v967_v18 = vld [vmem:[%s1181_s27 + $0xa8] sm:$0xf0]  ;;  %v885_v20 = vld [vmem:[%s1181_s27] sm:$0xf] }
  0x11   : > { %1047 = vmatmul.msk.bf16.vlgmr.msra.gmra.mxu1 %vm479_vm0, %v890_v6  ;;  %v898_v15 = vor.u32 %v1068_v13, %v895_v14  ;;  %v1067_v21 = vld [vmem:[%s1181_s27 + $0x4] sm:$0xf0]  ;;  %v970_v22 = vor.u32 %v1086_v17, %v967_v18  ;;  %v949_v23 = vld [vmem:[%s1181_s27 + $0x80] sm:$0xf]  ;;  %v1070_v27 = vld [vmem:[%s1181_s27 + $0x24] sm:$0xf] }
  0x12   : > { %1056 = vmatmul.msk.bf16.vlgmr.msra.gmra.mxu3 %vm479_vm0, %v962_v10  ;;  %v1083_v24 = vld [vmem:[%s1181_s27 + $0x84] sm:$0xf0]  ;;  %v886_v25 = vor.u32 %v1067_v21, %v885_v20  ;;  %v903_v28 = vld [vmem:[%s1181_s27 + $0x28] sm:$0xf0]  ;;  %v1088_v30 = vld [vmem:[%s1181_s27 + $0xb4] sm:$0xf] }
  0x13   : > { %v950_v26 = vor.u32 %v1083_v24, %v949_v23  ;;  %v906_v29 = vor.u32 %v1070_v27, %v903_v28  ;;  %v975_v31 = vld [vmem:[%s1181_s27 + $0xb8] sm:$0xf0]  ;;  %v893_v32 = vld [vmem:[%s1181_s27 + $0x10] sm:$0xf]  ;;  %v1069_v33 = vld [vmem:[%s1181_s27 + $0x14] sm:$0xf0] }
  0x14   : > { %530 = vmatpush.bf16.msra.mxu0 %v1103_v3  ;;  %1109 = vmatpush.bf16.msra.mxu2 %v1103_v3  ;;  %v978_v34 = vor.u32 %v1088_v30, %v975_v31  ;;  %v957_v35 = vld [vmem:[%s1181_s27 + $0x90] sm:$0xf]  ;;  %v1085_v36 = vld [vmem:[%s1181_s27 + $0x94] sm:$0xf0]  ;;  %v894_v37 = vor.u32 %v1069_v33, %v893_v32  ;;  %v1072_v39 = vld [vmem:[%s1181_s27 + $0x34] sm:$0xf] }
  0x15   : > { %v958_v38 = vor.u32 %v1085_v36, %v957_v35  ;;  %v911_v40 = vld [vmem:[%s1181_s27 + $0x38] sm:$0xf0]  ;;  %v1090_v42 = vld [vmem:[%s1181_s27 + $0xc4] sm:$0xf]  ;;  %v983_v43 = vld [vmem:[%s1181_s27 + $0xc8] sm:$0xf0] }
  0x16   : > { %v914_v41 = vor.u32 %v1072_v39, %v911_v40  ;;  %v901_v44 = vld [vmem:[%s1181_s27 + $0x20] sm:$0xf]  ;;  %v1071_v45 = vld [vmem:[%s1181_s27 + $0x24] sm:$0xf0]  ;;  %v986_v46 = vor.u32 %v1090_v42, %v983_v43  ;;  %v1074_v51 = vld [vmem:[%s1181_s27 + $0x44] sm:$0xf] }
  0x17   : > { %v965_v47 = vld [vmem:[%s1181_s27 + $0xa0] sm:$0xf]  ;;  %v1087_v48 = vld [vmem:[%s1181_s27 + $0xa4] sm:$0xf0]  ;;  %v902_v49 = vor.u32 %v1071_v45, %v901_v44  ;;  %v919_v52 = vld [vmem:[%s1181_s27 + $0x48] sm:$0xf0] }
  0x18   : > { %531 = vmatpush.bf16.msra.mxu0 %v1102_v7  ;;  %1110 = vmatpush.bf16.msra.mxu2 %v1102_v7  ;;  %v966_v50 = vor.u32 %v1087_v48, %v965_v47  ;;  %v922_v53 = vor.u32 %v1074_v51, %v919_v52  ;;  %v1092_v54 = vld [vmem:[%s1181_s27 + $0xd4] sm:$0xf]  ;;  %v991_v55 = vld [vmem:[%s1181_s27 + $0xd8] sm:$0xf0]  ;;  %v909_v56 = vld [vmem:[%s1181_s27 + $0x30] sm:$0xf] }
  0x19   : > { %v1073_v57 = vld [vmem:[%s1181_s27 + $0x34] sm:$0xf0]  ;;  %v994_v58 = vor.u32 %v1092_v54, %v991_v55  ;;  %v973_v59 = vld [vmem:[%s1181_s27 + $0xb0] sm:$0xf]  ;;  %v1076_v63 = vld [vmem:[%s1181_s27 + $0x54] sm:$0xf] }
  0x1a   : > { %v1089_v60 = vld [vmem:[%s1181_s27 + $0xb4] sm:$0xf0]  ;;  %v910_v61 = vor.u32 %v1073_v57, %v909_v56  ;;  %v927_v0 = vld [vmem:[%s1181_s27 + $0x58] sm:$0xf0]  ;;  %v1094_v2 = vld [vmem:[%s1181_s27 + $0xe4] sm:$0xf] }
  0x1b   : > { %v974_v62 = vor.u32 %v1089_v60, %v973_v59  ;;  %v930_v1 = vor.u32 %v1076_v63, %v927_v0  ;;  %v999_v3 = vld [vmem:[%s1181_s27 + $0xe8] sm:$0xf0]  ;;  %v917_v4 = vld [vmem:[%s1181_s27 + $0x40] sm:$0xf]  ;;  %v1075_v5 = vld [vmem:[%s1181_s27 + $0x44] sm:$0xf0] }
  0x1c   : > { %532 = vmatpush.bf16.msra.mxu0 %v1101_v11  ;;  %1111 = vmatpush.bf16.msra.mxu2 %v1101_v11  ;;  %v1002_v6 = vor.u32 %v1094_v2, %v999_v3  ;;  %v981_v7 = vld [vmem:[%s1181_s27 + $0xc0] sm:$0xf]  ;;  %v1091_v8 = vld [vmem:[%s1181_s27 + $0xc4] sm:$0xf0]  ;;  %v918_v9 = vor.u32 %v1075_v5, %v917_v4  ;;  %v1078_v11 = vld [vmem:[%s1181_s27 + $0x64] sm:$0xf] }
  0x1d   : > { %v982_v10 = vor.u32 %v1091_v8, %v981_v7  ;;  %v1096_v14 = vld [vmem:[%s1181_s27 + $0xf4] sm:$0xf]  ;;  %v1077_v17 = vld [vmem:[%s1181_s27 + $0x54] sm:$0xf0]  ;;  %v943_v24 = vld [vmem:[%s1181_s27 + $0x78] sm:$0xf0] }
  0x1e   : > { %v1093_v20 = vld [vmem:[%s1181_s27 + $0xd4] sm:$0xf0]  ;;  %v1080_v23 = vld [vmem:[%s1181_s27 + $0x74] sm:$0xf]  ;;  %v1079_v27 = vld [vmem:[%s1181_s27 + $0x64] sm:$0xf0] }
  0x1f   : > { %v997_v28 = vld [vmem:[%s1181_s27 + $0xe0] sm:$0xf]  ;;  %v1082_v32 = vld [vmem:[%s1181_s27 + $0x84] sm:$0xf]  ;;  %v951_v33 = vld [vmem:[%s1181_s27 + $0x88] sm:$0xf0] }
  0x20   : > { %533 = vmatpush.bf16.msra.mxu0 %v1100_v12  ;;  %1112 = vmatpush.bf16.msra.mxu2 %v1100_v12  ;;  %v935_v12 = vld [vmem:[%s1181_s27 + $0x68] sm:$0xf0]  ;;  %v941_v36 = vld [vmem:[%s1181_s27 + $0x70] sm:$0xf]  ;;  %v1097_v39 = vld [vmem:[%s1181_s27 + $0xf4] sm:$0xf0] }
  0x21   : > { %1048 = vmatmul.msk.bf16.gmra.mxu1 %vm479_vm0, %v898_v15  ;;  %v938_v13 = vor.u32 %v1078_v11, %v935_v12  ;;  %v1007_v15 = vld [vmem:[%s1181_s27 + $0xf8] sm:$0xf0]  ;;  %v1284_v44 = vld [vmem:[%s1437_s2] ss:$0 sm:$0xff]  ;;  %v707_v57 = vld [vmem:[%s1290_s19 + $0x8] sm:$0xff] }
  0x22   : > { %1057 = vmatmul.msk.bf16.gmra.mxu3 %vm479_vm0, %v970_v22  ;;  %v1010_v18 = vor.u32 %v1096_v14, %v1007_v15  ;;  %v708_v0 = vld [vmem:[%s1290_s19 + $0x10] sm:$0xff]  ;;  %v709_v11 = vld [vmem:[%s1290_s19 + $0x18] sm:$0xff] }
  0x23   : > { %v724_v7 = vld [vmem:[%s1290_s19 + $0x90] sm:$0xff] }
  0x24   : > { %534 = vmatpush.bf16.msra.mxu0 %v1099_v16  ;;  %1113 = vmatpush.bf16.msra.mxu2 %v1099_v16  ;;  %v925_v16 = vld [vmem:[%s1181_s27 + $0x50] sm:$0xf] }
  0x25   : > { %v926_v21 = vor.u32 %v1077_v17, %v925_v16 }
  0x28   : > { %535 = vmatpush.bf16.msra.mxu0 %v1098_v19  ;;  %1114 = vmatpush.bf16.msra.mxu2 %v1098_v19  ;;  %v989_v19 = vld [vmem:[%s1181_s27 + $0xd0] sm:$0xf] }
  0x29   : > { %v990_v22 = vor.u32 %v1093_v20, %v989_v19  ;;  %v725_v19 = vld [vmem:[%s1290_s19 + $0x98] sm:$0xff] }
  0x2b   : > { %536 = vmatmul.bf16.vlgmr.msra.gmra.mxu0 %v886_v25  ;;  %576 = vmatmul.bf16.vlgmr.msra.gmra.mxu2 %v950_v26  ;;  %v946_v25 = vor.u32 %v1080_v23, %v943_v24  ;;  %v933_v26 = vld [vmem:[%s1181_s27 + $0x60] sm:$0xf] }
  0x2c   : > { %v934_v30 = vor.u32 %v1079_v27, %v933_v26  ;;  %v710_v23 = vld [vmem:[%s1290_s19 + $0x20] sm:$0xff] }
  0x31   : > { %1049 = vmatmul.msk.bf16.gmra.mxu1 %vm479_vm0, %v906_v29  ;;  %v1095_v29 = vld [vmem:[%s1181_s27 + $0xe4] sm:$0xf0] }
  0x32   : > { %1058 = vmatmul.msk.bf16.gmra.mxu3 %vm479_vm0, %v978_v34  ;;  %v998_v31 = vor.u32 %v1095_v29, %v997_v28  ;;  %v954_v34 = vor.u32 %v1082_v32, %v951_v33 }
  0x3b   : > { %541 = vmatmul.bf16.gmra.mxu0 %v894_v37  ;;  %581 = vmatmul.bf16.gmra.mxu2 %v958_v38  ;;  %v1081_v37 = vld [vmem:[%s1181_s27 + $0x74] sm:$0xf0]  ;;  %v1005_v38 = vld [vmem:[%s1181_s27 + $0xf0] sm:$0xf] }
  0x3c   : > { %v942_v40 = vor.u32 %v1081_v37, %v941_v36 }
  0x41   : > { %1050 = vmatmul.msk.bf16.gmra.mxu1 %vm479_vm0, %v914_v41  ;;  %v1006_v41 = vor.u32 %v1097_v39, %v1005_v38 }
  0x42   : > { %1059 = vmatmul.msk.bf16.gmra.mxu3 %vm479_vm0, %v986_v46 }
  0x4b   : > { %546 = vmatmul.bf16.gmra.mxu0 %v902_v49  ;;  %586 = vmatmul.bf16.gmra.mxu2 %v966_v50  ;;  %v706_v49 = vld [vmem:[%s1290_s19] sm:$0xff] }
  0x51   : > { %1051 = vmatmul.msk.bf16.gmra.mxu1 %vm479_vm0, %v922_v53 }
  0x52   : > { %1060 = vmatmul.msk.bf16.gmra.mxu3 %vm479_vm0, %v994_v58 }
  0x5b   : > { %551 = vmatmul.bf16.gmra.mxu0 %v910_v61  ;;  %591 = vmatmul.bf16.gmra.mxu2 %v974_v62 }
  0x61   : > { %1052 = vmatmul.msk.bf16.gmra.mxu1 %vm479_vm0, %v930_v1 }
  0x62   : > { %1061 = vmatmul.msk.bf16.gmra.mxu3 %vm479_vm0, %v1002_v6 }
  0x6b   : > { %556 = vmatmul.bf16.gmra.mxu0 %v918_v9  ;;  %596 = vmatmul.bf16.gmra.mxu2 %v982_v10 }
  0x71   : > { %1053 = vmatmul.msk.bf16.gmra.mxu1 %vm479_vm0, %v938_v13 }
  0x72   : > { %1062 = vmatmul.msk.bf16.gmra.mxu3 %vm479_vm0, %v1010_v18 }
  0x7b   : > { %561 = vmatmul.bf16.gmra.mxu0 %v926_v21  ;;  %601 = vmatmul.bf16.gmra.mxu2 %v990_v22 }
  0x81   : > { %1054 = vmatmul.msk.bf16.gmra.mxu1 %vm479_vm0, %v946_v25 }
  0x8b   : > { %566 = vmatmul.bf16.gmra.mxu0 %v934_v30  ;;  %606 = vmatmul.bf16.gmra.mxu2 %v998_v31  ;;  %v726_v31 = vld [vmem:[%s1290_s19 + $0xa0] sm:$0xff] }
  0x8e   : > { %v626_v35 = vpop.f32.mrf.mxu1 }
  0x91   : > { %1055 = vmatmul.msk.bf16.gmra.mxu1 %vm479_vm0, %v954_v34 }
  0x95   : > { %v671_v45 = vpop.f32.mrf.mxu3 }
  0x96   : > { %v628_v42 = vpop.f32.mrf.mxu1 }
  0x9b   : > { %571 = vmatmul.bf16.gmra.mxu0 %v942_v40  ;;  %611 = vmatmul.bf16.gmra.mxu2 %v1006_v41 }
  0x9d   : > { %v673_v56 = vpop.f32.mrf.mxu3 }
  0x9e   : > { %v631_v43 = vpop.f32.mrf.mxu1 }
  0xa5   : > { %v676_v2 = vpop.f32.mrf.mxu3 }
  0xa6   : > { %v633_v48 = vpop.f32.mrf.mxu1 }
  0xa8   : > { %v537_v46 = vpop.f32.mrf.mxu0 }
  0xa9   : > { %v538_v47 = vadd.f32 %v1284_v44, %v537_v46 }
  0xab   : > { %v627_v50 = vadd.f32 %v626_v35, %v538_v47  ;;  %v711_v35 = vld [vmem:[%s1290_s19 + $0x28] sm:$0xff] }
  0xad   : > { %v738_v51 = vadd.f32 %v706_v49, %v627_v50  ;;  %v678_v15 = vpop.f32.mrf.mxu3 }
  0xae   : > { %v1302_v52 = vpop.f32.mrf.mxu2  ;;  %v636_v55 = vpop.f32.mrf.mxu1 }
  0xaf   : > { %771 = vst.msk [vmem:[%s1298_s22] sm:$0xff] %vm770_vm1, %v738_v51 }
  0xb0   : > { %v539_v53 = vpop.f32.mrf.mxu0 }
  0xb1   : > { %v540_v54 = vadd.f32 %v1284_v44, %v539_v53 }
  0xb3   : > { %v629_v58 = vadd.f32 %v628_v42, %v540_v54  ;;  %v727_v42 = vld [vmem:[%s1290_s19 + $0xa8] sm:$0xff] }
  0xb5   : > { %v739_v59 = vadd.f32 %v707_v57, %v629_v58  ;;  %v681_v28 = vpop.f32.mrf.mxu3 }
  0xb6   : > { %v1308_v60 = vpop.f32.mrf.mxu2  ;;  %v638_v63 = vpop.f32.mrf.mxu1 }
  0xb7   : > { %772 = vst.msk [vmem:[%s1298_s22 + $0x8] sm:$0xff] %vm770_vm1, %v739_v59 }
  0xb8   : > { %v542_v61 = vpop.f32.mrf.mxu0 }
  0xb9   : > { %v543_v62 = vadd.f32 %v1284_v44, %v542_v61  ;;  %v713_v61 = vld [vmem:[%s1290_s19 + $0x38] sm:$0xff] }
  0xbb   : > { %v632_v1 = vadd.f32 %v631_v43, %v543_v62 }
  0xbd   : > { %v740_v3 = vadd.f32 %v708_v0, %v632_v1  ;;  %v683_v46 = vpop.f32.mrf.mxu3 }
  0xbe   : > { %v582_v4 = vpop.f32.mrf.mxu2  ;;  %v641_v9 = vpop.f32.mrf.mxu1 }
  0xbf   : > { %773 = vst.msk [vmem:[%s1298_s22 + $0x10] sm:$0xff] %vm770_vm1, %v740_v3  ;;  %v583_v5 = vadd.f32 %v1284_v44, %v582_v4 }
  0xc0   : > { %v544_v6 = vpop.f32.mrf.mxu0 }
  0xc1   : > { %v545_v8 = vadd.f32 %v1284_v44, %v544_v6  ;;  %v672_v10 = vadd.f32 %v671_v45, %v583_v5  ;;  %v729_v5 = vld [vmem:[%s1290_s19 + $0xb8] sm:$0xff] }
  0xc3   : > { %v634_v12 = vadd.f32 %v633_v48, %v545_v8  ;;  %v756_v13 = vadd.f32 %v724_v7, %v672_v10  ;;  %v712_v48 = vld [vmem:[%s1290_s19 + $0x30] sm:$0xff] }
  0xc5   : > { %v741_v14 = vadd.f32 %v709_v11, %v634_v12  ;;  %789 = vst.msk [vmem:[%s1298_s22 + $0x90] sm:$0xff] %vm770_vm1, %v756_v13 }
  0xc6   : > { %v584_v16 = vpop.f32.mrf.mxu2  ;;  %v643_v21 = vpop.f32.mrf.mxu1 }
  0xc7   : > { %774 = vst.msk [vmem:[%s1298_s22 + $0x18] sm:$0xff] %vm770_vm1, %v741_v14  ;;  %v585_v17 = vadd.f32 %v1284_v44, %v584_v16 }
  0xc8   : > { %v547_v18 = vpop.f32.mrf.mxu0 }
  0xc9   : > { %v548_v20 = vadd.f32 %v1284_v44, %v547_v18  ;;  %v674_v22 = vadd.f32 %v673_v56, %v585_v17  ;;  %v728_v56 = vld [vmem:[%s1290_s19 + $0xb0] sm:$0xff]  ;;  %v730_v17 = vld [vmem:[%s1290_s19 + $0xc0] sm:$0xff] }
  0xcb   : > { %v637_v24 = vadd.f32 %v636_v55, %v548_v20  ;;  %v757_v25 = vadd.f32 %v725_v19, %v674_v22 }
  0xcd   : > { %v742_v26 = vadd.f32 %v710_v23, %v637_v24  ;;  %790 = vst.msk [vmem:[%s1298_s22 + $0x98] sm:$0xff] %vm770_vm1, %v757_v25 }
  0xce   : > { %v587_v27 = vpop.f32.mrf.mxu2  ;;  %v646_v33 = vpop.f32.mrf.mxu1 }
  0xcf   : > { %775 = vst.msk [vmem:[%s1298_s22 + $0x20] sm:$0xff] %vm770_vm1, %v742_v26  ;;  %v588_v29 = vadd.f32 %v1284_v44, %v587_v27 }
  0xd0   : > { %v549_v30 = vpop.f32.mrf.mxu0 }
  0xd1   : > { %v550_v32 = vadd.f32 %v1284_v44, %v549_v30  ;;  %v677_v34 = vadd.f32 %v676_v2, %v588_v29  ;;  %v731_v29 = vld [vmem:[%s1290_s19 + $0xc8] sm:$0xff] }
  0xd3   : > { %v639_v36 = vadd.f32 %v638_v63, %v550_v32  ;;  %v758_v37 = vadd.f32 %v726_v31, %v677_v34  ;;  %v686_v63 = vpop.f32.mrf.mxu3 }
  0xd5   : > { %v743_v38 = vadd.f32 %v711_v35, %v639_v36  ;;  %791 = vst.msk [vmem:[%s1298_s22 + $0xa0] sm:$0xff] %vm770_vm1, %v758_v37 }
  0xd6   : > { %v589_v39 = vpop.f32.mrf.mxu2  ;;  %v648_v45 = vpop.f32.mrf.mxu1 }
  0xd7   : > { %776 = vst.msk [vmem:[%s1298_s22 + $0x28] sm:$0xff] %vm770_vm1, %v743_v38  ;;  %v590_v40 = vadd.f32 %v1284_v44, %v589_v39 }
  0xd8   : > { %v552_v41 = vpop.f32.mrf.mxu0 }
  0xd9   : > { %v553_v43 = vadd.f32 %v1284_v44, %v552_v41  ;;  %v679_v47 = vadd.f32 %v678_v15, %v590_v40  ;;  %v732_v40 = vld [vmem:[%s1290_s19 + $0xd0] sm:$0xff] }
  0xdb   : > { %v642_v49 = vadd.f32 %v641_v9, %v553_v43  ;;  %v759_v50 = vadd.f32 %v727_v42, %v679_v47  ;;  %v714_v9 = vld [vmem:[%s1290_s19 + $0x40] sm:$0xff]  ;;  %v688_v13 = vpop.f32.mrf.mxu3 }
  0xdd   : > { %v744_v51 = vadd.f32 %v712_v48, %v642_v49  ;;  %792 = vst.msk [vmem:[%s1298_s22 + $0xa8] sm:$0xff] %vm770_vm1, %v759_v50 }
  0xde   : > { %v592_v53 = vpop.f32.mrf.mxu2  ;;  %v651_v58 = vpop.f32.mrf.mxu1 }
  0xdf   : > { %777 = vst.msk [vmem:[%s1298_s22 + $0x30] sm:$0xff] %vm770_vm1, %v744_v51  ;;  %v593_v54 = vadd.f32 %v1284_v44, %v592_v53 }
  0xe0   : > { %v554_v55 = vpop.f32.mrf.mxu0 }
  0xe1   : > { %v555_v57 = vadd.f32 %v1284_v44, %v554_v55  ;;  %v682_v59 = vadd.f32 %v681_v28, %v593_v54  ;;  %v733_v54 = vld [vmem:[%s1290_s19 + $0xd8] sm:$0xff] }
  0xe3   : > { %v644_v62 = vadd.f32 %v643_v21, %v555_v57  ;;  %v760_v0 = vadd.f32 %v728_v56, %v682_v59  ;;  %v715_v21 = vld [vmem:[%s1290_s19 + $0x48] sm:$0xff]  ;;  %v691_v26 = vpop.f32.mrf.mxu3 }
  0xe5   : > { %v745_v1 = vadd.f32 %v713_v61, %v644_v62  ;;  %793 = vst.msk [vmem:[%s1298_s22 + $0xb0] sm:$0xff] %vm770_vm1, %v760_v0 }
  0xe6   : > { %v594_v2 = vpop.f32.mrf.mxu2  ;;  %v653_v7 = vpop.f32.mrf.mxu1 }
  0xe7   : > { %778 = vst.msk [vmem:[%s1298_s22 + $0x38] sm:$0xff] %vm770_vm1, %v745_v1  ;;  %v595_v3 = vadd.f32 %v1284_v44, %v594_v2  ;;  %v578_v1 = vadd.f32 %v1284_v44, %v1302_v52 }
  0xe8   : > { %v557_v4 = vpop.f32.mrf.mxu0 }
  0xe9   : > { %v558_v6 = vadd.f32 %v1284_v44, %v557_v4  ;;  %v684_v8 = vadd.f32 %v683_v46, %v595_v3  ;;  %v717_v46 = vld [vmem:[%s1290_s19 + $0x58] sm:$0xff]  ;;  %v734_v4 = vld [vmem:[%s1290_s19 + $0xe0] sm:$0xff] }
  0xeb   : > { %v647_v10 = vadd.f32 %v646_v33, %v558_v6  ;;  %v761_v11 = vadd.f32 %v729_v5, %v684_v8  ;;  %v716_v33 = vld [vmem:[%s1290_s19 + $0x50] sm:$0xff]  ;;  %v693_v43 = vpop.f32.mrf.mxu3 }
  0xed   : > { %v746_v12 = vadd.f32 %v714_v9, %v647_v10  ;;  %794 = vst.msk [vmem:[%s1298_s22 + $0xb8] sm:$0xff] %vm770_vm1, %v761_v11  ;;  %v719_v9 = vld [vmem:[%s1290_s19 + $0x68] sm:$0xff] }
  0xee   : > { %v597_v14 = vpop.f32.mrf.mxu2  ;;  %v656_v19 = vpop.f32.mrf.mxu1 }
  0xef   : > { %779 = vst.msk [vmem:[%s1298_s22 + $0x40] sm:$0xff] %vm770_vm1, %v746_v12  ;;  %v598_v15 = vadd.f32 %v1284_v44, %v597_v14 }
  0xf0   : > { %v559_v16 = vpop.f32.mrf.mxu0 }
  0xf1   : > { %v560_v18 = vadd.f32 %v1284_v44, %v559_v16  ;;  %v687_v20 = vadd.f32 %v686_v63, %v598_v15  ;;  %v580_v16 = vadd.f32 %v1284_v44, %v1308_v60 }
  0xf3   : > { %v649_v22 = vadd.f32 %v648_v45, %v560_v18  ;;  %v762_v23 = vadd.f32 %v730_v17, %v687_v20  ;;  %v696_v61 = vpop.f32.mrf.mxu3 }
  0xf5   : > { %v747_v24 = vadd.f32 %v715_v21, %v649_v22  ;;  %795 = vst.msk [vmem:[%s1298_s22 + $0xc0] sm:$0xff] %vm770_vm1, %v762_v23  ;;  %v723_v22 = vld [vmem:[%s1290_s19 + $0x88] sm:$0xff] }
  0xf6   : > { %v599_v25 = vpop.f32.mrf.mxu2  ;;  %v658_v31 = vpop.f32.mrf.mxu1 }
  0xf7   : > { %780 = vst.msk [vmem:[%s1298_s22 + $0x48] sm:$0xff] %vm770_vm1, %v747_v24  ;;  %v600_v27 = vadd.f32 %v1284_v44, %v599_v25  ;;  %v720_v24 = vld [vmem:[%s1290_s19 + $0x70] sm:$0xff] }
  0xf8   : > { %v562_v28 = vpop.f32.mrf.mxu0 }
  0xf9   : > { %v563_v30 = vadd.f32 %v1284_v44, %v562_v28  ;;  %v689_v32 = vadd.f32 %v688_v13, %v600_v27 }
  0xfb   : > { %v652_v34 = vadd.f32 %v651_v58, %v563_v30  ;;  %v763_v35 = vadd.f32 %v731_v29, %v689_v32  ;;  %v718_v58 = vld [vmem:[%s1290_s19 + $0x60] sm:$0xff]  ;;  %v698_v14 = vpop.f32.mrf.mxu3 }
  0xfd   : > { %v748_v36 = vadd.f32 %v716_v33, %v652_v34  ;;  %796 = vst.msk [vmem:[%s1298_s22 + $0xc8] sm:$0xff] %vm770_vm1, %v763_v35  ;;  %v736_v33 = vld [vmem:[%s1290_s19 + $0xf0] sm:$0xff] }
  0xfe   : > { %v602_v37 = vpop.f32.mrf.mxu2  ;;  %v661_v42 = vpop.f32.mrf.mxu1 }
  0xff   : > { %781 = vst.msk [vmem:[%s1298_s22 + $0x50] sm:$0xff] %vm770_vm1, %v748_v36  ;;  %v603_v38 = vadd.f32 %v1284_v44, %v602_v37  ;;  %v721_v36 = vld [vmem:[%s1290_s19 + $0x78] sm:$0xff] }
 0x100   : > { %v564_v39 = vpop.f32.mrf.mxu0 }
 0x101   : > { %v565_v41 = vadd.f32 %v1284_v44, %v564_v39  ;;  %v692_v45 = vadd.f32 %v691_v26, %v603_v38 }
 0x103   : > { %v654_v47 = vadd.f32 %v653_v7, %v565_v41  ;;  %v764_v48 = vadd.f32 %v732_v40, %v692_v45  ;;  %v722_v7 = vld [vmem:[%s1290_s19 + $0x80] sm:$0xff]  ;;  %v701_v29 = vpop.f32.mrf.mxu3 }
 0x105   : > { %v749_v49 = vadd.f32 %v717_v46, %v654_v47  ;;  %797 = vst.msk [vmem:[%s1298_s22 + $0xd0] sm:$0xff] %vm770_vm1, %v764_v48 }
 0x106   : > { %v604_v50 = vpop.f32.mrf.mxu2  ;;  %v663_v56 = vpop.f32.mrf.mxu1 }
 0x107   : > { %782 = vst.msk [vmem:[%s1298_s22 + $0x58] sm:$0xff] %vm770_vm1, %v749_v49  ;;  %v605_v51 = vadd.f32 %v1284_v44, %v604_v50 }
 0x108   : > { %v567_v53 = vpop.f32.mrf.mxu0 }
 0x109   : > { %v568_v55 = vadd.f32 %v1284_v44, %v567_v53  ;;  %v694_v57 = vadd.f32 %v693_v43, %v605_v51  ;;  %v737_v43 = vld [vmem:[%s1290_s19 + $0xf8] sm:$0xff] }
 0x10b   : > { %v657_v59 = vadd.f32 %v656_v19, %v568_v55  ;;  %v765_v62 = vadd.f32 %v733_v54, %v694_v57  ;;  %v735_v19 = vld [vmem:[%s1290_s19 + $0xe8] sm:$0xff] }
 0x10d   : > { %v750_v63 = vadd.f32 %v718_v58, %v657_v59  ;;  %798 = vst.msk [vmem:[%s1298_s22 + $0xd8] sm:$0xff] %vm770_vm1, %v765_v62 }
 0x10e   : > { %v607_v0 = vpop.f32.mrf.mxu2  ;;  %v666_v6 = vpop.f32.mrf.mxu1 }
 0x10f   : > { %783 = vst.msk [vmem:[%s1298_s22 + $0x60] sm:$0xff] %vm770_vm1, %v750_v63  ;;  %v608_v2 = vadd.f32 %v1284_v44, %v607_v0  ;;  %v667_v10 = vadd.f32 %v666_v6, %v578_v1 }
 0x110   : > { %v569_v3 = vpop.f32.mrf.mxu0 }
 0x111   : > { %v570_v5 = vadd.f32 %v1284_v44, %v569_v3  ;;  %v697_v8 = vadd.f32 %v696_v61, %v608_v2  ;;  %v754_v13 = vadd.f32 %v722_v7, %v667_v10 }
 0x113   : > { %v659_v11 = vadd.f32 %v658_v31, %v570_v5  ;;  %v766_v12 = vadd.f32 %v734_v4, %v697_v8  ;;  %787 = vst.msk [vmem:[%s1298_s22 + $0x80] sm:$0xff] %vm770_vm1, %v754_v13 }
 0x115   : > { %v751_v52 = vadd.f32 %v719_v9, %v659_v11  ;;  %799 = vst.msk [vmem:[%s1298_s22 + $0xe0] sm:$0xff] %vm770_vm1, %v766_v12 }
 0x116   : > { %v609_v15 = vpop.f32.mrf.mxu2  ;;  %v668_v21 = vpop.f32.mrf.mxu1 }
 0x117   : > { %784 = vst.msk [vmem:[%s1298_s22 + $0x68] sm:$0xff] %vm770_vm1, %v751_v52  ;;  %v610_v17 = vadd.f32 %v1284_v44, %v609_v15  ;;  %v669_v25 = vadd.f32 %v668_v21, %v580_v16 }
 0x118   : > { %v572_v18 = vpop.f32.mrf.mxu0 }
 0x119   : > { %v573_v20 = vadd.f32 %v1284_v44, %v572_v18  ;;  %v699_v23 = vadd.f32 %v698_v14, %v610_v17  ;;  %v755_v60 = vadd.f32 %v723_v22, %v669_v25 }
 0x11b   : > { %v662_v26 = vadd.f32 %v661_v42, %v573_v20  ;;  %v767_v27 = vadd.f32 %v735_v19, %v699_v23  ;;  %788 = vst.msk [vmem:[%s1298_s22 + $0x88] sm:$0xff] %vm770_vm1, %v755_v60  ;;  %v703_v42 = vpop.f32.mrf.mxu3 }
 0x11d   : > { %v752_v28 = vadd.f32 %v720_v24, %v662_v26  ;;  %800 = vst.msk [vmem:[%s1298_s22 + $0xe8] sm:$0xff] %vm770_vm1, %v767_v27 }
 0x11e   : > { %v612_v30 = vpop.f32.mrf.mxu2 }
 0x11f   : > { %785 = vst.msk [vmem:[%s1298_s22 + $0x70] sm:$0xff] %vm770_vm1, %v752_v28  ;;  %v613_v31 = vadd.f32 %v1284_v44, %v612_v30 }
 0x120   : > { %v574_v32 = vpop.f32.mrf.mxu0 }
 0x121   : > { %v575_v34 = vadd.f32 %v1284_v44, %v574_v32  ;;  %v702_v35 = vadd.f32 %v701_v29, %v613_v31 }
 0x123   : > { %v664_v37 = vadd.f32 %v663_v56, %v575_v34  ;;  %v768_v38 = vadd.f32 %v736_v33, %v702_v35 }
 0x125   : > { %v753_v39 = vadd.f32 %v721_v36, %v664_v37  ;;  %801 = vst.msk [vmem:[%s1298_s22 + $0xf0] sm:$0xff] %vm770_vm1, %v768_v38 }
 0x126   : > { %v614_v40 = vpop.f32.mrf.mxu2 }
 0x127   : > { %786 = vst.msk [vmem:[%s1298_s22 + $0x78] sm:$0xff] %vm770_vm1, %v753_v39  ;;  %v615_v41 = vadd.f32 %v1284_v44, %v614_v40 }
 0x129   : > { %v704_v45 = vadd.f32 %v703_v42, %v615_v41 }
 0x12b   : > { %v769_v46 = vadd.f32 %v737_v43, %v704_v45 }
 0x12d   : > { %802 = vst.msk [vmem:[%s1298_s22 + $0xf8] sm:$0xff] %vm770_vm1, %v769_v46 }
 0x12e PF: > { %s14_s15 = sadd.s32 1, %s1131_s15  }
 0x12f   : > { %p11_p4 = scmp.ge.s32.totalorder %s14_s15, 4  }
 0x131   :  { %13 = sbr.rel (!%p11_p4) target bundleno = 1 (0x1), region = 69 }

// kernel: att_net_forward.35
= control target key start
LH: loop header
LB: loop body
LE: loop exit
PB: predicated region body
PF: predicated region fallthrough
CT: control target
= control target key end

     0   :  { %s1071_s21 = smov 0   ;;  %s1355_s0 = inlined_call_operand.vmem [shape: bf16[512,72], index: 0, kind: input, shape index: {}]   ;;  %s1356_s1 = inlined_call_operand.vmem [shape: bf16[72,8], index: 1, kind: input, shape index: {}]   ;;  %s1357_s2 = inlined_call_operand.vmem [shape: f32[1,8], index: 2, kind: input, shape index: {}]   ;;  %s1358_s3 = inlined_call_operand.vmem [shape: f32[512,8], index: 3, kind: input, shape index: {}]   ;;  %s1359_s4 = inlined_call_operand.vmem [shape: f32[1,8], index: 4, kind: input, shape index: {}]   ;;  %s1360_s5 = inlined_call_operand.vmem [shape: f32[1,8], index: 5, kind: input, shape index: {}]   ;;  %s1361_s6 = inlined_call_operand.vmem [shape: f32[512,8], index: 6, kind: output, shape index: {}]  }
   0x1 LB: > { %s873_s22 = sadd.s32 4294967295, %s1034_s21   ;;  %p877_p0 = scmp.ge.s32.totalorder %s1034_s21, 1  ;;  %s1034_s21 = sphi %s1071_s21, %s16_s21  }
   0x2   : > { %p224_p1 = scmp.lt.s32.totalorder %s1034_s21, 3 }
   0x4   : > { %p225_p2 = pnand %p877_p0, %p224_p1 }
   0x5   : > { %s878_s25 = sshll.u32 (!%p225_p2), %s873_s22, 5 }
   0x6   : > { %228 = sbr.rel (%p225_p2) target bundleno = 239 (0xef), region = 44  ;;  %p260_p3 = scmp.lt.s32.totalorder (!%p225_p2), %s878_s25, 63 }
   0xb   : > { %v318_v0 = vld [vmem:[%s1356_s1 + $0x20] sm:$0xf]  ;;  %vm479_vm0 = vcmask 1043456   ;;  %v1001_v4 = vld [vmem:[%s1356_s1 + $0x18] sm:$0xff]  ;;  %v1000_v5 = vld [vmem:[%s1356_s1 + $0x10] sm:$0xff]  ;;  %s1363_s25 = smov (!%p260_p3, %s878_s25), 63 }
   0xc   : > { %v420_v1 = vunpack.c.l.b16 %v318_v0  ;;  %v999_v6 = vld [vmem:[%s1356_s1 + $0x8] sm:$0xff]  ;;  %s879_s8 = sshll.u32 %s1363_s25, 2  ;;  %v998_v7 = vld [vmem:[%s1356_s1] sm:$0xff]  ;;  %vm430_vm1 = vcmask 588800   ;;  %s881_s16 = sshll.u32 %s1363_s25, 3  ;;  %vm772_vm2 = vcmask 64512  }
   0xd   : > { %s1100_s13 = scalar_lea.vmem %s1355_s0, %s879_s8  ;;  %v1137_v24 = vld [vmem:[%s1357_s2] ss:$0 sm:$0xff]  ;;  %s1143_s19 = scalar_lea.vmem %s1358_s3, %s881_s16 }
   0xe   : > { %v425_v2 = vpack.c.b16 %v420_v1, %v420_v1  ;;  %v982_v8 = vld [vmem:[%s1100_s13] sm:$0xff]  ;;  %v983_v12 = vld [vmem:[%s1100_s13 + $0x8] sm:$0xff]  ;;  %v984_v16 = vld [vmem:[%s1100_s13 + $0x10] sm:$0xff]  ;;  %s1168_s27 = scalar_lea.vmem %s1361_s6, %s881_s16 }
   0xf   : > { %v986_v9 = vld [vmem:[%s1100_s13 + $0x20] sm:$0xff]  ;;  %v987_v13 = vld [vmem:[%s1100_s13 + $0x28] sm:$0xff]  ;;  %v988_v17 = vld [vmem:[%s1100_s13 + $0x30] sm:$0xff] }
  0x10   : > { %v481_v3 = vsel %vm479_vm0, %v425_v2, 0  ;;  %v990_v10 = vld [vmem:[%s1100_s13 + $0x40] sm:$0xff]  ;;  %v991_v14 = vld [vmem:[%s1100_s13 + $0x48] sm:$0xff]  ;;  %v992_v18 = vld [vmem:[%s1100_s13 + $0x50] sm:$0xff] }
  0x11   : > { %486 = vmatpush.bf16.msra.mxu0 %v481_v3  ;;  %1002 = vmatpush.bf16.msra.mxu1 %v481_v3  ;;  %v994_v11 = vld [vmem:[%s1100_s13 + $0x60] sm:$0xff]  ;;  %v995_v15 = vld [vmem:[%s1100_s13 + $0x68] sm:$0xff]  ;;  %v996_v19 = vld [vmem:[%s1100_s13 + $0x70] sm:$0xff] }
  0x12   : > { %1003 = vmatpush.bf16.msra.mxu2 %v481_v3  ;;  %1004 = vmatpush.bf16.msra.mxu3 %v481_v3  ;;  %v985_v20 = vld [vmem:[%s1100_s13 + $0x18] sm:$0xff]  ;;  %v636_v31 = vld [vmem:[%s1143_s19] sm:$0xff]  ;;  %v637_v59 = vld [vmem:[%s1143_s19 + $0x8] sm:$0xff] }
  0x13   : > { %v989_v21 = vld [vmem:[%s1100_s13 + $0x38] sm:$0xff]  ;;  %v644_v32 = vld [vmem:[%s1143_s19 + $0x40] sm:$0xff]  ;;  %v645_v60 = vld [vmem:[%s1143_s19 + $0x48] sm:$0xff] }
  0x14   : > { %v993_v22 = vld [vmem:[%s1100_s13 + $0x58] sm:$0xff]  ;;  %v1152_v34 = vld [vmem:[%s1359_s4] ss:$0 sm:$0xff] }
  0x15   : > { %487 = vmatpush.bf16.msra.mxu0 %v1001_v4  ;;  %1005 = vmatpush.bf16.msra.mxu1 %v1001_v4  ;;  %v997_v23 = vld [vmem:[%s1100_s13 + $0x78] sm:$0xff]  ;;  %v1157_v37 = vld [vmem:[%s1360_s5] ss:$0 sm:$0xff] }
  0x16   : > { %1006 = vmatpush.bf16.msra.mxu2 %v1001_v4  ;;  %1007 = vmatpush.bf16.msra.mxu3 %v1001_v4  ;;  %v652_v53 = vld [vmem:[%s1143_s19 + $0x80] sm:$0xff] }
  0x17   : > { %v660_v54 = vld [vmem:[%s1143_s19 + $0xc0] sm:$0xff] }
  0x19   : > { %488 = vmatpush.bf16.msra.mxu0 %v1000_v5  ;;  %1008 = vmatpush.bf16.msra.mxu1 %v1000_v5 }
  0x1a   : > { %1009 = vmatpush.bf16.msra.mxu2 %v1000_v5  ;;  %1010 = vmatpush.bf16.msra.mxu3 %v1000_v5 }
  0x1d   : > { %489 = vmatpush.bf16.msra.mxu0 %v999_v6  ;;  %1011 = vmatpush.bf16.msra.mxu1 %v999_v6 }
  0x1e   : > { %1012 = vmatpush.bf16.msra.mxu2 %v999_v6  ;;  %1013 = vmatpush.bf16.msra.mxu3 %v999_v6 }
  0x21   : > { %490 = vmatpush.bf16.msra.mxu0 %v998_v7  ;;  %1014 = vmatpush.bf16.msra.mxu1 %v998_v7 }
  0x22   : > { %1015 = vmatpush.bf16.msra.mxu2 %v998_v7  ;;  %1016 = vmatpush.bf16.msra.mxu3 %v998_v7 }
  0x24   : > { %964 = vmatmul.msk.bf16.vlgmr.msra.gmra.mxu0 %vm430_vm1, %v982_v8  ;;  %968 = vmatmul.msk.bf16.vlgmr.msra.gmra.mxu1 %vm430_vm1, %v986_v9 }
  0x25   : > { %972 = vmatmul.msk.bf16.vlgmr.msra.gmra.mxu2 %vm430_vm1, %v990_v10  ;;  %976 = vmatmul.msk.bf16.vlgmr.msra.gmra.mxu3 %vm430_vm1, %v994_v11 }
  0x34   : > { %965 = vmatmul.msk.bf16.gmra.mxu0 %vm430_vm1, %v983_v12  ;;  %969 = vmatmul.msk.bf16.gmra.mxu1 %vm430_vm1, %v987_v13 }
  0x35   : > { %973 = vmatmul.msk.bf16.gmra.mxu2 %vm430_vm1, %v991_v14  ;;  %977 = vmatmul.msk.bf16.gmra.mxu3 %vm430_vm1, %v995_v15 }
  0x44   : > { %966 = vmatmul.msk.bf16.gmra.mxu0 %vm430_vm1, %v984_v16  ;;  %970 = vmatmul.msk.bf16.gmra.mxu1 %vm430_vm1, %v988_v17 }
  0x45   : > { %974 = vmatmul.msk.bf16.gmra.mxu2 %vm430_vm1, %v992_v18  ;;  %978 = vmatmul.msk.bf16.gmra.mxu3 %vm430_vm1, %v996_v19 }
  0x54   : > { %967 = vmatmul.msk.bf16.gmra.mxu0 %vm430_vm1, %v985_v20  ;;  %971 = vmatmul.msk.bf16.gmra.mxu1 %vm430_vm1, %v989_v21  ;;  %v653_v21 = vld [vmem:[%s1143_s19 + $0x88] sm:$0xff] }
  0x55   : > { %975 = vmatmul.msk.bf16.gmra.mxu2 %vm430_vm1, %v993_v22  ;;  %979 = vmatmul.msk.bf16.gmra.mxu3 %vm430_vm1, %v997_v23  ;;  %v661_v22 = vld [vmem:[%s1143_s19 + $0xc8] sm:$0xff] }
  0xa1   : > { %v492_v25 = vpop.f32.mrf.mxu0  ;;  %v512_v26 = vpop.f32.mrf.mxu1 }
  0xa2   : > { %v493_v27 = vadd.f32 %v1137_v24, %v492_v25  ;;  %v513_v28 = vadd.f32 %v1137_v24, %v512_v26 }
  0xa4   : > { %v572_v29 = vmax.f32 %v493_v27, 0.0  ;;  %v580_v30 = vmax.f32 %v513_v28, 0.0  ;;  %v638_v28 = vld [vmem:[%s1143_s19 + $0x10] sm:$0xff] }
  0xa6   : > { %v604_v33 = vmin.f32 %v572_v29, 6.0  ;;  %v612_v35 = vmin.f32 %v580_v30, 6.0  ;;  %v646_v29 = vld [vmem:[%s1143_s19 + $0x50] sm:$0xff] }
  0xa8   : > { %v668_v36 = vadd.f32 %v636_v31, %v604_v33  ;;  %v676_v38 = vadd.f32 %v644_v32, %v612_v35  ;;  %v532_v39 = vpop.f32.mrf.mxu2  ;;  %v552_v40 = vpop.f32.mrf.mxu3 }
  0xa9   : > { %v533_v41 = vadd.f32 %v1137_v24, %v532_v39  ;;  %v553_v42 = vadd.f32 %v1137_v24, %v552_v40  ;;  %v494_v43 = vpop.f32.mrf.mxu0  ;;  %v514_v44 = vpop.f32.mrf.mxu1 }
  0xaa   : > { %v704_v45 = vmul.f32 %v1152_v34, %v668_v36  ;;  %v712_v46 = vmul.f32 %v1152_v34, %v676_v38  ;;  %v495_v47 = vadd.f32 %v1137_v24, %v494_v43  ;;  %v515_v48 = vadd.f32 %v1137_v24, %v514_v44 }
  0xab   : > { %v588_v49 = vmax.f32 %v533_v41, 0.0  ;;  %v596_v50 = vmax.f32 %v553_v42, 0.0 }
  0xac   : > { %v740_v51 = vadd.f32 %v1157_v37, %v704_v45  ;;  %v748_v52 = vadd.f32 %v1157_v37, %v712_v46  ;;  %v573_v55 = vmax.f32 %v495_v47, 0.0  ;;  %v581_v56 = vmax.f32 %v515_v48, 0.0 }
  0xad   : > { %v620_v57 = vmin.f32 %v588_v49, 6.0  ;;  %v628_v58 = vmin.f32 %v596_v50, 6.0 }
  0xae   : > { %773 = vst.msk [vmem:[%s1168_s27] sm:$0xff] %vm772_vm2, %v740_v51  ;;  %v605_v61 = vmin.f32 %v573_v55, 6.0  ;;  %v613_v62 = vmin.f32 %v581_v56, 6.0  ;;  %v654_v56 = vld [vmem:[%s1143_s19 + $0x90] sm:$0xff] }
  0xaf   : > { %781 = vst.msk [vmem:[%s1168_s27 + $0x40] sm:$0xff] %vm772_vm2, %v748_v52  ;;  %v684_v63 = vadd.f32 %v652_v53, %v620_v57  ;;  %v692_v0 = vadd.f32 %v660_v54, %v628_v58  ;;  %v662_v57 = vld [vmem:[%s1143_s19 + $0xd0] sm:$0xff] }
  0xb0   : > { %v669_v1 = vadd.f32 %v637_v59, %v605_v61  ;;  %v677_v2 = vadd.f32 %v645_v60, %v613_v62  ;;  %v534_v3 = vpop.f32.mrf.mxu2  ;;  %v554_v4 = vpop.f32.mrf.mxu3  ;;  %v639_v62 = vld [vmem:[%s1143_s19 + $0x18] sm:$0xff] }
  0xb1   : > { %v720_v5 = vmul.f32 %v1152_v34, %v684_v63  ;;  %v728_v6 = vmul.f32 %v1152_v34, %v692_v0  ;;  %v535_v7 = vadd.f32 %v1137_v24, %v534_v3  ;;  %v555_v8 = vadd.f32 %v1137_v24, %v554_v4  ;;  %v497_v9 = vpop.f32.mrf.mxu0  ;;  %v517_v10 = vpop.f32.mrf.mxu1  ;;  %v647_v63 = vld [vmem:[%s1143_s19 + $0x58] sm:$0xff] }
  0xb2   : > { %v705_v11 = vmul.f32 %v1152_v34, %v669_v1  ;;  %v713_v12 = vmul.f32 %v1152_v34, %v677_v2  ;;  %v498_v13 = vadd.f32 %v1137_v24, %v497_v9  ;;  %v518_v14 = vadd.f32 %v1137_v24, %v517_v10 }
  0xb3   : > { %v756_v15 = vadd.f32 %v1157_v37, %v720_v5  ;;  %v764_v16 = vadd.f32 %v1157_v37, %v728_v6  ;;  %v589_v17 = vmax.f32 %v535_v7, 0.0  ;;  %v597_v18 = vmax.f32 %v555_v8, 0.0 }
  0xb4   : > { %v741_v19 = vadd.f32 %v1157_v37, %v705_v11  ;;  %v749_v20 = vadd.f32 %v1157_v37, %v713_v12  ;;  %v574_v23 = vmax.f32 %v498_v13, 0.0  ;;  %v582_v25 = vmax.f32 %v518_v14, 0.0 }
  0xb5   : > { %789 = vst.msk [vmem:[%s1168_s27 + $0x80] sm:$0xff] %vm772_vm2, %v756_v15  ;;  %v621_v26 = vmin.f32 %v589_v17, 6.0  ;;  %v629_v27 = vmin.f32 %v597_v18, 6.0 }
  0xb6   : > { %797 = vst.msk [vmem:[%s1168_s27 + $0xc0] sm:$0xff] %vm772_vm2, %v764_v16  ;;  %v606_v30 = vmin.f32 %v574_v23, 6.0  ;;  %v614_v31 = vmin.f32 %v582_v25, 6.0  ;;  %v655_v25 = vld [vmem:[%s1143_s19 + $0x98] sm:$0xff] }
  0xb7   : > { %774 = vst.msk [vmem:[%s1168_s27 + $0x8] sm:$0xff] %vm772_vm2, %v741_v19  ;;  %v685_v32 = vadd.f32 %v653_v21, %v621_v26  ;;  %v693_v33 = vadd.f32 %v661_v22, %v629_v27  ;;  %v663_v26 = vld [vmem:[%s1143_s19 + $0xd8] sm:$0xff] }
  0xb8   : > { %782 = vst.msk [vmem:[%s1168_s27 + $0x48] sm:$0xff] %vm772_vm2, %v749_v20  ;;  %v670_v35 = vadd.f32 %v638_v28, %v606_v30  ;;  %v678_v36 = vadd.f32 %v646_v29, %v614_v31  ;;  %v537_v38 = vpop.f32.mrf.mxu2  ;;  %v557_v39 = vpop.f32.mrf.mxu3  ;;  %v640_v31 = vld [vmem:[%s1143_s19 + $0x20] sm:$0xff] }
  0xb9   : > { %v721_v40 = vmul.f32 %v1152_v34, %v685_v32  ;;  %v729_v41 = vmul.f32 %v1152_v34, %v693_v33  ;;  %v538_v42 = vadd.f32 %v1137_v24, %v537_v38  ;;  %v558_v43 = vadd.f32 %v1137_v24, %v557_v39  ;;  %v499_v44 = vpop.f32.mrf.mxu0  ;;  %v519_v45 = vpop.f32.mrf.mxu1  ;;  %v648_v32 = vld [vmem:[%s1143_s19 + $0x60] sm:$0xff] }
  0xba   : > { %v706_v46 = vmul.f32 %v1152_v34, %v670_v35  ;;  %v714_v47 = vmul.f32 %v1152_v34, %v678_v36  ;;  %v500_v48 = vadd.f32 %v1137_v24, %v499_v44  ;;  %v520_v49 = vadd.f32 %v1137_v24, %v519_v45 }
  0xbb   : > { %v757_v50 = vadd.f32 %v1157_v37, %v721_v40  ;;  %v765_v51 = vadd.f32 %v1157_v37, %v729_v41  ;;  %v590_v52 = vmax.f32 %v538_v42, 0.0  ;;  %v598_v53 = vmax.f32 %v558_v43, 0.0 }
  0xbc   : > { %v742_v54 = vadd.f32 %v1157_v37, %v706_v46  ;;  %v750_v55 = vadd.f32 %v1157_v37, %v714_v47  ;;  %v575_v58 = vmax.f32 %v500_v48, 0.0  ;;  %v583_v59 = vmax.f32 %v520_v49, 0.0 }
  0xbd   : > { %790 = vst.msk [vmem:[%s1168_s27 + $0x88] sm:$0xff] %vm772_vm2, %v757_v50  ;;  %v622_v60 = vmin.f32 %v590_v52, 6.0  ;;  %v630_v61 = vmin.f32 %v598_v53, 6.0 }
  0xbe   : > { %798 = vst.msk [vmem:[%s1168_s27 + $0xc8] sm:$0xff] %vm772_vm2, %v765_v51  ;;  %v607_v0 = vmin.f32 %v575_v58, 6.0  ;;  %v615_v1 = vmin.f32 %v583_v59, 6.0  ;;  %v656_v59 = vld [vmem:[%s1143_s19 + $0xa0] sm:$0xff] }
  0xbf   : > { %775 = vst.msk [vmem:[%s1168_s27 + $0x10] sm:$0xff] %vm772_vm2, %v742_v54  ;;  %v686_v2 = vadd.f32 %v654_v56, %v622_v60  ;;  %v694_v3 = vadd.f32 %v662_v57, %v630_v61  ;;  %v664_v60 = vld [vmem:[%s1143_s19 + $0xe0] sm:$0xff] }
  0xc0   : > { %783 = vst.msk [vmem:[%s1168_s27 + $0x50] sm:$0xff] %vm772_vm2, %v750_v55  ;;  %v671_v4 = vadd.f32 %v639_v62, %v607_v0  ;;  %v679_v5 = vadd.f32 %v647_v63, %v615_v1  ;;  %v539_v6 = vpop.f32.mrf.mxu2  ;;  %v559_v7 = vpop.f32.mrf.mxu3  ;;  %v641_v1 = vld [vmem:[%s1143_s19 + $0x28] sm:$0xff] }
  0xc1   : > { %v722_v8 = vmul.f32 %v1152_v34, %v686_v2  ;;  %v730_v9 = vmul.f32 %v1152_v34, %v694_v3  ;;  %v540_v10 = vadd.f32 %v1137_v24, %v539_v6  ;;  %v560_v11 = vadd.f32 %v1137_v24, %v559_v7  ;;  %v502_v12 = vpop.f32.mrf.mxu0  ;;  %v522_v13 = vpop.f32.mrf.mxu1  ;;  %v649_v2 = vld [vmem:[%s1143_s19 + $0x68] sm:$0xff] }
  0xc2   : > { %v707_v14 = vmul.f32 %v1152_v34, %v671_v4  ;;  %v715_v15 = vmul.f32 %v1152_v34, %v679_v5  ;;  %v503_v16 = vadd.f32 %v1137_v24, %v502_v12  ;;  %v523_v17 = vadd.f32 %v1137_v24, %v522_v13 }
  0xc3   : > { %v758_v18 = vadd.f32 %v1157_v37, %v722_v8  ;;  %v766_v19 = vadd.f32 %v1157_v37, %v730_v9  ;;  %v591_v20 = vmax.f32 %v540_v10, 0.0  ;;  %v599_v21 = vmax.f32 %v560_v11, 0.0 }
  0xc4   : > { %v743_v22 = vadd.f32 %v1157_v37, %v707_v14  ;;  %v751_v23 = vadd.f32 %v1157_v37, %v715_v15  ;;  %v576_v27 = vmax.f32 %v503_v16, 0.0  ;;  %v584_v28 = vmax.f32 %v523_v17, 0.0 }
  0xc5   : > { %791 = vst.msk [vmem:[%s1168_s27 + $0x90] sm:$0xff] %vm772_vm2, %v758_v18  ;;  %v623_v29 = vmin.f32 %v591_v20, 6.0  ;;  %v631_v30 = vmin.f32 %v599_v21, 6.0 }
  0xc6   : > { %799 = vst.msk [vmem:[%s1168_s27 + $0xd0] sm:$0xff] %vm772_vm2, %v766_v19  ;;  %v608_v33 = vmin.f32 %v576_v27, 6.0  ;;  %v616_v35 = vmin.f32 %v584_v28, 6.0  ;;  %v657_v28 = vld [vmem:[%s1143_s19 + $0xa8] sm:$0xff] }
  0xc7   : > { %776 = vst.msk [vmem:[%s1168_s27 + $0x18] sm:$0xff] %vm772_vm2, %v743_v22  ;;  %v687_v36 = vadd.f32 %v655_v25, %v623_v29  ;;  %v695_v38 = vadd.f32 %v663_v26, %v631_v30  ;;  %v665_v29 = vld [vmem:[%s1143_s19 + $0xe8] sm:$0xff] }
  0xc8   : > { %784 = vst.msk [vmem:[%s1168_s27 + $0x58] sm:$0xff] %vm772_vm2, %v751_v23  ;;  %v672_v39 = vadd.f32 %v640_v31, %v608_v33  ;;  %v680_v40 = vadd.f32 %v648_v32, %v616_v35  ;;  %v542_v41 = vpop.f32.mrf.mxu2  ;;  %v562_v42 = vpop.f32.mrf.mxu3  ;;  %v642_v35 = vld [vmem:[%s1143_s19 + $0x30] sm:$0xff] }
  0xc9   : > { %v723_v43 = vmul.f32 %v1152_v34, %v687_v36  ;;  %v731_v44 = vmul.f32 %v1152_v34, %v695_v38  ;;  %v543_v45 = vadd.f32 %v1137_v24, %v542_v41  ;;  %v563_v46 = vadd.f32 %v1137_v24, %v562_v42  ;;  %v504_v47 = vpop.f32.mrf.mxu0  ;;  %v524_v48 = vpop.f32.mrf.mxu1  ;;  %v650_v36 = vld [vmem:[%s1143_s19 + $0x70] sm:$0xff] }
  0xca   : > { %v708_v49 = vmul.f32 %v1152_v34, %v672_v39  ;;  %v716_v50 = vmul.f32 %v1152_v34, %v680_v40  ;;  %v505_v51 = vadd.f32 %v1137_v24, %v504_v47  ;;  %v525_v52 = vadd.f32 %v1137_v24, %v524_v48 }
  0xcb   : > { %v759_v53 = vadd.f32 %v1157_v37, %v723_v43  ;;  %v767_v54 = vadd.f32 %v1157_v37, %v731_v44  ;;  %v592_v55 = vmax.f32 %v543_v45, 0.0  ;;  %v600_v56 = vmax.f32 %v563_v46, 0.0 }
  0xcc   : > { %v744_v57 = vadd.f32 %v1157_v37, %v708_v49  ;;  %v752_v58 = vadd.f32 %v1157_v37, %v716_v50  ;;  %v577_v61 = vmax.f32 %v505_v51, 0.0  ;;  %v585_v62 = vmax.f32 %v525_v52, 0.0 }
  0xcd   : > { %792 = vst.msk [vmem:[%s1168_s27 + $0x98] sm:$0xff] %vm772_vm2, %v759_v53  ;;  %v624_v63 = vmin.f32 %v592_v55, 6.0  ;;  %v632_v0 = vmin.f32 %v600_v56, 6.0 }
  0xce   : > { %800 = vst.msk [vmem:[%s1168_s27 + $0xd8] sm:$0xff] %vm772_vm2, %v767_v54  ;;  %v609_v3 = vmin.f32 %v577_v61, 6.0  ;;  %v617_v4 = vmin.f32 %v585_v62, 6.0  ;;  %v658_v62 = vld [vmem:[%s1143_s19 + $0xb0] sm:$0xff] }
  0xcf   : > { %777 = vst.msk [vmem:[%s1168_s27 + $0x20] sm:$0xff] %vm772_vm2, %v744_v57  ;;  %v688_v5 = vadd.f32 %v656_v59, %v624_v63  ;;  %v696_v6 = vadd.f32 %v664_v60, %v632_v0  ;;  %v666_v63 = vld [vmem:[%s1143_s19 + $0xf0] sm:$0xff] }
  0xd0   : > { %785 = vst.msk [vmem:[%s1168_s27 + $0x60] sm:$0xff] %vm772_vm2, %v752_v58  ;;  %v673_v7 = vadd.f32 %v641_v1, %v609_v3  ;;  %v681_v8 = vadd.f32 %v649_v2, %v617_v4  ;;  %v544_v9 = vpop.f32.mrf.mxu2  ;;  %v564_v10 = vpop.f32.mrf.mxu3  ;;  %v643_v4 = vld [vmem:[%s1143_s19 + $0x38] sm:$0xff] }
  0xd1   : > { %v724_v11 = vmul.f32 %v1152_v34, %v688_v5  ;;  %v732_v12 = vmul.f32 %v1152_v34, %v696_v6  ;;  %v545_v13 = vadd.f32 %v1137_v24, %v544_v9  ;;  %v565_v14 = vadd.f32 %v1137_v24, %v564_v10  ;;  %v507_v15 = vpop.f32.mrf.mxu0  ;;  %v527_v16 = vpop.f32.mrf.mxu1  ;;  %v651_v5 = vld [vmem:[%s1143_s19 + $0x78] sm:$0xff] }
  0xd2   : > { %v709_v17 = vmul.f32 %v1152_v34, %v673_v7  ;;  %v717_v18 = vmul.f32 %v1152_v34, %v681_v8  ;;  %v508_v19 = vadd.f32 %v1137_v24, %v507_v15  ;;  %v528_v20 = vadd.f32 %v1137_v24, %v527_v16 }
  0xd3   : > { %v760_v21 = vadd.f32 %v1157_v37, %v724_v11  ;;  %v768_v22 = vadd.f32 %v1157_v37, %v732_v12  ;;  %v593_v23 = vmax.f32 %v545_v13, 0.0  ;;  %v601_v25 = vmax.f32 %v565_v14, 0.0 }
  0xd4   : > { %v745_v26 = vadd.f32 %v1157_v37, %v709_v17  ;;  %v753_v27 = vadd.f32 %v1157_v37, %v717_v18  ;;  %v578_v30 = vmax.f32 %v508_v19, 0.0  ;;  %v586_v31 = vmax.f32 %v528_v20, 0.0 }
  0xd5   : > { %793 = vst.msk [vmem:[%s1168_s27 + $0xa0] sm:$0xff] %vm772_vm2, %v760_v21  ;;  %v625_v32 = vmin.f32 %v593_v23, 6.0  ;;  %v633_v33 = vmin.f32 %v601_v25, 6.0 }
  0xd6   : > { %801 = vst.msk [vmem:[%s1168_s27 + $0xe0] sm:$0xff] %vm772_vm2, %v768_v22  ;;  %v610_v38 = vmin.f32 %v578_v30, 6.0  ;;  %v618_v39 = vmin.f32 %v586_v31, 6.0 }
  0xd7   : > { %778 = vst.msk [vmem:[%s1168_s27 + $0x28] sm:$0xff] %vm772_vm2, %v745_v26  ;;  %v689_v40 = vadd.f32 %v657_v28, %v625_v32  ;;  %v697_v41 = vadd.f32 %v665_v29, %v633_v33  ;;  %v667_v28 = vld [vmem:[%s1143_s19 + $0xf8] sm:$0xff] }
  0xd8   : > { %786 = vst.msk [vmem:[%s1168_s27 + $0x68] sm:$0xff] %vm772_vm2, %v753_v27  ;;  %v674_v42 = vadd.f32 %v642_v35, %v610_v38  ;;  %v682_v43 = vadd.f32 %v650_v36, %v618_v39  ;;  %v547_v44 = vpop.f32.mrf.mxu2  ;;  %v567_v45 = vpop.f32.mrf.mxu3  ;;  %v659_v27 = vld [vmem:[%s1143_s19 + $0xb8] sm:$0xff] }
  0xd9   : > { %v725_v46 = vmul.f32 %v1152_v34, %v689_v40  ;;  %v733_v47 = vmul.f32 %v1152_v34, %v697_v41  ;;  %v548_v48 = vadd.f32 %v1137_v24, %v547_v44  ;;  %v568_v49 = vadd.f32 %v1137_v24, %v567_v45  ;;  %v509_v50 = vpop.f32.mrf.mxu0  ;;  %v529_v51 = vpop.f32.mrf.mxu1 }
  0xda   : > { %v710_v52 = vmul.f32 %v1152_v34, %v674_v42  ;;  %v718_v53 = vmul.f32 %v1152_v34, %v682_v43  ;;  %v510_v54 = vadd.f32 %v1137_v24, %v509_v50  ;;  %v530_v55 = vadd.f32 %v1137_v24, %v529_v51 }
  0xdb   : > { %v761_v56 = vadd.f32 %v1157_v37, %v725_v46  ;;  %v769_v57 = vadd.f32 %v1157_v37, %v733_v47  ;;  %v594_v58 = vmax.f32 %v548_v48, 0.0  ;;  %v602_v59 = vmax.f32 %v568_v49, 0.0 }
  0xdc   : > { %v746_v60 = vadd.f32 %v1157_v37, %v710_v52  ;;  %v754_v61 = vadd.f32 %v1157_v37, %v718_v53  ;;  %v579_v0 = vmax.f32 %v510_v54, 0.0  ;;  %v587_v1 = vmax.f32 %v530_v55, 0.0 }
  0xdd   : > { %794 = vst.msk [vmem:[%s1168_s27 + $0xa8] sm:$0xff] %vm772_vm2, %v761_v56  ;;  %v626_v2 = vmin.f32 %v594_v58, 6.0  ;;  %v634_v3 = vmin.f32 %v602_v59, 6.0 }
  0xde   : > { %802 = vst.msk [vmem:[%s1168_s27 + $0xe8] sm:$0xff] %vm772_vm2, %v769_v57  ;;  %v611_v6 = vmin.f32 %v579_v0, 6.0  ;;  %v619_v7 = vmin.f32 %v587_v1, 6.0 }
  0xdf   : > { %779 = vst.msk [vmem:[%s1168_s27 + $0x30] sm:$0xff] %vm772_vm2, %v746_v60  ;;  %v690_v8 = vadd.f32 %v658_v62, %v626_v2  ;;  %v698_v9 = vadd.f32 %v666_v63, %v634_v3 }
  0xe0   : > { %787 = vst.msk [vmem:[%s1168_s27 + $0x70] sm:$0xff] %vm772_vm2, %v754_v61  ;;  %v675_v10 = vadd.f32 %v643_v4, %v611_v6  ;;  %v683_v11 = vadd.f32 %v651_v5, %v619_v7  ;;  %v549_v12 = vpop.f32.mrf.mxu2  ;;  %v569_v13 = vpop.f32.mrf.mxu3 }
  0xe1   : > { %v726_v14 = vmul.f32 %v1152_v34, %v690_v8  ;;  %v734_v15 = vmul.f32 %v1152_v34, %v698_v9  ;;  %v550_v16 = vadd.f32 %v1137_v24, %v549_v12  ;;  %v570_v17 = vadd.f32 %v1137_v24, %v569_v13 }
  0xe2   : > { %v711_v18 = vmul.f32 %v1152_v34, %v675_v10  ;;  %v719_v19 = vmul.f32 %v1152_v34, %v683_v11 }
  0xe3   : > { %v762_v20 = vadd.f32 %v1157_v37, %v726_v14  ;;  %v770_v21 = vadd.f32 %v1157_v37, %v734_v15  ;;  %v595_v22 = vmax.f32 %v550_v16, 0.0  ;;  %v603_v23 = vmax.f32 %v570_v17, 0.0 }
  0xe4   : > { %v747_v25 = vadd.f32 %v1157_v37, %v711_v18  ;;  %v755_v26 = vadd.f32 %v1157_v37, %v719_v19 }
  0xe5   : > { %795 = vst.msk [vmem:[%s1168_s27 + $0xb0] sm:$0xff] %vm772_vm2, %v762_v20  ;;  %v627_v24 = vmin.f32 %v595_v22, 6.0  ;;  %v635_v29 = vmin.f32 %v603_v23, 6.0 }
  0xe6   : > { %803 = vst.msk [vmem:[%s1168_s27 + $0xf0] sm:$0xff] %vm772_vm2, %v770_v21 }
  0xe7   : > { %780 = vst.msk [vmem:[%s1168_s27 + $0x38] sm:$0xff] %vm772_vm2, %v747_v25  ;;  %v691_v30 = vadd.f32 %v659_v27, %v627_v24  ;;  %v699_v31 = vadd.f32 %v667_v28, %v635_v29 }
  0xe8   : > { %788 = vst.msk [vmem:[%s1168_s27 + $0x78] sm:$0xff] %vm772_vm2, %v755_v26 }
  0xe9   : > { %v727_v32 = vmul.f32 %v1152_v34, %v691_v30  ;;  %v735_v33 = vmul.f32 %v1152_v34, %v699_v31 }
  0xeb   : > { %v763_v35 = vadd.f32 %v1157_v37, %v727_v32  ;;  %v771_v36 = vadd.f32 %v1157_v37, %v735_v33 }
  0xed   : > { %796 = vst.msk [vmem:[%s1168_s27 + $0xb8] sm:$0xff] %vm772_vm2, %v763_v35 }
  0xee   : > { %804 = vst.msk [vmem:[%s1168_s27 + $0xf8] sm:$0xff] %vm772_vm2, %v771_v36 }
  0xef PF: > { %s16_s21 = sadd.s32 1, %s1034_s21  }
  0xf0   : > { %p13_p4 = scmp.ge.s32.totalorder %s16_s21, 4  }
  0xf2   :  { %15 = sbr.rel (!%p13_p4) target bundleno = 1 (0x1), region = 77 }

// kernel: att_net_forward.37
= control target key start
LH: loop header
LB: loop body
LE: loop exit
PB: predicated region body
PF: predicated region fallthrough
CT: control target
= control target key end

     0   :  { %vm26_vm0 = vcmask 64512   ;;  %s350_s0 = inlined_call_operand.vmem [shape: f32[8,512], index: 0, kind: input, shape index: {}]   ;;  %s351_s1 = inlined_call_operand.vmem [shape: f32[2,8], index: 1, kind: input, shape index: {}]   ;;  %s352_s2 = inlined_call_operand.vmem [shape: f32[2,1], index: 2, kind: input, shape index: {}]   ;;  %s353_s3 = inlined_call_operand.hbm [shape: f32[2,512], index: 3, kind: output, shape index: {}]  }
   0x1   :  { %v16_v0 = vld [vmem:[%s350_s0] sm:$0xff]  ;;  %v17_v1 = vld [vmem:[%s350_s0 + $0x8] sm:$0xff]  ;;  %v18_v2 = vld [vmem:[%s350_s0 + $0x10] sm:$0xff] }
   0x2   :  { %45 = vmatpush.msra.mxu0 %v16_v0  ;;  %65 = vmatpush.msra.mxu1 %v17_v1  ;;  %v19_v3 = vld [vmem:[%s350_s0 + $0x18] sm:$0xff]  ;;  %v15_v4 = vld [vmem:[%s351_s1] sm:$0x3] }
   0x3   :  { %85 = vmatpush.msra.mxu2 %v18_v2  ;;  %105 = vmatpush.msra.mxu3 %v19_v3 }
   0x4   :  { %8 = vsyncpa [#allocation3], 0  ;;  %225 = vmatmul.msk.f32.vlgmr.msra.gmra.mxu0 %vm26_vm0, %v15_v4  ;;  %226 = vmatmul.msk.f32.vlgmr.msra.gmra.mxu1 %vm26_vm0, %v15_v4  ;;  %v20_v5 = vld [vmem:[%s352_s2] sm:$0x3]  ;;  %v274_v6 = vmov 0   ;;  %vm110_vm1 = vcmask 1041408  }
   0x5   :  { %227 = vmatmul.msk.f32.vlgmr.msra.gmra.mxu2 %vm26_vm0, %v15_v4  ;;  %228 = vmatmul.msk.f32.vlgmr.msra.gmra.mxu3 %vm26_vm0, %v15_v4  ;;  %vm203_vm2 = vcmask 1045508   ;;  %s275_s0 = smov [#allocation2]   ;;  %s216_s25 = sshll.u32 %s353_s3, 4  ;;  %vm205_vm3 = vcmask 1043456   ;;  %s217_s25 = int_to_ptr.hbm [resolvable:$true] %s216_s25 }
   0x6   :  { %231 = vset.pattern.permute.xlu0 %v274_v6  ;;  %s214_s1 = sshll.u32 %s275_s0, 4  ;;  %s215_s1 = int_to_ptr.vmem [resolvable:$true] %s214_s1 }
   0x7   :  { %23 = vperm.xlu0 %231, %v20_v5  }
  0x79   :  { %v24_v7 = vpop.permute.xlu0 %23 }
  0x81   :  { %v47_v8 = vpop.f32.mrf.mxu0  ;;  %v67_v9 = vpop.f32.mrf.mxu1 }
  0x82   :  { %v314_v10 = vadd.f32 %v47_v8, %v24_v7  ;;  %v316_v11 = vadd.f32 %v67_v9, %v24_v7 }
  0x84   :  { %v111_v12 = vsel %vm110_vm1, %v314_v10, -inf  ;;  %v118_v13 = vsel %vm110_vm1, %v316_v11, -inf }
  0x85   :  { %v112_v14 = vrot.slane %v111_v12, 4  ;;  %v119_v15 = vrot.slane %v118_v13, 4 }
  0x87   :  { %v113_v16 = vmax.f32 %v111_v12, %v112_v14  ;;  %v120_v17 = vmax.f32 %v118_v13, %v119_v15 }
  0x88   :  { %v87_v18 = vpop.f32.mrf.mxu2  ;;  %v107_v19 = vpop.f32.mrf.mxu3 }
  0x89   :  { %v114_v20 = vrot.slane %v113_v16, 2  ;;  %v121_v21 = vrot.slane %v120_v17, 2  ;;  %v322_v22 = vadd.f32 %v87_v18, %v24_v7  ;;  %v324_v23 = vadd.f32 %v107_v19, %v24_v7 }
  0x8b   :  { %v115_v24 = vmax.f32 %v113_v16, %v114_v20  ;;  %v122_v25 = vmax.f32 %v120_v17, %v121_v21  ;;  %v125_v26 = vsel %vm110_vm1, %v322_v22, -inf  ;;  %v132_v27 = vsel %vm110_vm1, %v324_v23, -inf }
  0x8c   :  { %v126_v28 = vrot.slane %v125_v26, 4  ;;  %v133_v29 = vrot.slane %v132_v27, 4 }
  0x8d   :  { %v116_v30 = vrot.slane %v115_v24, 1  ;;  %v123_v31 = vrot.slane %v122_v25, 1 }
  0x8e   :  { %v127_v32 = vmax.f32 %v125_v26, %v126_v28  ;;  %v134_v33 = vmax.f32 %v132_v27, %v133_v29 }
  0x8f   :  { %v330_v34 = vmax.f32 %v115_v24, %v116_v30  ;;  %v124_v35 = vmax.f32 %v122_v25, %v123_v31 }
  0x90   :  { %v128_v36 = vrot.slane %v127_v32, 2  ;;  %v135_v37 = vrot.slane %v134_v33, 2 }
  0x91   :  { %v139_v38 = vsub.f32 %v314_v10, %v330_v34  ;;  %v140_v39 = vsub.f32 %v316_v11, %v124_v35 }
  0x92   :  { %v129_v40 = vmax.f32 %v127_v32, %v128_v36  ;;  %v136_v41 = vmax.f32 %v134_v33, %v135_v37 }
  0x93   :  { %v143_v42 = vmul.f32 1.442695, %v139_v38  ;;  %v145_v43 = vmul.f32 1.442695, %v140_v39 }
  0x94   :  { %v130_v44 = vrot.slane %v129_v40, 1  ;;  %v137_v45 = vrot.slane %v136_v41, 1 }
  0x95   :  { %232 = vpow2.f32 %v143_v42 }
  0x96   :  { %234 = vpow2.f32 %v145_v43  ;;  %v131_v46 = vmax.f32 %v129_v40, %v130_v44  ;;  %v138_v47 = vmax.f32 %v136_v41, %v137_v45 }
  0x98   :  { %v141_v48 = vsub.f32 %v322_v22, %v131_v46  ;;  %v142_v49 = vsub.f32 %v324_v23, %v138_v47 }
  0x9a   :  { %v147_v50 = vmul.f32 1.442695, %v141_v48  ;;  %v149_v51 = vmul.f32 1.442695, %v142_v49 }
  0x9b   :  { %v233_v52 = vpop.eup %232 }
  0x9c   :  { %v235_v53 = vpop.eup %234  ;;  %v151_v54 = vsel %vm110_vm1, %v233_v52, 0.0  ;;  %236 = vpow2.f32 %v147_v50 }
  0x9d   :  { %v152_v55 = vrot.slane %v151_v54, 4  ;;  %v158_v56 = vsel %vm110_vm1, %v235_v53, 0.0  ;;  %238 = vpow2.f32 %v149_v51 }
  0x9e   :  { %v159_v57 = vrot.slane %v158_v56, 4 }
  0x9f   :  { %v153_v58 = vadd.f32 %v152_v55, %v151_v54 }
  0xa0   :  { %v160_v59 = vadd.f32 %v159_v57, %v158_v56 }
  0xa1   :  { %v154_v60 = vrot.slane %v153_v58, 2 }
  0xa2   :  { %v237_v61 = vpop.eup %236  ;;  %v161_v62 = vrot.slane %v160_v59, 2 }
  0xa3   :  { %v239_v63 = vpop.eup %238  ;;  %v155_v0 = vadd.f32 %v154_v60, %v153_v58  ;;  %v165_v1 = vsel %vm110_vm1, %v237_v61, 0.0 }
  0xa4   :  { %v162_v2 = vadd.f32 %v161_v62, %v160_v59  ;;  %v166_v3 = vrot.slane %v165_v1, 4  ;;  %v172_v4 = vsel %vm110_vm1, %v239_v63, 0.0 }
  0xa5   :  { %v156_v5 = vrot.slane %v155_v0, 1  ;;  %v173_v6 = vrot.slane %v172_v4, 4 }
  0xa6   :  { %v163_v7 = vrot.slane %v162_v2, 1  ;;  %v167_v8 = vadd.f32 %v166_v3, %v165_v1 }
  0xa7   :  { %v174_v9 = vadd.f32 %v173_v6, %v172_v4  ;;  %v157_v14 = vadd.f32 %v156_v5, %v155_v0 }
  0xa8   :  { %v164_v12 = vadd.f32 %v163_v7, %v162_v2  ;;  %v168_v13 = vrot.slane %v167_v8, 2 }
  0xa9   :  { %v175_v15 = vrot.slane %v174_v9, 2 }
  0xaa   :  { %240 = vlog2.f32 %v164_v12  ;;  %v169_v16 = vadd.f32 %v168_v13, %v167_v8 }
  0xab   :  { %v176_v17 = vadd.f32 %v175_v15, %v174_v9  ;;  %242 = vlog2.f32 %v157_v14 }
  0xac   :  { %v170_v18 = vrot.slane %v169_v16, 1 }
  0xad   :  { %v177_v19 = vrot.slane %v176_v17, 1 }
  0xae   :  { %v171_v20 = vadd.f32 %v170_v18, %v169_v16 }
  0xaf   :  { %v178_v21 = vadd.f32 %v177_v19, %v176_v17 }
  0xb0   :  { %v241_v24 = vpop.eup %240  ;;  %244 = vlog2.f32 %v171_v20 }
  0xb1   :  { %v182_v25 = vmul.f32 0.6931472, %v241_v24  ;;  %246 = vlog2.f32 %v178_v21  ;;  %v243_v26 = vpop.eup %242 }
  0xb2   :  { %v180_v29 = vmul.f32 0.6931472, %v243_v26 }
  0xb3   :  { %v188_v27 = vadd.f32 %v182_v25, %v124_v35 }
  0xb4   :  { %v187_v37 = vadd.f32 %v180_v29, %v330_v34 }
  0xb5   :  { %v192_v32 = vsub.f32 %v316_v11, %v188_v27 }
  0xb6   :  { %v245_v28 = vpop.eup %244  ;;  %v191_v11 = vsub.f32 %v314_v10, %v187_v37 }
  0xb7   :  { %v247_v30 = vpop.eup %246  ;;  %v184_v31 = vmul.f32 0.6931472, %v245_v28  ;;  %v199_v40 = vrot.slane %v192_v32, 6 }
  0xb8   :  { %v186_v33 = vmul.f32 0.6931472, %v247_v30 }
  0xb9   :  { %v189_v36 = vadd.f32 %v184_v31, %v131_v46  ;;  %v202_v34 = vsel %vm110_vm1, %v191_v11, %v199_v40 }
  0xba   :  { %v190_v38 = vadd.f32 %v186_v33, %v138_v47 }
  0xbb   :  { %v193_v39 = vsub.f32 %v322_v22, %v189_v36 }
  0xbc   :  { %v194_v41 = vsub.f32 %v324_v23, %v190_v38 }
  0xbd   :  { %v200_v42 = vrot.slane %v193_v39, 4 }
  0xbe   :  { %v201_v35 = vrot.slane %v194_v41, 2 }
  0xc0   :  { %v204_v43 = vsel %vm203_vm2, %v200_v42, %v201_v35 }
  0xc1   :  { %v206_v22 = vsel %vm205_vm3, %v202_v34, %v204_v43 }
  0xc2   :  { %208 = vst [vmem:[#allocation2] sm:$0xff] %v206_v22 }
  0xc3   :  { %219 = dma.vmem_to_hbm [thread:$0]  %s215_s1, 128, %s217_s25, [#allocation3]  }
  0xc4   :  { %272 = dma.done.wait [#allocation3], 128  }
  0xc5   :  { %273 = vsyncadd [#allocation3], 4294967168 }
  0xc6   :  { %224 = vsyncpa [#allocation3], 1 }

</bundles_post_ra>
